<compile_context>
chip_gen: v6e
topology: v6e:2x2x1
jax: 0.10.0
libtpu: 0.0.40
codegen_flags: <defaults>
</compile_context>

<pallas_src>
import functools
import math

import jax
import jax.numpy as jnp
from jax.experimental import pallas as pl
from jax.experimental.pallas import tpu as pltpu


# ----------------------------------------------------------------------------
# in-kernel helpers
# ----------------------------------------------------------------------------
def _bf16(x):
    return x.astype(jnp.bfloat16)


def _ada_layernorm(x, mod, d_model):
    """LayerNorm(eps=1e-6, no affine) * (1 + scale) + shift.

    x:   (N, D)  float32
    mod: (1, 2D) float32  -- precomputed [shift | scale] (hoisted matmul).
    """
    shift = mod[:, :d_model]
    scale = mod[:, d_model:]
    mean = jnp.mean(x, axis=-1, keepdims=True)
    var = jnp.mean(jnp.square(x - mean), axis=-1, keepdims=True)
    xn = (x - mean) * jax.lax.rsqrt(var + 1e-6)
    return xn * (1.0 + scale) + shift


# ----------------------------------------------------------------------------
# Kernel A: fused  AdaLN(latents) + AdaLN(x) + MHA + residual
# ----------------------------------------------------------------------------
def _attn_block_kernel(lat_ref, x_ref, mod1_ref, mod2_ref,
                       wq_ref, bq_ref, wkv_ref, bkv_ref, wo_ref, bo_ref,
                       o_ref, *, num_heads):
    lat = lat_ref[0]                                    # (L, D) f32
    x = x_ref[0]                                        # (S, D) f32
    d = lat.shape[-1]
    hd = d // num_heads
    l = lat.shape[0]
    m = l + x.shape[0]

    # AdaLayerNorms (modulation matmul hoisted to JAX)
    nl = _ada_layernorm(lat, mod1_ref[0], d)            # (L, D)
    nx = _ada_layernorm(x, mod2_ref[0], d)              # (S, D)

    # kv = concat([normed_latents, normed_x]) built directly in VMEM
    kv = jnp.concatenate([nl, nx], axis=0)              # (M, D)

    # projections: bf16 MXU operands, f32 accumulation
    qp = jnp.dot(_bf16(nl), wq_ref[...],
                 preferred_element_type=jnp.float32) + bq_ref[...]     # (L, D)
    kvp = jnp.dot(_bf16(kv), wkv_ref[...],
                  preferred_element_type=jnp.float32) + bkv_ref[...]   # (M, 2D)
    kp = kvp[:, :d]
    vp = kvp[:, d:]

    # heads-batched attention: one dot_general per contraction, no per-head loop
    qh = jnp.transpose(qp.reshape(l, num_heads, hd), (1, 0, 2))  # (H, L, hd)
    kh = jnp.transpose(kp.reshape(m, num_heads, hd), (1, 0, 2))  # (H, M, hd)
    vh = jnp.transpose(vp.reshape(m, num_heads, hd), (1, 0, 2))  # (H, M, hd)

    s = jnp.einsum('hld,hmd->hlm', _bf16(qh), _bf16(kh),
                   preferred_element_type=jnp.float32) * (1.0 / math.sqrt(hd))
    s = s - jnp.max(s, axis=-1, keepdims=True)
    p = jnp.exp(s)
    p = p * pl.reciprocal(jnp.sum(p, axis=-1, keepdims=True), approx=True)
    ctx = jnp.einsum('hlm,hmd->hld', _bf16(p), _bf16(vh),
                     preferred_element_type=jnp.float32)         # (H, L, hd)
    ctx = jnp.transpose(ctx, (1, 0, 2)).reshape(l, d)            # (L, D)

    out = jnp.dot(_bf16(ctx), wo_ref[...],
                  preferred_element_type=jnp.float32) + bo_ref[...]

    # fused residual add
    o_ref[0] = lat + out


def attn_block_pallas(latents, x, mod1, mod2, wq, bq, wkv, bkv, wo, bo,
                      num_heads):
    b, l, d = latents.shape
    s = x.shape[1]
    mod1 = mod1.reshape(b, 1, 2 * d)
    mod2 = mod2.reshape(b, 1, 2 * d)
    wspec_q = pl.BlockSpec((d, d), lambda i: (0, 0))
    return pl.pallas_call(
        functools.partial(_attn_block_kernel, num_heads=num_heads),
        out_shape=jax.ShapeDtypeStruct((b, l, d), jnp.float32),
        grid=(b,),
        in_specs=[
            pl.BlockSpec((1, l, d), lambda i: (i, 0, 0)),
            pl.BlockSpec((1, s, d), lambda i: (i, 0, 0)),
            pl.BlockSpec((1, 1, 2 * d), lambda i: (i, 0, 0)),
            pl.BlockSpec((1, 1, 2 * d), lambda i: (i, 0, 0)),
            wspec_q,
            pl.BlockSpec((1, d), lambda i: (0, 0)),
            pl.BlockSpec((d, 2 * d), lambda i: (0, 0)),
            pl.BlockSpec((1, 2 * d), lambda i: (0, 0)),
            wspec_q,
            pl.BlockSpec((1, d), lambda i: (0, 0)),
        ],
        out_specs=pl.BlockSpec((1, l, d), lambda i: (i, 0, 0)),
        compiler_params=pltpu.CompilerParams(dimension_semantics=("parallel",)),
    )(latents, x, mod1, mod2,
      wq, bq.reshape(1, d), wkv, bkv.reshape(1, 2 * d), wo, bo.reshape(1, d))


# ----------------------------------------------------------------------------
# Kernel B: fused  AdaLN + Linear -> SquaredReLU -> Linear + residual
# ----------------------------------------------------------------------------
def _ff_block_kernel(lat_ref, modff_ref, fcw_ref, fcb_ref, pjw_ref, pjb_ref,
                     o_ref):
    lat = lat_ref[0]                                    # (L, D) f32
    d = lat.shape[-1]
    h = _ada_layernorm(lat, modff_ref[0], d)
    h = jnp.dot(_bf16(h), fcw_ref[...],
                preferred_element_type=jnp.float32) + fcb_ref[...]     # (L, 4D)
    h = jnp.square(jnp.maximum(h, 0.0))                                # sq-ReLU
    h = jnp.dot(_bf16(h), pjw_ref[...],
                preferred_element_type=jnp.float32) + pjb_ref[...]     # (L, D)
    o_ref[0] = lat + h                                  # fused residual


def ff_block_pallas(latents, modff, fc_w, fc_b, pj_w, pj_b):
    b, l, d = latents.shape
    dh = fc_w.shape[1]
    modff = modff.reshape(b, 1, 2 * d)
    return pl.pallas_call(
        _ff_block_kernel,
        out_shape=jax.ShapeDtypeStruct((b, l, d), jnp.float32),
        grid=(b,),
        in_specs=[
            pl.BlockSpec((1, l, d), lambda i: (i, 0, 0)),
            pl.BlockSpec((1, 1, 2 * d), lambda i: (i, 0, 0)),
            pl.BlockSpec((d, dh), lambda i: (0, 0)),
            pl.BlockSpec((1, dh), lambda i: (0, 0)),
            pl.BlockSpec((dh, d), lambda i: (0, 0)),
            pl.BlockSpec((1, d), lambda i: (0, 0)),
        ],
        out_specs=pl.BlockSpec((1, l, d), lambda i: (i, 0, 0)),
        compiler_params=pltpu.CompilerParams(dimension_semantics=("parallel",)),
    )(latents, modff, fc_w, fc_b.reshape(1, dh), pj_w, pj_b.reshape(1, d))


# ----------------------------------------------------------------------------
# Kernel C: batched linear (used once, for proj_in)
# ----------------------------------------------------------------------------
def _linear3d_kernel(x_ref, w_ref, b_ref, o_ref):
    o_ref[0] = jnp.dot(_bf16(x_ref[0]), w_ref[...],
                       preferred_element_type=jnp.float32) + b_ref[...]


def linear3d_pallas(x, w, b):
    bsz, n, din = x.shape
    dout = w.shape[1]
    return pl.pallas_call(
        _linear3d_kernel,
        out_shape=jax.ShapeDtypeStruct((bsz, n, dout), jnp.float32),
        grid=(bsz,),
        in_specs=[
            pl.BlockSpec((1, n, din), lambda i: (i, 0, 0)),
            pl.BlockSpec((din, dout), lambda i: (0, 0)),
            pl.BlockSpec((1, dout), lambda i: (0, 0)),
        ],
        out_specs=pl.BlockSpec((1, n, dout), lambda i: (i, 0, 0)),
        compiler_params=pltpu.CompilerParams(dimension_semantics=("parallel",)),
    )(x, w, b.reshape(1, dout))


# ----------------------------------------------------------------------------
# glue: sinusoidal Timesteps (diffusers get_timestep_embedding) -- plain JAX
# ----------------------------------------------------------------------------
def timesteps_features(timesteps, dim, flip_sin_to_cos=True,
                       downscale_freq_shift=0.0, max_period=10000.0):
    half = dim // 2
    exponent = -math.log(max_period) * jnp.arange(half, dtype=jnp.float32)
    exponent = exponent / (half - downscale_freq_shift)
    freqs = jnp.exp(exponent)
    emb = timesteps.astype(jnp.float32)[:, None] * freqs[None, :]
    emb = jnp.concatenate([jnp.sin(emb), jnp.cos(emb)], axis=-1)
    if flip_sin_to_cos:
        emb = jnp.concatenate([emb[:, half:], emb[:, :half]], axis=-1)
    return emb  # (T, dim)


# ----------------------------------------------------------------------------
# parameter initialization (deterministic, synthetic -- no checkpoint load)
# ----------------------------------------------------------------------------
def _dense(key, din, dout, scale=0.02, dtype=jnp.float32):
    w = (scale * jax.random.normal(key, (din, dout), jnp.float32)).astype(dtype)
    b = jnp.zeros((dout,), jnp.float32)
    return w, b


def init_params(key, *, time_channel, time_embed_dim, width, layers,
                num_latents, input_dim):
    def nk():
        nonlocal key
        key, sub = jax.random.split(key)
        return sub

    p = {}
    # TimestepEmbedding (tiny -- stays on the plain-JAX path)
    p["te_w1"], p["te_b1"] = _dense(nk(), time_channel, time_embed_dim)
    p["te_w2"], p["te_b2"] = _dense(nk(), time_embed_dim, time_embed_dim)
    # PerceiverResampler
    p["latents"] = (width ** -0.5) * jax.random.normal(
        nk(), (num_latents, width), jnp.float32)
    p["taw_w"], p["taw_b"] = _dense(nk(), time_embed_dim, width)
    p["proj_in_w"], p["proj_in_b"] = _dense(nk(), input_dim, width,
                                            dtype=jnp.bfloat16)
    blocks = []
    for _ in range(layers):
        blk = {}
        # The three AdaLayerNorm linears packed into one (Temb, 6W) matrix:
        #   [ln1 shift|scale | ln2 shift|scale | ln_ff shift|scale]
        # (PyTorch zero-inits these; small random used here so the
        #  scale/shift path is actually exercised.)
        blk["mod_w"], blk["mod_b"] = _dense(nk(), time_embed_dim, 6 * width, 0.01)
        # MultiheadAttention: separate q / packed kv weights -- an equivalent
        # re-parameterization of PyTorch's packed in_proj.
        blk["wq"], blk["bq"] = _dense(nk(), width, width, dtype=jnp.bfloat16)
        blk["wkv"], blk["bkv"] = _dense(nk(), width, 2 * width, dtype=jnp.bfloat16)
        blk["wo"], blk["bo"] = _dense(nk(), width, width, dtype=jnp.bfloat16)
        # MLP
        blk["fc_w"], blk["fc_b"] = _dense(nk(), width, 4 * width, dtype=jnp.bfloat16)
        blk["pj_w"], blk["pj_b"] = _dense(nk(), 4 * width, width, dtype=jnp.bfloat16)
        blocks.append(blk)
    p["blocks"] = blocks
    return p


# ----------------------------------------------------------------------------
# forward pass (mirrors ELLA.forward)
# ----------------------------------------------------------------------------
def ella_forward(params, text_encode_features, timesteps, *, time_channel,
                 num_heads):
    bsz = text_encode_features.shape[0]
    width = params["latents"].shape[-1]

    # Timesteps (sinusoidal) -> (B, time_channel)  [plain JAX, tiny]
    t_feat = timesteps_features(timesteps.reshape(-1), time_channel)
    t_feat = jnp.broadcast_to(t_feat, (bsz, time_channel))

    # TimestepEmbedding: linear -> SiLU -> linear  [plain JAX, tiny]
    te = t_feat @ params["te_w1"] + params["te_b1"]
    te = jax.nn.silu(te)
    te = te @ params["te_w2"] + params["te_b2"]                  # (B, Temb)
    silu_te = jax.nn.silu(te)

    # PerceiverResampler: latents = latent_param + time_aware_linear(silu(te))
    tlin = silu_te @ params["taw_w"] + params["taw_b"]           # (B, W)
    latents = params["latents"][None, :, :] + tlin[:, None, :]   # (B, L, W)

    # proj_in  (single batched Pallas linear)
    x = linear3d_pallas(text_encode_features,
                        params["proj_in_w"], params["proj_in_b"])  # (B, S, W)

    for blk in params["blocks"]:
        # hoisted AdaLN modulation: one (B,Temb)@(Temb,6W) matmul per block
        mods = silu_te @ blk["mod_w"] + blk["mod_b"]             # (B, 6W)
        mod1 = mods[:, 0 * 2 * width:1 * 2 * width]
        mod2 = mods[:, 1 * 2 * width:2 * 2 * width]
        modff = mods[:, 2 * 2 * width:3 * 2 * width]

        latents = attn_block_pallas(latents, x, mod1, mod2,
                                    blk["wq"], blk["bq"],
                                    blk["wkv"], blk["bkv"],
                                    blk["wo"], blk["bo"], num_heads)
        latents = ff_block_pallas(latents, modff,
                                  blk["fc_w"], blk["fc_b"],
                                  blk["pj_w"], blk["pj_b"])
    return latents                                               # (B, L, W)


# ----------------------------------------------------------------------------
if __name__ == "__main__":
    # small, TPU-friendly config consistent with the module (head_dim = 128)
    B, S = 2, 8
    TIME_CHANNEL = 32
    TIME_EMBED_DIM = 128
    WIDTH = 256
    LAYERS = 2
    HEADS = 2
    NUM_LATENTS = 16
    INPUT_DIM = 64

    key = jax.random.PRNGKey(0)
    kp, kx = jax.random.split(key)
    params = init_params(kp,
                         time_channel=TIME_CHANNEL,
                         time_embed_dim=TIME_EMBED_DIM,
                         width=WIDTH,
                         layers=LAYERS,
                         num_latents=NUM_LATENTS,
                         input_dim=INPUT_DIM)

    text_encode_features = jax.random.normal(kx, (B, S, INPUT_DIM), jnp.float32)
    timesteps = jnp.array([10.0, 500.0], jnp.float32)

    fwd = jax.jit(functools.partial(ella_forward,
                                    time_channel=TIME_CHANNEL,
                                    num_heads=HEADS))
    out = fwd(params, text_encode_features, timesteps)
    out = jax.block_until_ready(out)

    assert out.shape == (B, NUM_LATENTS, WIDTH), out.shape
    assert bool(jnp.all(jnp.isfinite(out)))
    print("KERNEL_OK")
</pallas_src>

<mosaic_0001>
module attributes {stable_mosaic.version = 11 : i64} {
  func.func @_attn_block_kernel(%arg0: i32, %arg1: memref<1x16x256xf32, #tpu.memory_space<vmem>>, %arg2: memref<1x8x256xf32, #tpu.memory_space<vmem>>, %arg3: memref<1x1x512xf32, #tpu.memory_space<vmem>>, %arg4: memref<1x1x512xf32, #tpu.memory_space<vmem>>, %arg5: memref<256x256xbf16, #tpu.memory_space<vmem>>, %arg6: memref<1x256xf32, #tpu.memory_space<vmem>>, %arg7: memref<256x512xbf16, #tpu.memory_space<vmem>>, %arg8: memref<1x512xf32, #tpu.memory_space<vmem>>, %arg9: memref<256x256xbf16, #tpu.memory_space<vmem>>, %arg10: memref<1x256xf32, #tpu.memory_space<vmem>>, %arg11: memref<1x16x256xf32, #tpu.memory_space<vmem>>) attributes {dimension_semantics = [#tpu.dimension_semantics<parallel>], iteration_bounds = array<i64: 2>, scalar_prefetch = 0 : i64, scratch_operands = 0 : i64, tpu.core_type = #tpu.core_type<tc>, window_params = [{transform_indices = @transform_0, window_bounds = array<i64: 1, 16, 256>}, {transform_indices = @transform_1, window_bounds = array<i64: 1, 8, 256>}, {transform_indices = @transform_2, window_bounds = array<i64: 1, 1, 512>}, {transform_indices = @transform_3, window_bounds = array<i64: 1, 1, 512>}, {pipeline_mode = #tpu.pipeline_mode<synchronous>, transform_indices = @transform_4, window_bounds = array<i64: 256, 256>}, {pipeline_mode = #tpu.pipeline_mode<synchronous>, transform_indices = @transform_5, window_bounds = array<i64: 1, 256>}, {pipeline_mode = #tpu.pipeline_mode<synchronous>, transform_indices = @transform_6, window_bounds = array<i64: 256, 512>}, {pipeline_mode = #tpu.pipeline_mode<synchronous>, transform_indices = @transform_7, window_bounds = array<i64: 1, 512>}, {pipeline_mode = #tpu.pipeline_mode<synchronous>, transform_indices = @transform_8, window_bounds = array<i64: 256, 256>}, {pipeline_mode = #tpu.pipeline_mode<synchronous>, transform_indices = @transform_9, window_bounds = array<i64: 1, 256>}, {transform_indices = @transform_10, window_bounds = array<i64: 1, 16, 256>}]} {
    %c0 = arith.constant 0 : index
    %c0_0 = arith.constant 0 : index
    %c0_1 = arith.constant 0 : index
    %0 = vector.load %arg1[%c0, %c0_0, %c0_1] : memref<1x16x256xf32, #tpu.memory_space<vmem>>, vector<1x16x256xf32>
    %1 = vector.shape_cast %0 : vector<1x16x256xf32> to vector<16x256xf32>
    %c0_2 = arith.constant 0 : index
    %c0_3 = arith.constant 0 : index
    %c0_4 = arith.constant 0 : index
    %2 = vector.load %arg2[%c0_2, %c0_3, %c0_4] : memref<1x8x256xf32, #tpu.memory_space<vmem>>, vector<1x8x256xf32>
    %3 = vector.shape_cast %2 : vector<1x8x256xf32> to vector<8x256xf32>
    %c0_5 = arith.constant 0 : index
    %c0_6 = arith.constant 0 : index
    %c0_7 = arith.constant 0 : index
    %4 = vector.load %arg3[%c0_5, %c0_6, %c0_7] : memref<1x1x512xf32, #tpu.memory_space<vmem>>, vector<1x1x512xf32>
    %5 = vector.shape_cast %4 : vector<1x1x512xf32> to vector<1x512xf32>
    %6 = vector.extract_strided_slice %5 {offsets = [0, 0], sizes = [1, 256], strides = [1, 1]} : vector<1x512xf32> to vector<1x256xf32>
    %7 = vector.extract_strided_slice %5 {offsets = [0, 256], sizes = [1, 256], strides = [1, 1]} : vector<1x512xf32> to vector<1x256xf32>
    %cst = arith.constant dense<0.000000e+00> : vector<16xf32>
    %8 = vector.multi_reduction <add>, %1, %cst [1] : vector<16x256xf32> to vector<16xf32>
    %9 = vector.shape_cast %8 : vector<16xf32> to vector<16x1xf32>
    %cst_8 = arith.constant 2.560000e+02 : f32
    %10 = vector.broadcast %cst_8 : f32 to vector<16x1xf32>
    %11 = arith.divf %9, %10 : vector<16x1xf32>
    %12 = vector.broadcast %11 : vector<16x1xf32> to vector<16x256xf32>
    %13 = arith.subf %1, %12 : vector<16x256xf32>
    %14 = arith.mulf %13, %13 : vector<16x256xf32>
    %cst_9 = arith.constant dense<0.000000e+00> : vector<16xf32>
    %15 = vector.multi_reduction <add>, %14, %cst_9 [1] : vector<16x256xf32> to vector<16xf32>
    %16 = vector.shape_cast %15 : vector<16xf32> to vector<16x1xf32>
    %cst_10 = arith.constant 2.560000e+02 : f32
    %17 = vector.broadcast %cst_10 : f32 to vector<16x1xf32>
    %18 = arith.divf %16, %17 : vector<16x1xf32>
    %19 = vector.broadcast %11 : vector<16x1xf32> to vector<16x256xf32>
    %20 = arith.subf %1, %19 : vector<16x256xf32>
    %cst_11 = arith.constant 9.99999997E-7 : f32
    %21 = vector.broadcast %cst_11 : f32 to vector<16x1xf32>
    %22 = arith.addf %18, %21 : vector<16x1xf32>
    %23 = math.rsqrt %22 : vector<16x1xf32>
    %24 = vector.broadcast %23 : vector<16x1xf32> to vector<16x256xf32>
    %25 = arith.mulf %20, %24 : vector<16x256xf32>
    %cst_12 = arith.constant 1.000000e+00 : f32
    %26 = vector.broadcast %cst_12 : f32 to vector<1x256xf32>
    %27 = arith.addf %26, %7 : vector<1x256xf32>
    %28 = vector.broadcast %27 : vector<1x256xf32> to vector<16x256xf32>
    %29 = arith.mulf %25, %28 : vector<16x256xf32>
    %30 = vector.broadcast %6 : vector<1x256xf32> to vector<16x256xf32>
    %31 = arith.addf %29, %30 : vector<16x256xf32>
    %c0_13 = arith.constant 0 : index
    %c0_14 = arith.constant 0 : index
    %c0_15 = arith.constant 0 : index
    %32 = vector.load %arg4[%c0_13, %c0_14, %c0_15] : memref<1x1x512xf32, #tpu.memory_space<vmem>>, vector<1x1x512xf32>
    %33 = vector.shape_cast %32 : vector<1x1x512xf32> to vector<1x512xf32>
    %34 = vector.extract_strided_slice %33 {offsets = [0, 0], sizes = [1, 256], strides = [1, 1]} : vector<1x512xf32> to vector<1x256xf32>
    %35 = vector.extract_strided_slice %33 {offsets = [0, 256], sizes = [1, 256], strides = [1, 1]} : vector<1x512xf32> to vector<1x256xf32>
    %cst_16 = arith.constant dense<0.000000e+00> : vector<8xf32>
    %36 = vector.multi_reduction <add>, %3, %cst_16 [1] : vector<8x256xf32> to vector<8xf32>
    %37 = vector.shape_cast %36 : vector<8xf32> to vector<8x1xf32>
    %cst_17 = arith.constant 2.560000e+02 : f32
    %38 = vector.broadcast %cst_17 : f32 to vector<8x1xf32>
    %39 = arith.divf %37, %38 : vector<8x1xf32>
    %40 = vector.broadcast %39 : vector<8x1xf32> to vector<8x256xf32>
    %41 = arith.subf %3, %40 : vector<8x256xf32>
    %42 = arith.mulf %41, %41 : vector<8x256xf32>
    %cst_18 = arith.constant dense<0.000000e+00> : vector<8xf32>
    %43 = vector.multi_reduction <add>, %42, %cst_18 [1] : vector<8x256xf32> to vector<8xf32>
    %44 = vector.shape_cast %43 : vector<8xf32> to vector<8x1xf32>
    %cst_19 = arith.constant 2.560000e+02 : f32
    %45 = vector.broadcast %cst_19 : f32 to vector<8x1xf32>
    %46 = arith.divf %44, %45 : vector<8x1xf32>
    %47 = vector.broadcast %39 : vector<8x1xf32> to vector<8x256xf32>
    %48 = arith.subf %3, %47 : vector<8x256xf32>
    %cst_20 = arith.constant 9.99999997E-7 : f32
    %49 = vector.broadcast %cst_20 : f32 to vector<8x1xf32>
    %50 = arith.addf %46, %49 : vector<8x1xf32>
    %51 = math.rsqrt %50 : vector<8x1xf32>
    %52 = vector.broadcast %51 : vector<8x1xf32> to vector<8x256xf32>
    %53 = arith.mulf %48, %52 : vector<8x256xf32>
    %cst_21 = arith.constant 1.000000e+00 : f32
    %54 = vector.broadcast %cst_21 : f32 to vector<1x256xf32>
    %55 = arith.addf %54, %35 : vector<1x256xf32>
    %56 = vector.broadcast %55 : vector<1x256xf32> to vector<8x256xf32>
    %57 = arith.mulf %53, %56 : vector<8x256xf32>
    %58 = vector.broadcast %34 : vector<1x256xf32> to vector<8x256xf32>
    %59 = arith.addf %57, %58 : vector<8x256xf32>
    %60 = tpu.concatenate %31, %59 in 0 : vector<16x256xf32>, vector<8x256xf32> -> vector<24x256xf32>
    %61 = arith.truncf %31 : vector<16x256xf32> to vector<16x256xbf16>
    %c0_22 = arith.constant 0 : index
    %c0_23 = arith.constant 0 : index
    %62 = vector.load %arg5[%c0_22, %c0_23] : memref<256x256xbf16, #tpu.memory_space<vmem>>, vector<256x256xbf16>
    %cst_24 = arith.constant dense<0.000000e+00> : vector<16x256xf32>
    %63 = tpu.matmul %61, %62, %cst_24 {dimension_numbers = #tpu.dot_dimension_numbers<[1], [0], [0], [1], [0, 0, 1, 1], [], []>} : vector<16x256xbf16>, vector<256x256xbf16>, vector<16x256xf32> -> vector<16x256xf32>
    %c0_25 = arith.constant 0 : index
    %c0_26 = arith.constant 0 : index
    %64 = vector.load %arg6[%c0_25, %c0_26] : memref<1x256xf32, #tpu.memory_space<vmem>>, vector<1x256xf32>
    %65 = vector.broadcast %64 : vector<1x256xf32> to vector<16x256xf32>
    %66 = arith.addf %63, %65 : vector<16x256xf32>
    %67 = arith.truncf %60 : vector<24x256xf32> to vector<24x256xbf16>
    %c0_27 = arith.constant 0 : index
    %c0_28 = arith.constant 0 : index
    %68 = vector.load %arg7[%c0_27, %c0_28] : memref<256x512xbf16, #tpu.memory_space<vmem>>, vector<256x512xbf16>
    %cst_29 = arith.constant dense<0.000000e+00> : vector<24x512xf32>
    %69 = tpu.matmul %67, %68, %cst_29 {dimension_numbers = #tpu.dot_dimension_numbers<[1], [0], [0], [1], [0, 0, 1, 1], [], []>} : vector<24x256xbf16>, vector<256x512xbf16>, vector<24x512xf32> -> vector<24x512xf32>
    %c0_30 = arith.constant 0 : index
    %c0_31 = arith.constant 0 : index
    %70 = vector.load %arg8[%c0_30, %c0_31] : memref<1x512xf32, #tpu.memory_space<vmem>>, vector<1x512xf32>
    %71 = vector.broadcast %70 : vector<1x512xf32> to vector<24x512xf32>
    %72 = arith.addf %69, %71 : vector<24x512xf32>
    %73 = vector.extract_strided_slice %72 {offsets = [0, 0], sizes = [24, 256], strides = [1, 1]} : vector<24x512xf32> to vector<24x256xf32>
    %74 = vector.extract_strided_slice %72 {offsets = [0, 256], sizes = [24, 256], strides = [1, 1]} : vector<24x512xf32> to vector<24x256xf32>
    %75 = vector.shape_cast %66 : vector<16x256xf32> to vector<16x2x128xf32>
    %76 = tpu.transpose %75, [1, 0, 2] : vector<16x2x128xf32> -> vector<2x16x128xf32>
    %77 = vector.shape_cast %73 : vector<24x256xf32> to vector<24x2x128xf32>
    %78 = tpu.transpose %77, [1, 0, 2] : vector<24x2x128xf32> -> vector<2x24x128xf32>
    %79 = vector.shape_cast %74 : vector<24x256xf32> to vector<24x2x128xf32>
    %80 = tpu.transpose %79, [1, 0, 2] : vector<24x2x128xf32> -> vector<2x24x128xf32>
    %81 = arith.truncf %76 : vector<2x16x128xf32> to vector<2x16x128xbf16>
    %82 = arith.truncf %78 : vector<2x24x128xf32> to vector<2x24x128xbf16>
    "tpu.trace_start"() <{level = 10 : i32, message = "hld,hmd->hlm"}> : () -> ()
    %cst_32 = arith.constant dense<0.000000e+00> : vector<2x16x24xf32>
    %83 = tpu.matmul %81, %82, %cst_32 {dimension_numbers = #tpu.dot_dimension_numbers<[2], [2], [1], [1], [0, 0, 0, 1, 1, 1], [0], [0]>} : vector<2x16x128xbf16>, vector<2x24x128xbf16>, vector<2x16x24xf32> -> vector<2x16x24xf32>
    "tpu.trace_stop"() : () -> ()
    %cst_33 = arith.constant 0.0883883461 : f32
    %84 = vector.broadcast %cst_33 : f32 to vector<2x16x24xf32>
    %85 = arith.mulf %83, %84 : vector<2x16x24xf32>
    %cst_34 = arith.constant dense<0xFF800000> : vector<2x16xf32>
    %86 = vector.multi_reduction <maximumf>, %85, %cst_34 [2] : vector<2x16x24xf32> to vector<2x16xf32>
    %87 = vector.shape_cast %86 : vector<2x16xf32> to vector<2x16x1xf32>
    %88 = vector.broadcast %87 : vector<2x16x1xf32> to vector<2x16x24xf32>
    %89 = arith.subf %85, %88 : vector<2x16x24xf32>
    %90 = math.exp %89 : vector<2x16x24xf32>
    %cst_35 = arith.constant dense<0.000000e+00> : vector<2x16xf32>
    %91 = vector.multi_reduction <add>, %90, %cst_35 [2] : vector<2x16x24xf32> to vector<2x16xf32>
    %92 = vector.shape_cast %91 : vector<2x16xf32> to vector<2x16x1xf32>
    %93 = tpu.reciprocal %92 {approx = true} : vector<2x16x1xf32> -> vector<2x16x1xf32>
    %94 = vector.broadcast %93 : vector<2x16x1xf32> to vector<2x16x24xf32>
    %95 = arith.mulf %90, %94 : vector<2x16x24xf32>
    %96 = arith.truncf %95 : vector<2x16x24xf32> to vector<2x16x24xbf16>
    %97 = arith.truncf %80 : vector<2x24x128xf32> to vector<2x24x128xbf16>
    "tpu.trace_start"() <{level = 10 : i32, message = "hlm,hmd->hld"}> : () -> ()
    %cst_36 = arith.constant dense<0.000000e+00> : vector<2x16x128xf32>
    %98 = tpu.matmul %96, %97, %cst_36 {dimension_numbers = #tpu.dot_dimension_numbers<[2], [1], [1], [2], [0, 0, 0, 1, 1, 2], [0], [0]>} : vector<2x16x24xbf16>, vector<2x24x128xbf16>, vector<2x16x128xf32> -> vector<2x16x128xf32>
    "tpu.trace_stop"() : () -> ()
    %99 = tpu.transpose %98, [1, 0, 2] : vector<2x16x128xf32> -> vector<16x2x128xf32>
    %100 = vector.shape_cast %99 : vector<16x2x128xf32> to vector<16x256xf32>
    %101 = arith.truncf %100 : vector<16x256xf32> to vector<16x256xbf16>
    %c0_37 = arith.constant 0 : index
    %c0_38 = arith.constant 0 : index
    %102 = vector.load %arg9[%c0_37, %c0_38] : memref<256x256xbf16, #tpu.memory_space<vmem>>, vector<256x256xbf16>
    %cst_39 = arith.constant dense<0.000000e+00> : vector<16x256xf32>
    %103 = tpu.matmul %101, %102, %cst_39 {dimension_numbers = #tpu.dot_dimension_numbers<[1], [0], [0], [1], [0, 0, 1, 1], [], []>} : vector<16x256xbf16>, vector<256x256xbf16>, vector<16x256xf32> -> vector<16x256xf32>
    %c0_40 = arith.constant 0 : index
    %c0_41 = arith.constant 0 : index
    %104 = vector.load %arg10[%c0_40, %c0_41] : memref<1x256xf32, #tpu.memory_space<vmem>>, vector<1x256xf32>
    %105 = vector.broadcast %104 : vector<1x256xf32> to vector<16x256xf32>
    %106 = arith.addf %103, %105 : vector<16x256xf32>
    %107 = arith.addf %1, %106 : vector<16x256xf32>
    %c0_42 = arith.constant 0 : index
    %c0_43 = arith.constant 0 : index
    %c0_44 = arith.constant 0 : index
    %108 = vector.load %arg11[%c0_42, %c0_43, %c0_44] : memref<1x16x256xf32, #tpu.memory_space<vmem>>, vector<1x16x256xf32>
    %109 = vector.shape_cast %108 : vector<1x16x256xf32> to vector<16x256xf32>
    %110 = vector.shape_cast %107 : vector<16x256xf32> to vector<1x16x256xf32>
    tpu.vector_store %arg11[%c0_42, %c0_43, %c0_44], %110 {strides = array<i32>} : memref<1x16x256xf32, #tpu.memory_space<vmem>>, vector<1x16x256xf32>,
    return
  }
  func.func @transform_0(%arg0: i32) -> (i32, i32, i32) {
    %c0_i32 = arith.constant 0 : i32
    %c0_i32_0 = arith.constant 0 : i32
    %c0_i32_1 = arith.constant 0 : i32
    return %arg0, %c0_i32, %c0_i32_0 : i32, i32, i32
  }
  func.func @transform_1(%arg0: i32) -> (i32, i32, i32) {
    %c0_i32 = arith.constant 0 : i32
    %c0_i32_0 = arith.constant 0 : i32
    %c0_i32_1 = arith.constant 0 : i32
    return %arg0, %c0_i32, %c0_i32_0 : i32, i32, i32
  }
  func.func @transform_2(%arg0: i32) -> (i32, i32, i32) {
    %c0_i32 = arith.constant 0 : i32
    %c0_i32_0 = arith.constant 0 : i32
    %c0_i32_1 = arith.constant 0 : i32
    return %arg0, %c0_i32, %c0_i32_0 : i32, i32, i32
  }
  func.func @transform_3(%arg0: i32) -> (i32, i32, i32) {
    %c0_i32 = arith.constant 0 : i32
    %c0_i32_0 = arith.constant 0 : i32
    %c0_i32_1 = arith.constant 0 : i32
    return %arg0, %c0_i32, %c0_i32_0 : i32, i32, i32
  }
  func.func @transform_4(%arg0: i32) -> (i32, i32) {
    %c0_i32 = arith.constant 0 : i32
    %c0_i32_0 = arith.constant 0 : i32
    %c0_i32_1 = arith.constant 0 : i32
    return %c0_i32, %c0_i32_0 : i32, i32
  }
  func.func @transform_5(%arg0: i32) -> (i32, i32) {
    %c0_i32 = arith.constant 0 : i32
    %c0_i32_0 = arith.constant 0 : i32
    %c0_i32_1 = arith.constant 0 : i32
    return %c0_i32, %c0_i32_0 : i32, i32
  }
  func.func @transform_6(%arg0: i32) -> (i32, i32) {
    %c0_i32 = arith.constant 0 : i32
    %c0_i32_0 = arith.constant 0 : i32
    %c0_i32_1 = arith.constant 0 : i32
    return %c0_i32, %c0_i32_0 : i32, i32
  }
  func.func @transform_7(%arg0: i32) -> (i32, i32) {
    %c0_i32 = arith.constant 0 : i32
    %c0_i32_0 = arith.constant 0 : i32
    %c0_i32_1 = arith.constant 0 : i32
    return %c0_i32, %c0_i32_0 : i32, i32
  }
  func.func @transform_8(%arg0: i32) -> (i32, i32) {
    %c0_i32 = arith.constant 0 : i32
    %c0_i32_0 = arith.constant 0 : i32
    %c0_i32_1 = arith.constant 0 : i32
    return %c0_i32, %c0_i32_0 : i32, i32
  }
  func.func @transform_9(%arg0: i32) -> (i32, i32) {
    %c0_i32 = arith.constant 0 : i32
    %c0_i32_0 = arith.constant 0 : i32
    %c0_i32_1 = arith.constant 0 : i32
    return %c0_i32, %c0_i32_0 : i32, i32
  }
  func.func @transform_10(%arg0: i32) -> (i32, i32, i32) {
    %c0_i32 = arith.constant 0 : i32
    %c0_i32_0 = arith.constant 0 : i32
    %c0_i32_1 = arith.constant 0 : i32
    return %arg0, %c0_i32, %c0_i32_0 : i32, i32, i32
  }
}

module attributes {stable_mosaic.version = 11 : i64} {
  func.func @_attn_block_kernel(%arg0: i32, %arg1: memref<1x16x256xf32, #tpu.memory_space<vmem>>, %arg2: memref<1x8x256xf32, #tpu.memory_space<vmem>>, %arg3: memref<1x1x512xf32, #tpu.memory_space<vmem>>, %arg4: memref<1x1x512xf32, #tpu.memory_space<vmem>>, %arg5: memref<256x256xbf16, #tpu.memory_space<vmem>>, %arg6: memref<1x256xf32, #tpu.memory_space<vmem>>, %arg7: memref<256x512xbf16, #tpu.memory_space<vmem>>, %arg8: memref<1x512xf32, #tpu.memory_space<vmem>>, %arg9: memref<256x256xbf16, #tpu.memory_space<vmem>>, %arg10: memref<1x256xf32, #tpu.memory_space<vmem>>, %arg11: memref<1x16x256xf32, #tpu.memory_space<vmem>>) attributes {dimension_semantics = [#tpu.dimension_semantics<parallel>], iteration_bounds = array<i64: 2>, scalar_prefetch = 0 : i64, scratch_operands = 0 : i64, tpu.core_type = #tpu.core_type<tc>, window_params = [{transform_indices = @transform_0, window_bounds = array<i64: 1, 16, 256>}, {transform_indices = @transform_1, window_bounds = array<i64: 1, 8, 256>}, {transform_indices = @transform_2, window_bounds = array<i64: 1, 1, 512>}, {transform_indices = @transform_3, window_bounds = array<i64: 1, 1, 512>}, {pipeline_mode = #tpu.pipeline_mode<synchronous>, transform_indices = @transform_4, window_bounds = array<i64: 256, 256>}, {pipeline_mode = #tpu.pipeline_mode<synchronous>, transform_indices = @transform_5, window_bounds = array<i64: 1, 256>}, {pipeline_mode = #tpu.pipeline_mode<synchronous>, transform_indices = @transform_6, window_bounds = array<i64: 256, 512>}, {pipeline_mode = #tpu.pipeline_mode<synchronous>, transform_indices = @transform_7, window_bounds = array<i64: 1, 512>}, {pipeline_mode = #tpu.pipeline_mode<synchronous>, transform_indices = @transform_8, window_bounds = array<i64: 256, 256>}, {pipeline_mode = #tpu.pipeline_mode<synchronous>, transform_indices = @transform_9, window_bounds = array<i64: 1, 256>}, {transform_indices = @transform_10, window_bounds = array<i64: 1, 16, 256>}]} {
    %c0 = arith.constant 0 : index
    %c0_0 = arith.constant 0 : index
    %c0_1 = arith.constant 0 : index
    %0 = vector.load %arg1[%c0, %c0_0, %c0_1] : memref<1x16x256xf32, #tpu.memory_space<vmem>>, vector<1x16x256xf32>
    %1 = vector.shape_cast %0 : vector<1x16x256xf32> to vector<16x256xf32>
    %c0_2 = arith.constant 0 : index
    %c0_3 = arith.constant 0 : index
    %c0_4 = arith.constant 0 : index
    %2 = vector.load %arg2[%c0_2, %c0_3, %c0_4] : memref<1x8x256xf32, #tpu.memory_space<vmem>>, vector<1x8x256xf32>
    %3 = vector.shape_cast %2 : vector<1x8x256xf32> to vector<8x256xf32>
    %c0_5 = arith.constant 0 : index
    %c0_6 = arith.constant 0 : index
    %c0_7 = arith.constant 0 : index
    %4 = vector.load %arg3[%c0_5, %c0_6, %c0_7] : memref<1x1x512xf32, #tpu.memory_space<vmem>>, vector<1x1x512xf32>
    %5 = vector.shape_cast %4 : vector<1x1x512xf32> to vector<1x512xf32>
    %6 = vector.extract_strided_slice %5 {offsets = [0, 0], sizes = [1, 256], strides = [1, 1]} : vector<1x512xf32> to vector<1x256xf32>
    %7 = vector.extract_strided_slice %5 {offsets = [0, 256], sizes = [1, 256], strides = [1, 1]} : vector<1x512xf32> to vector<1x256xf32>
    %cst = arith.constant dense<0.000000e+00> : vector<16xf32>
    %8 = vector.multi_reduction <add>, %1, %cst [1] : vector<16x256xf32> to vector<16xf32>
    %9 = vector.shape_cast %8 : vector<16xf32> to vector<16x1xf32>
    %cst_8 = arith.constant 2.560000e+02 : f32
    %10 = vector.broadcast %cst_8 : f32 to vector<16x1xf32>
    %11 = arith.divf %9, %10 : vector<16x1xf32>
    %12 = vector.broadcast %11 : vector<16x1xf32> to vector<16x256xf32>
    %13 = arith.subf %1, %12 : vector<16x256xf32>
    %14 = arith.mulf %13, %13 : vector<16x256xf32>
    %cst_9 = arith.constant dense<0.000000e+00> : vector<16xf32>
    %15 = vector.multi_reduction <add>, %14, %cst_9 [1] : vector<16x256xf32> to vector<16xf32>
    %16 = vector.shape_cast %15 : vector<16xf32> to vector<16x1xf32>
    %cst_10 = arith.constant 2.560000e+02 : f32
    %17 = vector.broadcast %cst_10 : f32 to vector<16x1xf32>
    %18 = arith.divf %16, %17 : vector<16x1xf32>
    %19 = vector.broadcast %11 : vector<16x1xf32> to vector<16x256xf32>
    %20 = arith.subf %1, %19 : vector<16x256xf32>
    %cst_11 = arith.constant 9.99999997E-7 : f32
    %21 = vector.broadcast %cst_11 : f32 to vector<16x1xf32>
    %22 = arith.addf %18, %21 : vector<16x1xf32>
    %23 = math.rsqrt %22 : vector<16x1xf32>
    %24 = vector.broadcast %23 : vector<16x1xf32> to vector<16x256xf32>
    %25 = arith.mulf %20, %24 : vector<16x256xf32>
    %cst_12 = arith.constant 1.000000e+00 : f32
    %26 = vector.broadcast %cst_12 : f32 to vector<1x256xf32>
    %27 = arith.addf %26, %7 : vector<1x256xf32>
    %28 = vector.broadcast %27 : vector<1x256xf32> to vector<16x256xf32>
    %29 = arith.mulf %25, %28 : vector<16x256xf32>
    %30 = vector.broadcast %6 : vector<1x256xf32> to vector<16x256xf32>
    %31 = arith.addf %29, %30 : vector<16x256xf32>
    %c0_13 = arith.constant 0 : index
    %c0_14 = arith.constant 0 : index
    %c0_15 = arith.constant 0 : index
    %32 = vector.load %arg4[%c0_13, %c0_14, %c0_15] : memref<1x1x512xf32, #tpu.memory_space<vmem>>, vector<1x1x512xf32>
    %33 = vector.shape_cast %32 : vector<1x1x512xf32> to vector<1x512xf32>
    %34 = vector.extract_strided_slice %33 {offsets = [0, 0], sizes = [1, 256], strides = [1, 1]} : vector<1x512xf32> to vector<1x256xf32>
    %35 = vector.extract_strided_slice %33 {offsets = [0, 256], sizes = [1, 256], strides = [1, 1]} : vector<1x512xf32> to vector<1x256xf32>
    %cst_16 = arith.constant dense<0.000000e+00> : vector<8xf32>
    %36 = vector.multi_reduction <add>, %3, %cst_16 [1] : vector<8x256xf32> to vector<8xf32>
    %37 = vector.shape_cast %36 : vector<8xf32> to vector<8x1xf32>
    %cst_17 = arith.constant 2.560000e+02 : f32
    %38 = vector.broadcast %cst_17 : f32 to vector<8x1xf32>
    %39 = arith.divf %37, %38 : vector<8x1xf32>
    %40 = vector.broadcast %39 : vector<8x1xf32> to vector<8x256xf32>
    %41 = arith.subf %3, %40 : vector<8x256xf32>
    %42 = arith.mulf %41, %41 : vector<8x256xf32>
    %cst_18 = arith.constant dense<0.000000e+00> : vector<8xf32>
    %43 = vector.multi_reduction <add>, %42, %cst_18 [1] : vector<8x256xf32> to vector<8xf32>
    %44 = vector.shape_cast %43 : vector<8xf32> to vector<8x1xf32>
    %cst_19 = arith.constant 2.560000e+02 : f32
    %45 = vector.broadcast %cst_19 : f32 to vector<8x1xf32>
    %46 = arith.divf %44, %45 : vector<8x1xf32>
    %47 = vector.broadcast %39 : vector<8x1xf32> to vector<8x256xf32>
    %48 = arith.subf %3, %47 : vector<8x256xf32>
    %cst_20 = arith.constant 9.99999997E-7 : f32
    %49 = vector.broadcast %cst_20 : f32 to vector<8x1xf32>
    %50 = arith.addf %46, %49 : vector<8x1xf32>
    %51 = math.rsqrt %50 : vector<8x1xf32>
    %52 = vector.broadcast %51 : vector<8x1xf32> to vector<8x256xf32>
    %53 = arith.mulf %48, %52 : vector<8x256xf32>
    %cst_21 = arith.constant 1.000000e+00 : f32
    %54 = vector.broadcast %cst_21 : f32 to vector<1x256xf32>
    %55 = arith.addf %54, %35 : vector<1x256xf32>
    %56 = vector.broadcast %55 : vector<1x256xf32> to vector<8x256xf32>
    %57 = arith.mulf %53, %56 : vector<8x256xf32>
    %58 = vector.broadcast %34 : vector<1x256xf32> to vector<8x256xf32>
    %59 = arith.addf %57, %58 : vector<8x256xf32>
    %60 = tpu.concatenate %31, %59 in 0 : vector<16x256xf32>, vector<8x256xf32> -> vector<24x256xf32>
    %61 = arith.truncf %31 : vector<16x256xf32> to vector<16x256xbf16>
    %c0_22 = arith.constant 0 : index
    %c0_23 = arith.constant 0 : index
    %62 = vector.load %arg5[%c0_22, %c0_23] : memref<256x256xbf16, #tpu.memory_space<vmem>>, vector<256x256xbf16>
    %cst_24 = arith.constant dense<0.000000e+00> : vector<16x256xf32>
    %63 = tpu.matmul %61, %62, %cst_24 {dimension_numbers = #tpu.dot_dimension_numbers<[1], [0], [0], [1], [0, 0, 1, 1], [], []>} : vector<16x256xbf16>, vector<256x256xbf16>, vector<16x256xf32> -> vector<16x256xf32>
    %c0_25 = arith.constant 0 : index
    %c0_26 = arith.constant 0 : index
    %64 = vector.load %arg6[%c0_25, %c0_26] : memref<1x256xf32, #tpu.memory_space<vmem>>, vector<1x256xf32>
    %65 = vector.broadcast %64 : vector<1x256xf32> to vector<16x256xf32>
    %66 = arith.addf %63, %65 : vector<16x256xf32>
    %67 = arith.truncf %60 : vector<24x256xf32> to vector<24x256xbf16>
    %c0_27 = arith.constant 0 : index
    %c0_28 = arith.constant 0 : index
    %68 = vector.load %arg7[%c0_27, %c0_28] : memref<256x512xbf16, #tpu.memory_space<vmem>>, vector<256x512xbf16>
    %cst_29 = arith.constant dense<0.000000e+00> : vector<24x512xf32>
    %69 = tpu.matmul %67, %68, %cst_29 {dimension_numbers = #tpu.dot_dimension_numbers<[1], [0], [0], [1], [0, 0, 1, 1], [], []>} : vector<24x256xbf16>, vector<256x512xbf16>, vector<24x512xf32> -> vector<24x512xf32>
    %c0_30 = arith.constant 0 : index
    %c0_31 = arith.constant 0 : index
    %70 = vector.load %arg8[%c0_30, %c0_31] : memref<1x512xf32, #tpu.memory_space<vmem>>, vector<1x512xf32>
    %71 = vector.broadcast %70 : vector<1x512xf32> to vector<24x512xf32>
    %72 = arith.addf %69, %71 : vector<24x512xf32>
    %73 = vector.extract_strided_slice %72 {offsets = [0, 0], sizes = [24, 256], strides = [1, 1]} : vector<24x512xf32> to vector<24x256xf32>
    %74 = vector.extract_strided_slice %72 {offsets = [0, 256], sizes = [24, 256], strides = [1, 1]} : vector<24x512xf32> to vector<24x256xf32>
    %75 = vector.shape_cast %66 : vector<16x256xf32> to vector<16x2x128xf32>
    %76 = tpu.transpose %75, [1, 0, 2] : vector<16x2x128xf32> -> vector<2x16x128xf32>
    %77 = vector.shape_cast %73 : vector<24x256xf32> to vector<24x2x128xf32>
    %78 = tpu.transpose %77, [1, 0, 2] : vector<24x2x128xf32> -> vector<2x24x128xf32>
    %79 = vector.shape_cast %74 : vector<24x256xf32> to vector<24x2x128xf32>
    %80 = tpu.transpose %79, [1, 0, 2] : vector<24x2x128xf32> -> vector<2x24x128xf32>
    %81 = arith.truncf %76 : vector<2x16x128xf32> to vector<2x16x128xbf16>
    %82 = arith.truncf %78 : vector<2x24x128xf32> to vector<2x24x128xbf16>
    "tpu.trace_start"() <{level = 10 : i32, message = "hld,hmd->hlm"}> : () -> ()
    %cst_32 = arith.constant dense<0.000000e+00> : vector<2x16x24xf32>
    %83 = tpu.matmul %81, %82, %cst_32 {dimension_numbers = #tpu.dot_dimension_numbers<[2], [2], [1], [1], [0, 0, 0, 1, 1, 1], [0], [0]>} : vector<2x16x128xbf16>, vector<2x24x128xbf16>, vector<2x16x24xf32> -> vector<2x16x24xf32>
    "tpu.trace_stop"() : () -> ()
    %cst_33 = arith.constant 0.0883883461 : f32
    %84 = vector.broadcast %cst_33 : f32 to vector<2x16x24xf32>
    %85 = arith.mulf %83, %84 : vector<2x16x24xf32>
    %cst_34 = arith.constant dense<0xFF800000> : vector<2x16xf32>
    %86 = vector.multi_reduction <maximumf>, %85, %cst_34 [2] : vector<2x16x24xf32> to vector<2x16xf32>
    %87 = vector.shape_cast %86 : vector<2x16xf32> to vector<2x16x1xf32>
    %88 = vector.broadcast %87 : vector<2x16x1xf32> to vector<2x16x24xf32>
    %89 = arith.subf %85, %88 : vector<2x16x24xf32>
    %90 = math.exp %89 : vector<2x16x24xf32>
    %cst_35 = arith.constant dense<0.000000e+00> : vector<2x16xf32>
    %91 = vector.multi_reduction <add>, %90, %cst_35 [2] : vector<2x16x24xf32> to vector<2x16xf32>
    %92 = vector.shape_cast %91 : vector<2x16xf32> to vector<2x16x1xf32>
    %93 = tpu.reciprocal %92 {approx = true} : vector<2x16x1xf32> -> vector<2x16x1xf32>
    %94 = vector.broadcast %93 : vector<2x16x1xf32> to vector<2x16x24xf32>
    %95 = arith.mulf %90, %94 : vector<2x16x24xf32>
    %96 = arith.truncf %95 : vector<2x16x24xf32> to vector<2x16x24xbf16>
    %97 = arith.truncf %80 : vector<2x24x128xf32> to vector<2x24x128xbf16>
    "tpu.trace_start"() <{level = 10 : i32, message = "hlm,hmd->hld"}> : () -> ()
    %cst_36 = arith.constant dense<0.000000e+00> : vector<2x16x128xf32>
    %98 = tpu.matmul %96, %97, %cst_36 {dimension_numbers = #tpu.dot_dimension_numbers<[2], [1], [1], [2], [0, 0, 0, 1, 1, 2], [0], [0]>} : vector<2x16x24xbf16>, vector<2x24x128xbf16>, vector<2x16x128xf32> -> vector<2x16x128xf32>
    "tpu.trace_stop"() : () -> ()
    %99 = tpu.transpose %98, [1, 0, 2] : vector<2x16x128xf32> -> vector<16x2x128xf32>
    %100 = vector.shape_cast %99 : vector<16x2x128xf32> to vector<16x256xf32>
    %101 = arith.truncf %100 : vector<16x256xf32> to vector<16x256xbf16>
    %c0_37 = arith.constant 0 : index
    %c0_38 = arith.constant 0 : index
    %102 = vector.load %arg9[%c0_37, %c0_38] : memref<256x256xbf16, #tpu.memory_space<vmem>>, vector<256x256xbf16>
    %cst_39 = arith.constant dense<0.000000e+00> : vector<16x256xf32>
    %103 = tpu.matmul %101, %102, %cst_39 {dimension_numbers = #tpu.dot_dimension_numbers<[1], [0], [0], [1], [0, 0, 1, 1], [], []>} : vector<16x256xbf16>, vector<256x256xbf16>, vector<16x256xf32> -> vector<16x256xf32>
    %c0_40 = arith.constant 0 : index
    %c0_41 = arith.constant 0 : index
    %104 = vector.load %arg10[%c0_40, %c0_41] : memref<1x256xf32, #tpu.memory_space<vmem>>, vector<1x256xf32>
    %105 = vector.broadcast %104 : vector<1x256xf32> to vector<16x256xf32>
    %106 = arith.addf %103, %105 : vector<16x256xf32>
    %107 = arith.addf %1, %106 : vector<16x256xf32>
    %c0_42 = arith.constant 0 : index
    %c0_43 = arith.constant 0 : index
    %c0_44 = arith.constant 0 : index
    %108 = vector.load %arg11[%c0_42, %c0_43, %c0_44] : memref<1x16x256xf32, #tpu.memory_space<vmem>>, vector<1x16x256xf32>
    %109 = vector.shape_cast %108 : vector<1x16x256xf32> to vector<16x256xf32>
    %110 = vector.shape_cast %107 : vector<16x256xf32> to vector<1x16x256xf32>
    tpu.vector_store %arg11[%c0_42, %c0_43, %c0_44], %110 {strides = array<i32>} : memref<1x16x256xf32, #tpu.memory_space<vmem>>, vector<1x16x256xf32>,
    return
  }
  func.func @transform_0(%arg0: i32) -> (i32, i32, i32) {
    %c0_i32 = arith.constant 0 : i32
    %c0_i32_0 = arith.constant 0 : i32
    %c0_i32_1 = arith.constant 0 : i32
    return %arg0, %c0_i32, %c0_i32_0 : i32, i32, i32
  }
  func.func @transform_1(%arg0: i32) -> (i32, i32, i32) {
    %c0_i32 = arith.constant 0 : i32
    %c0_i32_0 = arith.constant 0 : i32
    %c0_i32_1 = arith.constant 0 : i32
    return %arg0, %c0_i32, %c0_i32_0 : i32, i32, i32
  }
  func.func @transform_2(%arg0: i32) -> (i32, i32, i32) {
    %c0_i32 = arith.constant 0 : i32
    %c0_i32_0 = arith.constant 0 : i32
    %c0_i32_1 = arith.constant 0 : i32
    return %arg0, %c0_i32, %c0_i32_0 : i32, i32, i32
  }
  func.func @transform_3(%arg0: i32) -> (i32, i32, i32) {
    %c0_i32 = arith.constant 0 : i32
    %c0_i32_0 = arith.constant 0 : i32
    %c0_i32_1 = arith.constant 0 : i32
    return %arg0, %c0_i32, %c0_i32_0 : i32, i32, i32
  }
  func.func @transform_4(%arg0: i32) -> (i32, i32) {
    %c0_i32 = arith.constant 0 : i32
    %c0_i32_0 = arith.constant 0 : i32
    %c0_i32_1 = arith.constant 0 : i32
    return %c0_i32, %c0_i32_0 : i32, i32
  }
  func.func @transform_5(%arg0: i32) -> (i32, i32) {
    %c0_i32 = arith.constant 0 : i32
    %c0_i32_0 = arith.constant 0 : i32
    %c0_i32_1 = arith.constant 0 : i32
    return %c0_i32, %c0_i32_0 : i32, i32
  }
  func.func @transform_6(%arg0: i32) -> (i32, i32) {
    %c0_i32 = arith.constant 0 : i32
    %c0_i32_0 = arith.constant 0 : i32
    %c0_i32_1 = arith.constant 0 : i32
    return %c0_i32, %c0_i32_0 : i32, i32
  }
  func.func @transform_7(%arg0: i32) -> (i32, i32) {
    %c0_i32 = arith.constant 0 : i32
    %c0_i32_0 = arith.constant 0 : i32
    %c0_i32_1 = arith.constant 0 : i32
    return %c0_i32, %c0_i32_0 : i32, i32
  }
  func.func @transform_8(%arg0: i32) -> (i32, i32) {
    %c0_i32 = arith.constant 0 : i32
    %c0_i32_0 = arith.constant 0 : i32
    %c0_i32_1 = arith.constant 0 : i32
    return %c0_i32, %c0_i32_0 : i32, i32
  }
  func.func @transform_9(%arg0: i32) -> (i32, i32) {
    %c0_i32 = arith.constant 0 : i32
    %c0_i32_0 = arith.constant 0 : i32
    %c0_i32_1 = arith.constant 0 : i32
    return %c0_i32, %c0_i32_0 : i32, i32
  }
  func.func @transform_10(%arg0: i32) -> (i32, i32, i32) {
    %c0_i32 = arith.constant 0 : i32
    %c0_i32_0 = arith.constant 0 : i32
    %c0_i32_1 = arith.constant 0 : i32
    return %arg0, %c0_i32, %c0_i32_0 : i32, i32, i32
  }
}

module attributes {stable_mosaic.version = 11 : i64} {
  func.func @_linear3d_kernel(%arg0: i32, %arg1: memref<1x8x64xf32, #tpu.memory_space<vmem>>, %arg2: memref<64x256xbf16, #tpu.memory_space<vmem>>, %arg3: memref<1x256xf32, #tpu.memory_space<vmem>>, %arg4: memref<1x8x256xf32, #tpu.memory_space<vmem>>) attributes {dimension_semantics = [#tpu.dimension_semantics<parallel>], iteration_bounds = array<i64: 2>, scalar_prefetch = 0 : i64, scratch_operands = 0 : i64, tpu.core_type = #tpu.core_type<tc>, window_params = [{transform_indices = @transform_0, window_bounds = array<i64: 1, 8, 64>}, {pipeline_mode = #tpu.pipeline_mode<synchronous>, transform_indices = @transform_1, window_bounds = array<i64: 64, 256>}, {pipeline_mode = #tpu.pipeline_mode<synchronous>, transform_indices = @transform_2, window_bounds = array<i64: 1, 256>}, {transform_indices = @transform_3, window_bounds = array<i64: 1, 8, 256>}]} {
    %c0 = arith.constant 0 : index
    %c0_0 = arith.constant 0 : index
    %c0_1 = arith.constant 0 : index
    %0 = vector.load %arg1[%c0, %c0_0, %c0_1] : memref<1x8x64xf32, #tpu.memory_space<vmem>>, vector<1x8x64xf32>
    %1 = vector.shape_cast %0 : vector<1x8x64xf32> to vector<8x64xf32>
    %2 = arith.truncf %1 : vector<8x64xf32> to vector<8x64xbf16>
    %c0_2 = arith.constant 0 : index
    %c0_3 = arith.constant 0 : index
    %3 = vector.load %arg2[%c0_2, %c0_3] : memref<64x256xbf16, #tpu.memory_space<vmem>>, vector<64x256xbf16>
    %cst = arith.constant dense<0.000000e+00> : vector<8x256xf32>
    %4 = tpu.matmul %2, %3, %cst {dimension_numbers = #tpu.dot_dimension_numbers<[1], [0], [0], [1], [0, 0, 1, 1], [], []>} : vector<8x64xbf16>, vector<64x256xbf16>, vector<8x256xf32> -> vector<8x256xf32>
    %c0_4 = arith.constant 0 : index
    %c0_5 = arith.constant 0 : index
    %5 = vector.load %arg3[%c0_4, %c0_5] : memref<1x256xf32, #tpu.memory_space<vmem>>, vector<1x256xf32>
    %6 = vector.broadcast %5 : vector<1x256xf32> to vector<8x256xf32>
    %7 = arith.addf %4, %6 : vector<8x256xf32>
    %c0_6 = arith.constant 0 : index
    %c0_7 = arith.constant 0 : index
    %c0_8 = arith.constant 0 : index
    %8 = vector.load %arg4[%c0_6, %c0_7, %c0_8] : memref<1x8x256xf32, #tpu.memory_space<vmem>>, vector<1x8x256xf32>
    %9 = vector.shape_cast %8 : vector<1x8x256xf32> to vector<8x256xf32>
    %10 = vector.shape_cast %7 : vector<8x256xf32> to vector<1x8x256xf32>
    tpu.vector_store %arg4[%c0_6, %c0_7, %c0_8], %10 {strides = array<i32>} : memref<1x8x256xf32, #tpu.memory_space<vmem>>, vector<1x8x256xf32>,
    return
  }
  func.func @transform_0(%arg0: i32) -> (i32, i32, i32) {
    %c0_i32 = arith.constant 0 : i32
    %c0_i32_0 = arith.constant 0 : i32
    %c0_i32_1 = arith.constant 0 : i32
    return %arg0, %c0_i32, %c0_i32_0 : i32, i32, i32
  }
  func.func @transform_1(%arg0: i32) -> (i32, i32) {
    %c0_i32 = arith.constant 0 : i32
    %c0_i32_0 = arith.constant 0 : i32
    %c0_i32_1 = arith.constant 0 : i32
    return %c0_i32, %c0_i32_0 : i32, i32
  }
  func.func @transform_2(%arg0: i32) -> (i32, i32) {
    %c0_i32 = arith.constant 0 : i32
    %c0_i32_0 = arith.constant 0 : i32
    %c0_i32_1 = arith.constant 0 : i32
    return %c0_i32, %c0_i32_0 : i32, i32
  }
  func.func @transform_3(%arg0: i32) -> (i32, i32, i32) {
    %c0_i32 = arith.constant 0 : i32
    %c0_i32_0 = arith.constant 0 : i32
    %c0_i32_1 = arith.constant 0 : i32
    return %arg0, %c0_i32, %c0_i32_0 : i32, i32, i32
  }
}

module attributes {stable_mosaic.version = 11 : i64} {
  func.func @_ff_block_kernel(%arg0: i32, %arg1: memref<1x16x256xf32, #tpu.memory_space<vmem>>, %arg2: memref<1x1x512xf32, #tpu.memory_space<vmem>>, %arg3: memref<256x1024xbf16, #tpu.memory_space<vmem>>, %arg4: memref<1x1024xf32, #tpu.memory_space<vmem>>, %arg5: memref<1024x256xbf16, #tpu.memory_space<vmem>>, %arg6: memref<1x256xf32, #tpu.memory_space<vmem>>, %arg7: memref<1x16x256xf32, #tpu.memory_space<vmem>>) attributes {dimension_semantics = [#tpu.dimension_semantics<parallel>], iteration_bounds = array<i64: 2>, scalar_prefetch = 0 : i64, scratch_operands = 0 : i64, tpu.core_type = #tpu.core_type<tc>, window_params = [{transform_indices = @transform_0, window_bounds = array<i64: 1, 16, 256>}, {transform_indices = @transform_1, window_bounds = array<i64: 1, 1, 512>}, {pipeline_mode = #tpu.pipeline_mode<synchronous>, transform_indices = @transform_2, window_bounds = array<i64: 256, 1024>}, {pipeline_mode = #tpu.pipeline_mode<synchronous>, transform_indices = @transform_3, window_bounds = array<i64: 1, 1024>}, {pipeline_mode = #tpu.pipeline_mode<synchronous>, transform_indices = @transform_4, window_bounds = array<i64: 1024, 256>}, {pipeline_mode = #tpu.pipeline_mode<synchronous>, transform_indices = @transform_5, window_bounds = array<i64: 1, 256>}, {transform_indices = @transform_6, window_bounds = array<i64: 1, 16, 256>}]} {
    %c0 = arith.constant 0 : index
    %c0_0 = arith.constant 0 : index
    %c0_1 = arith.constant 0 : index
    %0 = vector.load %arg1[%c0, %c0_0, %c0_1] : memref<1x16x256xf32, #tpu.memory_space<vmem>>, vector<1x16x256xf32>
    %1 = vector.shape_cast %0 : vector<1x16x256xf32> to vector<16x256xf32>
    %c0_2 = arith.constant 0 : index
    %c0_3 = arith.constant 0 : index
    %c0_4 = arith.constant 0 : index
    %2 = vector.load %arg2[%c0_2, %c0_3, %c0_4] : memref<1x1x512xf32, #tpu.memory_space<vmem>>, vector<1x1x512xf32>
    %3 = vector.shape_cast %2 : vector<1x1x512xf32> to vector<1x512xf32>
    %4 = vector.extract_strided_slice %3 {offsets = [0, 0], sizes = [1, 256], strides = [1, 1]} : vector<1x512xf32> to vector<1x256xf32>
    %5 = vector.extract_strided_slice %3 {offsets = [0, 256], sizes = [1, 256], strides = [1, 1]} : vector<1x512xf32> to vector<1x256xf32>
    %cst = arith.constant dense<0.000000e+00> : vector<16xf32>
    %6 = vector.multi_reduction <add>, %1, %cst [1] : vector<16x256xf32> to vector<16xf32>
    %7 = vector.shape_cast %6 : vector<16xf32> to vector<16x1xf32>
    %cst_5 = arith.constant 2.560000e+02 : f32
    %8 = vector.broadcast %cst_5 : f32 to vector<16x1xf32>
    %9 = arith.divf %7, %8 : vector<16x1xf32>
    %10 = vector.broadcast %9 : vector<16x1xf32> to vector<16x256xf32>
    %11 = arith.subf %1, %10 : vector<16x256xf32>
    %12 = arith.mulf %11, %11 : vector<16x256xf32>
    %cst_6 = arith.constant dense<0.000000e+00> : vector<16xf32>
    %13 = vector.multi_reduction <add>, %12, %cst_6 [1] : vector<16x256xf32> to vector<16xf32>
    %14 = vector.shape_cast %13 : vector<16xf32> to vector<16x1xf32>
    %cst_7 = arith.constant 2.560000e+02 : f32
    %15 = vector.broadcast %cst_7 : f32 to vector<16x1xf32>
    %16 = arith.divf %14, %15 : vector<16x1xf32>
    %17 = vector.broadcast %9 : vector<16x1xf32> to vector<16x256xf32>
    %18 = arith.subf %1, %17 : vector<16x256xf32>
    %cst_8 = arith.constant 9.99999997E-7 : f32
    %19 = vector.broadcast %cst_8 : f32 to vector<16x1xf32>
    %20 = arith.addf %16, %19 : vector<16x1xf32>
    %21 = math.rsqrt %20 : vector<16x1xf32>
    %22 = vector.broadcast %21 : vector<16x1xf32> to vector<16x256xf32>
    %23 = arith.mulf %18, %22 : vector<16x256xf32>
    %cst_9 = arith.constant 1.000000e+00 : f32
    %24 = vector.broadcast %cst_9 : f32 to vector<1x256xf32>
    %25 = arith.addf %24, %5 : vector<1x256xf32>
    %26 = vector.broadcast %25 : vector<1x256xf32> to vector<16x256xf32>
    %27 = arith.mulf %23, %26 : vector<16x256xf32>
    %28 = vector.broadcast %4 : vector<1x256xf32> to vector<16x256xf32>
    %29 = arith.addf %27, %28 : vector<16x256xf32>
    %30 = arith.truncf %29 : vector<16x256xf32> to vector<16x256xbf16>
    %c0_10 = arith.constant 0 : index
    %c0_11 = arith.constant 0 : index
    %31 = vector.load %arg3[%c0_10, %c0_11] : memref<256x1024xbf16, #tpu.memory_space<vmem>>, vector<256x1024xbf16>
    %cst_12 = arith.constant dense<0.000000e+00> : vector<16x1024xf32>
    %32 = tpu.matmul %30, %31, %cst_12 {dimension_numbers = #tpu.dot_dimension_numbers<[1], [0], [0], [1], [0, 0, 1, 1], [], []>} : vector<16x256xbf16>, vector<256x1024xbf16>, vector<16x1024xf32> -> vector<16x1024xf32>
    %c0_13 = arith.constant 0 : index
    %c0_14 = arith.constant 0 : index
    %33 = vector.load %arg4[%c0_13, %c0_14] : memref<1x1024xf32, #tpu.memory_space<vmem>>, vector<1x1024xf32>
    %34 = vector.broadcast %33 : vector<1x1024xf32> to vector<16x1024xf32>
    %35 = arith.addf %32, %34 : vector<16x1024xf32>
    %cst_15 = arith.constant 0.000000e+00 : f32
    %36 = vector.broadcast %cst_15 : f32 to vector<16x1024xf32>
    %37 = arith.maximumf %35, %36 : vector<16x1024xf32>
    %38 = arith.mulf %37, %37 : vector<16x1024xf32>
    %39 = arith.truncf %38 : vector<16x1024xf32> to vector<16x1024xbf16>
    %c0_16 = arith.constant 0 : index
    %c0_17 = arith.constant 0 : index
    %40 = vector.load %arg5[%c0_16, %c0_17] : memref<1024x256xbf16, #tpu.memory_space<vmem>>, vector<1024x256xbf16>
    %cst_18 = arith.constant dense<0.000000e+00> : vector<16x256xf32>
    %41 = tpu.matmul %39, %40, %cst_18 {dimension_numbers = #tpu.dot_dimension_numbers<[1], [0], [0], [1], [0, 0, 1, 1], [], []>} : vector<16x1024xbf16>, vector<1024x256xbf16>, vector<16x256xf32> -> vector<16x256xf32>
    %c0_19 = arith.constant 0 : index
    %c0_20 = arith.constant 0 : index
    %42 = vector.load %arg6[%c0_19, %c0_20] : memref<1x256xf32, #tpu.memory_space<vmem>>, vector<1x256xf32>
    %43 = vector.broadcast %42 : vector<1x256xf32> to vector<16x256xf32>
    %44 = arith.addf %41, %43 : vector<16x256xf32>
    %45 = arith.addf %1, %44 : vector<16x256xf32>
    %c0_21 = arith.constant 0 : index
    %c0_22 = arith.constant 0 : index
    %c0_23 = arith.constant 0 : index
    %46 = vector.load %arg7[%c0_21, %c0_22, %c0_23] : memref<1x16x256xf32, #tpu.memory_space<vmem>>, vector<1x16x256xf32>
    %47 = vector.shape_cast %46 : vector<1x16x256xf32> to vector<16x256xf32>
    %48 = vector.shape_cast %45 : vector<16x256xf32> to vector<1x16x256xf32>
    tpu.vector_store %arg7[%c0_21, %c0_22, %c0_23], %48 {strides = array<i32>} : memref<1x16x256xf32, #tpu.memory_space<vmem>>, vector<1x16x256xf32>,
    return
  }
  func.func @transform_0(%arg0: i32) -> (i32, i32, i32) {
    %c0_i32 = arith.constant 0 : i32
    %c0_i32_0 = arith.constant 0 : i32
    %c0_i32_1 = arith.constant 0 : i32
    return %arg0, %c0_i32, %c0_i32_0 : i32, i32, i32
  }
  func.func @transform_1(%arg0: i32) -> (i32, i32, i32) {
    %c0_i32 = arith.constant 0 : i32
    %c0_i32_0 = arith.constant 0 : i32
    %c0_i32_1 = arith.constant 0 : i32
    return %arg0, %c0_i32, %c0_i32_0 : i32, i32, i32
  }
  func.func @transform_2(%arg0: i32) -> (i32, i32) {
    %c0_i32 = arith.constant 0 : i32
    %c0_i32_0 = arith.constant 0 : i32
    %c0_i32_1 = arith.constant 0 : i32
    return %c0_i32, %c0_i32_0 : i32, i32
  }
  func.func @transform_3(%arg0: i32) -> (i32, i32) {
    %c0_i32 = arith.constant 0 : i32
    %c0_i32_0 = arith.constant 0 : i32
    %c0_i32_1 = arith.constant 0 : i32
    return %c0_i32, %c0_i32_0 : i32, i32
  }
  func.func @transform_4(%arg0: i32) -> (i32, i32) {
    %c0_i32 = arith.constant 0 : i32
    %c0_i32_0 = arith.constant 0 : i32
    %c0_i32_1 = arith.constant 0 : i32
    return %c0_i32, %c0_i32_0 : i32, i32
  }
  func.func @transform_5(%arg0: i32) -> (i32, i32) {
    %c0_i32 = arith.constant 0 : i32
    %c0_i32_0 = arith.constant 0 : i32
    %c0_i32_1 = arith.constant 0 : i32
    return %c0_i32, %c0_i32_0 : i32, i32
  }
  func.func @transform_6(%arg0: i32) -> (i32, i32, i32) {
    %c0_i32 = arith.constant 0 : i32
    %c0_i32_0 = arith.constant 0 : i32
    %c0_i32_1 = arith.constant 0 : i32
    return %arg0, %c0_i32, %c0_i32_0 : i32, i32, i32
  }
}

module attributes {stable_mosaic.version = 11 : i64} {
  func.func @_ff_block_kernel(%arg0: i32, %arg1: memref<1x16x256xf32, #tpu.memory_space<vmem>>, %arg2: memref<1x1x512xf32, #tpu.memory_space<vmem>>, %arg3: memref<256x1024xbf16, #tpu.memory_space<vmem>>, %arg4: memref<1x1024xf32, #tpu.memory_space<vmem>>, %arg5: memref<1024x256xbf16, #tpu.memory_space<vmem>>, %arg6: memref<1x256xf32, #tpu.memory_space<vmem>>, %arg7: memref<1x16x256xf32, #tpu.memory_space<vmem>>) attributes {dimension_semantics = [#tpu.dimension_semantics<parallel>], iteration_bounds = array<i64: 2>, scalar_prefetch = 0 : i64, scratch_operands = 0 : i64, tpu.core_type = #tpu.core_type<tc>, window_params = [{transform_indices = @transform_0, window_bounds = array<i64: 1, 16, 256>}, {transform_indices = @transform_1, window_bounds = array<i64: 1, 1, 512>}, {pipeline_mode = #tpu.pipeline_mode<synchronous>, transform_indices = @transform_2, window_bounds = array<i64: 256, 1024>}, {pipeline_mode = #tpu.pipeline_mode<synchronous>, transform_indices = @transform_3, window_bounds = array<i64: 1, 1024>}, {pipeline_mode = #tpu.pipeline_mode<synchronous>, transform_indices = @transform_4, window_bounds = array<i64: 1024, 256>}, {pipeline_mode = #tpu.pipeline_mode<synchronous>, transform_indices = @transform_5, window_bounds = array<i64: 1, 256>}, {transform_indices = @transform_6, window_bounds = array<i64: 1, 16, 256>}]} {
    %c0 = arith.constant 0 : index
    %c0_0 = arith.constant 0 : index
    %c0_1 = arith.constant 0 : index
    %0 = vector.load %arg1[%c0, %c0_0, %c0_1] : memref<1x16x256xf32, #tpu.memory_space<vmem>>, vector<1x16x256xf32>
    %1 = vector.shape_cast %0 : vector<1x16x256xf32> to vector<16x256xf32>
    %c0_2 = arith.constant 0 : index
    %c0_3 = arith.constant 0 : index
    %c0_4 = arith.constant 0 : index
    %2 = vector.load %arg2[%c0_2, %c0_3, %c0_4] : memref<1x1x512xf32, #tpu.memory_space<vmem>>, vector<1x1x512xf32>
    %3 = vector.shape_cast %2 : vector<1x1x512xf32> to vector<1x512xf32>
    %4 = vector.extract_strided_slice %3 {offsets = [0, 0], sizes = [1, 256], strides = [1, 1]} : vector<1x512xf32> to vector<1x256xf32>
    %5 = vector.extract_strided_slice %3 {offsets = [0, 256], sizes = [1, 256], strides = [1, 1]} : vector<1x512xf32> to vector<1x256xf32>
    %cst = arith.constant dense<0.000000e+00> : vector<16xf32>
    %6 = vector.multi_reduction <add>, %1, %cst [1] : vector<16x256xf32> to vector<16xf32>
    %7 = vector.shape_cast %6 : vector<16xf32> to vector<16x1xf32>
    %cst_5 = arith.constant 2.560000e+02 : f32
    %8 = vector.broadcast %cst_5 : f32 to vector<16x1xf32>
    %9 = arith.divf %7, %8 : vector<16x1xf32>
    %10 = vector.broadcast %9 : vector<16x1xf32> to vector<16x256xf32>
    %11 = arith.subf %1, %10 : vector<16x256xf32>
    %12 = arith.mulf %11, %11 : vector<16x256xf32>
    %cst_6 = arith.constant dense<0.000000e+00> : vector<16xf32>
    %13 = vector.multi_reduction <add>, %12, %cst_6 [1] : vector<16x256xf32> to vector<16xf32>
    %14 = vector.shape_cast %13 : vector<16xf32> to vector<16x1xf32>
    %cst_7 = arith.constant 2.560000e+02 : f32
    %15 = vector.broadcast %cst_7 : f32 to vector<16x1xf32>
    %16 = arith.divf %14, %15 : vector<16x1xf32>
    %17 = vector.broadcast %9 : vector<16x1xf32> to vector<16x256xf32>
    %18 = arith.subf %1, %17 : vector<16x256xf32>
    %cst_8 = arith.constant 9.99999997E-7 : f32
    %19 = vector.broadcast %cst_8 : f32 to vector<16x1xf32>
    %20 = arith.addf %16, %19 : vector<16x1xf32>
    %21 = math.rsqrt %20 : vector<16x1xf32>
    %22 = vector.broadcast %21 : vector<16x1xf32> to vector<16x256xf32>
    %23 = arith.mulf %18, %22 : vector<16x256xf32>
    %cst_9 = arith.constant 1.000000e+00 : f32
    %24 = vector.broadcast %cst_9 : f32 to vector<1x256xf32>
    %25 = arith.addf %24, %5 : vector<1x256xf32>
    %26 = vector.broadcast %25 : vector<1x256xf32> to vector<16x256xf32>
    %27 = arith.mulf %23, %26 : vector<16x256xf32>
    %28 = vector.broadcast %4 : vector<1x256xf32> to vector<16x256xf32>
    %29 = arith.addf %27, %28 : vector<16x256xf32>
    %30 = arith.truncf %29 : vector<16x256xf32> to vector<16x256xbf16>
    %c0_10 = arith.constant 0 : index
    %c0_11 = arith.constant 0 : index
    %31 = vector.load %arg3[%c0_10, %c0_11] : memref<256x1024xbf16, #tpu.memory_space<vmem>>, vector<256x1024xbf16>
    %cst_12 = arith.constant dense<0.000000e+00> : vector<16x1024xf32>
    %32 = tpu.matmul %30, %31, %cst_12 {dimension_numbers = #tpu.dot_dimension_numbers<[1], [0], [0], [1], [0, 0, 1, 1], [], []>} : vector<16x256xbf16>, vector<256x1024xbf16>, vector<16x1024xf32> -> vector<16x1024xf32>
    %c0_13 = arith.constant 0 : index
    %c0_14 = arith.constant 0 : index
    %33 = vector.load %arg4[%c0_13, %c0_14] : memref<1x1024xf32, #tpu.memory_space<vmem>>, vector<1x1024xf32>
    %34 = vector.broadcast %33 : vector<1x1024xf32> to vector<16x1024xf32>
    %35 = arith.addf %32, %34 : vector<16x1024xf32>
    %cst_15 = arith.constant 0.000000e+00 : f32
    %36 = vector.broadcast %cst_15 : f32 to vector<16x1024xf32>
    %37 = arith.maximumf %35, %36 : vector<16x1024xf32>
    %38 = arith.mulf %37, %37 : vector<16x1024xf32>
    %39 = arith.truncf %38 : vector<16x1024xf32> to vector<16x1024xbf16>
    %c0_16 = arith.constant 0 : index
    %c0_17 = arith.constant 0 : index
    %40 = vector.load %arg5[%c0_16, %c0_17] : memref<1024x256xbf16, #tpu.memory_space<vmem>>, vector<1024x256xbf16>
    %cst_18 = arith.constant dense<0.000000e+00> : vector<16x256xf32>
    %41 = tpu.matmul %39, %40, %cst_18 {dimension_numbers = #tpu.dot_dimension_numbers<[1], [0], [0], [1], [0, 0, 1, 1], [], []>} : vector<16x1024xbf16>, vector<1024x256xbf16>, vector<16x256xf32> -> vector<16x256xf32>
    %c0_19 = arith.constant 0 : index
    %c0_20 = arith.constant 0 : index
    %42 = vector.load %arg6[%c0_19, %c0_20] : memref<1x256xf32, #tpu.memory_space<vmem>>, vector<1x256xf32>
    %43 = vector.broadcast %42 : vector<1x256xf32> to vector<16x256xf32>
    %44 = arith.addf %41, %43 : vector<16x256xf32>
    %45 = arith.addf %1, %44 : vector<16x256xf32>
    %c0_21 = arith.constant 0 : index
    %c0_22 = arith.constant 0 : index
    %c0_23 = arith.constant 0 : index
    %46 = vector.load %arg7[%c0_21, %c0_22, %c0_23] : memref<1x16x256xf32, #tpu.memory_space<vmem>>, vector<1x16x256xf32>
    %47 = vector.shape_cast %46 : vector<1x16x256xf32> to vector<16x256xf32>
    %48 = vector.shape_cast %45 : vector<16x256xf32> to vector<1x16x256xf32>
    tpu.vector_store %arg7[%c0_21, %c0_22, %c0_23], %48 {strides = array<i32>} : memref<1x16x256xf32, #tpu.memory_space<vmem>>, vector<1x16x256xf32>,
    return
  }
  func.func @transform_0(%arg0: i32) -> (i32, i32, i32) {
    %c0_i32 = arith.constant 0 : i32
    %c0_i32_0 = arith.constant 0 : i32
    %c0_i32_1 = arith.constant 0 : i32
    return %arg0, %c0_i32, %c0_i32_0 : i32, i32, i32
  }
  func.func @transform_1(%arg0: i32) -> (i32, i32, i32) {
    %c0_i32 = arith.constant 0 : i32
    %c0_i32_0 = arith.constant 0 : i32
    %c0_i32_1 = arith.constant 0 : i32
    return %arg0, %c0_i32, %c0_i32_0 : i32, i32, i32
  }
  func.func @transform_2(%arg0: i32) -> (i32, i32) {
    %c0_i32 = arith.constant 0 : i32
    %c0_i32_0 = arith.constant 0 : i32
    %c0_i32_1 = arith.constant 0 : i32
    return %c0_i32, %c0_i32_0 : i32, i32
  }
  func.func @transform_3(%arg0: i32) -> (i32, i32) {
    %c0_i32 = arith.constant 0 : i32
    %c0_i32_0 = arith.constant 0 : i32
    %c0_i32_1 = arith.constant 0 : i32
    return %c0_i32, %c0_i32_0 : i32, i32
  }
  func.func @transform_4(%arg0: i32) -> (i32, i32) {
    %c0_i32 = arith.constant 0 : i32
    %c0_i32_0 = arith.constant 0 : i32
    %c0_i32_1 = arith.constant 0 : i32
    return %c0_i32, %c0_i32_0 : i32, i32
  }
  func.func @transform_5(%arg0: i32) -> (i32, i32) {
    %c0_i32 = arith.constant 0 : i32
    %c0_i32_0 = arith.constant 0 : i32
    %c0_i32_1 = arith.constant 0 : i32
    return %c0_i32, %c0_i32_0 : i32, i32
  }
  func.func @transform_6(%arg0: i32) -> (i32, i32, i32) {
    %c0_i32 = arith.constant 0 : i32
    %c0_i32_0 = arith.constant 0 : i32
    %c0_i32_1 = arith.constant 0 : i32
    return %arg0, %c0_i32, %c0_i32_0 : i32, i32, i32
  }
}

</mosaic_0001>

<bundles_post_ra>
// kernel: ella_forward.5
= control target key start
LH: loop header
LB: loop body
LE: loop exit
PB: predicated region body
PF: predicated region fallthrough
CT: control target
= control target key end

     0   :  { %8 = vsyncpa [#allocation3], 0  ;;  %s478_s12 = smov 0   ;;  %s524_s0 = inlined_call_operand.vmem [shape: f32[2,8,64], index: 0, kind: input, shape index: {}]   ;;  %s525_s1 = inlined_call_operand.hbm [shape: bf16[64,256], index: 1, kind: input, shape index: {}]   ;;  %s526_s2 = inlined_call_operand.vmem [shape: f32[1,256], index: 2, kind: input, shape index: {}]   ;;  %s527_s3 = inlined_call_operand.vmem [shape: f32[2,8,256], index: 3, kind: output, shape index: {}]  }
   0x1 LB: > { %s484_s13 = sadd.s32 4294967295, %s452_s12   ;;  %p362_p0 = scmp.ge.s32.totalorder %s452_s12, 1  ;;  %s452_s12 = sphi %s478_s12, %s14_s12  }
   0x2   : > { %p113_p1 = scmp.lt.s32.totalorder %s452_s12, 3  ;;  %s454_s14 = smov [#allocation2]  }
   0x3   : > { %s125_s15 = sshll.u32 %s454_s14, 4  ;;  %p390_p3 = scmp.eq.s32.totalorder %s484_s13, 0  ;;  %s126_s15 = int_to_ptr.vmem [resolvable:$true] %s125_s15 }
   0x4   : > { %p488_p2 = pnand %p362_p0, %p113_p1  ;;  %s427_s17 = scalar_lea.vmem %s126_s15, 1024 }
   0x5   : > { %p428_p7 = scmp.ne.s32.totalorder %s126_s15, %s427_s17  ;;  %p435_p10 = scmp.lt.s32.totalorder %s126_s15, %s126_s15 }
   0x6   : > { %p386_p4 = pneg %p488_p2  ;;  %p436_p11 = scmp.lt.s32.totalorder %s427_s17, %s427_s17 }
   0x8   : > { %p387_p5 = pnand %p390_p3, %p386_p4  ;;  %p437_p12 = por %p436_p11, %p435_p10 }
   0xa   : > { %p418_p6 = pneg %p387_p5 }
   0xc   : > { %p430_p8 = pnand %p428_p7, %p418_p6 }
   0xe   : > { %p431_p9 = pneg %p430_p8 }
  0x10   : > { %p438_p13 = pnand %p437_p12, %p431_p9 }
  0x12   : > { %441 = shalt.err (!%p438_p13)
}
  0x13   : > { %s455_s18 = smov 128   ;;  %s456_s19 = smov 8  }
  0x14   : > { %389 = dma.hbm_to_vmem [thread:$0]  (!%p387_p5), %s525_s1, 1024, %s126_s15, [#allocation3], %s455_s18, %s455_s18, %s456_s19  }
  0x15   : > { %151 = sbr.rel (%p488_p2) target bundleno = 243 (0xf3), region = 32 }
  0x1a   : > { %447 = dma.done.wait (%p390_p3), [#allocation3], 1024  }
  0x1b   : > { %449 = vsyncadd (%p390_p3), [#allocation3], 4294966272  ;;  %v457_v0 = vmov 0   ;;  %p174_p0 = scmp.lt.s32.totalorder %s484_s13, 1  ;;  %v404_v1 = vld [vmem:[#allocation2 + $0x34] ss:$8 sps:$4 sm:$0xff]   ;;  %v196_v11 = vlaneseq }
  0x1c   : > { %282 = vmatprep.mubr.bf16.mxu0 %v457_v0  ;;  %v406_v2 = vld [vmem:[#allocation2 + $0x30] ss:$8 sps:$4 sm:$0xff]   ;;  %258 = vmatprep.subr.bf16.mxu0 %v404_v1  ;;  %v407_v3 = vld [vmem:[#allocation2 + $0x24] ss:$8 sps:$4 sm:$0xff]   ;;  %v409_v4 = vld [vmem:[#allocation2 + $0x20] ss:$8 sps:$4 sm:$0xff]  }
  0x1d   : > { %s530_s13 = smov (!%p174_p0, %s484_s13), 1  ;;  %259 = vmatpush1.bf16.msra.mxu0 %v406_v2  ;;  %v410_v5 = vld [vmem:[#allocation2 + $0x14] ss:$8 sps:$4 sm:$0xff]   ;;  %v412_v6 = vld [vmem:[#allocation2 + $0x10] ss:$8 sps:$4 sm:$0xff]   ;;  %vm246_vm0 = vcmask 523264  }
  0x1e   : > { %260 = vmatprep.subr.bf16.mxu0 %v407_v3  ;;  %s367_s22 = sshll.u32 %s530_s13, 3  ;;  %v413_v7 = vld [vmem:[#allocation2 + $0x4] ss:$8 sps:$4 sm:$0xff]   ;;  %v415_v8 = vld [vmem:[#allocation2] ss:$8 sps:$4 sm:$0xff]   ;;  %v197_v12 = vshrl.u32 %v196_v11, 7 }
  0x1f   : > { %s177_s25 = scalar_lea.vmem %s524_s0, %s367_s22  ;;  %v194_v14 = vld [vmem:[%s526_s2] sm:$0x3]  ;;  %s381_s28 = sshll.u32 %s530_s13, 4 }
  0x20   : > { %v184_v9 = vld [vmem:[%s177_s25] sm:$0xff]  ;;  %v198_v13 = vsub.s32 0, %v197_v12  ;;  %v202_v15 = vsub.s32 1, %v197_v12  ;;  %s182_s4 = scalar_lea.vmem %s527_s3, %s381_s28 }
  0x21   : > { %261 = vmatpush1.bf16.msra.mxu0 %v409_v4  ;;  %v185_v10 = vpack.c.bf16 %v184_v9, %v184_v9 }
  0x22   : > { %262 = vmatprep.subr.bf16.mxu0 %v410_v5  ;;  %v199_v16 = vrot.slane %v194_v14, %v198_v13  ;;  %v203_v17 = vrot.slane %v194_v14, %v202_v15 }
  0x25   : > { %263 = vmatpush1.bf16.msra.mxu0 %v412_v6 }
  0x26   : > { %264 = vmatprep.subr.bf16.mxu0 %v413_v7 }
  0x29   : > { %265 = vmatpush1.bf16.msra.mxu0 %v415_v8 }
  0x2c   : > { %378 = vmatmul.mubr.msk.bf16.vlgmr.msra.gmra.mxu0 %vm246_vm0, %v185_v10 }
  0xec   : > { %v284_v18 = vpop.f32.mrf.mxu0 }
  0xed   : > { %v285_v19 = vadd.f32 %v284_v18, %v199_v16 }
  0xee   : > { %v286_v20 = vpop.f32.mrf.mxu0 }
  0xef   : > { %291 = vst [vmem:[%s182_s4] sm:$0xff] %v285_v19  ;;  %v287_v21 = vadd.f32 %v286_v20, %v203_v17 }
  0xf0   : > { %v288_v22 = vpop.f32.mrf.mxu0 }
  0xf1   : > { %292 = vst [vmem:[%s182_s4 + $0x8] sm:$0xff] %v287_v21 }
  0xf2   : > { %v289_v23 = vpop.f32.mrf.mxu0 }
  0xf3 PF: > { %s14_s12 = sadd.s32 1, %s452_s12  }
  0xf4   : > { %p11_p1 = scmp.ge.s32.totalorder %s14_s12, 4  }
  0xf6   :  { %13 = sbr.rel (!%p11_p1) target bundleno = 1 (0x1), region = 67 }
  0xfb   :  { %314 = vsyncpa [#allocation3], 1 }
  0xfc   :  { %316 = vsyncpa [#allocation3 + $0x1], 1 }

// kernel: ella_forward.8
= control target key start
LH: loop header
LB: loop body
LE: loop exit
PB: predicated region body
PF: predicated region fallthrough
CT: control target
= control target key end

     0   :  { %s3548_s13 = smov 0   ;;  %s4311_s0 = inlined_call_operand.vmem [shape: f32[2,16,256], index: 0, kind: input, shape index: {}]   ;;  %s4312_s1 = inlined_call_operand.vmem [shape: f32[2,8,256], index: 1, kind: input, shape index: {}]   ;;  %s4313_s2 = inlined_call_operand.vmem [shape: f32[2,1,512], index: 2, kind: input, shape index: {}]   ;;  %s4314_s3 = inlined_call_operand.vmem [shape: f32[2,1,512], index: 3, kind: input, shape index: {}]   ;;  %s4315_s4 = inlined_call_operand.vmem [shape: bf16[256,256], index: 4, kind: input, shape index: {}]   ;;  %s4316_s5 = inlined_call_operand.vmem [shape: f32[1,256], index: 5, kind: input, shape index: {}]   ;;  %s4317_s6 = inlined_call_operand.vmem [shape: bf16[256,512], index: 6, kind: input, shape index: {}]   ;;  %s4318_s7 = inlined_call_operand.vmem [shape: f32[1,512], index: 7, kind: input, shape index: {}]   ;;  %s4319_s8 = inlined_call_operand.vmem [shape: bf16[256,256], index: 8, kind: input, shape index: {}]   ;;  %s4320_s9 = inlined_call_operand.vmem [shape: f32[1,256], index: 9, kind: input, shape index: {}]   ;;  %s4321_s10 = inlined_call_operand.vmem [shape: f32[2,16,256], index: 10, kind: output, shape index: {}]  }
   0x1 LB: > { %s3039_s14 = sadd.s32 4294967295, %s3487_s13   ;;  %p3043_p0 = scmp.ge.s32.totalorder %s3487_s13, 1  ;;  %s3487_s13 = sphi %s3548_s13, %s20_s13  }
   0x2   : > { %p340_p1 = scmp.lt.s32.totalorder %s3487_s13, 3 }
   0x4   : > { %p341_p2 = pnand %p3043_p0, %p340_p1 }
   0x5   : > { %p391_p3 = scmp.lt.s32.totalorder (!%p341_p2), %s3039_s14, 1 }
   0x6   : > { %344 = sbr.rel (%p341_p2) target bundleno = 1517 (0x5ed), region = 60 }
   0xb   : > { %s4323_s14 = smov (!%p391_p3, %s3039_s14), 1  ;;  %v3263_v9 = vld [vmem:[%s4315_s4 + $0x74] ss:$8 sps:$4 sm:$0xff]   ;;  %v3265_v10 = vld [vmem:[%s4315_s4 + $0x70] ss:$8 sps:$4 sm:$0xff]   ;;  %vm3490_vm0 = vmmov 0  }
   0xc   : > { %s3204_s15 = sshll.u32 %s4323_s14, 5  ;;  %s3205_s16 = sshll.u32 %s4323_s14, 4  ;;  %v3266_v11 = vld [vmem:[%s4317_s6 + $0xe4] ss:$16 sps:$4 sm:$0xff]   ;;  %v3268_v12 = vld [vmem:[%s4317_s6 + $0xe0] ss:$16 sps:$4 sm:$0xff]   ;;  %740 = vmatprep.subr.bf16.mxu0 %v3263_v9 }
   0xd   : > { %s3565_s19 = scalar_lea.vmem %s4311_s0, %s3204_s15  ;;  %s400_s22 = scalar_lea.vmem %s4312_s1, %s3205_s16  ;;  %v3269_v13 = vld [vmem:[%s4315_s4 + $0x64] ss:$8 sps:$4 sm:$0xff]   ;;  %1191 = vmatprep.subr.bf16.mxu1 %v3266_v11  ;;  %741 = vmatpush1.bf16.msra.mxu0 %v3265_v10  ;;  %v3271_v15 = vld [vmem:[%s4315_s4 + $0x60] ss:$8 sps:$4 sm:$0xff]   ;;  %v3275_v17 = vld [vmem:[%s4315_s4 + $0x54] ss:$8 sps:$4 sm:$0xff]  }
   0xe   : > { %v3568_v0 = vld [vmem:[%s3565_s19] sm:$0xff]  ;;  %v3571_v1 = vld [vmem:[%s3565_s19 + $0x8] sm:$0xff]  ;;  %v3577_v2 = vld [vmem:[%s3565_s19 + $0x10] sm:$0xff]  ;;  %1192 = vmatpush1.bf16.msra.mxu1 %v3268_v12  ;;  %742 = vmatprep.subr.bf16.mxu0 %v3269_v13  ;;  %s3048_s25 = sshll.u32 %s4323_s14, 2  ;;  %vm2367_vm1 = vcmask 1043456   ;;  %vm2313_vm2 = vcmask 195584  }
   0xf   : > { %v422_v3 = vadd.f32 %v3571_v1, %v3568_v0  ;;  %v3581_v4 = vld [vmem:[%s400_s22] sm:$0xff]  ;;  %v3583_v5 = vld [vmem:[%s400_s22 + $0x8] sm:$0xff]  ;;  %v3586_v6 = vld [vmem:[%s3565_s19 + $0x18] sm:$0xff]  ;;  %s404_s28 = scalar_lea.vmem %s4313_s2, %s3048_s25  ;;  %s408_s11 = scalar_lea.vmem %s4314_s3, %s3048_s25 }
  0x10   : > { %v489_v7 = vadd.f32 %v3583_v5, %v3581_v4  ;;  %v425_v8 = vadd.f32 %v3586_v6, %v3577_v2  ;;  %v3272_v14 = vld [vmem:[%s4317_s6 + $0xc4] ss:$16 sps:$4 sm:$0xff]   ;;  %v3274_v16 = vld [vmem:[%s4317_s6 + $0xc0] ss:$16 sps:$4 sm:$0xff]   ;;  %s413_s22 = scalar_lea.vmem %s4321_s10, %s3204_s15 }
  0x11   : > { %423 = vadd.xlane.f32.xlu0 %v422_v3  ;;  %1193 = vmatprep.subr.bf16.mxu1 %v3272_v14  ;;  %v3278_v18 = vld [vmem:[%s4317_s6 + $0xa4] ss:$16 sps:$4 sm:$0xff]   ;;  %v3277_v19 = vld [vmem:[%s4315_s4 + $0x50] ss:$8 sps:$4 sm:$0xff]   ;;  %v3283_v23 = vld [vmem:[%s4315_s4 + $0x40] ss:$8 sps:$4 sm:$0xff]  }
  0x12   : > { %490 = vadd.xlane.f32.xlu1 %v489_v7  ;;  %743 = vmatpush1.bf16.msra.mxu0 %v3271_v15  ;;  %v3280_v20 = vld [vmem:[%s4317_s6 + $0xa0] ss:$16 sps:$4 sm:$0xff]   ;;  %v3281_v21 = vld [vmem:[%s4315_s4 + $0x44] ss:$8 sps:$4 sm:$0xff]   ;;  %v3287_v25 = vld [vmem:[%s4315_s4 + $0x34] ss:$8 sps:$4 sm:$0xff]  }
  0x13   : > { %1194 = vmatpush1.bf16.msra.mxu1 %v3274_v16  ;;  %744 = vmatprep.subr.bf16.mxu0 %v3275_v17  ;;  %v3284_v22 = vld [vmem:[%s4317_s6 + $0x84] ss:$16 sps:$4 sm:$0xff]   ;;  %v3286_v24 = vld [vmem:[%s4317_s6 + $0x80] ss:$16 sps:$4 sm:$0xff]  }
  0x14   : > { %1195 = vmatprep.subr.bf16.mxu1 %v3278_v18  ;;  %v3290_v26 = vld [vmem:[%s4317_s6 + $0x64] ss:$16 sps:$4 sm:$0xff]   ;;  %v3289_v27 = vld [vmem:[%s4315_s4 + $0x30] ss:$8 sps:$4 sm:$0xff]   ;;  %v3295_v31 = vld [vmem:[%s4315_s4 + $0x20] ss:$8 sps:$4 sm:$0xff]  }
  0x15   : > { %426 = vadd.xlane.f32.xlu0 %v425_v8  ;;  %v3292_v28 = vld [vmem:[%s4317_s6 + $0x60] ss:$16 sps:$4 sm:$0xff]   ;;  %v3293_v29 = vld [vmem:[%s4315_s4 + $0x24] ss:$8 sps:$4 sm:$0xff]   ;;  %v3299_v33 = vld [vmem:[%s4315_s4 + $0x14] ss:$8 sps:$4 sm:$0xff]  }
  0x16   : > { %745 = vmatpush1.bf16.msra.mxu0 %v3277_v19  ;;  %v3296_v30 = vld [vmem:[%s4317_s6 + $0x44] ss:$16 sps:$4 sm:$0xff]   ;;  %v3298_v32 = vld [vmem:[%s4317_s6 + $0x40] ss:$16 sps:$4 sm:$0xff]  }
  0x17   : > { %1196 = vmatpush1.bf16.msra.mxu1 %v3280_v20  ;;  %746 = vmatprep.subr.bf16.mxu0 %v3281_v21  ;;  %v3302_v34 = vld [vmem:[%s4317_s6 + $0x24] ss:$16 sps:$4 sm:$0xff]   ;;  %v3301_v35 = vld [vmem:[%s4315_s4 + $0x10] ss:$8 sps:$4 sm:$0xff]   ;;  %v3307_v39 = vld [vmem:[%s4315_s4] ss:$8 sps:$4 sm:$0xff]  }
  0x18   : > { %1197 = vmatprep.subr.bf16.mxu1 %v3284_v22  ;;  %v3304_v36 = vld [vmem:[%s4317_s6 + $0x20] ss:$16 sps:$4 sm:$0xff]   ;;  %v3305_v37 = vld [vmem:[%s4315_s4 + $0x4] ss:$8 sps:$4 sm:$0xff]   ;;  %v3311_v41 = vld [vmem:[%s4315_s4 + $0xf4] ss:$8 sps:$4 sm:$0xff]  }
  0x19   : > { %v3308_v38 = vld [vmem:[%s4317_s6 + $0x4] ss:$16 sps:$4 sm:$0xff]   ;;  %v3310_v40 = vld [vmem:[%s4317_s6] ss:$16 sps:$4 sm:$0xff]  }
  0x1a   : > { %747 = vmatpush1.bf16.msra.mxu0 %v3283_v23  ;;  %v3314_v42 = vld [vmem:[%s4317_s6 + $0x1e4] ss:$16 sps:$4 sm:$0xff]   ;;  %v3313_v43 = vld [vmem:[%s4315_s4 + $0xf0] ss:$8 sps:$4 sm:$0xff]   ;;  %v3319_v3 = vld [vmem:[%s4315_s4 + $0xe0] ss:$8 sps:$4 sm:$0xff]  }
  0x1b   : > { %1198 = vmatpush1.bf16.msra.mxu1 %v3286_v24  ;;  %748 = vmatprep.subr.bf16.mxu0 %v3287_v25  ;;  %v3325_v7 = vld [vmem:[%s4315_s4 + $0xd0] ss:$8 sps:$4 sm:$0xff]   ;;  %v3326_v8 = vld [vmem:[%s4317_s6 + $0x1a4] ss:$16 sps:$4 sm:$0xff]   ;;  %v3331_v11 = vld [vmem:[%s4315_s4 + $0xc0] ss:$8 sps:$4 sm:$0xff]  }
  0x1c   : > { %1199 = vmatprep.subr.bf16.mxu1 %v3290_v26  ;;  %v3328_v9 = vld [vmem:[%s4317_s6 + $0x1a0] ss:$16 sps:$4 sm:$0xff]   ;;  %v3329_v10 = vld [vmem:[%s4315_s4 + $0xc4] ss:$8 sps:$4 sm:$0xff]   ;;  %v3335_v14 = vld [vmem:[%s4315_s4 + $0xb4] ss:$8 sps:$4 sm:$0xff]  }
  0x1d   : > { %v3332_v12 = vld [vmem:[%s4317_s6 + $0x184] ss:$16 sps:$4 sm:$0xff]   ;;  %v3334_v13 = vld [vmem:[%s4317_s6 + $0x180] ss:$16 sps:$4 sm:$0xff]  }
  0x1e   : > { %749 = vmatpush1.bf16.msra.mxu0 %v3289_v27  ;;  %v3338_v15 = vld [vmem:[%s4317_s6 + $0x164] ss:$16 sps:$4 sm:$0xff]   ;;  %v3337_v16 = vld [vmem:[%s4315_s4 + $0xb0] ss:$8 sps:$4 sm:$0xff]   ;;  %v3343_v20 = vld [vmem:[%s4315_s4 + $0xa0] ss:$8 sps:$4 sm:$0xff]  }
  0x1f   : > { %1200 = vmatpush1.bf16.msra.mxu1 %v3292_v28  ;;  %750 = vmatprep.subr.bf16.mxu0 %v3293_v29  ;;  %v3340_v17 = vld [vmem:[%s4317_s6 + $0x160] ss:$16 sps:$4 sm:$0xff]   ;;  %v3341_v18 = vld [vmem:[%s4315_s4 + $0xa4] ss:$8 sps:$4 sm:$0xff]   ;;  %v3347_v22 = vld [vmem:[%s4315_s4 + $0x94] ss:$8 sps:$4 sm:$0xff]  }
  0x20   : > { %1201 = vmatprep.subr.bf16.mxu1 %v3296_v30  ;;  %v3344_v19 = vld [vmem:[%s4317_s6 + $0x144] ss:$16 sps:$4 sm:$0xff]   ;;  %v3346_v21 = vld [vmem:[%s4317_s6 + $0x140] ss:$16 sps:$4 sm:$0xff]   ;;  %v3361_v30 = vld [vmem:[%s4317_s6 + $0xec] ss:$16 sps:$4 sm:$0xff]  }
  0x21   : > { %v3350_v23 = vld [vmem:[%s4317_s6 + $0x124] ss:$16 sps:$4 sm:$0xff]   ;;  %v3349_v24 = vld [vmem:[%s4315_s4 + $0x90] ss:$8 sps:$4 sm:$0xff]   ;;  %v3355_v28 = vld [vmem:[%s4315_s4 + $0x80] ss:$8 sps:$4 sm:$0xff]  }
  0x22   : > { %751 = vmatpush1.bf16.msra.mxu0 %v3295_v31  ;;  %v3352_v25 = vld [vmem:[%s4317_s6 + $0x120] ss:$16 sps:$4 sm:$0xff]   ;;  %v3353_v26 = vld [vmem:[%s4315_s4 + $0x84] ss:$8 sps:$4 sm:$0xff]  }
  0x23   : > { %1202 = vmatpush1.bf16.msra.mxu1 %v3298_v32  ;;  %752 = vmatprep.subr.bf16.mxu0 %v3299_v33  ;;  %v3356_v27 = vld [vmem:[%s4317_s6 + $0x104] ss:$16 sps:$4 sm:$0xff]   ;;  %v3358_v29 = vld [vmem:[%s4317_s6 + $0x100] ss:$16 sps:$4 sm:$0xff]  }
  0x24   : > { %1203 = vmatprep.subr.bf16.mxu1 %v3302_v34 }
  0x26   : > { %753 = vmatpush1.bf16.msra.mxu0 %v3301_v35 }
  0x27   : > { %1204 = vmatpush1.bf16.msra.mxu1 %v3304_v36  ;;  %754 = vmatprep.subr.bf16.mxu0 %v3305_v37 }
  0x28   : > { %1205 = vmatprep.subr.bf16.mxu1 %v3308_v38 }
  0x2a   : > { %755 = vmatpush1.bf16.msra.mxu0 %v3307_v39 }
  0x2b   : > { %1206 = vmatpush1.bf16.msra.mxu1 %v3310_v40  ;;  %756 = vmatprep.subr.bf16.mxu0 %v3311_v41  ;;  %v460_v40 = vlaneseq  ;;  %v421_v41 = vld [vmem:[%s404_s28] sm:$0xf] }
  0x2c   : > { %1207 = vmatprep.subr.bf16.mxu1 %v3314_v42  ;;  %v488_v42 = vld [vmem:[%s408_s11] sm:$0xf] }
  0x2e   : > { %757 = vmatpush2.bf16.msra.mxu0 %v3313_v43  ;;  %v456_v43 = vrot.slane %v421_v41, 2 }
  0x9a   : > { %v424_v44 = vpop.xlane.xlu0 %423 }
  0x9b   : > { %v429_v45 = vmul.f32 0.00390625, %v424_v44  ;;  %v491_v46 = vpop.xlane.xlu1 %490  ;;  %v3824_v44 = vshrl.u32 %v460_v40, 7  ;;  %v3394_v40 = vld [vmem:[%s4317_s6 + $0x18c] ss:$16 sps:$4 sm:$0xff]  }
  0x9c   : > { %v492_v47 = vmul.f32 0.00390625, %v491_v46  ;;  %v458_v46 = vadd.f32 1.0, %v456_v43  ;;  %v3395_v43 = vld [vmem:[%s4317_s6 + $0x168] ss:$16 sps:$4 sm:$0xff]  }
  0x9d   : > { %v3698_v48 = vsub.f32 %v3568_v0, %v429_v45  ;;  %v3701_v49 = vsub.f32 %v3571_v1, %v429_v45  ;;  %v3316_v1 = vld [vmem:[%s4317_s6 + $0x1e0] ss:$16 sps:$4 sm:$0xff]   ;;  %v506_v45 = vrot.slane %v488_v42, 2 }
  0x9e   : > { %v3704_v50 = vsub.f32 %v3581_v4, %v492_v47  ;;  %v3707_v51 = vsub.f32 %v3583_v5, %v492_v47  ;;  %v427_v52 = vpop.xlane.xlu0 %426  ;;  %1208 = vmatpush2.bf16.msra.mxu1 %v3316_v1  ;;  %v3320_v4 = vld [vmem:[%s4317_s6 + $0x1c4] ss:$16 sps:$4 sm:$0xff]   ;;  %v3322_v5 = vld [vmem:[%s4317_s6 + $0x1c0] ss:$16 sps:$4 sm:$0xff]   ;;  %v3827_v47 = vsub.s32 1, %v3824_v44 }
  0x9f   : > { %v430_v53 = vmul.f32 0.00390625, %v427_v52  ;;  %v435_v54 = vmul.f32 %v3698_v48, %v3698_v48  ;;  %v436_v55 = vmul.f32 %v3701_v49, %v3701_v49  ;;  %1209 = vmatprep.subr.bf16.mxu1 %v3320_v4  ;;  %v3830_v52 = vsub.s32 0, %v3824_v44 }
  0xa0   : > { %v495_v56 = vmul.f32 %v3704_v50, %v3704_v50  ;;  %v496_v57 = vmul.f32 %v3707_v51, %v3707_v51  ;;  %v481_v1 = vrot.slane %v421_v41, %v3827_v47 }
  0xa1   : > { %v3718_v58 = vsub.f32 %v3577_v2, %v430_v53  ;;  %v3721_v59 = vsub.f32 %v3586_v6, %v430_v53  ;;  %v439_v60 = vadd.f32 %v436_v55, %v435_v54  ;;  %v3317_v2 = vld [vmem:[%s4315_s4 + $0xe4] ss:$8 sps:$4 sm:$0xff]   ;;  %v3323_v6 = vld [vmem:[%s4315_s4 + $0xd4] ss:$8 sps:$4 sm:$0xff]   ;;  %v508_v53 = vadd.f32 1.0, %v506_v45 }
  0xa2   : > { %v497_v61 = vadd.f32 %v496_v57, %v495_v56  ;;  %758 = vmatprep.subr.bf16.mxu0 %v3317_v2  ;;  %1210 = vmatpush2.bf16.msra.mxu1 %v3322_v5  ;;  %v467_v56 = vrot.slane %v458_v46, %v3827_v47  ;;  %v477_v2 = vrot.slane %v421_v41, %v3830_v52  ;;  %v3392_v41 = vld [vmem:[%s4317_s6 + $0x188] ss:$16 sps:$4 sm:$0xff]   ;;  %v3400_v45 = vld [vmem:[%s4317_s6 + $0x14c] ss:$16 sps:$4 sm:$0xff]  }
  0xa3   : > { %440 = vadd.xlane.f32.xlu1 %v439_v60  ;;  %v437_v62 = vmul.f32 %v3718_v58, %v3718_v58  ;;  %v438_v63 = vmul.f32 %v3721_v59, %v3721_v59  ;;  %759 = vmatpush2.bf16.msra.mxu0 %v3319_v3  ;;  %v463_v60 = vrot.slane %v458_v46, %v3830_v52  ;;  %v3398_v46 = vld [vmem:[%s4317_s6 + $0x148] ss:$16 sps:$4 sm:$0xff]  }
  0xa4   : > { %760 = vmatprep.subr.bf16.mxu0 %v3323_v6  ;;  %1211 = vmatprep.subr.bf16.mxu1 %v3326_v8 }
  0xa5   : > { %v442_v0 = vadd.f32 %v438_v63, %v437_v62 }
  0xa6   : > { %1212 = vmatpush2.bf16.msra.mxu1 %v3328_v9 }
  0xa7   : > { %498 = vadd.xlane.f32.xlu1 %v497_v61  ;;  %443 = vadd.xlane.f32.xlu0 %v442_v0  ;;  %v517_v61 = vrot.slane %v508_v53, %v3827_v47 }
  0xa8   : > { %761 = vmatpush2.bf16.msra.mxu0 %v3325_v7  ;;  %1213 = vmatprep.subr.bf16.mxu1 %v3332_v12 }
  0xa9   : > { %762 = vmatprep.subr.bf16.mxu0 %v3329_v10 }
  0xaa   : > { %1214 = vmatpush2.bf16.msra.mxu1 %v3334_v13 }
  0xab   : > { %1215 = vmatprep.subr.bf16.mxu1 %v3338_v15 }
  0xac   : > { %763 = vmatpush2.bf16.msra.mxu0 %v3331_v11  ;;  %v513_v11 = vrot.slane %v508_v53, %v3830_v52  ;;  %v3403_v53 = vld [vmem:[%s4317_s6 + $0x12c] ss:$16 sps:$4 sm:$0xff]  }
  0xad   : > { %764 = vmatprep.subr.bf16.mxu0 %v3335_v14 }
  0xae   : > { %1216 = vmatpush2.bf16.msra.mxu1 %v3340_v17 }
  0xaf   : > { %1217 = vmatprep.subr.bf16.mxu1 %v3344_v19  ;;  %v3362_v19 = vld [vmem:[%s4317_s6 + $0xc8] ss:$16 sps:$4 sm:$0xff]  }
  0xb0   : > { %765 = vmatpush2.bf16.msra.mxu0 %v3337_v16  ;;  %v3364_v16 = vld [vmem:[%s4317_s6 + $0xcc] ss:$16 sps:$4 sm:$0xff]  }
  0xb1   : > { %766 = vmatprep.subr.bf16.mxu0 %v3341_v18 }
  0xb2   : > { %1218 = vmatpush2.bf16.msra.mxu1 %v3346_v21 }
  0xb3   : > { %1219 = vmatprep.subr.bf16.mxu1 %v3350_v23 }
  0xb4   : > { %767 = vmatpush2.bf16.msra.mxu0 %v3343_v20  ;;  %v3367_v20 = vld [vmem:[%s4317_s6 + $0xac] ss:$16 sps:$4 sm:$0xff]  }
  0xb5   : > { %768 = vmatprep.subr.bf16.mxu0 %v3347_v22  ;;  %v3365_v22 = vld [vmem:[%s4317_s6 + $0xa8] ss:$16 sps:$4 sm:$0xff]  }
  0xb6   : > { %1220 = vmatpush2.bf16.msra.mxu1 %v3352_v25  ;;  %v3368_v25 = vld [vmem:[%s4317_s6 + $0x88] ss:$16 sps:$4 sm:$0xff]  }
  0xb7   : > { %1221 = vmatprep.subr.bf16.mxu1 %v3356_v27  ;;  %v3371_v27 = vld [vmem:[%s4317_s6 + $0x68] ss:$16 sps:$4 sm:$0xff]  }
  0xb8   : > { %769 = vmatpush2.bf16.msra.mxu0 %v3349_v24  ;;  %v3370_v24 = vld [vmem:[%s4317_s6 + $0x8c] ss:$16 sps:$4 sm:$0xff]  }
  0xb9   : > { %770 = vmatprep.subr.bf16.mxu0 %v3353_v26  ;;  %v3373_v26 = vld [vmem:[%s4317_s6 + $0x6c] ss:$16 sps:$4 sm:$0xff]  }
  0xba   : > { %1222 = vmatpush2.bf16.msra.mxu1 %v3358_v29  ;;  %v3374_v29 = vld [vmem:[%s4317_s6 + $0x48] ss:$16 sps:$4 sm:$0xff]  }
  0xbc   : > { %771 = vmatpush2.bf16.msra.mxu0 %v3355_v28  ;;  %v3376_v28 = vld [vmem:[%s4317_s6 + $0x4c] ss:$16 sps:$4 sm:$0xff]  }
  0xbd   : > { %1242 = vmatprep.subr.bf16.mxu0 %v3361_v30  ;;  %v3379_v30 = vld [vmem:[%s4317_s6 + $0x2c] ss:$16 sps:$4 sm:$0xff]  }
 0x12c   : > { %v441_v31 = vpop.xlane.xlu1 %440 }
 0x12d   : > { %v445_v32 = vmul.f32 0.00390625, %v441_v31  ;;  %v3377_v31 = vld [vmem:[%s4317_s6 + $0x28] ss:$16 sps:$4 sm:$0xff]  }
 0x12f   : > { %v447_v33 = vadd.f32 1e-06, %v445_v32  ;;  %v3382_v32 = vld [vmem:[%s4317_s6 + $0xc] ss:$16 sps:$4 sm:$0xff]  }
 0x130   : > { %v499_v34 = vpop.xlane.xlu1 %498  ;;  %v444_v35 = vpop.xlane.xlu0 %443 }
 0x131   : > { %3455 = vrsqrt.f32 %v447_v33  ;;  %v500_v36 = vmul.f32 0.00390625, %v499_v34  ;;  %v446_v37 = vmul.f32 0.00390625, %v444_v35  ;;  %v3380_v33 = vld [vmem:[%s4317_s6 + $0x8] ss:$16 sps:$4 sm:$0xff]   ;;  %v3385_v34 = vld [vmem:[%s4317_s6 + $0x1ec] ss:$16 sps:$4 sm:$0xff]  }
 0x132   : > { %v3383_v35 = vld [vmem:[%s4317_s6 + $0x1e8] ss:$16 sps:$4 sm:$0xff]  }
 0x133   : > { %v501_v38 = vadd.f32 1e-06, %v500_v36  ;;  %v448_v39 = vadd.f32 1e-06, %v446_v37  ;;  %v3388_v36 = vld [vmem:[%s4317_s6 + $0x1cc] ss:$16 sps:$4 sm:$0xff]  }
 0x134   : > { %v3386_v37 = vld [vmem:[%s4317_s6 + $0x1c8] ss:$16 sps:$4 sm:$0xff]  }
 0x135   : > { %3457 = vrsqrt.f32 %v501_v38  ;;  %v3391_v38 = vld [vmem:[%s4317_s6 + $0x1ac] ss:$16 sps:$4 sm:$0xff]  }
 0x136   : > { %3459 = vrsqrt.f32 %v448_v39  ;;  %v3389_v39 = vld [vmem:[%s4317_s6 + $0x1a8] ss:$16 sps:$4 sm:$0xff]  }
 0x13e   : > { %v3456_v54 = vpop.eup %3455 }
 0x13f   : > { %v452_v55 = vmul.f32 %v3456_v54, %v3701_v49  ;;  %v451_v57 = vmul.f32 %v3456_v54, %v3698_v48  ;;  %v529_v48 = vrot.slane %v488_v42, %v3827_v47  ;;  %v3401_v54 = vld [vmem:[%s4317_s6 + $0x128] ss:$16 sps:$4 sm:$0xff]  }
 0x141   : > { %v471_v0 = vmul.f32 %v467_v56, %v452_v55  ;;  %v470_v5 = vmul.f32 %v463_v60, %v451_v57  ;;  %v3406_v55 = vld [vmem:[%s4317_s6 + $0x10c] ss:$16 sps:$4 sm:$0xff]   ;;  %v3489_v57 = vmov 0.0  }
 0x142   : > { %v3458_v62 = vpop.eup %3457  ;;  %3227 = vmatprep.subr.bf16.mxu1 %v3489_v57 }
 0x143   : > { %v3460_v63 = vpop.eup %3459  ;;  %v504_v3 = vmul.f32 %v3458_v62, %v3707_v51  ;;  %v485_v9 = vadd.f32 %v481_v1, %v471_v0  ;;  %v503_v10 = vmul.f32 %v3458_v62, %v3704_v50  ;;  %v484_v13 = vadd.f32 %v477_v2, %v470_v5 }
 0x144   : > { %v454_v4 = vmul.f32 %v3460_v63, %v3721_v59  ;;  %v453_v49 = vmul.f32 %v3460_v63, %v3718_v58  ;;  %v3359_v58 = vld [vmem:[%s4317_s6 + $0xe8] ss:$16 sps:$4 sm:$0xff]   ;;  %v525_v50 = vrot.slane %v488_v42, %v3830_v52  ;;  %v3397_v42 = vld [vmem:[%s4317_s6 + $0x16c] ss:$16 sps:$4 sm:$0xff]   ;;  %v3957_v63 = vld [vmem:[%s4318_s7] sm:$0xf] }
 0x145   : > { %v521_v6 = vmul.f32 %v517_v61, %v504_v3  ;;  %v520_v17 = vmul.f32 %v513_v11, %v503_v10  ;;  %v3491_v3 = vmov 1983009808   ;;  %v854_v5 = vrot.slane %v3957_v63, %v3830_v52 }
 0x146   : > { %v473_v7 = vmul.f32 %v467_v56, %v454_v4  ;;  %v472_v8 = vmul.f32 %v463_v60, %v453_v49  ;;  %v3404_v56 = vld [vmem:[%s4317_s6 + $0x108] ss:$16 sps:$4 sm:$0xff]   ;;  %v1295_v4 = vunpack.c.l.s4 %v3491_v3  ;;  %v568_v49 = vld [vmem:[%s4316_s5] sm:$0x3] }
 0x147   : > { %v533_v15 = vadd.f32 %v529_v48, %v521_v6  ;;  %v532_v21 = vadd.f32 %v525_v50, %v520_v17  ;;  %v577_v6 = vrot.slane %v568_v49, %v3827_v47  ;;  %v573_v10 = vrot.slane %v568_v49, %v3830_v52 }
 0x148   : > { %v487_v12 = vadd.f32 %v481_v1, %v473_v7  ;;  %v486_v14 = vadd.f32 %v477_v2, %v472_v8  ;;  %v858_v1 = vrot.slane %v3957_v63, %v3827_v47  ;;  %v1296_v11 = vunpack.c.0.s8 %v1295_v4 }
 0x149   : > { %v3854_v18 = vpack.c.bf16 %v533_v15, %v533_v15  ;;  %v783_v23 = vpack.c.bf16 %v532_v21, %v532_v21 }
 0x14a   : > { %v535_v51 = vpack.c.bf16 %v487_v12, %v485_v9  ;;  %v3848_v59 = vpack.c.bf16 %v486_v14, %v484_v13  ;;  %v3492_v14 = vmov 1934713408   ;;  %v3970_v17 = vsub.s32 %v1296_v11, %v3824_v44 }
 0x14b   : > { %v1326_v15 = vunpack.c.l.s4 %v3492_v14 }
 0x14c   : > { %772 = vmatprep.mubr.bf16.mxu0 %v535_v51  ;;  %1223 = vmatprep.mubr.bf16.mxu1 %v535_v51 }
 0x14d   : > { %773 = vmatmul.mubr.bf16.vlgmr.msra.gmra.mxu0 %v3848_v59  ;;  %1224 = vmatmul.mubr.bf16.vlgmr.msra.gmra.mxu1 %v3848_v59 }
 0x14e   : > { %1243 = vmatpush1.bf16.msra.mxu0 %v3359_v58  ;;  %1233 = vmatprep.mubr.bf16.mxu1 %v3854_v18 }
 0x14f   : > { %1274 = vmatprep.mubr.bf16.mxu0 %v535_v51  ;;  %1244 = vmatprep.subr.bf16.mxu0 %v3364_v16 }
 0x152   : > { %1245 = vmatpush1.bf16.msra.mxu0 %v3362_v19  ;;  %v1327_v19 = vunpack.c.0.s8 %v1326_v15 }
 0x153   : > { %1246 = vmatprep.subr.bf16.mxu0 %v3367_v20 }
 0x155   : > { %1234 = vmatmul.mubr.bf16.gmra.mxu1 %v783_v23 }
 0x156   : > { %1247 = vmatpush1.bf16.msra.mxu0 %v3365_v22  ;;  %3231 = vmatprep.mubr.msk.bf16.mxu1 %vm3490_vm0, %v3489_v57 }
 0x157   : > { %1248 = vmatprep.subr.bf16.mxu0 %v3370_v24 }
 0x15a   : > { %1249 = vmatpush1.bf16.msra.mxu0 %v3368_v25 }
 0x15b   : > { %1250 = vmatprep.subr.bf16.mxu0 %v3373_v26 }
 0x15e   : > { %1251 = vmatpush1.bf16.msra.mxu0 %v3371_v27 }
 0x15f   : > { %1252 = vmatprep.subr.bf16.mxu0 %v3376_v28 }
 0x162   : > { %1253 = vmatpush1.bf16.msra.mxu0 %v3374_v29 }
 0x163   : > { %1254 = vmatprep.subr.bf16.mxu0 %v3379_v30 }
 0x166   : > { %1255 = vmatpush1.bf16.msra.mxu0 %v3377_v31 }
 0x167   : > { %1256 = vmatprep.subr.bf16.mxu0 %v3382_v32  ;;  %v3984_v32 = vsub.s32 %v1327_v19, %v3824_v44 }
 0x16a   : > { %1257 = vmatpush1.bf16.msra.mxu0 %v3380_v33 }
 0x16b   : > { %1258 = vmatprep.subr.bf16.mxu0 %v3385_v34 }
 0x16e   : > { %1259 = vmatpush2.bf16.msra.mxu0 %v3383_v35 }
 0x16f   : > { %1260 = vmatprep.subr.bf16.mxu0 %v3388_v36 }
 0x172   : > { %1261 = vmatpush2.bf16.msra.mxu0 %v3386_v37 }
 0x173   : > { %1262 = vmatprep.subr.bf16.mxu0 %v3391_v38 }
 0x176   : > { %1263 = vmatpush2.bf16.msra.mxu0 %v3389_v39 }
 0x177   : > { %1264 = vmatprep.subr.bf16.mxu0 %v3394_v40 }
 0x17a   : > { %1265 = vmatpush2.bf16.msra.mxu0 %v3392_v41 }
 0x17b   : > { %1266 = vmatprep.subr.bf16.mxu0 %v3397_v42 }
 0x17e   : > { %1267 = vmatpush2.bf16.msra.mxu0 %v3395_v43 }
 0x17f   : > { %1268 = vmatprep.subr.bf16.mxu0 %v3400_v45 }
 0x182   : > { %1269 = vmatpush2.bf16.msra.mxu0 %v3398_v46 }
 0x183   : > { %1270 = vmatprep.subr.bf16.mxu0 %v3403_v53 }
 0x186   : > { %1271 = vmatpush2.bf16.msra.mxu0 %v3401_v54 }
 0x187   : > { %1272 = vmatprep.subr.bf16.mxu0 %v3406_v55 }
 0x18a   : > { %1273 = vmatpush2.bf16.msra.mxu0 %v3404_v56 }
 0x18b   : > { %3219 = vmatprep.subr.bf16.mxu0 %v3489_v57 }
 0x18d   : > { %1275 = vmatmul.mubr.bf16.vlgmr.msra.gmra.mxu0 %v3848_v59 }
 0x18e   : > { %1284 = vmatprep.mubr.bf16.mxu0 %v3854_v18 }
 0x195   : > { %1285 = vmatmul.mubr.bf16.gmra.mxu0 %v783_v23 }
 0x196   : > { %3223 = vmatprep.mubr.msk.bf16.mxu0 %vm3490_vm0, %v3489_v57 }
 0x20d   : > { %v1225_v60 = vpop.f32.mrf.mxu1  ;;  %v774_v0 = vpop.f32.mrf.mxu0 }
 0x20e   : > { %v1226_v12 = vadd.f32 %v1225_v60, %v854_v5  ;;  %v775_v16 = vadd.f32 %v774_v0, %v573_v10 }
 0x20f   : > { %v1227_v61 = vpop.f32.mrf.mxu1  ;;  %v776_v7 = vpop.f32.mrf.mxu0 }
 0x210   : > { %v1228_v8 = vadd.f32 %v1227_v61, %v858_v1  ;;  %v777_v51 = vadd.f32 %v776_v7, %v577_v6  ;;  %v1525_v50 = vcombine.high %v1226_v12, %v3489_v57  ;;  %v1293_v25 = vcombine.high %v775_v16, %v3489_v57 }
 0x211   : > { %v1229_v62 = vpop.f32.mrf.mxu1  ;;  %v778_v18 = vpop.f32.mrf.mxu0  ;;  %v1532_v27 = vrot.slane %v1226_v12, %v3970_v17  ;;  %v3991_v35 = vrot.slane %v775_v16, %v3970_v17 }
 0x212   : > { %v1540_v58 = vcombine.high %v1228_v8, %v3489_v57  ;;  %v1308_v20 = vcombine.high %v777_v51, %v3489_v57  ;;  %v1230_v21 = vadd.f32 %v1229_v62, %v854_v5  ;;  %v1547_v23 = vrot.slane %v1228_v8, %v3970_v17 }
 0x213   : > { %v1231_v2 = vpop.f32.mrf.mxu1  ;;  %v1539_v28 = vrot.slane %v1525_v50, %v3970_v17  ;;  %v3981_v29 = vrot.slane %v777_v51, %v3970_v17  ;;  %v779_v30 = vadd.f32 %v778_v18, %v573_v10  ;;  %v780_v31 = vpop.f32.mrf.mxu0  ;;  %v3994_v39 = vrot.slane %v1293_v25, %v3970_v17 }
 0x214   : > { %v1232_v22 = vadd.f32 %v1231_v2, %v858_v1  ;;  %v1554_v24 = vrot.slane %v1540_v58, %v3970_v17  ;;  %v3987_v33 = vrot.slane %v1308_v20, %v3970_v17  ;;  %v1591_v34 = vcombine.high %v1230_v21, %v3489_v57 }
 0x215   : > { %v1235_v48 = vpop.f32.mrf.mxu1  ;;  %v1555_v36 = vcombine.low %v1532_v27, %v1547_v23  ;;  %v1556_v37 = vcombine.high %v1532_v27, %v1547_v23  ;;  %v781_v41 = vadd.f32 %v780_v31, %v577_v6  ;;  %v1323_v43 = vcombine.low %v3991_v35, %v3981_v29 }
 0x216   : > { %v1606_v26 = vcombine.high %v1232_v22, %v3489_v57  ;;  %v1571_v38 = vcombine.low %v1539_v28, %v1554_v24  ;;  %v1572_v40 = vcombine.high %v1539_v28, %v1554_v24  ;;  %v1359_v45 = vcombine.high %v779_v30, %v3489_v57 }
 0x217   : > { %v1237_v9 = vpop.f32.mrf.mxu1  ;;  %v4001_v46 = vrot.slane %v779_v30, %v3970_v17  ;;  %v1236_v53 = vadd.f32 %v1235_v48, %v854_v5  ;;  %v1339_v54 = vcombine.low %v3994_v39, %v3987_v33  ;;  %v1598_v55 = vrot.slane %v1230_v21, %v3970_v17 }
 0x218   : > { %v1620_v42 = vrot.slane %v1606_v26, %v3970_v17  ;;  %v1605_v56 = vrot.slane %v1591_v34, %v3970_v17  ;;  %v1613_v60 = vrot.slane %v1232_v22, %v3970_v17  ;;  %v4009_v61 = vrot.slane %v1555_v36, %v3984_v32 }
 0x219   : > { %v1239_v13 = vpop.f32.mrf.mxu1  ;;  %v4012_v62 = vrot.slane %v1556_v37, %v3984_v32  ;;  %v4015_v0 = vrot.slane %v1571_v38, %v3984_v32  ;;  %v1238_v2 = vadd.f32 %v1237_v9, %v858_v1  ;;  %v1586_v3 = vrot.slane %v1572_v40, %v3984_v32 }
 0x21a   : > { %v1374_v4 = vcombine.high %v781_v41, %v3489_v57  ;;  %v1637_v49 = vcombine.low %v1605_v56, %v1620_v42  ;;  %v1638_v5 = vcombine.high %v1605_v56, %v1620_v42  ;;  %v1324_v48 = vcombine.high %v3991_v35, %v3981_v29 }
 0x21b   : > { %v1240_v59 = vpop.f32.mrf.mxu1  ;;  %v4022_v6 = vrot.slane %v1323_v43, %v3984_v32  ;;  %v1373_v7 = vrot.slane %v1359_v45, %v3970_v17  ;;  %v1657_v8 = vcombine.high %v1236_v53, %v3489_v57  ;;  %v1340_v10 = vcombine.high %v3994_v39, %v3987_v33 }
 0x21c   : > { %v4029_v1 = vrot.slane %v1339_v54, %v3984_v32  ;;  %v1621_v9 = vcombine.low %v1598_v55, %v1613_v60  ;;  %v1622_v11 = vcombine.high %v1598_v55, %v1613_v60  ;;  %v1723_v12 = vcombine.low %v4009_v61, %v4012_v62 }
 0x21d   : > { %v1664_v13 = vrot.slane %v1236_v53, %v3970_v17  ;;  %v1672_v14 = vcombine.high %v1238_v2, %v3489_v57  ;;  %v1679_v15 = vrot.slane %v1238_v2, %v3970_v17  ;;  %v1739_v51 = vcombine.low %v4015_v0, %v1586_v3 }
 0x21e   : > { %v1388_v58 = vrot.slane %v1374_v4, %v3970_v17  ;;  %v1645_v59 = vrot.slane %v1637_v49, %v3984_v32  ;;  %v1652_v16 = vrot.slane %v1638_v5, %v3984_v32  ;;  %v1671_v50 = vrot.slane %v1657_v8, %v3970_v17 }
 0x21f   : > { %v1686_v18 = vrot.slane %v1672_v14, %v3970_v17  ;;  %v1687_v19 = vcombine.low %v1664_v13, %v1679_v15  ;;  %v1688_v20 = vcombine.high %v1664_v13, %v1679_v15  ;;  %v3153_v21 = vcombine.high %v4015_v0, %v1586_v3 }
 0x220   : > { %v1381_v22 = vrot.slane %v781_v41, %v3970_v17  ;;  %v1629_v23 = vrot.slane %v1621_v9, %v3984_v32  ;;  %v1636_v24 = vrot.slane %v1622_v11, %v3984_v32  ;;  %v1405_v29 = vcombine.low %v1373_v7, %v1388_v58 }
 0x221   : > { %v1695_v25 = vrot.slane %v1687_v19, %v3984_v32  ;;  %v1702_v26 = vrot.slane %v1688_v20, %v3984_v32  ;;  %v1703_v27 = vcombine.low %v1671_v50, %v1686_v18  ;;  %v1704_v28 = vcombine.high %v1671_v50, %v1686_v18 }
 0x222   : > { %v1406_v30 = vcombine.high %v1373_v7, %v1388_v58  ;;  %v1789_v31 = vcombine.low %v1645_v59, %v1652_v16  ;;  %v3155_v33 = vcombine.high %v1645_v59, %v1652_v16  ;;  %v1389_v38 = vcombine.low %v4001_v46, %v1381_v22 }
 0x223   : > { %v1711_v34 = vrot.slane %v1703_v27, %v3984_v32  ;;  %v1718_v35 = vrot.slane %v1704_v28, %v3984_v32  ;;  %v1823_v36 = vcombine.low %v1695_v25, %v1702_v26  ;;  %v3156_v37 = vcombine.high %v1695_v25, %v1702_v26 }
 0x224   : > { %v1390_v39 = vcombine.high %v4001_v46, %v1381_v22  ;;  %v1773_v40 = vcombine.low %v1629_v23, %v1636_v24  ;;  %v3154_v41 = vcombine.high %v1629_v23, %v1636_v24  ;;  %v3152_v54 = vcombine.high %v4009_v61, %v4012_v62 }
 0x225   : > { %v1830_v42 = vrot.slane %v1823_v36, %v3970_v17  ;;  %v1838_v43 = vrot.slane %v3156_v37, %v3970_v17  ;;  %v1839_v45 = vcombine.low %v1711_v34, %v1718_v35  ;;  %v3157_v53 = vcombine.high %v1711_v34, %v1718_v35 }
 0x226   : > { %v1413_v55 = vrot.slane %v1405_v29, %v3984_v32  ;;  %v1420_v56 = vrot.slane %v1406_v30, %v3984_v32  ;;  %v1796_v60 = vrot.slane %v1789_v31, %v3970_v17  ;;  %v1804_v0 = vrot.slane %v3155_v33, %v3970_v17 }
 0x227   : > { %v1846_v46 = vrot.slane %v1839_v45, %v3970_v17  ;;  %v1854_v2 = vrot.slane %v3157_v53, %v3970_v17  ;;  %v1855_v3 = vcombine.low %v1830_v42, %v1838_v43  ;;  %v1354_v4 = vrot.slane %v1340_v10, %v3984_v32 }
 0x228   : > { %v1746_v49 = vrot.slane %v1739_v51, %v3970_v17  ;;  %v1397_v5 = vrot.slane %v1389_v38, %v3984_v32  ;;  %v1404_v61 = vrot.slane %v1390_v39, %v3984_v32  ;;  %v1754_v62 = vrot.slane %v3153_v21, %v3970_v17 }
 0x229   : > { %v1780_v7 = vrot.slane %v1773_v40, %v3970_v17  ;;  %v1788_v8 = vrot.slane %v3154_v41, %v3970_v17  ;;  %v1863_v9 = vcombine.low %v1846_v46, %v1854_v2  ;;  %v1338_v11 = vrot.slane %v1324_v48, %v3984_v32 }
 0x22a   : > { %v1730_v13 = vrot.slane %v1723_v12, %v3970_v17  ;;  %v1491_v14 = vcombine.low %v1413_v55, %v1420_v56  ;;  %v3151_v15 = vcombine.high %v1413_v55, %v1420_v56  ;;  %v1738_v10 = vrot.slane %v3152_v54, %v3970_v17 }
 0x22b   : > { %v1862_v51 = vrot.slane %v1855_v3, %v3984_v32  ;;  %v1870_v58 = vrot.slane %v1863_v9, %v3984_v32  ;;  %v1813_v59 = vcombine.low %v1796_v60, %v1804_v0  ;;  %v1441_v16 = vcombine.low %v4029_v1, %v1354_v4 }
 0x22c   : > { %v3149_v50 = vcombine.high %v4029_v1, %v1354_v4  ;;  %v1475_v18 = vcombine.low %v1397_v5, %v1404_v61  ;;  %v3150_v19 = vcombine.high %v1397_v5, %v1404_v61  ;;  %v1805_v20 = vcombine.low %v1780_v7, %v1788_v8 }
 0x22d   : > { %v1871_v21 = vcombine.low %v1862_v51, %v1870_v58  ;;  %v1872_v48 = vcombine.high %v1862_v51, %v1870_v58  ;;  %v1763_v22 = vcombine.low %v1746_v49, %v1754_v62  ;;  %v1425_v12 = vcombine.low %v4022_v6, %v1338_v11 }
 0x22e   : > { %v3148_v23 = vcombine.high %v4022_v6, %v1338_v11  ;;  %v1498_v24 = vrot.slane %v1491_v14, %v3970_v17  ;;  %v1506_v25 = vrot.slane %v3151_v15, %v3970_v17  ;;  %v1755_v26 = vcombine.low %v1730_v13, %v1738_v10 }
 0x22f   : > { %v2224_v27 = vpack.c.bf16 %v1871_v21, %v1871_v21  ;;  %v2226_v28 = vpack.c.bf16 %v1872_v48, %v1872_v48  ;;  %v1820_v29 = vrot.slane %v1813_v59, %v3984_v32  ;;  %v1448_v1 = vrot.slane %v1441_v16, %v3970_v17 }
 0x230   : > { %v1456_v30 = vrot.slane %v3149_v50, %v3970_v17  ;;  %v1482_v31 = vrot.slane %v1475_v18, %v3970_v17  ;;  %v1490_v33 = vrot.slane %v3150_v19, %v3970_v17  ;;  %v1770_v6 = vrot.slane %v1763_v22, %v3984_v32 }
 0x231   : > { %3220 = vmatpush3.bf16.xpose.msra.mxu0 %v2224_v27  ;;  %3228 = vmatpush3.bf16.xpose.msra.mxu1 %v2226_v28  ;;  %v1812_v34 = vrot.slane %v1805_v20, %v3984_v32  ;;  %v1432_v35 = vrot.slane %v1425_v12, %v3970_v17  ;;  %v1440_v36 = vrot.slane %v3148_v23, %v3970_v17  ;;  %v865_v4 = vsub.s32 3, %v3824_v44 }
 0x232   : > { %v1515_v37 = vcombine.low %v1498_v24, %v1506_v25  ;;  %3221 = vmatprep.subr.bf16.mxu0 %v3489_v57  ;;  %3229 = vmatprep.subr.bf16.mxu1 %v3489_v57  ;;  %v1762_v38 = vrot.slane %v1755_v26, %v3984_v32  ;;  %v1465_v41 = vcombine.low %v1448_v1, %v1456_v30  ;;  %v861_v61 = vsub.s32 2, %v3824_v44 }
 0x233   : > { %v1821_v39 = vcombine.low %v1812_v34, %v1820_v29  ;;  %v1822_v40 = vcombine.high %v1812_v34, %v1820_v29  ;;  %v1507_v42 = vcombine.low %v1482_v31, %v1490_v33  ;;  %v1457_v53 = vcombine.low %v1432_v35, %v1440_v36 }
 0x234   : > { %v1771_v43 = vcombine.low %v1762_v38, %v1770_v6  ;;  %v1772_v45 = vcombine.high %v1762_v38, %v1770_v6  ;;  %v1522_v54 = vrot.slane %v1515_v37, %v3984_v32  ;;  %v1472_v0 = vrot.slane %v1465_v41, %v3984_v32 }
 0x235   : > { %v1514_v60 = vrot.slane %v1507_v42, %v3984_v32  ;;  %v1464_v46 = vrot.slane %v1457_v53, %v3984_v32  ;;  %v866_v9 = vrot.slane %v3957_v63, %v865_v4  ;;  %v862_v11 = vrot.slane %v3957_v63, %v861_v61 }
 0x236   : > { %v2223_v55 = vpack.c.bf16 %v1821_v39, %v1771_v43  ;;  %v2225_v56 = vpack.c.bf16 %v1822_v40, %v1772_v45 }
 0x237   : > { %v1523_v2 = vcombine.low %v1514_v60, %v1522_v54  ;;  %v1524_v3 = vcombine.high %v1514_v60, %v1522_v54  ;;  %v1473_v49 = vcombine.low %v1464_v46, %v1472_v0  ;;  %v1474_v5 = vcombine.high %v1464_v46, %v1472_v0 }
 0x239   : > { %3222 = vmatpush3.bf16.xpose.msra.mxu0 %v2223_v55  ;;  %3230 = vmatpush3.bf16.xpose.msra.mxu1 %v2225_v56  ;;  %v2221_v62 = vpack.c.bf16 %v1523_v2, %v1473_v49  ;;  %v2222_v7 = vpack.c.bf16 %v1524_v3, %v1474_v5 }
 0x23a   : > { %3235 = vmatprep.subr.bf16.mxu0 %v3489_v57  ;;  %3243 = vmatprep.subr.bf16.mxu1 %v3489_v57 }
 0x240   : > { %3224 = vmatmul.mubr.bf16.vlgmr.msra.gmra.mxu0 %v2221_v62  ;;  %3232 = vmatmul.mubr.bf16.vlgmr.msra.gmra.mxu1 %v2222_v7 }
 0x241   : > { %3239 = vmatprep.mubr.msk.bf16.mxu0 %vm3490_vm0, %v3489_v57  ;;  %3247 = vmatprep.mubr.msk.bf16.mxu1 %vm3490_vm0, %v3489_v57 }
 0x24d   : > { %v1276_v8 = vpop.f32.mrf.mxu0 }
 0x24e   : > { %v1277_v10 = vadd.f32 %v1276_v8, %v862_v11 }
 0x24f   : > { %v1278_v13 = vpop.f32.mrf.mxu0 }
 0x250   : > { %v1279_v14 = vadd.f32 %v1278_v13, %v866_v9  ;;  %v1873_v63 = vcombine.high %v1277_v10, %v3489_v57  ;;  %v1880_v1 = vrot.slane %v1277_v10, %v3970_v17 }
 0x251   : > { %v1280_v15 = vpop.f32.mrf.mxu0 }
 0x252   : > { %v1281_v44 = vadd.f32 %v1280_v15, %v862_v11  ;;  %v1888_v58 = vcombine.high %v1279_v14, %v3489_v57  ;;  %v1887_v23 = vrot.slane %v1873_v63, %v3970_v17  ;;  %v1895_v25 = vrot.slane %v1279_v14, %v3970_v17 }
 0x253   : > { %v1282_v51 = vpop.f32.mrf.mxu0 }
 0x254   : > { %v1939_v59 = vcombine.high %v1281_v44, %v3489_v57  ;;  %v1283_v16 = vadd.f32 %v1282_v51, %v866_v9  ;;  %v1902_v20 = vrot.slane %v1888_v58, %v3970_v17  ;;  %v1946_v26 = vrot.slane %v1281_v44, %v3970_v17 }
 0x255   : > { %v1286_v50 = vpop.f32.mrf.mxu0  ;;  %v1903_v36 = vcombine.low %v1880_v1, %v1895_v25  ;;  %v1904_v37 = vcombine.high %v1880_v1, %v1895_v25 }
 0x256   : > { %v1954_v18 = vcombine.high %v1283_v16, %v3489_v57  ;;  %v1953_v21 = vrot.slane %v1939_v59, %v3970_v17  ;;  %v1961_v48 = vrot.slane %v1283_v16, %v3970_v17  ;;  %v1287_v24 = vadd.f32 %v1286_v50, %v862_v11 }
 0x257   : > { %v1288_v19 = vpop.f32.mrf.mxu0  ;;  %v1919_v30 = vcombine.low %v1887_v23, %v1902_v20  ;;  %v1920_v31 = vcombine.high %v1887_v23, %v1902_v20  ;;  %v1911_v46 = vrot.slane %v1903_v36, %v3984_v32  ;;  %v1918_v2 = vrot.slane %v1904_v37, %v3984_v32 }
 0x258   : > { %v1968_v22 = vrot.slane %v1954_v18, %v3970_v17  ;;  %v1969_v33 = vcombine.low %v1946_v26, %v1961_v48  ;;  %v1970_v6 = vcombine.high %v1946_v26, %v1961_v48  ;;  %v2005_v34 = vcombine.high %v1287_v24, %v3489_v57 }
 0x259   : > { %v1290_v12 = vpop.f32.mrf.mxu0  ;;  %v1289_v35 = vadd.f32 %v1288_v19, %v866_v9  ;;  %v2012_v40 = vrot.slane %v1287_v24, %v3970_v17  ;;  %v1927_v43 = vrot.slane %v1919_v30, %v3984_v32  ;;  %v1934_v45 = vrot.slane %v1920_v31, %v3984_v32 }
 0x25a   : > { %v1985_v27 = vcombine.low %v1953_v21, %v1968_v22  ;;  %v1986_v28 = vcombine.high %v1953_v21, %v1968_v22  ;;  %v1977_v53 = vrot.slane %v1969_v33, %v3984_v32  ;;  %v1984_v54 = vrot.slane %v1970_v6, %v3984_v32 }
 0x25b   : > { %v1291_v29 = vpop.f32.mrf.mxu0  ;;  %v2020_v41 = vcombine.high %v1289_v35, %v3489_v57  ;;  %v2027_v42 = vrot.slane %v1289_v35, %v3970_v17  ;;  %v2019_v55 = vrot.slane %v2005_v34, %v3970_v17  ;;  %v2087_v7 = vcombine.low %v1927_v43, %v1934_v45 }
 0x25c   : > { %v1993_v38 = vrot.slane %v1985_v27, %v3984_v32  ;;  %v2000_v39 = vrot.slane %v1986_v28, %v3984_v32  ;;  %v3159_v8 = vcombine.high %v1927_v43, %v1934_v45  ;;  %v2121_v9 = vcombine.low %v1977_v53, %v1984_v54 }
 0x25d   : > { %v2034_v56 = vrot.slane %v2020_v41, %v3970_v17  ;;  %v2035_v60 = vcombine.low %v2012_v40, %v2027_v42  ;;  %v2036_v0 = vcombine.high %v2012_v40, %v2027_v42  ;;  %v3160_v11 = vcombine.high %v1977_v53, %v1984_v54 }
 0x25e   : > { %v2137_v3 = vcombine.low %v1993_v38, %v2000_v39  ;;  %v3161_v4 = vcombine.high %v1993_v38, %v2000_v39  ;;  %v2071_v44 = vcombine.low %v1911_v46, %v1918_v2  ;;  %v3158_v51 = vcombine.high %v1911_v46, %v1918_v2 }
 0x25f   : > { %v2043_v49 = vrot.slane %v2035_v60, %v3984_v32  ;;  %v2050_v5 = vrot.slane %v2036_v0, %v3984_v32  ;;  %v2051_v61 = vcombine.low %v2019_v55, %v2034_v56  ;;  %v2052_v62 = vcombine.high %v2019_v55, %v2034_v56 }
 0x260   : > { %v2144_v58 = vrot.slane %v2137_v3, %v3970_v17  ;;  %v2152_v59 = vrot.slane %v3161_v4, %v3970_v17  ;;  %v2094_v19 = vrot.slane %v2087_v7, %v3970_v17  ;;  %v2102_v20 = vrot.slane %v3159_v8, %v3970_v17 }
 0x261   : > { %v2059_v13 = vrot.slane %v2051_v61, %v3984_v32  ;;  %v2066_v14 = vrot.slane %v2052_v62, %v3984_v32  ;;  %v2171_v15 = vcombine.low %v2043_v49, %v2050_v5  ;;  %v3162_v10 = vcombine.high %v2043_v49, %v2050_v5 }
 0x262   : > { %v2128_v21 = vrot.slane %v2121_v9, %v3970_v17  ;;  %v2136_v48 = vrot.slane %v3160_v11, %v3970_v17  ;;  %v2078_v24 = vrot.slane %v2071_v44, %v3970_v17  ;;  %v2086_v25 = vrot.slane %v3158_v51, %v3970_v17 }
 0x263   : > { %v2178_v16 = vrot.slane %v2171_v15, %v3970_v17  ;;  %v2186_v50 = vrot.slane %v3162_v10, %v3970_v17  ;;  %v2187_v63 = vcombine.low %v2059_v13, %v2066_v14  ;;  %v3163_v18 = vcombine.high %v2059_v13, %v2066_v14 }
 0x264   : > { %v2161_v26 = vcombine.low %v2144_v58, %v2152_v59  ;;  %v2153_v28 = vcombine.low %v2128_v21, %v2136_v48  ;;  %v2111_v29 = vcombine.low %v2094_v19, %v2102_v20  ;;  %v2103_v31 = vcombine.low %v2078_v24, %v2086_v25 }
 0x265   : > { %v2194_v22 = vrot.slane %v2187_v63, %v3970_v17  ;;  %v2202_v12 = vrot.slane %v3163_v18, %v3970_v17  ;;  %v2203_v23 = vcombine.low %v2178_v16, %v2186_v50 }
 0x266   : > { %v2168_v33 = vrot.slane %v2161_v26, %v3984_v32  ;;  %v2118_v35 = vrot.slane %v2111_v29, %v3984_v32  ;;  %v2160_v36 = vrot.slane %v2153_v28, %v3984_v32  ;;  %v2110_v39 = vrot.slane %v2103_v31, %v3984_v32  ;;  %v3409_v26 = vld [vmem:[%s4319_s8 + $0x74] ss:$8 sps:$4 sm:$0xff]  }
 0x267   : > { %v2211_v27 = vcombine.low %v2194_v22, %v2202_v12  ;;  %v2210_v1 = vrot.slane %v2203_v23, %v3984_v32 }
 0x268   : > { %v2169_v40 = vcombine.low %v2160_v36, %v2168_v33  ;;  %v2170_v41 = vcombine.high %v2160_v36, %v2168_v33  ;;  %v2119_v45 = vcombine.low %v2110_v39, %v2118_v35  ;;  %v2120_v53 = vcombine.high %v2110_v39, %v2118_v35  ;;  %v3407_v39 = vld [vmem:[%s4319_s8 + $0x70] ss:$8 sps:$4 sm:$0xff]  }
 0x269   : > { %v2218_v30 = vrot.slane %v2211_v27, %v3984_v32 }
 0x26a   : > { %v2360_v54 = vpack.c.bf16 %v2169_v40, %v2119_v45  ;;  %v2362_v55 = vpack.c.bf16 %v2170_v41, %v2120_v53  ;;  %v3412_v41 = vld [vmem:[%s4319_s8 + $0x64] ss:$8 sps:$4 sm:$0xff]   ;;  %v3413_v45 = vld [vmem:[%s4319_s8 + $0x50] ss:$8 sps:$4 sm:$0xff]  }
 0x26b   : > { %v2219_v6 = vcombine.low %v2210_v1, %v2218_v30  ;;  %v2220_v34 = vcombine.high %v2210_v1, %v2218_v30  ;;  %v3418_v53 = vld [vmem:[%s4319_s8 + $0x44] ss:$8 sps:$4 sm:$0xff]  }
 0x26d   : > { %v2361_v37 = vpack.c.bf16 %v2219_v6, %v2219_v6  ;;  %v2363_v38 = vpack.c.bf16 %v2220_v34, %v2220_v34 }
 0x26f   : > { %v2369_v42 = vsel %vm2367_vm1, %v2361_v37, 0  ;;  %v2416_v43 = vsel %vm2367_vm1, %v2363_v38, 0 }
 0x270   : > { %3236 = vmatpush3.bf16.msra.mxu0 %v2369_v42  ;;  %3244 = vmatpush3.bf16.msra.mxu1 %v2416_v43  ;;  %v3410_v42 = vld [vmem:[%s4319_s8 + $0x60] ss:$8 sps:$4 sm:$0xff]   ;;  %v3415_v43 = vld [vmem:[%s4319_s8 + $0x54] ss:$8 sps:$4 sm:$0xff]  }
 0x271   : > { %3237 = vmatprep.subr.bf16.mxu0 %v3489_v57  ;;  %3245 = vmatprep.subr.bf16.mxu1 %v3489_v57 }
 0x274   : > { %3238 = vmatpush3.bf16.msra.mxu0 %v2360_v54  ;;  %3246 = vmatpush3.bf16.msra.mxu1 %v2362_v55  ;;  %v3416_v54 = vld [vmem:[%s4319_s8 + $0x40] ss:$8 sps:$4 sm:$0xff]   ;;  %v3421_v55 = vld [vmem:[%s4319_s8 + $0x34] ss:$8 sps:$4 sm:$0xff]  }
 0x275   : > { %2897 = vmatprep.subr.bf16.mxu1 %v3409_v26 }
 0x300   : > { %v2261_v56 = vpop.f32.mrf.mxu0  ;;  %v2302_v60 = vpop.f32.mrf.mxu1 }
 0x301   : > { %v2309_v0 = vmul.f32 0.088388346, %v2261_v56  ;;  %v2311_v3 = vmul.f32 0.088388346, %v2302_v60  ;;  %v3419_v56 = vld [vmem:[%s4319_s8 + $0x30] ss:$8 sps:$4 sm:$0xff]  }
 0x302   : > { %v3225_v46 = vpop.f32.mrf.mxu0  ;;  %v3233_v2 = vpop.f32.mrf.mxu1  ;;  %v3424_v60 = vld [vmem:[%s4319_s8 + $0x24] ss:$8 sps:$4 sm:$0xff]  }
 0x303   : > { %v2314_v4 = vsel %vm2313_vm2, %v2309_v0, -inf  ;;  %v2320_v9 = vsel %vm2313_vm2, %v2311_v3, -inf  ;;  %v3427_v46 = vld [vmem:[%s4319_s8 + $0x14] ss:$8 sps:$4 sm:$0xff]   ;;  %v3425_v2 = vld [vmem:[%s4319_s8 + $0x10] ss:$8 sps:$4 sm:$0xff]  }
 0x304   : > { %v2305_v49 = vpop.f32.mrf.mxu1  ;;  %2315 = vmax.xlane.f32.xlu0 %v2314_v4  ;;  %v2264_v5 = vpop.f32.mrf.mxu0  ;;  %v3428_v4 = vld [vmem:[%s4319_s8] ss:$8 sps:$4 sm:$0xff]  }
 0x305   : > { %v2310_v61 = vmul.f32 0.088388346, %v2264_v5  ;;  %v2312_v8 = vmul.f32 0.088388346, %v2305_v49  ;;  %v3433_v49 = vld [vmem:[%s4319_s8 + $0xf4] ss:$8 sps:$4 sm:$0xff]  }
 0x306   : > { %v3226_v62 = vpop.f32.mrf.mxu0  ;;  %v3234_v7 = vpop.f32.mrf.mxu1  ;;  %v3431_v5 = vld [vmem:[%s4319_s8 + $0xf0] ss:$8 sps:$4 sm:$0xff]  }
 0x307   : > { %v2317_v11 = vsel %vm2313_vm2, %v2310_v61, -inf  ;;  %v2323_v13 = vsel %vm2313_vm2, %v2312_v8, -inf  ;;  %v3434_v62 = vld [vmem:[%s4319_s8 + $0xe0] ss:$8 sps:$4 sm:$0xff]   ;;  %v3439_v7 = vld [vmem:[%s4319_s8 + $0xd4] ss:$8 sps:$4 sm:$0xff]  }
 0x308   : > { %2321 = vmax.xlane.f32.xlu0 %v2320_v9  ;;  %2318 = vmax.xlane.f32.xlu1 %v2317_v11  ;;  %v3442_v9 = vld [vmem:[%s4319_s8 + $0xc4] ss:$8 sps:$4 sm:$0xff]   ;;  %v3440_v11 = vld [vmem:[%s4319_s8 + $0xc0] ss:$8 sps:$4 sm:$0xff]  }
 0x30c   : > { %2324 = vmax.xlane.f32.xlu1 %v2323_v13  ;;  %v3445_v13 = vld [vmem:[%s4319_s8 + $0xb4] ss:$8 sps:$4 sm:$0xff]  }
 0x38d   : > { %v2316_v14 = vpop.xlane.xlu0 %2315 }
 0x38e   : > { %v2326_v15 = vsub.f32 %v2309_v0, %v2316_v14  ;;  %v3422_v0 = vld [vmem:[%s4319_s8 + $0x20] ss:$8 sps:$4 sm:$0xff]   ;;  %v3443_v14 = vld [vmem:[%s4319_s8 + $0xb0] ss:$8 sps:$4 sm:$0xff]  }
 0x390   : > { %v2330_v10 = vmul.f32 1.442695, %v2326_v15  ;;  %v3448_v15 = vld [vmem:[%s4319_s8 + $0xa4] ss:$8 sps:$4 sm:$0xff]  }
 0x391   : > { %v2322_v44 = vpop.xlane.xlu0 %2321  ;;  %v2319_v51 = vpop.xlane.xlu1 %2318 }
 0x392   : > { %3461 = vpow2.f32 %v2330_v10  ;;  %v2328_v58 = vsub.f32 %v2311_v3, %v2322_v44  ;;  %v2327_v59 = vsub.f32 %v2310_v61, %v2319_v51  ;;  %v3430_v3 = vld [vmem:[%s4319_s8 + $0x4] ss:$8 sps:$4 sm:$0xff]   ;;  %v3446_v10 = vld [vmem:[%s4319_s8 + $0xa0] ss:$8 sps:$4 sm:$0xff]   ;;  %v3449_v44 = vld [vmem:[%s4319_s8 + $0x90] ss:$8 sps:$4 sm:$0xff]  }
 0x393   : > { %v3436_v61 = vld [vmem:[%s4319_s8 + $0xe4] ss:$8 sps:$4 sm:$0xff]   ;;  %v3451_v51 = vld [vmem:[%s4319_s8 + $0x94] ss:$8 sps:$4 sm:$0xff]  }
 0x394   : > { %v2334_v16 = vmul.f32 1.442695, %v2328_v58  ;;  %v2332_v50 = vmul.f32 1.442695, %v2327_v59  ;;  %v3454_v58 = vld [vmem:[%s4319_s8 + $0x84] ss:$8 sps:$4 sm:$0xff]  }
 0x395   : > { %v2325_v63 = vpop.xlane.xlu1 %2324  ;;  %v3452_v59 = vld [vmem:[%s4319_s8 + $0x80] ss:$8 sps:$4 sm:$0xff]  }
 0x396   : > { %3463 = vpow2.f32 %v2334_v16  ;;  %v2329_v18 = vsub.f32 %v2312_v8, %v2325_v63  ;;  %v3437_v8 = vld [vmem:[%s4319_s8 + $0xd0] ss:$8 sps:$4 sm:$0xff]  }
 0x397   : > { %3465 = vpow2.f32 %v2332_v50 }
 0x398   : > { %v2336_v19 = vmul.f32 1.442695, %v2329_v18 }
 0x39a   : > { %3467 = vpow2.f32 %v2336_v19 }
 0x39f   : > { %v3462_v20 = vpop.eup %3461 }
 0x3a0   : > { %v2338_v21 = vsel %vm2313_vm2, %v3462_v20, 0.0 }
 0x3a1   : > { %2339 = vadd.xlane.f32.xlu0 %v2338_v21 }
 0x3a3   : > { %v3464_v48 = vpop.eup %3463 }
 0x3a4   : > { %v3466_v22 = vpop.eup %3465  ;;  %v2344_v12 = vsel %vm2313_vm2, %v3464_v48, 0.0 }
 0x3a5   : > { %2345 = vadd.xlane.f32.xlu0 %v2344_v12  ;;  %v2341_v23 = vsel %vm2313_vm2, %v3466_v22, 0.0 }
 0x3a6   : > { %2342 = vadd.xlane.f32.xlu1 %v2341_v23 }
 0x3a7   : > { %v3468_v24 = vpop.eup %3467 }
 0x3a8   : > { %v2347_v25 = vsel %vm2313_vm2, %v3468_v24, 0.0 }
 0x3aa   : > { %2348 = vadd.xlane.f32.xlu1 %v2347_v25 }
 0x42a   : > { %v2340_v27 = vpop.xlane.xlu0 %2339 }
 0x42b   : > { %3469 = vrcp.f32 %v2340_v27 }
 0x42e   : > { %v2346_v28 = vpop.xlane.xlu0 %2345 }
 0x42f   : > { %v2343_v29 = vpop.xlane.xlu1 %2342 }
 0x430   : > { %3471 = vrcp.f32 %v2343_v29 }
 0x431   : > { %3473 = vrcp.f32 %v2346_v28 }
 0x433   : > { %v2349_v1 = vpop.xlane.xlu1 %2348 }
 0x434   : > { %3475 = vrcp.f32 %v2349_v1 }
 0x438   : > { %v3470_v30 = vpop.eup %3469 }
 0x439   : > { %v2354_v33 = vmul.f32 %v3470_v30, %v3462_v20 }
 0x43d   : > { %v3472_v31 = vpop.eup %3471 }
 0x43e   : > { %v2355_v6 = vmul.f32 %v3472_v31, %v3466_v22  ;;  %v3474_v34 = vpop.eup %3473 }
 0x43f   : > { %v2356_v37 = vmul.f32 %v3474_v34, %v3464_v48 }
 0x440   : > { %v2358_v35 = vpack.c.bf16 %v2355_v6, %v2354_v33 }
 0x441   : > { %v3476_v36 = vpop.eup %3475 }
 0x442   : > { %v2357_v38 = vmul.f32 %v3476_v36, %v3468_v24  ;;  %3240 = vmatmul.mubr.msk.bf16.vlgmr.msra.gmra.mxu0 %vm2313_vm2, %v2358_v35 }
 0x444   : > { %v2359_v40 = vpack.c.bf16 %v2357_v38, %v2356_v37 }
 0x446   : > { %3248 = vmatmul.mubr.msk.bf16.vlgmr.msra.gmra.mxu1 %vm2313_vm2, %v2359_v40 }
 0x447   : > { %2898 = vmatpush1.bf16.msra.mxu1 %v3407_v39 }
 0x448   : > { %2899 = vmatprep.subr.bf16.mxu1 %v3412_v41 }
 0x44b   : > { %2900 = vmatpush1.bf16.msra.mxu1 %v3410_v42 }
 0x44c   : > { %2901 = vmatprep.subr.bf16.mxu1 %v3415_v43 }
 0x44f   : > { %2902 = vmatpush1.bf16.msra.mxu1 %v3413_v45 }
 0x450   : > { %2903 = vmatprep.subr.bf16.mxu1 %v3418_v53 }
 0x453   : > { %2904 = vmatpush1.bf16.msra.mxu1 %v3416_v54 }
 0x454   : > { %2905 = vmatprep.subr.bf16.mxu1 %v3421_v55 }
 0x457   : > { %2906 = vmatpush1.bf16.msra.mxu1 %v3419_v56 }
 0x458   : > { %2907 = vmatprep.subr.bf16.mxu1 %v3424_v60 }
 0x45b   : > { %2908 = vmatpush1.bf16.msra.mxu1 %v3422_v0 }
 0x45c   : > { %2909 = vmatprep.subr.bf16.mxu1 %v3427_v46 }
 0x45f   : > { %2910 = vmatpush1.bf16.msra.mxu1 %v3425_v2 }
 0x460   : > { %2911 = vmatprep.subr.bf16.mxu1 %v3430_v3 }
 0x463   : > { %2912 = vmatpush1.bf16.msra.mxu1 %v3428_v4 }
 0x464   : > { %2913 = vmatprep.subr.bf16.mxu1 %v3433_v49 }
 0x467   : > { %2914 = vmatpush2.bf16.msra.mxu1 %v3431_v5 }
 0x468   : > { %2915 = vmatprep.subr.bf16.mxu1 %v3436_v61 }
 0x46b   : > { %2916 = vmatpush2.bf16.msra.mxu1 %v3434_v62 }
 0x46c   : > { %2917 = vmatprep.subr.bf16.mxu1 %v3439_v7 }
 0x46f   : > { %2918 = vmatpush2.bf16.msra.mxu1 %v3437_v8 }
 0x470   : > { %2919 = vmatprep.subr.bf16.mxu1 %v3442_v9 }
 0x473   : > { %2920 = vmatpush2.bf16.msra.mxu1 %v3440_v11 }
 0x474   : > { %2921 = vmatprep.subr.bf16.mxu1 %v3445_v13 }
 0x477   : > { %2922 = vmatpush2.bf16.msra.mxu1 %v3443_v14 }
 0x478   : > { %2923 = vmatprep.subr.bf16.mxu1 %v3448_v15 }
 0x47b   : > { %2924 = vmatpush2.bf16.msra.mxu1 %v3446_v10 }
 0x47c   : > { %2925 = vmatprep.subr.bf16.mxu1 %v3451_v51 }
 0x47f   : > { %2926 = vmatpush2.bf16.msra.mxu1 %v3449_v44 }
 0x480   : > { %2927 = vmatprep.subr.bf16.mxu1 %v3454_v58 }
 0x483   : > { %2928 = vmatpush2.bf16.msra.mxu1 %v3452_v59 }
 0x502   : > { %v2405_v16 = vpop.f32.mrf.mxu0 }
 0x503   : > { %v2459_v63 = vcombine.high %v2405_v16, %v3489_v57  ;;  %v2466_v20 = vrot.slane %v2405_v16, %v3970_v17 }
 0x504   : > { %v3241_v50 = vpop.f32.mrf.mxu0 }
 0x505   : > { %v2473_v23 = vrot.slane %v2459_v63, %v3970_v17 }
 0x506   : > { %v2408_v18 = vpop.f32.mrf.mxu0  ;;  %v2452_v19 = vpop.f32.mrf.mxu1 }
 0x507   : > { %v2474_v21 = vcombine.high %v2452_v19, %v3489_v57  ;;  %v2481_v48 = vrot.slane %v2452_v19, %v3970_v17  ;;  %v2525_v27 = vcombine.high %v2408_v18, %v3489_v57  ;;  %v2532_v33 = vrot.slane %v2408_v18, %v3970_v17 }
 0x508   : > { %v3242_v22 = vpop.f32.mrf.mxu0  ;;  %v3249_v12 = vpop.f32.mrf.mxu1 }
 0x509   : > { %v2488_v24 = vrot.slane %v2474_v21, %v3970_v17  ;;  %v2489_v25 = vcombine.low %v2466_v20, %v2481_v48  ;;  %v2490_v26 = vcombine.high %v2466_v20, %v2481_v48  ;;  %v2539_v40 = vrot.slane %v2525_v27, %v3970_v17  ;;  %v2725_v20 = vld [vmem:[%s4320_s9] sm:$0x3]  ;;  %v3478_v27 = vld [vmem:[%s3565_s19 + $0x8] sm:$0xff] }
 0x50a   : > { %v2455_v28 = vpop.f32.mrf.mxu1  ;;  %v2730_v21 = vrot.slane %v2725_v20, %v3830_v52  ;;  %v2734_v48 = vrot.slane %v2725_v20, %v3827_v47  ;;  %v3479_v47 = vld [vmem:[%s3565_s19 + $0x10] sm:$0xff] }
 0x50b   : > { %v2497_v29 = vrot.slane %v2489_v25, %v3984_v32  ;;  %v2504_v1 = vrot.slane %v2490_v26, %v3984_v32  ;;  %v2505_v30 = vcombine.low %v2473_v23, %v2488_v24  ;;  %v2506_v31 = vcombine.high %v2473_v23, %v2488_v24  ;;  %v3477_v23 = vld [vmem:[%s3565_s19] sm:$0xff] }
 0x50c   : > { %v2540_v6 = vcombine.high %v2455_v28, %v3489_v57  ;;  %v2547_v34 = vrot.slane %v2455_v28, %v3970_v17  ;;  %v3250_v35 = vpop.f32.mrf.mxu1 }
 0x50d   : > { %v2513_v36 = vrot.slane %v2505_v30, %v3984_v32  ;;  %v2520_v37 = vrot.slane %v2506_v31, %v3984_v32  ;;  %v2591_v38 = vcombine.low %v2497_v29, %v2504_v1  ;;  %v3166_v39 = vcombine.high %v2497_v29, %v2504_v1  ;;  %v3480_v31 = vld [vmem:[%s3565_s19 + $0x18] sm:$0xff] }
 0x50e   : > { %v2554_v41 = vrot.slane %v2540_v6, %v3970_v17  ;;  %v2555_v42 = vcombine.low %v2532_v33, %v2547_v34  ;;  %v2556_v43 = vcombine.high %v2532_v33, %v2547_v34 }
 0x50f   : > { %v2607_v45 = vcombine.low %v2513_v36, %v2520_v37  ;;  %v3167_v53 = vcombine.high %v2513_v36, %v2520_v37  ;;  %v2598_v60 = vrot.slane %v2591_v38, %v3970_v17  ;;  %v2606_v0 = vrot.slane %v3166_v39, %v3970_v17 }
 0x510   : > { %v2563_v54 = vrot.slane %v2555_v42, %v3984_v32  ;;  %v2570_v57 = vrot.slane %v2556_v43, %v3984_v32  ;;  %v2571_v55 = vcombine.low %v2539_v40, %v2554_v41  ;;  %v2572_v56 = vcombine.high %v2539_v40, %v2554_v41 }
 0x511   : > { %v2614_v46 = vrot.slane %v2607_v45, %v3970_v17  ;;  %v2622_v2 = vrot.slane %v3167_v53, %v3970_v17  ;;  %v2623_v14 = vcombine.low %v2598_v60, %v2606_v0 }
 0x512   : > { %v2579_v3 = vrot.slane %v2571_v55, %v3984_v32  ;;  %v2586_v4 = vrot.slane %v2572_v56, %v3984_v32  ;;  %v2641_v49 = vcombine.low %v2563_v54, %v2570_v57  ;;  %v3168_v5 = vcombine.high %v2563_v54, %v2570_v57 }
 0x513   : > { %v2631_v61 = vcombine.low %v2614_v46, %v2622_v2  ;;  %v2630_v51 = vrot.slane %v2623_v14, %v3984_v32 }
 0x514   : > { %v2648_v62 = vrot.slane %v2641_v49, %v3970_v17  ;;  %v2656_v7 = vrot.slane %v3168_v5, %v3970_v17  ;;  %v2657_v8 = vcombine.low %v2579_v3, %v2586_v4  ;;  %v3169_v9 = vcombine.high %v2579_v3, %v2586_v4 }
 0x515   : > { %v2638_v10 = vrot.slane %v2631_v61, %v3984_v32 }
 0x516   : > { %v2664_v11 = vrot.slane %v2657_v8, %v3970_v17  ;;  %v2672_v13 = vrot.slane %v3169_v9, %v3970_v17  ;;  %v2673_v15 = vcombine.low %v2648_v62, %v2656_v7 }
 0x517   : > { %v2640_v16 = vcombine.high %v2630_v51, %v2638_v10  ;;  %v2639_v63 = vcombine.low %v2630_v51, %v2638_v10 }
 0x518   : > { %v2681_v44 = vcombine.low %v2664_v11, %v2672_v13  ;;  %v2680_v58 = vrot.slane %v2673_v15, %v3984_v32 }
 0x51a   : > { %v2688_v59 = vrot.slane %v2681_v44, %v3984_v32 }
 0x51c   : > { %v2690_v50 = vcombine.high %v2680_v58, %v2688_v59  ;;  %v2689_v18 = vcombine.low %v2680_v58, %v2688_v59 }
 0x51e   : > { %v2692_v19 = vpack.c.bf16 %v2690_v50, %v2640_v16  ;;  %v2691_v17 = vpack.c.bf16 %v2689_v18, %v2639_v63 }
 0x520   : > { %2929 = vmatprep.mubr.bf16.mxu1 %v2692_v19 }
 0x521   : > { %2930 = vmatmul.mubr.bf16.vlgmr.msra.gmra.mxu1 %v2691_v17 }
 0x5e1   : > { %v2931_v32 = vpop.f32.mrf.mxu1 }
 0x5e2   : > { %v2932_v22 = vadd.f32 %v2931_v32, %v2730_v21 }
 0x5e3   : > { %v2933_v12 = vpop.f32.mrf.mxu1 }
 0x5e4   : > { %v2940_v24 = vadd.f32 %v3477_v23, %v2932_v22  ;;  %v2934_v25 = vadd.f32 %v2933_v12, %v2734_v48 }
 0x5e5   : > { %v2935_v26 = vpop.f32.mrf.mxu1 }
 0x5e6   : > { %2944 = vst [vmem:[%s413_s22] sm:$0xff] %v2940_v24  ;;  %v2941_v28 = vadd.f32 %v3478_v27, %v2934_v25  ;;  %v2936_v52 = vadd.f32 %v2935_v26, %v2730_v21 }
 0x5e7   : > { %v2937_v29 = vpop.f32.mrf.mxu1 }
 0x5e8   : > { %2945 = vst [vmem:[%s413_s22 + $0x8] sm:$0xff] %v2941_v28  ;;  %v2942_v1 = vadd.f32 %v3479_v47, %v2936_v52  ;;  %v2938_v30 = vadd.f32 %v2937_v29, %v2734_v48 }
 0x5ea   : > { %2946 = vst [vmem:[%s413_s22 + $0x10] sm:$0xff] %v2942_v1  ;;  %v2943_v33 = vadd.f32 %v3480_v31, %v2938_v30 }
 0x5ec   : > { %2947 = vst [vmem:[%s413_s22 + $0x18] sm:$0xff] %v2943_v33 }
 0x5ed PF: > { %s20_s13 = sadd.s32 1, %s3487_s13  }
 0x5ee   : > { %p17_p4 = scmp.ge.s32.totalorder %s20_s13, 4  }
 0x5f0   :  { %19 = sbr.rel (!%p17_p4) target bundleno = 1 (0x1), region = 99 }

// kernel: ella_forward.6
= control target key start
LH: loop header
LB: loop body
LE: loop exit
PB: predicated region body
PF: predicated region fallthrough
CT: control target
= control target key end

     0   :  { %15 = vsyncpa [#allocation3], 0  ;;  %s3617_s13 = smov 0   ;;  %s4391_s0 = inlined_call_operand.vmem [shape: f32[2,16,256], index: 0, kind: input, shape index: {}]   ;;  %s4392_s1 = inlined_call_operand.vmem [shape: f32[2,8,256], index: 1, kind: input, shape index: {}]   ;;  %s4393_s2 = inlined_call_operand.vmem [shape: f32[2,1,512], index: 2, kind: input, shape index: {}]   ;;  %s4394_s3 = inlined_call_operand.vmem [shape: f32[2,1,512], index: 3, kind: input, shape index: {}]   ;;  %s4395_s4 = inlined_call_operand.vmem [shape: bf16[256,256], index: 4, kind: input, shape index: {}]   ;;  %s4396_s5 = inlined_call_operand.vmem [shape: f32[1,256], index: 5, kind: input, shape index: {}]   ;;  %s4397_s6 = inlined_call_operand.vmem [shape: bf16[256,512], index: 6, kind: input, shape index: {}]   ;;  %s4398_s7 = inlined_call_operand.vmem [shape: f32[1,512], index: 7, kind: input, shape index: {}]   ;;  %s4399_s8 = inlined_call_operand.vmem [shape: bf16[256,256], index: 8, kind: input, shape index: {}]   ;;  %s4400_s9 = inlined_call_operand.hbm [shape: f32[1,256], index: 9, kind: input, shape index: {}]   ;;  %s4401_s10 = inlined_call_operand.vmem [shape: f32[2,16,256], index: 10, kind: output, shape index: {}]  }
   0x1 LB: > { %s3064_s14 = sadd.s32 4294967295, %s3555_s13   ;;  %p3066_p0 = scmp.ge.s32.totalorder %s3555_s13, 1  ;;  %s3555_s13 = sphi %s3617_s13, %s21_s13  }
   0x2   : > { %p282_p1 = scmp.lt.s32.totalorder %s3555_s13, 3  ;;  %p3286_p3 = scmp.eq.s32.totalorder %s3064_s14, 0 }
   0x3   : > { %s3557_s16 = smov [#allocation2]  }
   0x4   : > { %p3625_p2 = pnand %p3066_p0, %p282_p1  ;;  %s310_s17 = sshll.u32 %s3557_s16, 4  ;;  %s311_s17 = int_to_ptr.vmem [resolvable:$true] %s310_s17 }
   0x5   : > { %s3530_s18 = scalar_lea.vmem %s311_s17, 32  ;;  %p3538_p10 = scmp.lt.s32.totalorder %s311_s17, %s311_s17 }
   0x6   : > { %p3282_p4 = pneg %p3625_p2  ;;  %p3531_p7 = scmp.ne.s32.totalorder %s311_s17, %s3530_s18 }
   0x7   : > { %p3539_p11 = scmp.lt.s32.totalorder %s3530_s18, %s3530_s18 }
   0x8   : > { %p3283_p5 = pnand %p3286_p3, %p3282_p4 }
   0x9   : > { %p3540_p12 = por %p3539_p11, %p3538_p10 }
   0xa   : > { %p3521_p6 = pneg %p3283_p5 }
   0xc   : > { %p3533_p8 = pnand %p3531_p7, %p3521_p6 }
   0xe   : > { %p3534_p9 = pneg %p3533_p8 }
  0x10   : > { %p3541_p13 = pnand %p3540_p12, %p3534_p9 }
  0x12   : > { %3544 = shalt.err (!%p3541_p13)
}
  0x13   : > { %3285 = dma.hbm_to_vmem [thread:$0]  (!%p3283_p5), %s4400_s9, 32, %s311_s17, [#allocation3]  }
  0x14   : > { %353 = sbr.rel (%p3625_p2) target bundleno = 1534 (0x5fe), region = 60 }
  0x19   : > { %3550 = dma.done.wait (%p3286_p3), [#allocation3], 32  }
  0x1a   : > { %3552 = vsyncadd (%p3286_p3), [#allocation3], 4294967264  ;;  %p404_p0 = scmp.lt.s32.totalorder %s3064_s14, 1  ;;  %v3301_v9 = vld [vmem:[%s4395_s4 + $0x74] ss:$8 sps:$4 sm:$0xff]   ;;  %vm3559_vm0 = vmmov 0  }
  0x1b   : > { %v3303_v10 = vld [vmem:[%s4395_s4 + $0x70] ss:$8 sps:$4 sm:$0xff]   ;;  %v3304_v11 = vld [vmem:[%s4397_s6 + $0xe4] ss:$16 sps:$4 sm:$0xff]   ;;  %753 = vmatprep.subr.bf16.mxu0 %v3301_v9  ;;  %v3309_v15 = vld [vmem:[%s4395_s4 + $0x60] ss:$8 sps:$4 sm:$0xff]  }
  0x1c   : > { %s4404_s14 = smov (!%p404_p0, %s3064_s14), 1  ;;  %v3306_v12 = vld [vmem:[%s4397_s6 + $0xe0] ss:$16 sps:$4 sm:$0xff]   ;;  %v3307_v13 = vld [vmem:[%s4395_s4 + $0x64] ss:$8 sps:$4 sm:$0xff]   ;;  %1204 = vmatprep.subr.bf16.mxu1 %v3304_v11  ;;  %754 = vmatpush1.bf16.msra.mxu0 %v3303_v10  ;;  %vm2380_vm1 = vcmask 1043456  }
  0x1d   : > { %s3231_s21 = sshll.u32 %s4404_s14, 5  ;;  %s3232_s22 = sshll.u32 %s4404_s14, 4  ;;  %v3310_v14 = vld [vmem:[%s4397_s6 + $0xc4] ss:$16 sps:$4 sm:$0xff]   ;;  %1205 = vmatpush1.bf16.msra.mxu1 %v3306_v12  ;;  %v3312_v16 = vld [vmem:[%s4397_s6 + $0xc0] ss:$16 sps:$4 sm:$0xff]   ;;  %755 = vmatprep.subr.bf16.mxu0 %v3307_v13 }
  0x1e   : > { %s3648_s25 = scalar_lea.vmem %s4391_s0, %s3231_s21  ;;  %s413_s28 = scalar_lea.vmem %s4392_s1, %s3232_s22  ;;  %1206 = vmatprep.subr.bf16.mxu1 %v3310_v14  ;;  %v3313_v17 = vld [vmem:[%s4395_s4 + $0x54] ss:$8 sps:$4 sm:$0xff]   ;;  %v3315_v19 = vld [vmem:[%s4395_s4 + $0x50] ss:$8 sps:$4 sm:$0xff]   ;;  %v3319_v21 = vld [vmem:[%s4395_s4 + $0x44] ss:$8 sps:$4 sm:$0xff]  }
  0x1f   : > { %v3654_v0 = vld [vmem:[%s3648_s25] sm:$0xff]  ;;  %v3657_v1 = vld [vmem:[%s3648_s25 + $0x8] sm:$0xff]  ;;  %v3666_v5 = vld [vmem:[%s3648_s25 + $0x10] sm:$0xff]  ;;  %s3075_s11 = sshll.u32 %s4404_s14, 2  ;;  %vm2326_vm2 = vcmask 195584   ;;  %s426_s26 = scalar_lea.vmem %s4401_s10, %s3231_s21 }
  0x20   : > { %v3659_v2 = vld [vmem:[%s413_s28] sm:$0xff]  ;;  %v435_v3 = vadd.f32 %v3657_v1, %v3654_v0  ;;  %v3663_v4 = vld [vmem:[%s413_s28 + $0x8] sm:$0xff]  ;;  %v3669_v6 = vld [vmem:[%s3648_s25 + $0x18] sm:$0xff]  ;;  %756 = vmatpush1.bf16.msra.mxu0 %v3309_v15  ;;  %s417_s16 = scalar_lea.vmem %s4393_s2, %s3075_s11  ;;  %s421_s19 = scalar_lea.vmem %s4394_s3, %s3075_s11 }
  0x21   : > { %v502_v7 = vadd.f32 %v3663_v4, %v3659_v2  ;;  %v438_v8 = vadd.f32 %v3669_v6, %v3666_v5  ;;  %v3316_v18 = vld [vmem:[%s4397_s6 + $0xa4] ss:$16 sps:$4 sm:$0xff]   ;;  %1207 = vmatpush1.bf16.msra.mxu1 %v3312_v16  ;;  %v3318_v20 = vld [vmem:[%s4397_s6 + $0xa0] ss:$16 sps:$4 sm:$0xff]   ;;  %757 = vmatprep.subr.bf16.mxu0 %v3313_v17 }
  0x22   : > { %436 = vadd.xlane.f32.xlu0 %v435_v3  ;;  %1208 = vmatprep.subr.bf16.mxu1 %v3316_v18  ;;  %v3322_v22 = vld [vmem:[%s4397_s6 + $0x84] ss:$16 sps:$4 sm:$0xff]   ;;  %v3321_v23 = vld [vmem:[%s4395_s4 + $0x40] ss:$8 sps:$4 sm:$0xff]   ;;  %v3327_v27 = vld [vmem:[%s4395_s4 + $0x30] ss:$8 sps:$4 sm:$0xff]  }
  0x23   : > { %503 = vadd.xlane.f32.xlu1 %v502_v7  ;;  %v3324_v24 = vld [vmem:[%s4397_s6 + $0x80] ss:$16 sps:$4 sm:$0xff]   ;;  %v3325_v25 = vld [vmem:[%s4395_s4 + $0x34] ss:$8 sps:$4 sm:$0xff]   ;;  %v3331_v29 = vld [vmem:[%s4395_s4 + $0x24] ss:$8 sps:$4 sm:$0xff]  }
  0x24   : > { %758 = vmatpush1.bf16.msra.mxu0 %v3315_v19  ;;  %v3328_v26 = vld [vmem:[%s4397_s6 + $0x64] ss:$16 sps:$4 sm:$0xff]   ;;  %v3330_v28 = vld [vmem:[%s4397_s6 + $0x60] ss:$16 sps:$4 sm:$0xff]  }
  0x25   : > { %1209 = vmatpush1.bf16.msra.mxu1 %v3318_v20  ;;  %759 = vmatprep.subr.bf16.mxu0 %v3319_v21  ;;  %v3334_v30 = vld [vmem:[%s4397_s6 + $0x44] ss:$16 sps:$4 sm:$0xff]   ;;  %v3333_v31 = vld [vmem:[%s4395_s4 + $0x20] ss:$8 sps:$4 sm:$0xff]   ;;  %v3339_v35 = vld [vmem:[%s4395_s4 + $0x10] ss:$8 sps:$4 sm:$0xff]  }
  0x26   : > { %439 = vadd.xlane.f32.xlu0 %v438_v8  ;;  %1210 = vmatprep.subr.bf16.mxu1 %v3322_v22  ;;  %v3336_v32 = vld [vmem:[%s4397_s6 + $0x40] ss:$16 sps:$4 sm:$0xff]   ;;  %v3337_v33 = vld [vmem:[%s4395_s4 + $0x14] ss:$8 sps:$4 sm:$0xff]   ;;  %v3343_v37 = vld [vmem:[%s4395_s4 + $0x4] ss:$8 sps:$4 sm:$0xff]  }
  0x27   : > { %v3340_v34 = vld [vmem:[%s4397_s6 + $0x24] ss:$16 sps:$4 sm:$0xff]   ;;  %v3342_v36 = vld [vmem:[%s4397_s6 + $0x20] ss:$16 sps:$4 sm:$0xff]  }
  0x28   : > { %760 = vmatpush1.bf16.msra.mxu0 %v3321_v23  ;;  %v3346_v38 = vld [vmem:[%s4397_s6 + $0x4] ss:$16 sps:$4 sm:$0xff]   ;;  %v3345_v39 = vld [vmem:[%s4395_s4] ss:$8 sps:$4 sm:$0xff]   ;;  %v3351_v43 = vld [vmem:[%s4395_s4 + $0xf0] ss:$8 sps:$4 sm:$0xff]  }
  0x29   : > { %1211 = vmatpush1.bf16.msra.mxu1 %v3324_v24  ;;  %761 = vmatprep.subr.bf16.mxu0 %v3325_v25  ;;  %v3348_v40 = vld [vmem:[%s4397_s6] ss:$16 sps:$4 sm:$0xff]   ;;  %v3349_v41 = vld [vmem:[%s4395_s4 + $0xf4] ss:$8 sps:$4 sm:$0xff]   ;;  %v3367_v10 = vld [vmem:[%s4395_s4 + $0xc4] ss:$8 sps:$4 sm:$0xff]  }
  0x2a   : > { %1212 = vmatprep.subr.bf16.mxu1 %v3328_v26  ;;  %v3352_v42 = vld [vmem:[%s4397_s6 + $0x1e4] ss:$16 sps:$4 sm:$0xff]   ;;  %v3357_v3 = vld [vmem:[%s4395_s4 + $0xe0] ss:$8 sps:$4 sm:$0xff]   ;;  %v3363_v7 = vld [vmem:[%s4395_s4 + $0xd0] ss:$8 sps:$4 sm:$0xff]  }
  0x2b   : > { %v3364_v8 = vld [vmem:[%s4397_s6 + $0x1a4] ss:$16 sps:$4 sm:$0xff]   ;;  %v3366_v9 = vld [vmem:[%s4397_s6 + $0x1a0] ss:$16 sps:$4 sm:$0xff]  }
  0x2c   : > { %762 = vmatpush1.bf16.msra.mxu0 %v3327_v27  ;;  %v3369_v11 = vld [vmem:[%s4395_s4 + $0xc0] ss:$8 sps:$4 sm:$0xff]   ;;  %v3370_v12 = vld [vmem:[%s4397_s6 + $0x184] ss:$16 sps:$4 sm:$0xff]   ;;  %v3375_v16 = vld [vmem:[%s4395_s4 + $0xb0] ss:$8 sps:$4 sm:$0xff]  }
  0x2d   : > { %1213 = vmatpush1.bf16.msra.mxu1 %v3330_v28  ;;  %763 = vmatprep.subr.bf16.mxu0 %v3331_v29  ;;  %v3372_v13 = vld [vmem:[%s4397_s6 + $0x180] ss:$16 sps:$4 sm:$0xff]   ;;  %v3373_v14 = vld [vmem:[%s4395_s4 + $0xb4] ss:$8 sps:$4 sm:$0xff]   ;;  %v3379_v18 = vld [vmem:[%s4395_s4 + $0xa4] ss:$8 sps:$4 sm:$0xff]  }
  0x2e   : > { %1214 = vmatprep.subr.bf16.mxu1 %v3334_v30  ;;  %v3376_v15 = vld [vmem:[%s4397_s6 + $0x164] ss:$16 sps:$4 sm:$0xff]   ;;  %v3378_v17 = vld [vmem:[%s4397_s6 + $0x160] ss:$16 sps:$4 sm:$0xff]   ;;  %v3399_v30 = vld [vmem:[%s4397_s6 + $0xec] ss:$16 sps:$4 sm:$0xff]  }
  0x2f   : > { %v3382_v19 = vld [vmem:[%s4397_s6 + $0x144] ss:$16 sps:$4 sm:$0xff]   ;;  %v3381_v20 = vld [vmem:[%s4395_s4 + $0xa0] ss:$8 sps:$4 sm:$0xff]   ;;  %v3387_v24 = vld [vmem:[%s4395_s4 + $0x90] ss:$8 sps:$4 sm:$0xff]  }
  0x30   : > { %764 = vmatpush1.bf16.msra.mxu0 %v3333_v31  ;;  %v3384_v21 = vld [vmem:[%s4397_s6 + $0x140] ss:$16 sps:$4 sm:$0xff]   ;;  %v3385_v22 = vld [vmem:[%s4395_s4 + $0x94] ss:$8 sps:$4 sm:$0xff]   ;;  %v3391_v26 = vld [vmem:[%s4395_s4 + $0x84] ss:$8 sps:$4 sm:$0xff]  }
  0x31   : > { %1215 = vmatpush1.bf16.msra.mxu1 %v3336_v32  ;;  %765 = vmatprep.subr.bf16.mxu0 %v3337_v33  ;;  %v3388_v23 = vld [vmem:[%s4397_s6 + $0x124] ss:$16 sps:$4 sm:$0xff]   ;;  %v3390_v25 = vld [vmem:[%s4397_s6 + $0x120] ss:$16 sps:$4 sm:$0xff]  }
  0x32   : > { %1216 = vmatprep.subr.bf16.mxu1 %v3340_v34  ;;  %v3394_v27 = vld [vmem:[%s4397_s6 + $0x104] ss:$16 sps:$4 sm:$0xff]   ;;  %v3393_v28 = vld [vmem:[%s4395_s4 + $0x80] ss:$8 sps:$4 sm:$0xff]  }
  0x33   : > { %v3396_v29 = vld [vmem:[%s4397_s6 + $0x100] ss:$16 sps:$4 sm:$0xff]  }
  0x34   : > { %766 = vmatpush1.bf16.msra.mxu0 %v3339_v35 }
  0x35   : > { %1217 = vmatpush1.bf16.msra.mxu1 %v3342_v36  ;;  %767 = vmatprep.subr.bf16.mxu0 %v3343_v37 }
  0x36   : > { %1218 = vmatprep.subr.bf16.mxu1 %v3346_v38 }
  0x38   : > { %768 = vmatpush1.bf16.msra.mxu0 %v3345_v39 }
  0x39   : > { %1219 = vmatpush1.bf16.msra.mxu1 %v3348_v40  ;;  %769 = vmatprep.subr.bf16.mxu0 %v3349_v41  ;;  %v473_v40 = vlaneseq  ;;  %v434_v41 = vld [vmem:[%s417_s16] sm:$0xf] }
  0x3a   : > { %1220 = vmatprep.subr.bf16.mxu1 %v3352_v42  ;;  %v501_v42 = vld [vmem:[%s421_s19] sm:$0xf] }
  0x3c   : > { %770 = vmatpush2.bf16.msra.mxu0 %v3351_v43  ;;  %v469_v43 = vrot.slane %v434_v41, 2 }
  0xab   : > { %v437_v44 = vpop.xlane.xlu0 %436 }
  0xac   : > { %v442_v45 = vmul.f32 0.00390625, %v437_v44  ;;  %v504_v46 = vpop.xlane.xlu1 %503  ;;  %v3907_v44 = vshrl.u32 %v473_v40, 7  ;;  %v3432_v40 = vld [vmem:[%s4397_s6 + $0x18c] ss:$16 sps:$4 sm:$0xff]  }
  0xad   : > { %v505_v47 = vmul.f32 0.00390625, %v504_v46  ;;  %v471_v46 = vadd.f32 1.0, %v469_v43  ;;  %v3433_v43 = vld [vmem:[%s4397_s6 + $0x168] ss:$16 sps:$4 sm:$0xff]  }
  0xae   : > { %v3781_v48 = vsub.f32 %v3654_v0, %v442_v45  ;;  %v3784_v49 = vsub.f32 %v3657_v1, %v442_v45  ;;  %v3354_v1 = vld [vmem:[%s4397_s6 + $0x1e0] ss:$16 sps:$4 sm:$0xff]   ;;  %v519_v45 = vrot.slane %v501_v42, 2 }
  0xaf   : > { %v3787_v50 = vsub.f32 %v3659_v2, %v505_v47  ;;  %v3790_v51 = vsub.f32 %v3663_v4, %v505_v47  ;;  %v440_v52 = vpop.xlane.xlu0 %439  ;;  %1221 = vmatpush2.bf16.msra.mxu1 %v3354_v1  ;;  %v3355_v2 = vld [vmem:[%s4395_s4 + $0xe4] ss:$8 sps:$4 sm:$0xff]   ;;  %v3910_v47 = vsub.s32 1, %v3907_v44 }
  0xb0   : > { %v443_v53 = vmul.f32 0.00390625, %v440_v52  ;;  %v448_v54 = vmul.f32 %v3781_v48, %v3781_v48  ;;  %v449_v55 = vmul.f32 %v3784_v49, %v3784_v49  ;;  %v3358_v4 = vld [vmem:[%s4397_s6 + $0x1c4] ss:$16 sps:$4 sm:$0xff]   ;;  %771 = vmatprep.subr.bf16.mxu0 %v3355_v2  ;;  %v3913_v52 = vsub.s32 0, %v3907_v44 }
  0xb1   : > { %v508_v56 = vmul.f32 %v3787_v50, %v3787_v50  ;;  %v509_v57 = vmul.f32 %v3790_v51, %v3790_v51  ;;  %772 = vmatpush2.bf16.msra.mxu0 %v3357_v3  ;;  %1222 = vmatprep.subr.bf16.mxu1 %v3358_v4  ;;  %v494_v1 = vrot.slane %v434_v41, %v3910_v47 }
  0xb2   : > { %v3801_v58 = vsub.f32 %v3666_v5, %v443_v53  ;;  %v3804_v59 = vsub.f32 %v3669_v6, %v443_v53  ;;  %v452_v60 = vadd.f32 %v449_v55, %v448_v54  ;;  %v3360_v5 = vld [vmem:[%s4397_s6 + $0x1c0] ss:$16 sps:$4 sm:$0xff]   ;;  %v3361_v6 = vld [vmem:[%s4395_s4 + $0xd4] ss:$8 sps:$4 sm:$0xff]   ;;  %v521_v53 = vadd.f32 1.0, %v519_v45 }
  0xb3   : > { %v510_v61 = vadd.f32 %v509_v57, %v508_v56  ;;  %1223 = vmatpush2.bf16.msra.mxu1 %v3360_v5  ;;  %773 = vmatprep.subr.bf16.mxu0 %v3361_v6  ;;  %v480_v56 = vrot.slane %v471_v46, %v3910_v47  ;;  %v490_v2 = vrot.slane %v434_v41, %v3913_v52  ;;  %v3430_v41 = vld [vmem:[%s4397_s6 + $0x188] ss:$16 sps:$4 sm:$0xff]   ;;  %v3438_v45 = vld [vmem:[%s4397_s6 + $0x14c] ss:$16 sps:$4 sm:$0xff]  }
  0xb4   : > { %453 = vadd.xlane.f32.xlu1 %v452_v60  ;;  %v450_v62 = vmul.f32 %v3801_v58, %v3801_v58  ;;  %v451_v63 = vmul.f32 %v3804_v59, %v3804_v59  ;;  %1224 = vmatprep.subr.bf16.mxu1 %v3364_v8  ;;  %v476_v60 = vrot.slane %v471_v46, %v3913_v52  ;;  %v3436_v46 = vld [vmem:[%s4397_s6 + $0x148] ss:$16 sps:$4 sm:$0xff]  }
  0xb5   : > { %774 = vmatpush2.bf16.msra.mxu0 %v3363_v7 }
  0xb6   : > { %v455_v0 = vadd.f32 %v451_v63, %v450_v62  ;;  %775 = vmatprep.subr.bf16.mxu0 %v3367_v10 }
  0xb7   : > { %1225 = vmatpush2.bf16.msra.mxu1 %v3366_v9 }
  0xb8   : > { %511 = vadd.xlane.f32.xlu1 %v510_v61  ;;  %456 = vadd.xlane.f32.xlu0 %v455_v0  ;;  %v530_v61 = vrot.slane %v521_v53, %v3910_v47 }
  0xb9   : > { %1226 = vmatprep.subr.bf16.mxu1 %v3370_v12  ;;  %776 = vmatpush2.bf16.msra.mxu0 %v3369_v11  ;;  %v526_v11 = vrot.slane %v521_v53, %v3913_v52  ;;  %v3441_v53 = vld [vmem:[%s4397_s6 + $0x12c] ss:$16 sps:$4 sm:$0xff]  }
  0xba   : > { %777 = vmatprep.subr.bf16.mxu0 %v3373_v14 }
  0xbb   : > { %1227 = vmatpush2.bf16.msra.mxu1 %v3372_v13 }
  0xbc   : > { %1228 = vmatprep.subr.bf16.mxu1 %v3376_v15 }
  0xbd   : > { %778 = vmatpush2.bf16.msra.mxu0 %v3375_v16  ;;  %v3402_v16 = vld [vmem:[%s4397_s6 + $0xcc] ss:$16 sps:$4 sm:$0xff]  }
  0xbe   : > { %779 = vmatprep.subr.bf16.mxu0 %v3379_v18 }
  0xbf   : > { %1229 = vmatpush2.bf16.msra.mxu1 %v3378_v17 }
  0xc0   : > { %1230 = vmatprep.subr.bf16.mxu1 %v3382_v19  ;;  %v3400_v19 = vld [vmem:[%s4397_s6 + $0xc8] ss:$16 sps:$4 sm:$0xff]  }
  0xc1   : > { %780 = vmatpush2.bf16.msra.mxu0 %v3381_v20  ;;  %v3405_v20 = vld [vmem:[%s4397_s6 + $0xac] ss:$16 sps:$4 sm:$0xff]  }
  0xc2   : > { %781 = vmatprep.subr.bf16.mxu0 %v3385_v22  ;;  %v3403_v22 = vld [vmem:[%s4397_s6 + $0xa8] ss:$16 sps:$4 sm:$0xff]  }
  0xc3   : > { %1231 = vmatpush2.bf16.msra.mxu1 %v3384_v21 }
  0xc4   : > { %1232 = vmatprep.subr.bf16.mxu1 %v3388_v23 }
  0xc5   : > { %782 = vmatpush2.bf16.msra.mxu0 %v3387_v24  ;;  %v3408_v24 = vld [vmem:[%s4397_s6 + $0x8c] ss:$16 sps:$4 sm:$0xff]  }
  0xc6   : > { %783 = vmatprep.subr.bf16.mxu0 %v3391_v26  ;;  %v3411_v26 = vld [vmem:[%s4397_s6 + $0x6c] ss:$16 sps:$4 sm:$0xff]  }
  0xc7   : > { %1233 = vmatpush2.bf16.msra.mxu1 %v3390_v25  ;;  %v3406_v25 = vld [vmem:[%s4397_s6 + $0x88] ss:$16 sps:$4 sm:$0xff]  }
  0xc8   : > { %1234 = vmatprep.subr.bf16.mxu1 %v3394_v27  ;;  %v3409_v27 = vld [vmem:[%s4397_s6 + $0x68] ss:$16 sps:$4 sm:$0xff]  }
  0xc9   : > { %784 = vmatpush2.bf16.msra.mxu0 %v3393_v28  ;;  %v3414_v28 = vld [vmem:[%s4397_s6 + $0x4c] ss:$16 sps:$4 sm:$0xff]  }
  0xca   : > { %1255 = vmatprep.subr.bf16.mxu0 %v3399_v30  ;;  %v3417_v30 = vld [vmem:[%s4397_s6 + $0x2c] ss:$16 sps:$4 sm:$0xff]  }
  0xcb   : > { %1235 = vmatpush2.bf16.msra.mxu1 %v3396_v29  ;;  %v3412_v29 = vld [vmem:[%s4397_s6 + $0x48] ss:$16 sps:$4 sm:$0xff]  }
 0x13d   : > { %v454_v31 = vpop.xlane.xlu1 %453 }
 0x13e   : > { %v458_v32 = vmul.f32 0.00390625, %v454_v31  ;;  %v3415_v31 = vld [vmem:[%s4397_s6 + $0x28] ss:$16 sps:$4 sm:$0xff]  }
 0x140   : > { %v460_v33 = vadd.f32 1e-06, %v458_v32  ;;  %v3420_v32 = vld [vmem:[%s4397_s6 + $0xc] ss:$16 sps:$4 sm:$0xff]  }
 0x141   : > { %v512_v34 = vpop.xlane.xlu1 %511  ;;  %v457_v35 = vpop.xlane.xlu0 %456 }
 0x142   : > { %3493 = vrsqrt.f32 %v460_v33  ;;  %v513_v36 = vmul.f32 0.00390625, %v512_v34  ;;  %v459_v37 = vmul.f32 0.00390625, %v457_v35  ;;  %v3418_v33 = vld [vmem:[%s4397_s6 + $0x8] ss:$16 sps:$4 sm:$0xff]   ;;  %v3423_v34 = vld [vmem:[%s4397_s6 + $0x1ec] ss:$16 sps:$4 sm:$0xff]  }
 0x143   : > { %v3421_v35 = vld [vmem:[%s4397_s6 + $0x1e8] ss:$16 sps:$4 sm:$0xff]  }
 0x144   : > { %v514_v38 = vadd.f32 1e-06, %v513_v36  ;;  %v461_v39 = vadd.f32 1e-06, %v459_v37  ;;  %v3426_v36 = vld [vmem:[%s4397_s6 + $0x1cc] ss:$16 sps:$4 sm:$0xff]  }
 0x145   : > { %v3424_v37 = vld [vmem:[%s4397_s6 + $0x1c8] ss:$16 sps:$4 sm:$0xff]  }
 0x146   : > { %3495 = vrsqrt.f32 %v514_v38  ;;  %v3429_v38 = vld [vmem:[%s4397_s6 + $0x1ac] ss:$16 sps:$4 sm:$0xff]  }
 0x147   : > { %3497 = vrsqrt.f32 %v461_v39  ;;  %v3427_v39 = vld [vmem:[%s4397_s6 + $0x1a8] ss:$16 sps:$4 sm:$0xff]  }
 0x14f   : > { %v3494_v54 = vpop.eup %3493 }
 0x150   : > { %v465_v55 = vmul.f32 %v3494_v54, %v3784_v49  ;;  %v464_v57 = vmul.f32 %v3494_v54, %v3781_v48  ;;  %v542_v48 = vrot.slane %v501_v42, %v3910_v47  ;;  %v3439_v54 = vld [vmem:[%s4397_s6 + $0x128] ss:$16 sps:$4 sm:$0xff]  }
 0x152   : > { %v484_v0 = vmul.f32 %v480_v56, %v465_v55  ;;  %v483_v5 = vmul.f32 %v476_v60, %v464_v57  ;;  %v3444_v55 = vld [vmem:[%s4397_s6 + $0x10c] ss:$16 sps:$4 sm:$0xff]   ;;  %v3558_v57 = vmov 0.0  }
 0x153   : > { %v3496_v62 = vpop.eup %3495  ;;  %3254 = vmatprep.subr.bf16.mxu1 %v3558_v57 }
 0x154   : > { %v3498_v63 = vpop.eup %3497  ;;  %v517_v3 = vmul.f32 %v3496_v62, %v3790_v51  ;;  %v498_v9 = vadd.f32 %v494_v1, %v484_v0  ;;  %v516_v10 = vmul.f32 %v3496_v62, %v3787_v50  ;;  %v497_v13 = vadd.f32 %v490_v2, %v483_v5 }
 0x155   : > { %v467_v4 = vmul.f32 %v3498_v63, %v3804_v59  ;;  %v466_v49 = vmul.f32 %v3498_v63, %v3801_v58  ;;  %v3397_v58 = vld [vmem:[%s4397_s6 + $0xe8] ss:$16 sps:$4 sm:$0xff]   ;;  %v538_v50 = vrot.slane %v501_v42, %v3913_v52  ;;  %v3435_v42 = vld [vmem:[%s4397_s6 + $0x16c] ss:$16 sps:$4 sm:$0xff]   ;;  %v4040_v63 = vld [vmem:[%s4398_s7] sm:$0xf] }
 0x156   : > { %v534_v6 = vmul.f32 %v530_v61, %v517_v3  ;;  %v533_v17 = vmul.f32 %v526_v11, %v516_v10  ;;  %v3560_v3 = vmov 1983009808   ;;  %v867_v5 = vrot.slane %v4040_v63, %v3913_v52 }
 0x157   : > { %v486_v7 = vmul.f32 %v480_v56, %v467_v4  ;;  %v485_v8 = vmul.f32 %v476_v60, %v466_v49  ;;  %v3442_v56 = vld [vmem:[%s4397_s6 + $0x108] ss:$16 sps:$4 sm:$0xff]   ;;  %v1308_v4 = vunpack.c.l.s4 %v3560_v3  ;;  %v581_v49 = vld [vmem:[%s4396_s5] sm:$0x3] }
 0x158   : > { %v546_v15 = vadd.f32 %v542_v48, %v534_v6  ;;  %v545_v21 = vadd.f32 %v538_v50, %v533_v17  ;;  %v590_v6 = vrot.slane %v581_v49, %v3910_v47  ;;  %v586_v10 = vrot.slane %v581_v49, %v3913_v52 }
 0x159   : > { %v500_v12 = vadd.f32 %v494_v1, %v486_v7  ;;  %v499_v14 = vadd.f32 %v490_v2, %v485_v8  ;;  %v871_v1 = vrot.slane %v4040_v63, %v3910_v47  ;;  %v1309_v11 = vunpack.c.0.s8 %v1308_v4 }
 0x15a   : > { %v3937_v18 = vpack.c.bf16 %v546_v15, %v546_v15  ;;  %v796_v23 = vpack.c.bf16 %v545_v21, %v545_v21 }
 0x15b   : > { %v548_v51 = vpack.c.bf16 %v500_v12, %v498_v9  ;;  %v3931_v59 = vpack.c.bf16 %v499_v14, %v497_v13  ;;  %v3561_v14 = vmov 1934713408   ;;  %v4053_v17 = vsub.s32 %v1309_v11, %v3907_v44 }
 0x15c   : > { %v1339_v15 = vunpack.c.l.s4 %v3561_v14 }
 0x15d   : > { %785 = vmatprep.mubr.bf16.mxu0 %v548_v51  ;;  %1236 = vmatprep.mubr.bf16.mxu1 %v548_v51 }
 0x15e   : > { %786 = vmatmul.mubr.bf16.vlgmr.msra.gmra.mxu0 %v3931_v59  ;;  %1237 = vmatmul.mubr.bf16.vlgmr.msra.gmra.mxu1 %v3931_v59 }
 0x15f   : > { %1256 = vmatpush1.bf16.msra.mxu0 %v3397_v58  ;;  %1246 = vmatprep.mubr.bf16.mxu1 %v3937_v18 }
 0x160   : > { %1287 = vmatprep.mubr.bf16.mxu0 %v548_v51  ;;  %1257 = vmatprep.subr.bf16.mxu0 %v3402_v16 }
 0x163   : > { %1258 = vmatpush1.bf16.msra.mxu0 %v3400_v19  ;;  %v1340_v19 = vunpack.c.0.s8 %v1339_v15 }
 0x164   : > { %1259 = vmatprep.subr.bf16.mxu0 %v3405_v20 }
 0x166   : > { %1247 = vmatmul.mubr.bf16.gmra.mxu1 %v796_v23 }
 0x167   : > { %1260 = vmatpush1.bf16.msra.mxu0 %v3403_v22  ;;  %3258 = vmatprep.mubr.msk.bf16.mxu1 %vm3559_vm0, %v3558_v57 }
 0x168   : > { %1261 = vmatprep.subr.bf16.mxu0 %v3408_v24 }
 0x16b   : > { %1262 = vmatpush1.bf16.msra.mxu0 %v3406_v25 }
 0x16c   : > { %1263 = vmatprep.subr.bf16.mxu0 %v3411_v26 }
 0x16f   : > { %1264 = vmatpush1.bf16.msra.mxu0 %v3409_v27 }
 0x170   : > { %1265 = vmatprep.subr.bf16.mxu0 %v3414_v28 }
 0x173   : > { %1266 = vmatpush1.bf16.msra.mxu0 %v3412_v29 }
 0x174   : > { %1267 = vmatprep.subr.bf16.mxu0 %v3417_v30 }
 0x177   : > { %1268 = vmatpush1.bf16.msra.mxu0 %v3415_v31 }
 0x178   : > { %1269 = vmatprep.subr.bf16.mxu0 %v3420_v32  ;;  %v4067_v32 = vsub.s32 %v1340_v19, %v3907_v44 }
 0x17b   : > { %1270 = vmatpush1.bf16.msra.mxu0 %v3418_v33 }
 0x17c   : > { %1271 = vmatprep.subr.bf16.mxu0 %v3423_v34 }
 0x17f   : > { %1272 = vmatpush2.bf16.msra.mxu0 %v3421_v35 }
 0x180   : > { %1273 = vmatprep.subr.bf16.mxu0 %v3426_v36 }
 0x183   : > { %1274 = vmatpush2.bf16.msra.mxu0 %v3424_v37 }
 0x184   : > { %1275 = vmatprep.subr.bf16.mxu0 %v3429_v38 }
 0x187   : > { %1276 = vmatpush2.bf16.msra.mxu0 %v3427_v39 }
 0x188   : > { %1277 = vmatprep.subr.bf16.mxu0 %v3432_v40 }
 0x18b   : > { %1278 = vmatpush2.bf16.msra.mxu0 %v3430_v41 }
 0x18c   : > { %1279 = vmatprep.subr.bf16.mxu0 %v3435_v42 }
 0x18f   : > { %1280 = vmatpush2.bf16.msra.mxu0 %v3433_v43 }
 0x190   : > { %1281 = vmatprep.subr.bf16.mxu0 %v3438_v45 }
 0x193   : > { %1282 = vmatpush2.bf16.msra.mxu0 %v3436_v46 }
 0x194   : > { %1283 = vmatprep.subr.bf16.mxu0 %v3441_v53 }
 0x197   : > { %1284 = vmatpush2.bf16.msra.mxu0 %v3439_v54 }
 0x198   : > { %1285 = vmatprep.subr.bf16.mxu0 %v3444_v55 }
 0x19b   : > { %1286 = vmatpush2.bf16.msra.mxu0 %v3442_v56 }
 0x19c   : > { %3246 = vmatprep.subr.bf16.mxu0 %v3558_v57 }
 0x19e   : > { %1288 = vmatmul.mubr.bf16.vlgmr.msra.gmra.mxu0 %v3931_v59 }
 0x19f   : > { %1297 = vmatprep.mubr.bf16.mxu0 %v3937_v18 }
 0x1a6   : > { %1298 = vmatmul.mubr.bf16.gmra.mxu0 %v796_v23 }
 0x1a7   : > { %3250 = vmatprep.mubr.msk.bf16.mxu0 %vm3559_vm0, %v3558_v57 }
 0x21e   : > { %v1238_v60 = vpop.f32.mrf.mxu1  ;;  %v787_v0 = vpop.f32.mrf.mxu0 }
 0x21f   : > { %v1239_v12 = vadd.f32 %v1238_v60, %v867_v5  ;;  %v788_v16 = vadd.f32 %v787_v0, %v586_v10 }
 0x220   : > { %v1240_v61 = vpop.f32.mrf.mxu1  ;;  %v789_v7 = vpop.f32.mrf.mxu0 }
 0x221   : > { %v1241_v8 = vadd.f32 %v1240_v61, %v871_v1  ;;  %v790_v51 = vadd.f32 %v789_v7, %v590_v6  ;;  %v1538_v50 = vcombine.high %v1239_v12, %v3558_v57  ;;  %v1306_v25 = vcombine.high %v788_v16, %v3558_v57 }
 0x222   : > { %v1242_v62 = vpop.f32.mrf.mxu1  ;;  %v791_v18 = vpop.f32.mrf.mxu0  ;;  %v1545_v27 = vrot.slane %v1239_v12, %v4053_v17  ;;  %v4074_v35 = vrot.slane %v788_v16, %v4053_v17 }
 0x223   : > { %v1553_v58 = vcombine.high %v1241_v8, %v3558_v57  ;;  %v1321_v20 = vcombine.high %v790_v51, %v3558_v57  ;;  %v1243_v21 = vadd.f32 %v1242_v62, %v867_v5  ;;  %v1560_v23 = vrot.slane %v1241_v8, %v4053_v17 }
 0x224   : > { %v1244_v2 = vpop.f32.mrf.mxu1  ;;  %v1552_v28 = vrot.slane %v1538_v50, %v4053_v17  ;;  %v4064_v29 = vrot.slane %v790_v51, %v4053_v17  ;;  %v792_v30 = vadd.f32 %v791_v18, %v586_v10  ;;  %v793_v31 = vpop.f32.mrf.mxu0  ;;  %v4077_v39 = vrot.slane %v1306_v25, %v4053_v17 }
 0x225   : > { %v1245_v22 = vadd.f32 %v1244_v2, %v871_v1  ;;  %v1567_v24 = vrot.slane %v1553_v58, %v4053_v17  ;;  %v4070_v33 = vrot.slane %v1321_v20, %v4053_v17  ;;  %v1604_v34 = vcombine.high %v1243_v21, %v3558_v57 }
 0x226   : > { %v1248_v48 = vpop.f32.mrf.mxu1  ;;  %v1568_v36 = vcombine.low %v1545_v27, %v1560_v23  ;;  %v1569_v37 = vcombine.high %v1545_v27, %v1560_v23  ;;  %v794_v41 = vadd.f32 %v793_v31, %v590_v6  ;;  %v1336_v43 = vcombine.low %v4074_v35, %v4064_v29 }
 0x227   : > { %v1619_v26 = vcombine.high %v1245_v22, %v3558_v57  ;;  %v1584_v38 = vcombine.low %v1552_v28, %v1567_v24  ;;  %v1585_v40 = vcombine.high %v1552_v28, %v1567_v24  ;;  %v1372_v45 = vcombine.high %v792_v30, %v3558_v57 }
 0x228   : > { %v1250_v9 = vpop.f32.mrf.mxu1  ;;  %v4084_v46 = vrot.slane %v792_v30, %v4053_v17  ;;  %v1249_v53 = vadd.f32 %v1248_v48, %v867_v5  ;;  %v1352_v54 = vcombine.low %v4077_v39, %v4070_v33  ;;  %v1611_v55 = vrot.slane %v1243_v21, %v4053_v17 }
 0x229   : > { %v1633_v42 = vrot.slane %v1619_v26, %v4053_v17  ;;  %v1618_v56 = vrot.slane %v1604_v34, %v4053_v17  ;;  %v1626_v60 = vrot.slane %v1245_v22, %v4053_v17  ;;  %v4092_v61 = vrot.slane %v1568_v36, %v4067_v32 }
 0x22a   : > { %v1252_v13 = vpop.f32.mrf.mxu1  ;;  %v4095_v62 = vrot.slane %v1569_v37, %v4067_v32  ;;  %v4098_v0 = vrot.slane %v1584_v38, %v4067_v32  ;;  %v1251_v2 = vadd.f32 %v1250_v9, %v871_v1  ;;  %v1599_v3 = vrot.slane %v1585_v40, %v4067_v32 }
 0x22b   : > { %v1387_v4 = vcombine.high %v794_v41, %v3558_v57  ;;  %v1650_v49 = vcombine.low %v1618_v56, %v1633_v42  ;;  %v1651_v5 = vcombine.high %v1618_v56, %v1633_v42  ;;  %v1337_v48 = vcombine.high %v4074_v35, %v4064_v29 }
 0x22c   : > { %v1253_v59 = vpop.f32.mrf.mxu1  ;;  %v4105_v6 = vrot.slane %v1336_v43, %v4067_v32  ;;  %v1386_v7 = vrot.slane %v1372_v45, %v4053_v17  ;;  %v1670_v8 = vcombine.high %v1249_v53, %v3558_v57  ;;  %v1353_v10 = vcombine.high %v4077_v39, %v4070_v33 }
 0x22d   : > { %v4112_v1 = vrot.slane %v1352_v54, %v4067_v32  ;;  %v1634_v9 = vcombine.low %v1611_v55, %v1626_v60  ;;  %v1635_v11 = vcombine.high %v1611_v55, %v1626_v60  ;;  %v1736_v12 = vcombine.low %v4092_v61, %v4095_v62 }
 0x22e   : > { %v1677_v13 = vrot.slane %v1249_v53, %v4053_v17  ;;  %v1685_v14 = vcombine.high %v1251_v2, %v3558_v57  ;;  %v1692_v15 = vrot.slane %v1251_v2, %v4053_v17  ;;  %v1752_v51 = vcombine.low %v4098_v0, %v1599_v3 }
 0x22f   : > { %v1401_v58 = vrot.slane %v1387_v4, %v4053_v17  ;;  %v1658_v59 = vrot.slane %v1650_v49, %v4067_v32  ;;  %v1665_v16 = vrot.slane %v1651_v5, %v4067_v32  ;;  %v1684_v50 = vrot.slane %v1670_v8, %v4053_v17 }
 0x230   : > { %v1699_v18 = vrot.slane %v1685_v14, %v4053_v17  ;;  %v1700_v19 = vcombine.low %v1677_v13, %v1692_v15  ;;  %v1701_v20 = vcombine.high %v1677_v13, %v1692_v15  ;;  %v3180_v21 = vcombine.high %v4098_v0, %v1599_v3 }
 0x231   : > { %v1394_v22 = vrot.slane %v794_v41, %v4053_v17  ;;  %v1642_v23 = vrot.slane %v1634_v9, %v4067_v32  ;;  %v1649_v24 = vrot.slane %v1635_v11, %v4067_v32  ;;  %v1418_v29 = vcombine.low %v1386_v7, %v1401_v58 }
 0x232   : > { %v1708_v25 = vrot.slane %v1700_v19, %v4067_v32  ;;  %v1715_v26 = vrot.slane %v1701_v20, %v4067_v32  ;;  %v1716_v27 = vcombine.low %v1684_v50, %v1699_v18  ;;  %v1717_v28 = vcombine.high %v1684_v50, %v1699_v18 }
 0x233   : > { %v1419_v30 = vcombine.high %v1386_v7, %v1401_v58  ;;  %v1802_v31 = vcombine.low %v1658_v59, %v1665_v16  ;;  %v3182_v33 = vcombine.high %v1658_v59, %v1665_v16  ;;  %v1402_v38 = vcombine.low %v4084_v46, %v1394_v22 }
 0x234   : > { %v1724_v34 = vrot.slane %v1716_v27, %v4067_v32  ;;  %v1731_v35 = vrot.slane %v1717_v28, %v4067_v32  ;;  %v1836_v36 = vcombine.low %v1708_v25, %v1715_v26  ;;  %v3183_v37 = vcombine.high %v1708_v25, %v1715_v26 }
 0x235   : > { %v1403_v39 = vcombine.high %v4084_v46, %v1394_v22  ;;  %v1786_v40 = vcombine.low %v1642_v23, %v1649_v24  ;;  %v3181_v41 = vcombine.high %v1642_v23, %v1649_v24  ;;  %v3179_v54 = vcombine.high %v4092_v61, %v4095_v62 }
 0x236   : > { %v1843_v42 = vrot.slane %v1836_v36, %v4053_v17  ;;  %v1851_v43 = vrot.slane %v3183_v37, %v4053_v17  ;;  %v1852_v45 = vcombine.low %v1724_v34, %v1731_v35  ;;  %v3184_v53 = vcombine.high %v1724_v34, %v1731_v35 }
 0x237   : > { %v1426_v55 = vrot.slane %v1418_v29, %v4067_v32  ;;  %v1433_v56 = vrot.slane %v1419_v30, %v4067_v32  ;;  %v1809_v60 = vrot.slane %v1802_v31, %v4053_v17  ;;  %v1817_v0 = vrot.slane %v3182_v33, %v4053_v17 }
 0x238   : > { %v1859_v46 = vrot.slane %v1852_v45, %v4053_v17  ;;  %v1867_v2 = vrot.slane %v3184_v53, %v4053_v17  ;;  %v1868_v3 = vcombine.low %v1843_v42, %v1851_v43  ;;  %v1367_v4 = vrot.slane %v1353_v10, %v4067_v32 }
 0x239   : > { %v1759_v49 = vrot.slane %v1752_v51, %v4053_v17  ;;  %v1410_v5 = vrot.slane %v1402_v38, %v4067_v32  ;;  %v1417_v61 = vrot.slane %v1403_v39, %v4067_v32  ;;  %v1767_v62 = vrot.slane %v3180_v21, %v4053_v17 }
 0x23a   : > { %v1793_v7 = vrot.slane %v1786_v40, %v4053_v17  ;;  %v1801_v8 = vrot.slane %v3181_v41, %v4053_v17  ;;  %v1876_v9 = vcombine.low %v1859_v46, %v1867_v2  ;;  %v1351_v11 = vrot.slane %v1337_v48, %v4067_v32 }
 0x23b   : > { %v1743_v13 = vrot.slane %v1736_v12, %v4053_v17  ;;  %v1504_v14 = vcombine.low %v1426_v55, %v1433_v56  ;;  %v3178_v15 = vcombine.high %v1426_v55, %v1433_v56  ;;  %v1751_v10 = vrot.slane %v3179_v54, %v4053_v17 }
 0x23c   : > { %v1875_v51 = vrot.slane %v1868_v3, %v4067_v32  ;;  %v1883_v58 = vrot.slane %v1876_v9, %v4067_v32  ;;  %v1826_v59 = vcombine.low %v1809_v60, %v1817_v0  ;;  %v1454_v16 = vcombine.low %v4112_v1, %v1367_v4 }
 0x23d   : > { %v3176_v50 = vcombine.high %v4112_v1, %v1367_v4  ;;  %v1488_v18 = vcombine.low %v1410_v5, %v1417_v61  ;;  %v3177_v19 = vcombine.high %v1410_v5, %v1417_v61  ;;  %v1818_v20 = vcombine.low %v1793_v7, %v1801_v8 }
 0x23e   : > { %v1884_v21 = vcombine.low %v1875_v51, %v1883_v58  ;;  %v1885_v48 = vcombine.high %v1875_v51, %v1883_v58  ;;  %v1776_v22 = vcombine.low %v1759_v49, %v1767_v62  ;;  %v1438_v12 = vcombine.low %v4105_v6, %v1351_v11 }
 0x23f   : > { %v3175_v23 = vcombine.high %v4105_v6, %v1351_v11  ;;  %v1511_v24 = vrot.slane %v1504_v14, %v4053_v17  ;;  %v1519_v25 = vrot.slane %v3178_v15, %v4053_v17  ;;  %v1768_v26 = vcombine.low %v1743_v13, %v1751_v10 }
 0x240   : > { %v2237_v27 = vpack.c.bf16 %v1884_v21, %v1884_v21  ;;  %v2239_v28 = vpack.c.bf16 %v1885_v48, %v1885_v48  ;;  %v1833_v29 = vrot.slane %v1826_v59, %v4067_v32  ;;  %v1461_v1 = vrot.slane %v1454_v16, %v4053_v17 }
 0x241   : > { %v1469_v30 = vrot.slane %v3176_v50, %v4053_v17  ;;  %v1495_v31 = vrot.slane %v1488_v18, %v4053_v17  ;;  %v1503_v33 = vrot.slane %v3177_v19, %v4053_v17  ;;  %v1783_v6 = vrot.slane %v1776_v22, %v4067_v32 }
 0x242   : > { %3247 = vmatpush3.bf16.xpose.msra.mxu0 %v2237_v27  ;;  %3255 = vmatpush3.bf16.xpose.msra.mxu1 %v2239_v28  ;;  %v1825_v34 = vrot.slane %v1818_v20, %v4067_v32  ;;  %v1445_v35 = vrot.slane %v1438_v12, %v4053_v17  ;;  %v1453_v36 = vrot.slane %v3175_v23, %v4053_v17  ;;  %v878_v4 = vsub.s32 3, %v3907_v44 }
 0x243   : > { %v1528_v37 = vcombine.low %v1511_v24, %v1519_v25  ;;  %3248 = vmatprep.subr.bf16.mxu0 %v3558_v57  ;;  %3256 = vmatprep.subr.bf16.mxu1 %v3558_v57  ;;  %v1775_v38 = vrot.slane %v1768_v26, %v4067_v32  ;;  %v1478_v41 = vcombine.low %v1461_v1, %v1469_v30  ;;  %v874_v61 = vsub.s32 2, %v3907_v44 }
 0x244   : > { %v1834_v39 = vcombine.low %v1825_v34, %v1833_v29  ;;  %v1835_v40 = vcombine.high %v1825_v34, %v1833_v29  ;;  %v1520_v42 = vcombine.low %v1495_v31, %v1503_v33  ;;  %v1470_v53 = vcombine.low %v1445_v35, %v1453_v36 }
 0x245   : > { %v1784_v43 = vcombine.low %v1775_v38, %v1783_v6  ;;  %v1785_v45 = vcombine.high %v1775_v38, %v1783_v6  ;;  %v1535_v54 = vrot.slane %v1528_v37, %v4067_v32  ;;  %v1485_v0 = vrot.slane %v1478_v41, %v4067_v32 }
 0x246   : > { %v1527_v60 = vrot.slane %v1520_v42, %v4067_v32  ;;  %v1477_v46 = vrot.slane %v1470_v53, %v4067_v32  ;;  %v879_v9 = vrot.slane %v4040_v63, %v878_v4  ;;  %v875_v11 = vrot.slane %v4040_v63, %v874_v61 }
 0x247   : > { %v2236_v55 = vpack.c.bf16 %v1834_v39, %v1784_v43  ;;  %v2238_v56 = vpack.c.bf16 %v1835_v40, %v1785_v45 }
 0x248   : > { %v1536_v2 = vcombine.low %v1527_v60, %v1535_v54  ;;  %v1537_v3 = vcombine.high %v1527_v60, %v1535_v54  ;;  %v1486_v49 = vcombine.low %v1477_v46, %v1485_v0  ;;  %v1487_v5 = vcombine.high %v1477_v46, %v1485_v0 }
 0x24a   : > { %3249 = vmatpush3.bf16.xpose.msra.mxu0 %v2236_v55  ;;  %3257 = vmatpush3.bf16.xpose.msra.mxu1 %v2238_v56  ;;  %v2234_v62 = vpack.c.bf16 %v1536_v2, %v1486_v49  ;;  %v2235_v7 = vpack.c.bf16 %v1537_v3, %v1487_v5 }
 0x24b   : > { %3262 = vmatprep.subr.bf16.mxu0 %v3558_v57  ;;  %3270 = vmatprep.subr.bf16.mxu1 %v3558_v57 }
 0x251   : > { %3251 = vmatmul.mubr.bf16.vlgmr.msra.gmra.mxu0 %v2234_v62  ;;  %3259 = vmatmul.mubr.bf16.vlgmr.msra.gmra.mxu1 %v2235_v7 }
 0x252   : > { %3266 = vmatprep.mubr.msk.bf16.mxu0 %vm3559_vm0, %v3558_v57  ;;  %3274 = vmatprep.mubr.msk.bf16.mxu1 %vm3559_vm0, %v3558_v57 }
 0x25e   : > { %v1289_v8 = vpop.f32.mrf.mxu0 }
 0x25f   : > { %v1290_v10 = vadd.f32 %v1289_v8, %v875_v11 }
 0x260   : > { %v1291_v13 = vpop.f32.mrf.mxu0 }
 0x261   : > { %v1292_v14 = vadd.f32 %v1291_v13, %v879_v9  ;;  %v1886_v63 = vcombine.high %v1290_v10, %v3558_v57  ;;  %v1893_v1 = vrot.slane %v1290_v10, %v4053_v17 }
 0x262   : > { %v1293_v15 = vpop.f32.mrf.mxu0 }
 0x263   : > { %v1294_v44 = vadd.f32 %v1293_v15, %v875_v11  ;;  %v1901_v58 = vcombine.high %v1292_v14, %v3558_v57  ;;  %v1900_v23 = vrot.slane %v1886_v63, %v4053_v17  ;;  %v1908_v25 = vrot.slane %v1292_v14, %v4053_v17 }
 0x264   : > { %v1295_v51 = vpop.f32.mrf.mxu0 }
 0x265   : > { %v1952_v59 = vcombine.high %v1294_v44, %v3558_v57  ;;  %v1296_v16 = vadd.f32 %v1295_v51, %v879_v9  ;;  %v1915_v20 = vrot.slane %v1901_v58, %v4053_v17  ;;  %v1959_v26 = vrot.slane %v1294_v44, %v4053_v17 }
 0x266   : > { %v1299_v50 = vpop.f32.mrf.mxu0  ;;  %v1916_v36 = vcombine.low %v1893_v1, %v1908_v25  ;;  %v1917_v37 = vcombine.high %v1893_v1, %v1908_v25 }
 0x267   : > { %v1967_v18 = vcombine.high %v1296_v16, %v3558_v57  ;;  %v1966_v21 = vrot.slane %v1952_v59, %v4053_v17  ;;  %v1974_v48 = vrot.slane %v1296_v16, %v4053_v17  ;;  %v1300_v24 = vadd.f32 %v1299_v50, %v875_v11 }
 0x268   : > { %v1301_v19 = vpop.f32.mrf.mxu0  ;;  %v1932_v30 = vcombine.low %v1900_v23, %v1915_v20  ;;  %v1933_v31 = vcombine.high %v1900_v23, %v1915_v20  ;;  %v1924_v46 = vrot.slane %v1916_v36, %v4067_v32  ;;  %v1931_v2 = vrot.slane %v1917_v37, %v4067_v32 }
 0x269   : > { %v1981_v22 = vrot.slane %v1967_v18, %v4053_v17  ;;  %v1982_v33 = vcombine.low %v1959_v26, %v1974_v48  ;;  %v1983_v6 = vcombine.high %v1959_v26, %v1974_v48  ;;  %v2018_v34 = vcombine.high %v1300_v24, %v3558_v57 }
 0x26a   : > { %v1303_v12 = vpop.f32.mrf.mxu0  ;;  %v1302_v35 = vadd.f32 %v1301_v19, %v879_v9  ;;  %v2025_v40 = vrot.slane %v1300_v24, %v4053_v17  ;;  %v1940_v43 = vrot.slane %v1932_v30, %v4067_v32  ;;  %v1947_v45 = vrot.slane %v1933_v31, %v4067_v32 }
 0x26b   : > { %v1998_v27 = vcombine.low %v1966_v21, %v1981_v22  ;;  %v1999_v28 = vcombine.high %v1966_v21, %v1981_v22  ;;  %v1990_v53 = vrot.slane %v1982_v33, %v4067_v32  ;;  %v1997_v54 = vrot.slane %v1983_v6, %v4067_v32 }
 0x26c   : > { %v1304_v29 = vpop.f32.mrf.mxu0  ;;  %v2033_v41 = vcombine.high %v1302_v35, %v3558_v57  ;;  %v2040_v42 = vrot.slane %v1302_v35, %v4053_v17  ;;  %v2032_v55 = vrot.slane %v2018_v34, %v4053_v17  ;;  %v2100_v7 = vcombine.low %v1940_v43, %v1947_v45 }
 0x26d   : > { %v2006_v38 = vrot.slane %v1998_v27, %v4067_v32  ;;  %v2013_v39 = vrot.slane %v1999_v28, %v4067_v32  ;;  %v3186_v8 = vcombine.high %v1940_v43, %v1947_v45  ;;  %v2134_v9 = vcombine.low %v1990_v53, %v1997_v54 }
 0x26e   : > { %v2047_v56 = vrot.slane %v2033_v41, %v4053_v17  ;;  %v2048_v60 = vcombine.low %v2025_v40, %v2040_v42  ;;  %v2049_v0 = vcombine.high %v2025_v40, %v2040_v42  ;;  %v3187_v11 = vcombine.high %v1990_v53, %v1997_v54 }
 0x26f   : > { %v2150_v3 = vcombine.low %v2006_v38, %v2013_v39  ;;  %v3188_v4 = vcombine.high %v2006_v38, %v2013_v39  ;;  %v2084_v44 = vcombine.low %v1924_v46, %v1931_v2  ;;  %v3185_v51 = vcombine.high %v1924_v46, %v1931_v2 }
 0x270   : > { %v2056_v49 = vrot.slane %v2048_v60, %v4067_v32  ;;  %v2063_v5 = vrot.slane %v2049_v0, %v4067_v32  ;;  %v2064_v61 = vcombine.low %v2032_v55, %v2047_v56  ;;  %v2065_v62 = vcombine.high %v2032_v55, %v2047_v56 }
 0x271   : > { %v2157_v58 = vrot.slane %v2150_v3, %v4053_v17  ;;  %v2165_v59 = vrot.slane %v3188_v4, %v4053_v17  ;;  %v2107_v19 = vrot.slane %v2100_v7, %v4053_v17  ;;  %v2115_v20 = vrot.slane %v3186_v8, %v4053_v17 }
 0x272   : > { %v2072_v13 = vrot.slane %v2064_v61, %v4067_v32  ;;  %v2079_v14 = vrot.slane %v2065_v62, %v4067_v32  ;;  %v2184_v15 = vcombine.low %v2056_v49, %v2063_v5  ;;  %v3189_v10 = vcombine.high %v2056_v49, %v2063_v5 }
 0x273   : > { %v2141_v21 = vrot.slane %v2134_v9, %v4053_v17  ;;  %v2149_v48 = vrot.slane %v3187_v11, %v4053_v17  ;;  %v2091_v24 = vrot.slane %v2084_v44, %v4053_v17  ;;  %v2099_v25 = vrot.slane %v3185_v51, %v4053_v17 }
 0x274   : > { %v2191_v16 = vrot.slane %v2184_v15, %v4053_v17  ;;  %v2199_v50 = vrot.slane %v3189_v10, %v4053_v17  ;;  %v2200_v63 = vcombine.low %v2072_v13, %v2079_v14  ;;  %v3190_v18 = vcombine.high %v2072_v13, %v2079_v14 }
 0x275   : > { %v2174_v26 = vcombine.low %v2157_v58, %v2165_v59  ;;  %v2166_v28 = vcombine.low %v2141_v21, %v2149_v48  ;;  %v2124_v29 = vcombine.low %v2107_v19, %v2115_v20  ;;  %v2116_v31 = vcombine.low %v2091_v24, %v2099_v25 }
 0x276   : > { %v2207_v22 = vrot.slane %v2200_v63, %v4053_v17  ;;  %v2215_v12 = vrot.slane %v3190_v18, %v4053_v17  ;;  %v2216_v23 = vcombine.low %v2191_v16, %v2199_v50 }
 0x277   : > { %v2181_v33 = vrot.slane %v2174_v26, %v4067_v32  ;;  %v2131_v35 = vrot.slane %v2124_v29, %v4067_v32  ;;  %v2173_v36 = vrot.slane %v2166_v28, %v4067_v32  ;;  %v2123_v39 = vrot.slane %v2116_v31, %v4067_v32  ;;  %v3447_v26 = vld [vmem:[%s4399_s8 + $0x74] ss:$8 sps:$4 sm:$0xff]  }
 0x278   : > { %v2224_v27 = vcombine.low %v2207_v22, %v2215_v12  ;;  %v2223_v1 = vrot.slane %v2216_v23, %v4067_v32 }
 0x279   : > { %v2182_v40 = vcombine.low %v2173_v36, %v2181_v33  ;;  %v2183_v41 = vcombine.high %v2173_v36, %v2181_v33  ;;  %v2132_v45 = vcombine.low %v2123_v39, %v2131_v35  ;;  %v2133_v53 = vcombine.high %v2123_v39, %v2131_v35  ;;  %v3445_v39 = vld [vmem:[%s4399_s8 + $0x70] ss:$8 sps:$4 sm:$0xff]  }
 0x27a   : > { %v2231_v30 = vrot.slane %v2224_v27, %v4067_v32 }
 0x27b   : > { %v2373_v54 = vpack.c.bf16 %v2182_v40, %v2132_v45  ;;  %v2375_v55 = vpack.c.bf16 %v2183_v41, %v2133_v53  ;;  %v3450_v41 = vld [vmem:[%s4399_s8 + $0x64] ss:$8 sps:$4 sm:$0xff]   ;;  %v3451_v45 = vld [vmem:[%s4399_s8 + $0x50] ss:$8 sps:$4 sm:$0xff]  }
 0x27c   : > { %v2232_v6 = vcombine.low %v2223_v1, %v2231_v30  ;;  %v2233_v34 = vcombine.high %v2223_v1, %v2231_v30  ;;  %v3456_v53 = vld [vmem:[%s4399_s8 + $0x44] ss:$8 sps:$4 sm:$0xff]  }
 0x27e   : > { %v2374_v37 = vpack.c.bf16 %v2232_v6, %v2232_v6  ;;  %v2376_v38 = vpack.c.bf16 %v2233_v34, %v2233_v34 }
 0x280   : > { %v2382_v42 = vsel %vm2380_vm1, %v2374_v37, 0  ;;  %v2429_v43 = vsel %vm2380_vm1, %v2376_v38, 0 }
 0x281   : > { %3263 = vmatpush3.bf16.msra.mxu0 %v2382_v42  ;;  %3271 = vmatpush3.bf16.msra.mxu1 %v2429_v43  ;;  %v3448_v42 = vld [vmem:[%s4399_s8 + $0x60] ss:$8 sps:$4 sm:$0xff]   ;;  %v3453_v43 = vld [vmem:[%s4399_s8 + $0x54] ss:$8 sps:$4 sm:$0xff]  }
 0x282   : > { %3264 = vmatprep.subr.bf16.mxu0 %v3558_v57  ;;  %3272 = vmatprep.subr.bf16.mxu1 %v3558_v57 }
 0x285   : > { %3265 = vmatpush3.bf16.msra.mxu0 %v2373_v54  ;;  %3273 = vmatpush3.bf16.msra.mxu1 %v2375_v55  ;;  %v3454_v54 = vld [vmem:[%s4399_s8 + $0x40] ss:$8 sps:$4 sm:$0xff]   ;;  %v3459_v55 = vld [vmem:[%s4399_s8 + $0x34] ss:$8 sps:$4 sm:$0xff]  }
 0x286   : > { %2910 = vmatprep.subr.bf16.mxu1 %v3447_v26 }
 0x311   : > { %v2274_v56 = vpop.f32.mrf.mxu0  ;;  %v2315_v60 = vpop.f32.mrf.mxu1 }
 0x312   : > { %v2322_v0 = vmul.f32 0.088388346, %v2274_v56  ;;  %v2324_v3 = vmul.f32 0.088388346, %v2315_v60  ;;  %v3457_v56 = vld [vmem:[%s4399_s8 + $0x30] ss:$8 sps:$4 sm:$0xff]  }
 0x313   : > { %v3252_v46 = vpop.f32.mrf.mxu0  ;;  %v3260_v2 = vpop.f32.mrf.mxu1  ;;  %v3462_v60 = vld [vmem:[%s4399_s8 + $0x24] ss:$8 sps:$4 sm:$0xff]  }
 0x314   : > { %v2327_v4 = vsel %vm2326_vm2, %v2322_v0, -inf  ;;  %v2333_v9 = vsel %vm2326_vm2, %v2324_v3, -inf  ;;  %v3465_v46 = vld [vmem:[%s4399_s8 + $0x14] ss:$8 sps:$4 sm:$0xff]   ;;  %v3463_v2 = vld [vmem:[%s4399_s8 + $0x10] ss:$8 sps:$4 sm:$0xff]  }
 0x315   : > { %v2318_v49 = vpop.f32.mrf.mxu1  ;;  %2328 = vmax.xlane.f32.xlu0 %v2327_v4  ;;  %v2277_v5 = vpop.f32.mrf.mxu0  ;;  %v3466_v4 = vld [vmem:[%s4399_s8] ss:$8 sps:$4 sm:$0xff]  }
 0x316   : > { %v2323_v61 = vmul.f32 0.088388346, %v2277_v5  ;;  %v2325_v8 = vmul.f32 0.088388346, %v2318_v49  ;;  %v3471_v49 = vld [vmem:[%s4399_s8 + $0xf4] ss:$8 sps:$4 sm:$0xff]  }
 0x317   : > { %v3253_v62 = vpop.f32.mrf.mxu0  ;;  %v3261_v7 = vpop.f32.mrf.mxu1  ;;  %v3469_v5 = vld [vmem:[%s4399_s8 + $0xf0] ss:$8 sps:$4 sm:$0xff]  }
 0x318   : > { %v2330_v11 = vsel %vm2326_vm2, %v2323_v61, -inf  ;;  %v2336_v13 = vsel %vm2326_vm2, %v2325_v8, -inf  ;;  %v3472_v62 = vld [vmem:[%s4399_s8 + $0xe0] ss:$8 sps:$4 sm:$0xff]   ;;  %v3477_v7 = vld [vmem:[%s4399_s8 + $0xd4] ss:$8 sps:$4 sm:$0xff]  }
 0x319   : > { %2334 = vmax.xlane.f32.xlu0 %v2333_v9  ;;  %2331 = vmax.xlane.f32.xlu1 %v2330_v11  ;;  %v3480_v9 = vld [vmem:[%s4399_s8 + $0xc4] ss:$8 sps:$4 sm:$0xff]   ;;  %v3478_v11 = vld [vmem:[%s4399_s8 + $0xc0] ss:$8 sps:$4 sm:$0xff]  }
 0x31d   : > { %2337 = vmax.xlane.f32.xlu1 %v2336_v13  ;;  %v3483_v13 = vld [vmem:[%s4399_s8 + $0xb4] ss:$8 sps:$4 sm:$0xff]  }
 0x39e   : > { %v2329_v14 = vpop.xlane.xlu0 %2328 }
 0x39f   : > { %v2339_v15 = vsub.f32 %v2322_v0, %v2329_v14  ;;  %v3460_v0 = vld [vmem:[%s4399_s8 + $0x20] ss:$8 sps:$4 sm:$0xff]   ;;  %v3481_v14 = vld [vmem:[%s4399_s8 + $0xb0] ss:$8 sps:$4 sm:$0xff]  }
 0x3a1   : > { %v2343_v10 = vmul.f32 1.442695, %v2339_v15  ;;  %v3486_v15 = vld [vmem:[%s4399_s8 + $0xa4] ss:$8 sps:$4 sm:$0xff]  }
 0x3a2   : > { %v2335_v44 = vpop.xlane.xlu0 %2334  ;;  %v2332_v51 = vpop.xlane.xlu1 %2331 }
 0x3a3   : > { %3499 = vpow2.f32 %v2343_v10  ;;  %v2341_v58 = vsub.f32 %v2324_v3, %v2335_v44  ;;  %v2340_v59 = vsub.f32 %v2323_v61, %v2332_v51  ;;  %v3468_v3 = vld [vmem:[%s4399_s8 + $0x4] ss:$8 sps:$4 sm:$0xff]   ;;  %v3484_v10 = vld [vmem:[%s4399_s8 + $0xa0] ss:$8 sps:$4 sm:$0xff]   ;;  %v3487_v44 = vld [vmem:[%s4399_s8 + $0x90] ss:$8 sps:$4 sm:$0xff]  }
 0x3a4   : > { %v3474_v61 = vld [vmem:[%s4399_s8 + $0xe4] ss:$8 sps:$4 sm:$0xff]   ;;  %v3489_v51 = vld [vmem:[%s4399_s8 + $0x94] ss:$8 sps:$4 sm:$0xff]  }
 0x3a5   : > { %v2347_v16 = vmul.f32 1.442695, %v2341_v58  ;;  %v2345_v50 = vmul.f32 1.442695, %v2340_v59  ;;  %v3492_v58 = vld [vmem:[%s4399_s8 + $0x84] ss:$8 sps:$4 sm:$0xff]  }
 0x3a6   : > { %v2338_v63 = vpop.xlane.xlu1 %2337  ;;  %v3490_v59 = vld [vmem:[%s4399_s8 + $0x80] ss:$8 sps:$4 sm:$0xff]  }
 0x3a7   : > { %3501 = vpow2.f32 %v2347_v16  ;;  %v2342_v18 = vsub.f32 %v2325_v8, %v2338_v63  ;;  %v3475_v8 = vld [vmem:[%s4399_s8 + $0xd0] ss:$8 sps:$4 sm:$0xff]  }
 0x3a8   : > { %3503 = vpow2.f32 %v2345_v50 }
 0x3a9   : > { %v2349_v19 = vmul.f32 1.442695, %v2342_v18 }
 0x3ab   : > { %3505 = vpow2.f32 %v2349_v19 }
 0x3b0   : > { %v3500_v20 = vpop.eup %3499 }
 0x3b1   : > { %v2351_v21 = vsel %vm2326_vm2, %v3500_v20, 0.0 }
 0x3b2   : > { %2352 = vadd.xlane.f32.xlu0 %v2351_v21 }
 0x3b4   : > { %v3502_v48 = vpop.eup %3501 }
 0x3b5   : > { %v3504_v22 = vpop.eup %3503  ;;  %v2357_v12 = vsel %vm2326_vm2, %v3502_v48, 0.0 }
 0x3b6   : > { %2358 = vadd.xlane.f32.xlu0 %v2357_v12  ;;  %v2354_v23 = vsel %vm2326_vm2, %v3504_v22, 0.0 }
 0x3b7   : > { %2355 = vadd.xlane.f32.xlu1 %v2354_v23 }
 0x3b8   : > { %v3506_v24 = vpop.eup %3505 }
 0x3b9   : > { %v2360_v25 = vsel %vm2326_vm2, %v3506_v24, 0.0 }
 0x3bb   : > { %2361 = vadd.xlane.f32.xlu1 %v2360_v25 }
 0x43b   : > { %v2353_v27 = vpop.xlane.xlu0 %2352 }
 0x43c   : > { %3507 = vrcp.f32 %v2353_v27 }
 0x43f   : > { %v2359_v28 = vpop.xlane.xlu0 %2358 }
 0x440   : > { %v2356_v29 = vpop.xlane.xlu1 %2355 }
 0x441   : > { %3509 = vrcp.f32 %v2356_v29 }
 0x442   : > { %3511 = vrcp.f32 %v2359_v28 }
 0x444   : > { %v2362_v1 = vpop.xlane.xlu1 %2361 }
 0x445   : > { %3513 = vrcp.f32 %v2362_v1 }
 0x449   : > { %v3508_v30 = vpop.eup %3507 }
 0x44a   : > { %v2367_v33 = vmul.f32 %v3508_v30, %v3500_v20 }
 0x44e   : > { %v3510_v31 = vpop.eup %3509 }
 0x44f   : > { %v2368_v6 = vmul.f32 %v3510_v31, %v3504_v22  ;;  %v3512_v34 = vpop.eup %3511 }
 0x450   : > { %v2369_v37 = vmul.f32 %v3512_v34, %v3502_v48 }
 0x451   : > { %v2371_v35 = vpack.c.bf16 %v2368_v6, %v2367_v33 }
 0x452   : > { %v3514_v36 = vpop.eup %3513 }
 0x453   : > { %v2370_v38 = vmul.f32 %v3514_v36, %v3506_v24  ;;  %3267 = vmatmul.mubr.msk.bf16.vlgmr.msra.gmra.mxu0 %vm2326_vm2, %v2371_v35 }
 0x455   : > { %v2372_v40 = vpack.c.bf16 %v2370_v38, %v2369_v37 }
 0x457   : > { %3275 = vmatmul.mubr.msk.bf16.vlgmr.msra.gmra.mxu1 %vm2326_vm2, %v2372_v40 }
 0x458   : > { %2911 = vmatpush1.bf16.msra.mxu1 %v3445_v39 }
 0x459   : > { %2912 = vmatprep.subr.bf16.mxu1 %v3450_v41 }
 0x45c   : > { %2913 = vmatpush1.bf16.msra.mxu1 %v3448_v42 }
 0x45d   : > { %2914 = vmatprep.subr.bf16.mxu1 %v3453_v43 }
 0x460   : > { %2915 = vmatpush1.bf16.msra.mxu1 %v3451_v45 }
 0x461   : > { %2916 = vmatprep.subr.bf16.mxu1 %v3456_v53 }
 0x464   : > { %2917 = vmatpush1.bf16.msra.mxu1 %v3454_v54 }
 0x465   : > { %2918 = vmatprep.subr.bf16.mxu1 %v3459_v55 }
 0x468   : > { %2919 = vmatpush1.bf16.msra.mxu1 %v3457_v56 }
 0x469   : > { %2920 = vmatprep.subr.bf16.mxu1 %v3462_v60 }
 0x46c   : > { %2921 = vmatpush1.bf16.msra.mxu1 %v3460_v0 }
 0x46d   : > { %2922 = vmatprep.subr.bf16.mxu1 %v3465_v46 }
 0x470   : > { %2923 = vmatpush1.bf16.msra.mxu1 %v3463_v2 }
 0x471   : > { %2924 = vmatprep.subr.bf16.mxu1 %v3468_v3 }
 0x474   : > { %2925 = vmatpush1.bf16.msra.mxu1 %v3466_v4 }
 0x475   : > { %2926 = vmatprep.subr.bf16.mxu1 %v3471_v49 }
 0x478   : > { %2927 = vmatpush2.bf16.msra.mxu1 %v3469_v5 }
 0x479   : > { %2928 = vmatprep.subr.bf16.mxu1 %v3474_v61 }
 0x47c   : > { %2929 = vmatpush2.bf16.msra.mxu1 %v3472_v62 }
 0x47d   : > { %2930 = vmatprep.subr.bf16.mxu1 %v3477_v7 }
 0x480   : > { %2931 = vmatpush2.bf16.msra.mxu1 %v3475_v8 }
 0x481   : > { %2932 = vmatprep.subr.bf16.mxu1 %v3480_v9 }
 0x484   : > { %2933 = vmatpush2.bf16.msra.mxu1 %v3478_v11 }
 0x485   : > { %2934 = vmatprep.subr.bf16.mxu1 %v3483_v13 }
 0x488   : > { %2935 = vmatpush2.bf16.msra.mxu1 %v3481_v14 }
 0x489   : > { %2936 = vmatprep.subr.bf16.mxu1 %v3486_v15 }
 0x48c   : > { %2937 = vmatpush2.bf16.msra.mxu1 %v3484_v10 }
 0x48d   : > { %2938 = vmatprep.subr.bf16.mxu1 %v3489_v51 }
 0x490   : > { %2939 = vmatpush2.bf16.msra.mxu1 %v3487_v44 }
 0x491   : > { %2940 = vmatprep.subr.bf16.mxu1 %v3492_v58 }
 0x494   : > { %2941 = vmatpush2.bf16.msra.mxu1 %v3490_v59 }
 0x513   : > { %v2418_v16 = vpop.f32.mrf.mxu0 }
 0x514   : > { %v2472_v63 = vcombine.high %v2418_v16, %v3558_v57  ;;  %v2479_v20 = vrot.slane %v2418_v16, %v4053_v17 }
 0x515   : > { %v3268_v50 = vpop.f32.mrf.mxu0 }
 0x516   : > { %v2486_v23 = vrot.slane %v2472_v63, %v4053_v17 }
 0x517   : > { %v2421_v18 = vpop.f32.mrf.mxu0  ;;  %v2465_v19 = vpop.f32.mrf.mxu1 }
 0x518   : > { %v2487_v21 = vcombine.high %v2465_v19, %v3558_v57  ;;  %v2494_v48 = vrot.slane %v2465_v19, %v4053_v17  ;;  %v2538_v27 = vcombine.high %v2421_v18, %v3558_v57  ;;  %v2545_v33 = vrot.slane %v2421_v18, %v4053_v17 }
 0x519   : > { %v3269_v22 = vpop.f32.mrf.mxu0  ;;  %v3276_v12 = vpop.f32.mrf.mxu1 }
 0x51a   : > { %v2501_v24 = vrot.slane %v2487_v21, %v4053_v17  ;;  %v2502_v25 = vcombine.low %v2479_v20, %v2494_v48  ;;  %v2503_v26 = vcombine.high %v2479_v20, %v2494_v48  ;;  %v2552_v40 = vrot.slane %v2538_v27, %v4053_v17  ;;  %v2738_v20 = vld [vmem:[#allocation2] sm:$0x3]  ;;  %v3516_v27 = vld [vmem:[%s3648_s25 + $0x8] sm:$0xff] }
 0x51b   : > { %v2468_v28 = vpop.f32.mrf.mxu1  ;;  %v2743_v21 = vrot.slane %v2738_v20, %v3913_v52  ;;  %v2747_v48 = vrot.slane %v2738_v20, %v3910_v47  ;;  %v3517_v47 = vld [vmem:[%s3648_s25 + $0x10] sm:$0xff] }
 0x51c   : > { %v2510_v29 = vrot.slane %v2502_v25, %v4067_v32  ;;  %v2517_v1 = vrot.slane %v2503_v26, %v4067_v32  ;;  %v2518_v30 = vcombine.low %v2486_v23, %v2501_v24  ;;  %v2519_v31 = vcombine.high %v2486_v23, %v2501_v24  ;;  %v3515_v23 = vld [vmem:[%s3648_s25] sm:$0xff] }
 0x51d   : > { %v2553_v6 = vcombine.high %v2468_v28, %v3558_v57  ;;  %v2560_v34 = vrot.slane %v2468_v28, %v4053_v17  ;;  %v3277_v35 = vpop.f32.mrf.mxu1 }
 0x51e   : > { %v2526_v36 = vrot.slane %v2518_v30, %v4067_v32  ;;  %v2533_v37 = vrot.slane %v2519_v31, %v4067_v32  ;;  %v2604_v38 = vcombine.low %v2510_v29, %v2517_v1  ;;  %v3193_v39 = vcombine.high %v2510_v29, %v2517_v1  ;;  %v3518_v31 = vld [vmem:[%s3648_s25 + $0x18] sm:$0xff] }
 0x51f   : > { %v2567_v41 = vrot.slane %v2553_v6, %v4053_v17  ;;  %v2568_v42 = vcombine.low %v2545_v33, %v2560_v34  ;;  %v2569_v43 = vcombine.high %v2545_v33, %v2560_v34 }
 0x520   : > { %v2620_v45 = vcombine.low %v2526_v36, %v2533_v37  ;;  %v3194_v53 = vcombine.high %v2526_v36, %v2533_v37  ;;  %v2611_v60 = vrot.slane %v2604_v38, %v4053_v17  ;;  %v2619_v0 = vrot.slane %v3193_v39, %v4053_v17 }
 0x521   : > { %v2576_v54 = vrot.slane %v2568_v42, %v4067_v32  ;;  %v2583_v57 = vrot.slane %v2569_v43, %v4067_v32  ;;  %v2584_v55 = vcombine.low %v2552_v40, %v2567_v41  ;;  %v2585_v56 = vcombine.high %v2552_v40, %v2567_v41 }
 0x522   : > { %v2627_v46 = vrot.slane %v2620_v45, %v4053_v17  ;;  %v2635_v2 = vrot.slane %v3194_v53, %v4053_v17  ;;  %v2636_v14 = vcombine.low %v2611_v60, %v2619_v0 }
 0x523   : > { %v2592_v3 = vrot.slane %v2584_v55, %v4067_v32  ;;  %v2599_v4 = vrot.slane %v2585_v56, %v4067_v32  ;;  %v2654_v49 = vcombine.low %v2576_v54, %v2583_v57  ;;  %v3195_v5 = vcombine.high %v2576_v54, %v2583_v57 }
 0x524   : > { %v2644_v61 = vcombine.low %v2627_v46, %v2635_v2  ;;  %v2643_v51 = vrot.slane %v2636_v14, %v4067_v32 }
 0x525   : > { %v2661_v62 = vrot.slane %v2654_v49, %v4053_v17  ;;  %v2669_v7 = vrot.slane %v3195_v5, %v4053_v17  ;;  %v2670_v8 = vcombine.low %v2592_v3, %v2599_v4  ;;  %v3196_v9 = vcombine.high %v2592_v3, %v2599_v4 }
 0x526   : > { %v2651_v10 = vrot.slane %v2644_v61, %v4067_v32 }
 0x527   : > { %v2677_v11 = vrot.slane %v2670_v8, %v4053_v17  ;;  %v2685_v13 = vrot.slane %v3196_v9, %v4053_v17  ;;  %v2686_v15 = vcombine.low %v2661_v62, %v2669_v7 }
 0x528   : > { %v2653_v16 = vcombine.high %v2643_v51, %v2651_v10  ;;  %v2652_v63 = vcombine.low %v2643_v51, %v2651_v10 }
 0x529   : > { %v2694_v44 = vcombine.low %v2677_v11, %v2685_v13  ;;  %v2693_v58 = vrot.slane %v2686_v15, %v4067_v32 }
 0x52b   : > { %v2701_v59 = vrot.slane %v2694_v44, %v4067_v32 }
 0x52d   : > { %v2703_v50 = vcombine.high %v2693_v58, %v2701_v59  ;;  %v2702_v18 = vcombine.low %v2693_v58, %v2701_v59 }
 0x52f   : > { %v2705_v19 = vpack.c.bf16 %v2703_v50, %v2653_v16  ;;  %v2704_v17 = vpack.c.bf16 %v2702_v18, %v2652_v63 }
 0x531   : > { %2942 = vmatprep.mubr.bf16.mxu1 %v2705_v19 }
 0x532   : > { %2943 = vmatmul.mubr.bf16.vlgmr.msra.gmra.mxu1 %v2704_v17 }
 0x5f2   : > { %v2944_v22 = vpop.f32.mrf.mxu1 }
 0x5f3   : > { %v2945_v12 = vadd.f32 %v2944_v22, %v2743_v21 }
 0x5f4   : > { %v2946_v32 = vpop.f32.mrf.mxu1 }
 0x5f5   : > { %v2953_v24 = vadd.f32 %v3515_v23, %v2945_v12  ;;  %v2947_v25 = vadd.f32 %v2946_v32, %v2747_v48 }
 0x5f6   : > { %v2948_v26 = vpop.f32.mrf.mxu1 }
 0x5f7   : > { %2957 = vst [vmem:[%s426_s26] sm:$0xff] %v2953_v24  ;;  %v2954_v28 = vadd.f32 %v3516_v27, %v2947_v25  ;;  %v2949_v52 = vadd.f32 %v2948_v26, %v2743_v21 }
 0x5f8   : > { %v2950_v29 = vpop.f32.mrf.mxu1 }
 0x5f9   : > { %2958 = vst [vmem:[%s426_s26 + $0x8] sm:$0xff] %v2954_v28  ;;  %v2955_v1 = vadd.f32 %v3517_v47, %v2949_v52  ;;  %v2951_v30 = vadd.f32 %v2950_v29, %v2747_v48 }
 0x5fb   : > { %2959 = vst [vmem:[%s426_s26 + $0x10] sm:$0xff] %v2955_v1  ;;  %v2956_v33 = vadd.f32 %v3518_v31, %v2951_v30 }
 0x5fd   : > { %2960 = vst [vmem:[%s426_s26 + $0x18] sm:$0xff] %v2956_v33 }
 0x5fe PF: > { %s21_s13 = sadd.s32 1, %s3555_s13  }
 0x5ff   : > { %p18_p1 = scmp.ge.s32.totalorder %s21_s13, 4  }
 0x601   :  { %20 = sbr.rel (!%p18_p1) target bundleno = 1 (0x1), region = 104 }
 0x606   :  { %2982 = vsyncpa [#allocation3], 1 }
 0x607   :  { %2984 = vsyncpa [#allocation3 + $0x1], 1 }

// kernel: ella_forward.7
= control target key start
LH: loop header
LB: loop body
LE: loop exit
PB: predicated region body
PF: predicated region fallthrough
CT: control target
= control target key end

     0   :  { %s2912_s21 = smov 0   ;;  %s3798_s0 = inlined_call_operand.vmem [shape: f32[2,16,256], index: 0, kind: input, shape index: {}]   ;;  %s3799_s1 = inlined_call_operand.vmem [shape: f32[2,1,512], index: 1, kind: input, shape index: {}]   ;;  %s3800_s2 = inlined_call_operand.vmem [shape: bf16[256,1024], index: 2, kind: input, shape index: {}]   ;;  %s3801_s3 = inlined_call_operand.vmem [shape: f32[1,1024], index: 3, kind: input, shape index: {}]   ;;  %s3802_s4 = inlined_call_operand.vmem [shape: bf16[1024,256], index: 4, kind: input, shape index: {}]   ;;  %s3803_s5 = inlined_call_operand.vmem [shape: f32[1,256], index: 5, kind: input, shape index: {}]   ;;  %s3804_s6 = inlined_call_operand.vmem [shape: f32[2,16,256], index: 6, kind: output, shape index: {}]  }
   0x1 LB: > { %s2391_s22 = sadd.s32 4294967295, %s2875_s21   ;;  %p2395_p0 = scmp.ge.s32.totalorder %s2875_s21, 1  ;;  %s2875_s21 = sphi %s2912_s21, %s16_s21  }
   0x2   : > { %p221_p1 = scmp.lt.s32.totalorder %s2875_s21, 3 }
   0x4   : > { %p222_p2 = pnand %p2395_p0, %p221_p1 }
   0x5   : > { %p255_p3 = scmp.lt.s32.totalorder (!%p222_p2), %s2391_s22, 1 }
   0x6   : > { %225 = sbr.rel (%p222_p2) target bundleno = 810 (0x32a), region = 44 }
   0xb   : > { %s3806_s22 = smov (!%p255_p3, %s2391_s22), 1  ;;  %v398_v6 = vld [vmem:[%s3800_s2 + $0x1c0] sm:$0xff]  ;;  %v399_v8 = vld [vmem:[%s3800_s2 + $0x1c8] sm:$0xff] }
   0xc   : > { %s2659_s23 = sshll.u32 %s3806_s22, 5  ;;  %v402_v7 = vld [vmem:[%s3800_s2 + $0x1e0] sm:$0xff]  ;;  %v403_v10 = vld [vmem:[%s3800_s2 + $0x1e8] sm:$0xff]  ;;  %s2398_s19 = sshll.u32 %s3806_s22, 2 }
   0xd   : > { %s2928_s26 = scalar_lea.vmem %s3798_s0, %s2659_s23  ;;  %v2458_v9 = vcombine.high %v398_v6, %v402_v7  ;;  %v2457_v11 = vcombine.low %v398_v6, %v402_v7  ;;  %v390_v12 = vld [vmem:[%s3800_s2 + $0x180] sm:$0xff]  ;;  %v2460_v14 = vcombine.high %v399_v8, %v403_v10  ;;  %v2459_v15 = vcombine.low %v399_v8, %v403_v10  ;;  %v391_v17 = vld [vmem:[%s3800_s2 + $0x188] sm:$0xff]  ;;  %s263_s25 = scalar_lea.vmem %s3799_s1, %s2398_s19 }
   0xe   : > { %v2931_v0 = vld [vmem:[%s2928_s26] sm:$0xff]  ;;  %v2934_v1 = vld [vmem:[%s2928_s26 + $0x8] sm:$0xff]  ;;  %v2939_v3 = vld [vmem:[%s2928_s26 + $0x10] sm:$0xff]  ;;  %s268_s29 = scalar_lea.vmem %s3804_s6, %s2659_s23 }
   0xf   : > { %v274_v2 = vadd.f32 %v2934_v1, %v2931_v0  ;;  %v2942_v4 = vld [vmem:[%s2928_s26 + $0x18] sm:$0xff]  ;;  %v394_v13 = vld [vmem:[%s3800_s2 + $0x1a0] sm:$0xff]  ;;  %v395_v18 = vld [vmem:[%s3800_s2 + $0x1a8] sm:$0xff]  ;;  %1152 = vmatprep.subr.bf16.mxu0 %v2458_v9  ;;  %1195 = vmatprep.subr.bf16.mxu1 %v2460_v14 }
  0x10   : > { %v277_v5 = vadd.f32 %v2942_v4, %v2939_v3  ;;  %v2450_v16 = vcombine.high %v390_v12, %v394_v13  ;;  %v382_v19 = vld [vmem:[%s3800_s2 + $0x140] sm:$0xff]  ;;  %v2452_v20 = vcombine.high %v391_v17, %v395_v18  ;;  %v383_v22 = vld [vmem:[%s3800_s2 + $0x148] sm:$0xff]  ;;  %1153 = vmatpush1.bf16.msra.mxu0 %v2457_v11  ;;  %v2449_v24 = vcombine.low %v390_v12, %v394_v13 }
  0x11   : > { %275 = vadd.xlane.f32.xlu0 %v274_v2  ;;  %v386_v21 = vld [vmem:[%s3800_s2 + $0x160] sm:$0xff]  ;;  %v387_v23 = vld [vmem:[%s3800_s2 + $0x168] sm:$0xff]  ;;  %1196 = vmatpush1.bf16.msra.mxu1 %v2459_v15  ;;  %v2451_v25 = vcombine.low %v391_v17, %v395_v18 }
  0x12   : > { %1154 = vmatprep.subr.bf16.mxu0 %v2450_v16  ;;  %v2442_v26 = vcombine.high %v382_v19, %v386_v21  ;;  %1197 = vmatprep.subr.bf16.mxu1 %v2452_v20  ;;  %v2444_v27 = vcombine.high %v383_v22, %v387_v23  ;;  %v374_v28 = vld [vmem:[%s3800_s2 + $0x100] sm:$0xff]  ;;  %v375_v30 = vld [vmem:[%s3800_s2 + $0x108] sm:$0xff]  ;;  %v2441_v32 = vcombine.low %v382_v19, %v386_v21 }
  0x13   : > { %v378_v29 = vld [vmem:[%s3800_s2 + $0x120] sm:$0xff]  ;;  %v379_v31 = vld [vmem:[%s3800_s2 + $0x128] sm:$0xff]  ;;  %v2443_v33 = vcombine.low %v383_v22, %v387_v23 }
  0x14   : > { %1155 = vmatpush1.bf16.msra.mxu0 %v2449_v24  ;;  %v2434_v34 = vcombine.high %v374_v28, %v378_v29  ;;  %v2436_v35 = vcombine.high %v375_v30, %v379_v31  ;;  %v366_v36 = vld [vmem:[%s3800_s2 + $0xc0] sm:$0xff]  ;;  %v367_v38 = vld [vmem:[%s3800_s2 + $0xc8] sm:$0xff]  ;;  %v2433_v40 = vcombine.low %v374_v28, %v378_v29  ;;  %v2435_v43 = vcombine.low %v375_v30, %v379_v31 }
  0x15   : > { %278 = vadd.xlane.f32.xlu0 %v277_v5  ;;  %1198 = vmatpush1.bf16.msra.mxu1 %v2451_v25  ;;  %v370_v37 = vld [vmem:[%s3800_s2 + $0xe0] sm:$0xff]  ;;  %v371_v39 = vld [vmem:[%s3800_s2 + $0xe8] sm:$0xff] }
  0x16   : > { %1156 = vmatprep.subr.bf16.mxu0 %v2442_v26  ;;  %1199 = vmatprep.subr.bf16.mxu1 %v2444_v27  ;;  %v358_v41 = vld [vmem:[%s3800_s2 + $0x80] sm:$0xff]  ;;  %v2426_v44 = vcombine.high %v366_v36, %v370_v37  ;;  %v359_v45 = vld [vmem:[%s3800_s2 + $0x88] sm:$0xff]  ;;  %v2428_v47 = vcombine.high %v367_v38, %v371_v39  ;;  %v2425_v48 = vcombine.low %v366_v36, %v370_v37 }
  0x17   : > { %v362_v42 = vld [vmem:[%s3800_s2 + $0xa0] sm:$0xff]  ;;  %v363_v46 = vld [vmem:[%s3800_s2 + $0xa8] sm:$0xff]  ;;  %v2427_v51 = vcombine.low %v367_v38, %v371_v39 }
  0x18   : > { %1157 = vmatpush1.bf16.msra.mxu0 %v2441_v32  ;;  %v350_v49 = vld [vmem:[%s3800_s2 + $0x40] sm:$0xff]  ;;  %v2418_v52 = vcombine.high %v358_v41, %v362_v42  ;;  %v351_v53 = vld [vmem:[%s3800_s2 + $0x48] sm:$0xff]  ;;  %v2420_v55 = vcombine.high %v359_v45, %v363_v46  ;;  %v2417_v56 = vcombine.low %v358_v41, %v362_v42  ;;  %v2419_v59 = vcombine.low %v359_v45, %v363_v46 }
  0x19   : > { %1200 = vmatpush1.bf16.msra.mxu1 %v2443_v33  ;;  %1158 = vmatprep.subr.bf16.mxu0 %v2434_v34  ;;  %v354_v50 = vld [vmem:[%s3800_s2 + $0x60] sm:$0xff]  ;;  %v355_v54 = vld [vmem:[%s3800_s2 + $0x68] sm:$0xff] }
  0x1a   : > { %1201 = vmatprep.subr.bf16.mxu1 %v2436_v35  ;;  %v342_v57 = vld [vmem:[%s3800_s2] sm:$0xff]  ;;  %v2410_v60 = vcombine.high %v350_v49, %v354_v50  ;;  %v343_v61 = vld [vmem:[%s3800_s2 + $0x8] sm:$0xff]  ;;  %v2412_v63 = vcombine.high %v351_v53, %v355_v54  ;;  %v2409_v2 = vcombine.low %v350_v49, %v354_v50  ;;  %v2411_v5 = vcombine.low %v351_v53, %v355_v54 }
  0x1b   : > { %v346_v58 = vld [vmem:[%s3800_s2 + $0x20] sm:$0xff]  ;;  %v347_v62 = vld [vmem:[%s3800_s2 + $0x28] sm:$0xff] }
  0x1c   : > { %1159 = vmatpush1.bf16.msra.mxu0 %v2433_v40  ;;  %v2402_v6 = vcombine.high %v342_v57, %v346_v58  ;;  %v2404_v7 = vcombine.high %v343_v61, %v347_v62  ;;  %v462_v8 = vld [vmem:[%s3800_s2 + $0x3c0] sm:$0xff]  ;;  %v463_v10 = vld [vmem:[%s3800_s2 + $0x3c8] sm:$0xff]  ;;  %v2401_v12 = vcombine.low %v342_v57, %v346_v58  ;;  %v2403_v13 = vcombine.low %v343_v61, %v347_v62 }
  0x1d   : > { %1202 = vmatpush1.bf16.msra.mxu1 %v2435_v43  ;;  %1160 = vmatprep.subr.bf16.mxu0 %v2426_v44  ;;  %v466_v9 = vld [vmem:[%s3800_s2 + $0x3e0] sm:$0xff]  ;;  %v467_v11 = vld [vmem:[%s3800_s2 + $0x3e8] sm:$0xff] }
  0x1e   : > { %1203 = vmatprep.subr.bf16.mxu1 %v2428_v47  ;;  %v2522_v14 = vcombine.high %v462_v8, %v466_v9  ;;  %v2524_v15 = vcombine.high %v463_v10, %v467_v11  ;;  %v2521_v16 = vcombine.low %v462_v8, %v466_v9  ;;  %v2523_v17 = vcombine.low %v463_v10, %v467_v11  ;;  %v454_v30 = vld [vmem:[%s3800_s2 + $0x380] sm:$0xff]  ;;  %v459_v32 = vld [vmem:[%s3800_s2 + $0x3a8] sm:$0xff] }
  0x1f   : > { %v446_v36 = vld [vmem:[%s3800_s2 + $0x340] sm:$0xff]  ;;  %v447_v38 = vld [vmem:[%s3800_s2 + $0x348] sm:$0xff] }
  0x20   : > { %1161 = vmatpush1.bf16.msra.mxu0 %v2425_v48  ;;  %v450_v37 = vld [vmem:[%s3800_s2 + $0x360] sm:$0xff]  ;;  %v451_v40 = vld [vmem:[%s3800_s2 + $0x368] sm:$0xff] }
  0x21   : > { %1204 = vmatpush1.bf16.msra.mxu1 %v2427_v51  ;;  %1162 = vmatprep.subr.bf16.mxu0 %v2418_v52  ;;  %v2506_v39 = vcombine.high %v446_v36, %v450_v37  ;;  %v2508_v41 = vcombine.high %v447_v38, %v451_v40  ;;  %v2505_v42 = vcombine.low %v446_v36, %v450_v37  ;;  %v438_v44 = vld [vmem:[%s3800_s2 + $0x300] sm:$0xff]  ;;  %v439_v46 = vld [vmem:[%s3800_s2 + $0x308] sm:$0xff] }
  0x22   : > { %1205 = vmatprep.subr.bf16.mxu1 %v2420_v55  ;;  %v2507_v43 = vcombine.low %v447_v38, %v451_v40  ;;  %v442_v45 = vld [vmem:[%s3800_s2 + $0x320] sm:$0xff]  ;;  %v443_v48 = vld [vmem:[%s3800_s2 + $0x328] sm:$0xff]  ;;  %v312_v38 = vlaneseq }
  0x23   : > { %v2498_v47 = vcombine.high %v438_v44, %v442_v45  ;;  %v2497_v49 = vcombine.low %v438_v44, %v442_v45  ;;  %v430_v50 = vld [vmem:[%s3800_s2 + $0x2c0] sm:$0xff]  ;;  %v2500_v52 = vcombine.high %v439_v46, %v443_v48  ;;  %v2499_v53 = vcombine.low %v439_v46, %v443_v48  ;;  %v431_v55 = vld [vmem:[%s3800_s2 + $0x2c8] sm:$0xff] }
  0x24   : > { %1163 = vmatpush1.bf16.msra.mxu0 %v2417_v56  ;;  %v434_v51 = vld [vmem:[%s3800_s2 + $0x2e0] sm:$0xff]  ;;  %v435_v56 = vld [vmem:[%s3800_s2 + $0x2e8] sm:$0xff] }
  0x25   : > { %1206 = vmatpush1.bf16.msra.mxu1 %v2419_v59  ;;  %1164 = vmatprep.subr.bf16.mxu0 %v2410_v60  ;;  %v2490_v54 = vcombine.high %v430_v50, %v434_v51  ;;  %v422_v57 = vld [vmem:[%s3800_s2 + $0x280] sm:$0xff]  ;;  %v2492_v58 = vcombine.high %v431_v55, %v435_v56  ;;  %v423_v60 = vld [vmem:[%s3800_s2 + $0x288] sm:$0xff]  ;;  %v2489_v62 = vcombine.low %v430_v50, %v434_v51 }
  0x26   : > { %1207 = vmatprep.subr.bf16.mxu1 %v2412_v63  ;;  %v426_v59 = vld [vmem:[%s3800_s2 + $0x2a0] sm:$0xff]  ;;  %v427_v61 = vld [vmem:[%s3800_s2 + $0x2a8] sm:$0xff]  ;;  %v2491_v63 = vcombine.low %v431_v55, %v435_v56 }
  0x27   : > { %v415_v8 = vld [vmem:[%s3800_s2 + $0x248] sm:$0xff]  ;;  %v2481_v10 = vcombine.low %v422_v57, %v426_v59  ;;  %v2483_v11 = vcombine.low %v423_v60, %v427_v61 }
  0x28   : > { %1165 = vmatpush1.bf16.msra.mxu0 %v2409_v2  ;;  %v2482_v2 = vcombine.high %v422_v57, %v426_v59  ;;  %v419_v9 = vld [vmem:[%s3800_s2 + $0x268] sm:$0xff] }
  0x29   : > { %1208 = vmatpush1.bf16.msra.mxu1 %v2411_v5  ;;  %1166 = vmatprep.subr.bf16.mxu0 %v2402_v6  ;;  %v2484_v5 = vcombine.high %v423_v60, %v427_v61  ;;  %v414_v6 = vld [vmem:[%s3800_s2 + $0x240] sm:$0xff] }
  0x2a   : > { %1209 = vmatprep.subr.bf16.mxu1 %v2404_v7  ;;  %v418_v7 = vld [vmem:[%s3800_s2 + $0x260] sm:$0xff] }
  0x2c   : > { %1167 = vmatpush1.bf16.msra.mxu0 %v2401_v12  ;;  %v2474_v12 = vcombine.high %v414_v6, %v418_v7 }
  0x2d   : > { %1210 = vmatpush1.bf16.msra.mxu1 %v2403_v13  ;;  %1168 = vmatprep.subr.bf16.mxu0 %v2522_v14  ;;  %v2476_v13 = vcombine.high %v415_v8, %v419_v9  ;;  %v406_v14 = vld [vmem:[%s3800_s2 + $0x200] sm:$0xff] }
  0x2e   : > { %1211 = vmatprep.subr.bf16.mxu1 %v2524_v15  ;;  %v410_v15 = vld [vmem:[%s3800_s2 + $0x220] sm:$0xff] }
  0x30   : > { %1169 = vmatpush2.bf16.msra.mxu0 %v2521_v16  ;;  %v407_v16 = vld [vmem:[%s3800_s2 + $0x208] sm:$0xff] }
  0x31   : > { %1212 = vmatpush2.bf16.msra.mxu1 %v2523_v17  ;;  %v411_v17 = vld [vmem:[%s3800_s2 + $0x228] sm:$0xff] }
  0x9a   : > { %v276_v18 = vpop.xlane.xlu0 %275 }
  0x9b   : > { %v281_v19 = vmul.f32 0.00390625, %v276_v18  ;;  %v2473_v18 = vcombine.low %v414_v6, %v418_v7 }
  0x9d   : > { %v3055_v20 = vsub.f32 %v2931_v0, %v281_v19  ;;  %v3058_v21 = vsub.f32 %v2934_v1, %v281_v19  ;;  %v2475_v19 = vcombine.low %v415_v8, %v419_v9  ;;  %v388_v8 = vld [vmem:[%s3800_s2 + $0x170] sm:$0xff]  ;;  %v385_v9 = vld [vmem:[%s3800_s2 + $0x158] sm:$0xff] }
  0x9e   : > { %v279_v22 = vpop.xlane.xlu0 %278 }
  0x9f   : > { %v282_v23 = vmul.f32 0.00390625, %v279_v22  ;;  %v287_v24 = vmul.f32 %v3055_v20, %v3055_v20  ;;  %v288_v25 = vmul.f32 %v3058_v21, %v3058_v21  ;;  %v2466_v22 = vcombine.high %v406_v14, %v410_v15 }
  0xa1   : > { %v3065_v26 = vsub.f32 %v2939_v3, %v282_v23  ;;  %v3068_v27 = vsub.f32 %v2942_v4, %v282_v23  ;;  %v291_v28 = vadd.f32 %v288_v25, %v287_v24  ;;  %v458_v3 = vld [vmem:[%s3800_s2 + $0x3a0] sm:$0xff]  ;;  %v455_v4 = vld [vmem:[%s3800_s2 + $0x388] sm:$0xff]  ;;  %v2468_v23 = vcombine.high %v407_v16, %v411_v17 }
  0xa2   : > { %v2514_v31 = vcombine.high %v454_v30, %v458_v3  ;;  %v2516_v33 = vcombine.high %v455_v4, %v459_v32  ;;  %v2513_v34 = vcombine.low %v454_v30, %v458_v3  ;;  %v2515_v35 = vcombine.low %v455_v4, %v459_v32  ;;  %v405_v30 = vld [vmem:[%s3800_s2 + $0x1f8] sm:$0xff] }
  0xa3   : > { %292 = vadd.xlane.f32.xlu1 %v291_v28  ;;  %v289_v0 = vmul.f32 %v3065_v26, %v3065_v26  ;;  %v290_v1 = vmul.f32 %v3068_v27, %v3068_v27  ;;  %v2465_v24 = vcombine.low %v406_v14, %v410_v15  ;;  %v2467_v25 = vcombine.low %v407_v16, %v411_v17  ;;  %v400_v28 = vld [vmem:[%s3800_s2 + $0x1d0] sm:$0xff]  ;;  %v377_v17 = vld [vmem:[%s3800_s2 + $0x118] sm:$0xff] }
  0xa4   : > { %1170 = vmatprep.subr.bf16.mxu0 %v2514_v31  ;;  %1213 = vmatprep.subr.bf16.mxu1 %v2516_v33  ;;  %v376_v15 = vld [vmem:[%s3800_s2 + $0x110] sm:$0xff] }
  0xa5   : > { %v294_v29 = vadd.f32 %v290_v1, %v289_v0  ;;  %1171 = vmatpush2.bf16.msra.mxu0 %v2513_v34  ;;  %1214 = vmatpush2.bf16.msra.mxu1 %v2515_v35  ;;  %v404_v0 = vld [vmem:[%s3800_s2 + $0x1f0] sm:$0xff]  ;;  %v401_v1 = vld [vmem:[%s3800_s2 + $0x1d8] sm:$0xff] }
  0xa6   : > { %1172 = vmatprep.subr.bf16.mxu0 %v2506_v39  ;;  %1215 = vmatprep.subr.bf16.mxu1 %v2508_v41  ;;  %v2461_v3 = vcombine.low %v400_v28, %v404_v0  ;;  %v2463_v4 = vcombine.low %v401_v1, %v405_v30  ;;  %v2464_v31 = vcombine.high %v401_v1, %v405_v30  ;;  %v273_v39 = vld [vmem:[%s263_s25] sm:$0xf]  ;;  %v3174_v41 = vshrl.u32 %v312_v38, 7  ;;  %v380_v16 = vld [vmem:[%s3800_s2 + $0x130] sm:$0xff]  ;;  %v373_v1 = vld [vmem:[%s3800_s2 + $0xf8] sm:$0xff] }
  0xa7   : > { %295 = vadd.xlane.f32.xlu1 %v294_v29  ;;  %v2462_v29 = vcombine.high %v400_v28, %v404_v0  ;;  %v308_v40 = vrot.slane %v273_v39, 2  ;;  %v372_v28 = vld [vmem:[%s3800_s2 + $0xf0] sm:$0xff]  ;;  %v369_v0 = vld [vmem:[%s3800_s2 + $0xd8] sm:$0xff] }
  0xa8   : > { %v3180_v44 = vsub.s32 0, %v3174_v41 }
  0xa9   : > { %1173 = vmatpush2.bf16.msra.mxu0 %v2505_v42  ;;  %1216 = vmatpush2.bf16.msra.mxu1 %v2507_v43  ;;  %v310_v42 = vadd.f32 1.0, %v308_v40  ;;  %v3177_v43 = vsub.s32 1, %v3174_v41  ;;  %v356_v40 = vld [vmem:[%s3800_s2 + $0x70] sm:$0xff] }
  0xaa   : > { %1174 = vmatprep.subr.bf16.mxu0 %v2498_v47  ;;  %1217 = vmatprep.subr.bf16.mxu1 %v2500_v52  ;;  %v329_v52 = vrot.slane %v273_v39, %v3180_v44 }
  0xab   : > { %v319_v47 = vrot.slane %v310_v42, %v3177_v43  ;;  %v333_v51 = vrot.slane %v273_v39, %v3177_v43  ;;  %v352_v39 = vld [vmem:[%s3800_s2 + $0x50] sm:$0xff] }
  0xad   : > { %1175 = vmatpush2.bf16.msra.mxu0 %v2497_v49  ;;  %1218 = vmatpush2.bf16.msra.mxu1 %v2499_v53  ;;  %v315_v49 = vrot.slane %v310_v42, %v3180_v44  ;;  %v353_v42 = vld [vmem:[%s3800_s2 + $0x58] sm:$0xff] }
  0xae   : > { %1176 = vmatprep.subr.bf16.mxu0 %v2490_v54  ;;  %1219 = vmatprep.subr.bf16.mxu1 %v2492_v58 }
  0xb1   : > { %1177 = vmatpush2.bf16.msra.mxu0 %v2489_v62  ;;  %1220 = vmatpush2.bf16.msra.mxu1 %v2491_v63  ;;  %v396_v62 = vld [vmem:[%s3800_s2 + $0x1b0] sm:$0xff] }
  0xb2   : > { %1178 = vmatprep.subr.bf16.mxu0 %v2482_v2  ;;  %1221 = vmatprep.subr.bf16.mxu1 %v2484_v5  ;;  %v384_v5 = vld [vmem:[%s3800_s2 + $0x150] sm:$0xff] }
  0xb5   : > { %1179 = vmatpush2.bf16.msra.mxu0 %v2481_v10  ;;  %1222 = vmatpush2.bf16.msra.mxu1 %v2483_v11  ;;  %v389_v10 = vld [vmem:[%s3800_s2 + $0x178] sm:$0xff] }
  0xb6   : > { %1180 = vmatprep.subr.bf16.mxu0 %v2474_v12  ;;  %1223 = vmatprep.subr.bf16.mxu1 %v2476_v13  ;;  %v2446_v13 = vcombine.high %v384_v5, %v388_v8  ;;  %v2448_v14 = vcombine.high %v385_v9, %v389_v10 }
  0xb9   : > { %1181 = vmatpush2.bf16.msra.mxu0 %v2473_v18  ;;  %1224 = vmatpush2.bf16.msra.mxu1 %v2475_v19  ;;  %v381_v18 = vld [vmem:[%s3800_s2 + $0x138] sm:$0xff]  ;;  %v2445_v19 = vcombine.low %v384_v5, %v388_v8 }
  0xba   : > { %1182 = vmatprep.subr.bf16.mxu0 %v2466_v22  ;;  %1225 = vmatprep.subr.bf16.mxu1 %v2468_v23  ;;  %v2447_v22 = vcombine.low %v385_v9, %v389_v10  ;;  %v2438_v23 = vcombine.high %v376_v15, %v380_v16  ;;  %v2439_v30 = vcombine.low %v377_v17, %v381_v18  ;;  %v457_v5 = vld [vmem:[%s3800_s2 + $0x398] sm:$0xff] }
  0xbd   : > { %1183 = vmatpush2.bf16.msra.mxu0 %v2465_v24  ;;  %1226 = vmatpush2.bf16.msra.mxu1 %v2467_v25  ;;  %v2440_v24 = vcombine.high %v377_v17, %v381_v18  ;;  %v368_v25 = vld [vmem:[%s3800_s2 + $0xd0] sm:$0xff] }
  0xbe   : > { %1238 = vmatprep.subr.bf16.mxu0 %v2462_v29  ;;  %1281 = vmatprep.subr.bf16.mxu1 %v2464_v31  ;;  %v2437_v29 = vcombine.low %v376_v15, %v380_v16  ;;  %v360_v31 = vld [vmem:[%s3800_s2 + $0x90] sm:$0xff] }
 0x12c   : > { %v293_v32 = vpop.xlane.xlu1 %292 }
 0x12d   : > { %v297_v33 = vmul.f32 0.00390625, %v293_v32  ;;  %v364_v32 = vld [vmem:[%s3800_s2 + $0xb0] sm:$0xff] }
 0x12f   : > { %v299_v34 = vadd.f32 1e-06, %v297_v33  ;;  %v361_v33 = vld [vmem:[%s3800_s2 + $0x98] sm:$0xff] }
 0x130   : > { %v296_v35 = vpop.xlane.xlu1 %295 }
 0x131   : > { %2861 = vrsqrt.f32 %v299_v34  ;;  %v298_v36 = vmul.f32 0.00390625, %v296_v35  ;;  %v365_v34 = vld [vmem:[%s3800_s2 + $0xb8] sm:$0xff]  ;;  %v2429_v35 = vcombine.low %v368_v25, %v372_v28 }
 0x132   : > { %v2424_v38 = vcombine.high %v361_v33, %v365_v34 }
 0x133   : > { %v300_v37 = vadd.f32 1e-06, %v298_v36  ;;  %v2431_v36 = vcombine.low %v369_v0, %v373_v1 }
 0x135   : > { %2863 = vrsqrt.f32 %v300_v37  ;;  %v2422_v37 = vcombine.high %v360_v31, %v364_v32 }
 0x13e   : > { %v2862_v45 = vpop.eup %2861 }
 0x13f   : > { %v304_v46 = vmul.f32 %v2862_v45, %v3058_v21  ;;  %v303_v48 = vmul.f32 %v2862_v45, %v3055_v20  ;;  %v392_v20 = vld [vmem:[%s3800_s2 + $0x190] sm:$0xff]  ;;  %v357_v45 = vld [vmem:[%s3800_s2 + $0x78] sm:$0xff] }
 0x140   : > { %v2454_v6 = vcombine.high %v392_v20, %v396_v62  ;;  %v2453_v11 = vcombine.low %v392_v20, %v396_v62 }
 0x141   : > { %v323_v54 = vmul.f32 %v319_v47, %v304_v46  ;;  %v322_v56 = vmul.f32 %v315_v49, %v303_v48  ;;  %v2421_v46 = vcombine.low %v360_v31, %v364_v32  ;;  %v2414_v48 = vcombine.high %v352_v39, %v356_v40 }
 0x142   : > { %v2864_v50 = vpop.eup %2863 }
 0x143   : > { %v306_v53 = vmul.f32 %v2864_v50, %v3068_v27  ;;  %v305_v55 = vmul.f32 %v2864_v50, %v3065_v26  ;;  %v337_v21 = vadd.f32 %v333_v51, %v323_v54  ;;  %v336_v60 = vadd.f32 %v329_v52, %v322_v56  ;;  %v393_v27 = vld [vmem:[%s3800_s2 + $0x198] sm:$0xff]  ;;  %v344_v50 = vld [vmem:[%s3800_s2 + $0x10] sm:$0xff] }
 0x144   : > { %v397_v26 = vld [vmem:[%s3800_s2 + $0x1b8] sm:$0xff]  ;;  %v2413_v54 = vcombine.low %v352_v39, %v356_v40 }
 0x145   : > { %v325_v57 = vmul.f32 %v319_v47, %v306_v53  ;;  %v324_v58 = vmul.f32 %v315_v49, %v305_v55  ;;  %v2456_v7 = vcombine.high %v393_v27, %v397_v26  ;;  %v2455_v12 = vcombine.low %v393_v27, %v397_v26  ;;  %v349_v53 = vld [vmem:[%s3800_s2 + $0x38] sm:$0xff]  ;;  %v456_v26 = vld [vmem:[%s3800_s2 + $0x390] sm:$0xff] }
 0x146   : > { %v2423_v47 = vcombine.low %v361_v33, %v365_v34  ;;  %v2416_v49 = vcombine.high %v353_v42, %v357_v45  ;;  %v2415_v55 = vcombine.low %v353_v42, %v357_v45 }
 0x147   : > { %v339_v59 = vadd.f32 %v333_v51, %v325_v57  ;;  %v338_v61 = vadd.f32 %v329_v52, %v324_v58  ;;  %v348_v51 = vld [vmem:[%s3800_s2 + $0x30] sm:$0xff]  ;;  %v345_v52 = vld [vmem:[%s3800_s2 + $0x18] sm:$0xff] }
 0x148   : > { %v2406_v56 = vcombine.high %v344_v50, %v348_v51  ;;  %v2408_v57 = vcombine.high %v345_v52, %v349_v53  ;;  %v464_v58 = vld [vmem:[%s3800_s2 + $0x3d0] sm:$0xff]  ;;  %v2407_v20 = vcombine.low %v345_v52, %v349_v53 }
 0x149   : > { %v341_v63 = vpack.c.bf16 %v339_v59, %v337_v21  ;;  %v3202_v2 = vpack.c.bf16 %v338_v61, %v336_v60  ;;  %v468_v21 = vld [vmem:[%s3800_s2 + $0x3f0] sm:$0xff]  ;;  %v465_v59 = vld [vmem:[%s3800_s2 + $0x3d8] sm:$0xff]  ;;  %v2405_v61 = vcombine.low %v344_v50, %v348_v51 }
 0x14a   : > { %v469_v60 = vld [vmem:[%s3800_s2 + $0x3f8] sm:$0xff]  ;;  %v2526_v62 = vcombine.high %v464_v58, %v468_v21 }
 0x14b   : > { %1184 = vmatprep.mubr.bf16.mxu0 %v341_v63  ;;  %1227 = vmatprep.mubr.bf16.mxu1 %v341_v63  ;;  %v2528_v27 = vcombine.high %v465_v59, %v469_v60  ;;  %v2527_v8 = vcombine.low %v465_v59, %v469_v60 }
 0x14c   : > { %1185 = vmatmul.mubr.bf16.vlgmr.msra.gmra.mxu0 %v3202_v2  ;;  %1228 = vmatmul.mubr.bf16.vlgmr.msra.gmra.mxu1 %v3202_v2 }
 0x14d   : > { %1239 = vmatpush1.bf16.msra.mxu0 %v2461_v3  ;;  %1282 = vmatpush1.bf16.msra.mxu1 %v2463_v4  ;;  %v2430_v3 = vcombine.high %v368_v25, %v372_v28  ;;  %v2432_v4 = vcombine.high %v369_v0, %v373_v1 }
 0x14e   : > { %1270 = vmatprep.mubr.bf16.mxu0 %v341_v63  ;;  %1313 = vmatprep.mubr.bf16.mxu1 %v341_v63  ;;  %v460_v63 = vld [vmem:[%s3800_s2 + $0x3b0] sm:$0xff] }
 0x14f   : > { %1240 = vmatprep.subr.bf16.mxu0 %v2454_v6  ;;  %1283 = vmatprep.subr.bf16.mxu1 %v2456_v7  ;;  %v461_v6 = vld [vmem:[%s3800_s2 + $0x3b8] sm:$0xff]  ;;  %v2525_v7 = vcombine.low %v464_v58, %v468_v21  ;;  %v2518_v9 = vcombine.high %v456_v26, %v460_v63  ;;  %v2517_v15 = vcombine.low %v456_v26, %v460_v63 }
 0x150   : > { %v2520_v10 = vcombine.high %v457_v5, %v461_v6  ;;  %v2519_v16 = vcombine.low %v457_v5, %v461_v6  ;;  %v2669_v26 = vld [vmem:[%s3802_s4 + $0x70] ss:$8 sps:$4 sm:$0xff]   ;;  %v2677_v5 = vld [vmem:[%s3802_s4 + $0x64] ss:$8 sps:$4 sm:$0xff]  }
 0x151   : > { %1241 = vmatpush1.bf16.msra.mxu0 %v2453_v11  ;;  %1284 = vmatpush1.bf16.msra.mxu1 %v2455_v12  ;;  %v448_v11 = vld [vmem:[%s3800_s2 + $0x350] sm:$0xff]  ;;  %v2680_v6 = vld [vmem:[%s3802_s4 + $0x164] ss:$8 sps:$4 sm:$0xff]  }
 0x152   : > { %1242 = vmatprep.subr.bf16.mxu0 %v2446_v13  ;;  %1285 = vmatprep.subr.bf16.mxu1 %v2448_v14  ;;  %v452_v12 = vld [vmem:[%s3800_s2 + $0x370] sm:$0xff]  ;;  %v449_v13 = vld [vmem:[%s3800_s2 + $0x358] sm:$0xff] }
 0x153   : > { %v453_v14 = vld [vmem:[%s3800_s2 + $0x378] sm:$0xff]  ;;  %v2510_v17 = vcombine.high %v448_v11, %v452_v12  ;;  %v2509_v25 = vcombine.low %v448_v11, %v452_v12  ;;  %v2689_v12 = vld [vmem:[%s3802_s4 + $0x44] ss:$8 sps:$4 sm:$0xff]  }
 0x154   : > { %v2512_v18 = vcombine.high %v449_v13, %v453_v14  ;;  %v2511_v28 = vcombine.low %v449_v13, %v453_v14  ;;  %v2672_v63 = vld [vmem:[%s3802_s4 + $0x170] ss:$8 sps:$4 sm:$0xff]   ;;  %v2692_v13 = vld [vmem:[%s3802_s4 + $0x144] ss:$8 sps:$4 sm:$0xff]   ;;  %v2687_v14 = vld [vmem:[%s3802_s4 + $0x40] ss:$8 sps:$4 sm:$0xff]  }
 0x155   : > { %1243 = vmatpush1.bf16.msra.mxu0 %v2445_v19  ;;  %1286 = vmatpush1.bf16.msra.mxu1 %v2447_v22  ;;  %v440_v19 = vld [vmem:[%s3800_s2 + $0x310] sm:$0xff] }
 0x156   : > { %1244 = vmatprep.subr.bf16.mxu0 %v2438_v23  ;;  %1287 = vmatprep.subr.bf16.mxu1 %v2440_v24  ;;  %v444_v22 = vld [vmem:[%s3800_s2 + $0x330] sm:$0xff]  ;;  %v441_v23 = vld [vmem:[%s3800_s2 + $0x318] sm:$0xff] }
 0x157   : > { %v445_v24 = vld [vmem:[%s3800_s2 + $0x338] sm:$0xff]  ;;  %v2502_v0 = vcombine.high %v440_v19, %v444_v22  ;;  %v2501_v31 = vcombine.low %v440_v19, %v444_v22  ;;  %v2701_v22 = vld [vmem:[%s3802_s4 + $0x24] ss:$8 sps:$4 sm:$0xff]  }
 0x158   : > { %v2504_v1 = vcombine.high %v441_v23, %v445_v24  ;;  %v2503_v32 = vcombine.low %v441_v23, %v445_v24  ;;  %v2684_v11 = vld [vmem:[%s3802_s4 + $0x150] ss:$8 sps:$4 sm:$0xff]   ;;  %v2704_v23 = vld [vmem:[%s3802_s4 + $0x124] ss:$8 sps:$4 sm:$0xff]   ;;  %v2699_v24 = vld [vmem:[%s3802_s4 + $0x20] ss:$8 sps:$4 sm:$0xff]  }
 0x159   : > { %1245 = vmatpush1.bf16.msra.mxu0 %v2437_v29  ;;  %1288 = vmatpush1.bf16.msra.mxu1 %v2439_v30  ;;  %v432_v29 = vld [vmem:[%s3800_s2 + $0x2d0] sm:$0xff] }
 0x15a   : > { %1246 = vmatprep.subr.bf16.mxu0 %v2430_v3  ;;  %1289 = vmatprep.subr.bf16.mxu1 %v2432_v4  ;;  %v436_v30 = vld [vmem:[%s3800_s2 + $0x2f0] sm:$0xff]  ;;  %v433_v3 = vld [vmem:[%s3800_s2 + $0x2d8] sm:$0xff] }
 0x15b   : > { %v437_v4 = vld [vmem:[%s3800_s2 + $0x2f8] sm:$0xff]  ;;  %v2494_v33 = vcombine.high %v432_v29, %v436_v30  ;;  %v2493_v39 = vcombine.low %v432_v29, %v436_v30  ;;  %v2713_v30 = vld [vmem:[%s3802_s4 + $0x4] ss:$8 sps:$4 sm:$0xff]  }
 0x15c   : > { %v2496_v34 = vcombine.high %v433_v3, %v437_v4  ;;  %v2495_v40 = vcombine.low %v433_v3, %v437_v4  ;;  %v2696_v19 = vld [vmem:[%s3802_s4 + $0x130] ss:$8 sps:$4 sm:$0xff]   ;;  %v2716_v3 = vld [vmem:[%s3802_s4 + $0x104] ss:$8 sps:$4 sm:$0xff]   ;;  %v2711_v4 = vld [vmem:[%s3802_s4] ss:$8 sps:$4 sm:$0xff]  }
 0x15d   : > { %1247 = vmatpush1.bf16.msra.mxu0 %v2429_v35  ;;  %1290 = vmatpush1.bf16.msra.mxu1 %v2431_v36  ;;  %v424_v35 = vld [vmem:[%s3800_s2 + $0x290] sm:$0xff] }
 0x15e   : > { %1248 = vmatprep.subr.bf16.mxu0 %v2422_v37  ;;  %1291 = vmatprep.subr.bf16.mxu1 %v2424_v38  ;;  %v428_v36 = vld [vmem:[%s3800_s2 + $0x2b0] sm:$0xff]  ;;  %v425_v37 = vld [vmem:[%s3800_s2 + $0x298] sm:$0xff] }
 0x15f   : > { %v429_v38 = vld [vmem:[%s3800_s2 + $0x2b8] sm:$0xff]  ;;  %v2486_v42 = vcombine.high %v424_v35, %v428_v36  ;;  %v2485_v50 = vcombine.low %v424_v35, %v428_v36  ;;  %v2725_v36 = vld [vmem:[%s3802_s4 + $0xe4] ss:$8 sps:$4 sm:$0xff]  }
 0x160   : > { %v2488_v45 = vcombine.high %v425_v37, %v429_v38  ;;  %v2487_v51 = vcombine.low %v425_v37, %v429_v38  ;;  %v2708_v29 = vld [vmem:[%s3802_s4 + $0x110] ss:$8 sps:$4 sm:$0xff]   ;;  %v2728_v37 = vld [vmem:[%s3802_s4 + $0x1e4] ss:$8 sps:$4 sm:$0xff]   ;;  %v2723_v38 = vld [vmem:[%s3802_s4 + $0xe0] ss:$8 sps:$4 sm:$0xff]  }
 0x161   : > { %1249 = vmatpush1.bf16.msra.mxu0 %v2421_v46  ;;  %1292 = vmatpush1.bf16.msra.mxu1 %v2423_v47  ;;  %v416_v46 = vld [vmem:[%s3800_s2 + $0x250] sm:$0xff] }
 0x162   : > { %1250 = vmatprep.subr.bf16.mxu0 %v2414_v48  ;;  %1293 = vmatprep.subr.bf16.mxu1 %v2416_v49  ;;  %v420_v47 = vld [vmem:[%s3800_s2 + $0x270] sm:$0xff]  ;;  %v417_v48 = vld [vmem:[%s3800_s2 + $0x258] sm:$0xff] }
 0x163   : > { %v421_v49 = vld [vmem:[%s3800_s2 + $0x278] sm:$0xff]  ;;  %v2478_v52 = vcombine.high %v416_v46, %v420_v47  ;;  %v2477_v58 = vcombine.low %v416_v46, %v420_v47  ;;  %v2737_v47 = vld [vmem:[%s3802_s4 + $0xc4] ss:$8 sps:$4 sm:$0xff]  }
 0x164   : > { %v2480_v53 = vcombine.high %v417_v48, %v421_v49  ;;  %v2479_v21 = vcombine.low %v417_v48, %v421_v49  ;;  %v2720_v35 = vld [vmem:[%s3802_s4 + $0x1f0] ss:$8 sps:$4 sm:$0xff]   ;;  %v2740_v48 = vld [vmem:[%s3802_s4 + $0x1c4] ss:$8 sps:$4 sm:$0xff]   ;;  %v2735_v49 = vld [vmem:[%s3802_s4 + $0xc0] ss:$8 sps:$4 sm:$0xff]  }
 0x165   : > { %1251 = vmatpush1.bf16.msra.mxu0 %v2413_v54  ;;  %1294 = vmatpush1.bf16.msra.mxu1 %v2415_v55  ;;  %v408_v54 = vld [vmem:[%s3800_s2 + $0x210] sm:$0xff] }
 0x166   : > { %1252 = vmatprep.subr.bf16.mxu0 %v2406_v56  ;;  %1295 = vmatprep.subr.bf16.mxu1 %v2408_v57  ;;  %v412_v55 = vld [vmem:[%s3800_s2 + $0x230] sm:$0xff]  ;;  %v409_v56 = vld [vmem:[%s3800_s2 + $0x218] sm:$0xff] }
 0x167   : > { %v413_v57 = vld [vmem:[%s3800_s2 + $0x238] sm:$0xff]  ;;  %v2470_v59 = vcombine.high %v408_v54, %v412_v55 }
 0x168   : > { %v2472_v60 = vcombine.high %v409_v56, %v413_v57  ;;  %v2732_v46 = vld [vmem:[%s3802_s4 + $0x1d0] ss:$8 sps:$4 sm:$0xff]  }
 0x169   : > { %1253 = vmatpush1.bf16.msra.mxu0 %v2405_v61  ;;  %1296 = vmatpush1.bf16.msra.mxu1 %v2407_v20  ;;  %v2469_v61 = vcombine.low %v408_v54, %v412_v55  ;;  %v2471_v20 = vcombine.low %v409_v56, %v413_v57  ;;  %v2744_v54 = vld [vmem:[%s3802_s4 + $0x1b0] ss:$8 sps:$4 sm:$0xff]   ;;  %v2749_v55 = vld [vmem:[%s3802_s4 + $0xa4] ss:$8 sps:$4 sm:$0xff]   ;;  %v2747_v57 = vld [vmem:[%s3802_s4 + $0xa0] ss:$8 sps:$4 sm:$0xff]  }
 0x16a   : > { %1254 = vmatprep.subr.bf16.mxu0 %v2526_v62  ;;  %1297 = vmatprep.subr.bf16.mxu1 %v2528_v27  ;;  %v2671_v62 = vld [vmem:[%s3802_s4 + $0x74] ss:$8 sps:$4 sm:$0xff]   ;;  %v2752_v56 = vld [vmem:[%s3802_s4 + $0x1a4] ss:$8 sps:$4 sm:$0xff]  }
 0x16b   : > { %v2674_v27 = vld [vmem:[%s3802_s4 + $0x174] ss:$8 sps:$4 sm:$0xff]  }
 0x16d   : > { %1255 = vmatpush2.bf16.msra.mxu0 %v2525_v7  ;;  %1298 = vmatpush2.bf16.msra.mxu1 %v2527_v8  ;;  %v2675_v7 = vld [vmem:[%s3802_s4 + $0x60] ss:$8 sps:$4 sm:$0xff]  }
 0x16e   : > { %1256 = vmatprep.subr.bf16.mxu0 %v2518_v9  ;;  %1299 = vmatprep.subr.bf16.mxu1 %v2520_v10  ;;  %v2678_v8 = vld [vmem:[%s3802_s4 + $0x160] ss:$8 sps:$4 sm:$0xff]   ;;  %v2683_v9 = vld [vmem:[%s3802_s4 + $0x54] ss:$8 sps:$4 sm:$0xff]   ;;  %v2681_v10 = vld [vmem:[%s3802_s4 + $0x50] ss:$8 sps:$4 sm:$0xff]  }
 0x171   : > { %1257 = vmatpush2.bf16.msra.mxu0 %v2517_v15  ;;  %1300 = vmatpush2.bf16.msra.mxu1 %v2519_v16  ;;  %v2690_v15 = vld [vmem:[%s3802_s4 + $0x140] ss:$8 sps:$4 sm:$0xff]   ;;  %v2695_v16 = vld [vmem:[%s3802_s4 + $0x34] ss:$8 sps:$4 sm:$0xff]  }
 0x172   : > { %1258 = vmatprep.subr.bf16.mxu0 %v2510_v17  ;;  %1301 = vmatprep.subr.bf16.mxu1 %v2512_v18  ;;  %v2698_v17 = vld [vmem:[%s3802_s4 + $0x134] ss:$8 sps:$4 sm:$0xff]   ;;  %v2693_v18 = vld [vmem:[%s3802_s4 + $0x30] ss:$8 sps:$4 sm:$0xff]  }
 0x175   : > { %1259 = vmatpush2.bf16.msra.mxu0 %v2509_v25  ;;  %1302 = vmatpush2.bf16.msra.mxu1 %v2511_v28  ;;  %v2702_v25 = vld [vmem:[%s3802_s4 + $0x120] ss:$8 sps:$4 sm:$0xff]   ;;  %v2707_v28 = vld [vmem:[%s3802_s4 + $0x14] ss:$8 sps:$4 sm:$0xff]  }
 0x176   : > { %1260 = vmatprep.subr.bf16.mxu0 %v2502_v0  ;;  %1303 = vmatprep.subr.bf16.mxu1 %v2504_v1  ;;  %v2710_v0 = vld [vmem:[%s3802_s4 + $0x114] ss:$8 sps:$4 sm:$0xff]   ;;  %v2705_v1 = vld [vmem:[%s3802_s4 + $0x10] ss:$8 sps:$4 sm:$0xff]  }
 0x179   : > { %1261 = vmatpush2.bf16.msra.mxu0 %v2501_v31  ;;  %1304 = vmatpush2.bf16.msra.mxu1 %v2503_v32  ;;  %v2714_v31 = vld [vmem:[%s3802_s4 + $0x100] ss:$8 sps:$4 sm:$0xff]   ;;  %v2719_v32 = vld [vmem:[%s3802_s4 + $0xf4] ss:$8 sps:$4 sm:$0xff]  }
 0x17a   : > { %1262 = vmatprep.subr.bf16.mxu0 %v2494_v33  ;;  %1305 = vmatprep.subr.bf16.mxu1 %v2496_v34  ;;  %v2722_v33 = vld [vmem:[%s3802_s4 + $0x1f4] ss:$8 sps:$4 sm:$0xff]   ;;  %v2717_v34 = vld [vmem:[%s3802_s4 + $0xf0] ss:$8 sps:$4 sm:$0xff]  }
 0x17d   : > { %1263 = vmatpush2.bf16.msra.mxu0 %v2493_v39  ;;  %1306 = vmatpush2.bf16.msra.mxu1 %v2495_v40  ;;  %v2726_v39 = vld [vmem:[%s3802_s4 + $0x1e0] ss:$8 sps:$4 sm:$0xff]   ;;  %v2731_v40 = vld [vmem:[%s3802_s4 + $0xd4] ss:$8 sps:$4 sm:$0xff]  }
 0x17e   : > { %1264 = vmatprep.subr.bf16.mxu0 %v2486_v42  ;;  %1307 = vmatprep.subr.bf16.mxu1 %v2488_v45  ;;  %v2734_v42 = vld [vmem:[%s3802_s4 + $0x1d4] ss:$8 sps:$4 sm:$0xff]   ;;  %v2729_v45 = vld [vmem:[%s3802_s4 + $0xd0] ss:$8 sps:$4 sm:$0xff]  }
 0x181   : > { %1265 = vmatpush2.bf16.msra.mxu0 %v2485_v50  ;;  %1308 = vmatpush2.bf16.msra.mxu1 %v2487_v51  ;;  %v2738_v50 = vld [vmem:[%s3802_s4 + $0x1c0] ss:$8 sps:$4 sm:$0xff]   ;;  %v2743_v51 = vld [vmem:[%s3802_s4 + $0xb4] ss:$8 sps:$4 sm:$0xff]  }
 0x182   : > { %1266 = vmatprep.subr.bf16.mxu0 %v2478_v52  ;;  %1309 = vmatprep.subr.bf16.mxu1 %v2480_v53  ;;  %v2746_v52 = vld [vmem:[%s3802_s4 + $0x1b4] ss:$8 sps:$4 sm:$0xff]   ;;  %v2741_v53 = vld [vmem:[%s3802_s4 + $0xb0] ss:$8 sps:$4 sm:$0xff]  }
 0x185   : > { %1267 = vmatpush2.bf16.msra.mxu0 %v2477_v58  ;;  %1310 = vmatpush2.bf16.msra.mxu1 %v2479_v21  ;;  %v2750_v58 = vld [vmem:[%s3802_s4 + $0x1a0] ss:$8 sps:$4 sm:$0xff]   ;;  %v2755_v21 = vld [vmem:[%s3802_s4 + $0x94] ss:$8 sps:$4 sm:$0xff]  }
 0x186   : > { %1268 = vmatprep.subr.bf16.mxu0 %v2470_v59  ;;  %1311 = vmatprep.subr.bf16.mxu1 %v2472_v60  ;;  %v2758_v59 = vld [vmem:[%s3802_s4 + $0x194] ss:$8 sps:$4 sm:$0xff]   ;;  %v2753_v60 = vld [vmem:[%s3802_s4 + $0x90] ss:$8 sps:$4 sm:$0xff]  }
 0x189   : > { %1269 = vmatpush2.bf16.msra.mxu0 %v2469_v61  ;;  %1312 = vmatpush2.bf16.msra.mxu1 %v2471_v20  ;;  %v2756_v61 = vld [vmem:[%s3802_s4 + $0x190] ss:$8 sps:$4 sm:$0xff]   ;;  %v2761_v20 = vld [vmem:[%s3802_s4 + $0x84] ss:$8 sps:$4 sm:$0xff]  }
 0x18a   : > { %2144 = vmatprep.subr.bf16.mxu0 %v2671_v62  ;;  %2187 = vmatprep.subr.bf16.mxu1 %v2674_v27  ;;  %v2764_v62 = vld [vmem:[%s3802_s4 + $0x184] ss:$8 sps:$4 sm:$0xff]   ;;  %v2759_v27 = vld [vmem:[%s3802_s4 + $0x80] ss:$8 sps:$4 sm:$0xff]  }
 0x18c   : > { %1271 = vmatmul.mubr.bf16.vlgmr.msra.gmra.mxu0 %v3202_v2  ;;  %1314 = vmatmul.mubr.bf16.vlgmr.msra.gmra.mxu1 %v3202_v2  ;;  %v2686_v2 = vld [vmem:[%s3802_s4 + $0x154] ss:$8 sps:$4 sm:$0xff]  }
 0x18d   : > { %2145 = vmatpush1.bf16.msra.mxu0 %v2669_v26  ;;  %2188 = vmatpush1.bf16.msra.mxu1 %v2672_v63  ;;  %v2762_v26 = vld [vmem:[%s3802_s4 + $0x180] ss:$8 sps:$4 sm:$0xff]   ;;  %v2767_v63 = vld [vmem:[%s3802_s4 + $0x274] ss:$8 sps:$4 sm:$0xff]  }
 0x18e   : > { %2146 = vmatprep.subr.bf16.mxu0 %v2677_v5  ;;  %2189 = vmatprep.subr.bf16.mxu1 %v2680_v6  ;;  %v2770_v5 = vld [vmem:[%s3802_s4 + $0x374] ss:$8 sps:$4 sm:$0xff]   ;;  %v486_v6 = vsub.s32 3, %v3174_v41 }
 0x191   : > { %2147 = vmatpush1.bf16.msra.mxu0 %v2675_v7  ;;  %2190 = vmatpush1.bf16.msra.mxu1 %v2678_v8  ;;  %v482_v7 = vsub.s32 2, %v3174_v41  ;;  %v3579_v8 = vld [vmem:[%s3801_s3] sm:$0xff] }
 0x192   : > { %2148 = vmatprep.subr.bf16.mxu0 %v2683_v9  ;;  %2191 = vmatprep.subr.bf16.mxu1 %v2686_v2  ;;  %v479_v9 = vrot.slane %v3579_v8, %v3177_v43  ;;  %v487_v2 = vrot.slane %v3579_v8, %v486_v6  ;;  %v2797_v6 = vld [vmem:[%s3802_s4 + $0x224] ss:$8 sps:$4 sm:$0xff]  }
 0x195   : > { %2149 = vmatpush1.bf16.msra.mxu0 %v2681_v10  ;;  %2192 = vmatpush1.bf16.msra.mxu1 %v2684_v11  ;;  %v475_v10 = vrot.slane %v3579_v8, %v3180_v44 }
 0x196   : > { %2150 = vmatprep.subr.bf16.mxu0 %v2689_v12  ;;  %2193 = vmatprep.subr.bf16.mxu1 %v2692_v13  ;;  %v483_v12 = vrot.slane %v3579_v8, %v482_v7  ;;  %v2800_v7 = vld [vmem:[%s3802_s4 + $0x324] ss:$8 sps:$4 sm:$0xff]  }
 0x199   : > { %2151 = vmatpush1.bf16.msra.mxu0 %v2687_v14  ;;  %2194 = vmatpush1.bf16.msra.mxu1 %v2690_v15 }
 0x19a   : > { %2152 = vmatprep.subr.bf16.mxu0 %v2695_v16  ;;  %2195 = vmatprep.subr.bf16.mxu1 %v2698_v17 }
 0x19d   : > { %2153 = vmatpush1.bf16.msra.mxu0 %v2693_v18  ;;  %2196 = vmatpush1.bf16.msra.mxu1 %v2696_v19 }
 0x19e   : > { %2154 = vmatprep.subr.bf16.mxu0 %v2701_v22  ;;  %2197 = vmatprep.subr.bf16.mxu1 %v2704_v23 }
 0x1a1   : > { %2155 = vmatpush1.bf16.msra.mxu0 %v2699_v24  ;;  %2198 = vmatpush1.bf16.msra.mxu1 %v2702_v25 }
 0x1a2   : > { %2156 = vmatprep.subr.bf16.mxu0 %v2707_v28  ;;  %2199 = vmatprep.subr.bf16.mxu1 %v2710_v0 }
 0x1a5   : > { %2157 = vmatpush1.bf16.msra.mxu0 %v2705_v1  ;;  %2200 = vmatpush1.bf16.msra.mxu1 %v2708_v29 }
 0x1a6   : > { %2158 = vmatprep.subr.bf16.mxu0 %v2713_v30  ;;  %2201 = vmatprep.subr.bf16.mxu1 %v2716_v3 }
 0x1a9   : > { %2159 = vmatpush1.bf16.msra.mxu0 %v2711_v4  ;;  %2202 = vmatpush1.bf16.msra.mxu1 %v2714_v31 }
 0x1aa   : > { %2160 = vmatprep.subr.bf16.mxu0 %v2719_v32  ;;  %2203 = vmatprep.subr.bf16.mxu1 %v2722_v33 }
 0x1ad   : > { %2161 = vmatpush2.bf16.msra.mxu0 %v2717_v34  ;;  %2204 = vmatpush2.bf16.msra.mxu1 %v2720_v35 }
 0x1ae   : > { %2162 = vmatprep.subr.bf16.mxu0 %v2725_v36  ;;  %2205 = vmatprep.subr.bf16.mxu1 %v2728_v37 }
 0x1b1   : > { %2163 = vmatpush2.bf16.msra.mxu0 %v2723_v38  ;;  %2206 = vmatpush2.bf16.msra.mxu1 %v2726_v39 }
 0x1b2   : > { %2164 = vmatprep.subr.bf16.mxu0 %v2731_v40  ;;  %2207 = vmatprep.subr.bf16.mxu1 %v2734_v42 }
 0x1b5   : > { %2165 = vmatpush2.bf16.msra.mxu0 %v2729_v45  ;;  %2208 = vmatpush2.bf16.msra.mxu1 %v2732_v46 }
 0x1b6   : > { %2166 = vmatprep.subr.bf16.mxu0 %v2737_v47  ;;  %2209 = vmatprep.subr.bf16.mxu1 %v2740_v48 }
 0x1b9   : > { %2167 = vmatpush2.bf16.msra.mxu0 %v2735_v49  ;;  %2210 = vmatpush2.bf16.msra.mxu1 %v2738_v50  ;;  %v2765_v49 = vld [vmem:[%s3802_s4 + $0x270] ss:$8 sps:$4 sm:$0xff]  }
 0x1ba   : > { %2168 = vmatprep.subr.bf16.mxu0 %v2743_v51  ;;  %2211 = vmatprep.subr.bf16.mxu1 %v2746_v52  ;;  %v2768_v50 = vld [vmem:[%s3802_s4 + $0x370] ss:$8 sps:$4 sm:$0xff]  }
 0x1bd   : > { %2169 = vmatpush2.bf16.msra.mxu0 %v2741_v53  ;;  %2212 = vmatpush2.bf16.msra.mxu1 %v2744_v54  ;;  %v2773_v53 = vld [vmem:[%s3802_s4 + $0x264] ss:$8 sps:$4 sm:$0xff]  }
 0x1be   : > { %2170 = vmatprep.subr.bf16.mxu0 %v2749_v55  ;;  %2213 = vmatprep.subr.bf16.mxu1 %v2752_v56  ;;  %v2776_v54 = vld [vmem:[%s3802_s4 + $0x364] ss:$8 sps:$4 sm:$0xff]   ;;  %v2771_v55 = vld [vmem:[%s3802_s4 + $0x260] ss:$8 sps:$4 sm:$0xff]  }
 0x1bf   : > { %v2774_v56 = vld [vmem:[%s3802_s4 + $0x360] ss:$8 sps:$4 sm:$0xff]  }
 0x1c1   : > { %2171 = vmatpush2.bf16.msra.mxu0 %v2747_v57  ;;  %2214 = vmatpush2.bf16.msra.mxu1 %v2750_v58  ;;  %v2779_v57 = vld [vmem:[%s3802_s4 + $0x254] ss:$8 sps:$4 sm:$0xff]  }
 0x1c2   : > { %2172 = vmatprep.subr.bf16.mxu0 %v2755_v21  ;;  %2215 = vmatprep.subr.bf16.mxu1 %v2758_v59  ;;  %v2782_v58 = vld [vmem:[%s3802_s4 + $0x354] ss:$8 sps:$4 sm:$0xff]   ;;  %v2777_v21 = vld [vmem:[%s3802_s4 + $0x250] ss:$8 sps:$4 sm:$0xff]  }
 0x1c3   : > { %v2780_v59 = vld [vmem:[%s3802_s4 + $0x350] ss:$8 sps:$4 sm:$0xff]  }
 0x1c5   : > { %2173 = vmatpush2.bf16.msra.mxu0 %v2753_v60  ;;  %2216 = vmatpush2.bf16.msra.mxu1 %v2756_v61  ;;  %v2785_v60 = vld [vmem:[%s3802_s4 + $0x244] ss:$8 sps:$4 sm:$0xff]  }
 0x1c6   : > { %2174 = vmatprep.subr.bf16.mxu0 %v2761_v20  ;;  %2217 = vmatprep.subr.bf16.mxu1 %v2764_v62  ;;  %v2788_v61 = vld [vmem:[%s3802_s4 + $0x344] ss:$8 sps:$4 sm:$0xff]   ;;  %v2783_v20 = vld [vmem:[%s3802_s4 + $0x240] ss:$8 sps:$4 sm:$0xff]  }
 0x1c7   : > { %v2786_v62 = vld [vmem:[%s3802_s4 + $0x340] ss:$8 sps:$4 sm:$0xff]  }
 0x1c9   : > { %2175 = vmatpush2.bf16.msra.mxu0 %v2759_v27  ;;  %2218 = vmatpush2.bf16.msra.mxu1 %v2762_v26  ;;  %v2791_v27 = vld [vmem:[%s3802_s4 + $0x234] ss:$8 sps:$4 sm:$0xff]  }
 0x1ca   : > { %2230 = vmatprep.subr.bf16.mxu0 %v2767_v63  ;;  %2273 = vmatprep.subr.bf16.mxu1 %v2770_v5  ;;  %v2794_v26 = vld [vmem:[%s3802_s4 + $0x334] ss:$8 sps:$4 sm:$0xff]   ;;  %v2789_v63 = vld [vmem:[%s3802_s4 + $0x230] ss:$8 sps:$4 sm:$0xff]  }
 0x1cb   : > { %v2792_v5 = vld [vmem:[%s3802_s4 + $0x330] ss:$8 sps:$4 sm:$0xff]  }
 0x20c   : > { %v1186_v11 = vpop.f32.mrf.mxu0  ;;  %v1229_v13 = vpop.f32.mrf.mxu1 }
 0x20d   : > { %v1187_v18 = vadd.f32 %v1186_v11, %v475_v10  ;;  %v1230_v19 = vadd.f32 %v1229_v13, %v483_v12  ;;  %v2806_v11 = vld [vmem:[%s3802_s4 + $0x314] ss:$8 sps:$4 sm:$0xff]   ;;  %v2804_v13 = vld [vmem:[%s3802_s4 + $0x310] ss:$8 sps:$4 sm:$0xff]  }
 0x20e   : > { %v1188_v14 = vpop.f32.mrf.mxu0  ;;  %v1231_v15 = vpop.f32.mrf.mxu1 }
 0x20f   : > { %v1189_v16 = vadd.f32 %v1188_v14, %v479_v9  ;;  %v1232_v17 = vadd.f32 %v1231_v15, %v487_v2  ;;  %v1324_v4 = vmax.f32 %v1187_v18, 0.0  ;;  %v1326_v31 = vmax.f32 %v1230_v19, 0.0  ;;  %v2809_v14 = vld [vmem:[%s3802_s4 + $0x204] ss:$8 sps:$4 sm:$0xff]   ;;  %v2815_v18 = vld [vmem:[%s3802_s4 + $0x2f4] ss:$8 sps:$4 sm:$0xff]  }
 0x210   : > { %v1190_v22 = vpop.f32.mrf.mxu0  ;;  %v1233_v23 = vpop.f32.mrf.mxu1  ;;  %v2812_v15 = vld [vmem:[%s3802_s4 + $0x304] ss:$8 sps:$4 sm:$0xff]   ;;  %v2818_v19 = vld [vmem:[%s3802_s4 + $0x3f4] ss:$8 sps:$4 sm:$0xff]  }
 0x211   : > { %v1191_v24 = vadd.f32 %v1190_v22, %v475_v10  ;;  %v1234_v25 = vadd.f32 %v1233_v23, %v483_v12  ;;  %v1325_v1 = vmax.f32 %v1189_v16, 0.0  ;;  %v1327_v29 = vmax.f32 %v1232_v17, 0.0  ;;  %v2803_v10 = vld [vmem:[%s3802_s4 + $0x214] ss:$8 sps:$4 sm:$0xff]   ;;  %v2801_v12 = vld [vmem:[%s3802_s4 + $0x210] ss:$8 sps:$4 sm:$0xff]  }
 0x212   : > { %v1192_v28 = vpop.f32.mrf.mxu0  ;;  %v1235_v0 = vpop.f32.mrf.mxu1  ;;  %v1340_v45 = vmul.f32 %v1324_v4, %v1324_v4  ;;  %v1342_v46 = vmul.f32 %v1326_v31, %v1326_v31  ;;  %v2807_v16 = vld [vmem:[%s3802_s4 + $0x200] ss:$8 sps:$4 sm:$0xff]   ;;  %v2813_v22 = vld [vmem:[%s3802_s4 + $0x2f0] ss:$8 sps:$4 sm:$0xff]   ;;  %v2833_v4 = vld [vmem:[%s3802_s4 + $0x2c4] ss:$8 sps:$4 sm:$0xff]  }
 0x213   : > { %v1193_v30 = vadd.f32 %v1192_v28, %v479_v9  ;;  %v1236_v3 = vadd.f32 %v1235_v0, %v487_v2  ;;  %v1332_v32 = vmax.f32 %v1191_v24, 0.0  ;;  %v1334_v33 = vmax.f32 %v1234_v25, 0.0  ;;  %v2795_v9 = vld [vmem:[%s3802_s4 + $0x220] ss:$8 sps:$4 sm:$0xff]   ;;  %v2816_v23 = vld [vmem:[%s3802_s4 + $0x3f0] ss:$8 sps:$4 sm:$0xff]  }
 0x214   : > { %v1341_v38 = vmul.f32 %v1325_v1, %v1325_v1  ;;  %v1343_v39 = vmul.f32 %v1327_v29, %v1327_v29  ;;  %v2798_v2 = vld [vmem:[%s3802_s4 + $0x320] ss:$8 sps:$4 sm:$0xff]   ;;  %v2821_v24 = vld [vmem:[%s3802_s4 + $0x2e4] ss:$8 sps:$4 sm:$0xff]   ;;  %v2827_v1 = vld [vmem:[%s3802_s4 + $0x2d4] ss:$8 sps:$4 sm:$0xff]  }
 0x215   : > { %v1333_v34 = vmax.f32 %v1193_v30, 0.0  ;;  %v1335_v35 = vmax.f32 %v1236_v3, 0.0  ;;  %v1348_v36 = vmul.f32 %v1332_v32, %v1332_v32  ;;  %v1350_v37 = vmul.f32 %v1334_v33, %v1334_v33  ;;  %v2810_v17 = vld [vmem:[%s3802_s4 + $0x300] ss:$8 sps:$4 sm:$0xff]   ;;  %v2824_v25 = vld [vmem:[%s3802_s4 + $0x3e4] ss:$8 sps:$4 sm:$0xff]  }
 0x216   : > { %v2819_v28 = vld [vmem:[%s3802_s4 + $0x2e0] ss:$8 sps:$4 sm:$0xff]   ;;  %v2830_v29 = vld [vmem:[%s3802_s4 + $0x3d4] ss:$8 sps:$4 sm:$0xff]   ;;  %v2825_v30 = vld [vmem:[%s3802_s4 + $0x2d0] ss:$8 sps:$4 sm:$0xff]  }
 0x217   : > { %v1349_v40 = vmul.f32 %v1333_v34, %v1333_v34  ;;  %v1351_v42 = vmul.f32 %v1335_v35, %v1335_v35  ;;  %v1356_v51 = vpack.c.bf16 %v1348_v36, %v1340_v45  ;;  %v1358_v52 = vpack.c.bf16 %v1350_v37, %v1342_v46  ;;  %v2822_v0 = vld [vmem:[%s3802_s4 + $0x3e0] ss:$8 sps:$4 sm:$0xff]   ;;  %v2828_v3 = vld [vmem:[%s3802_s4 + $0x3d0] ss:$8 sps:$4 sm:$0xff]   ;;  %v2836_v31 = vld [vmem:[%s3802_s4 + $0x3c4] ss:$8 sps:$4 sm:$0xff]  }
 0x218   : > { %v2831_v32 = vld [vmem:[%s3802_s4 + $0x2c0] ss:$8 sps:$4 sm:$0xff]   ;;  %v2839_v34 = vld [vmem:[%s3802_s4 + $0x2b4] ss:$8 sps:$4 sm:$0xff]   ;;  %v494_v36 = vsub.s32 5, %v3174_v41  ;;  %v502_v37 = vsub.s32 7, %v3174_v41 }
 0x219   : > { %v1357_v47 = vpack.c.bf16 %v1349_v40, %v1341_v38  ;;  %v1359_v48 = vpack.c.bf16 %v1351_v42, %v1343_v39  ;;  %v2834_v33 = vld [vmem:[%s3802_s4 + $0x3c0] ss:$8 sps:$4 sm:$0xff]   ;;  %v2842_v35 = vld [vmem:[%s3802_s4 + $0x3b4] ss:$8 sps:$4 sm:$0xff]   ;;  %v490_v38 = vsub.s32 4, %v3174_v41  ;;  %v498_v39 = vsub.s32 6, %v3174_v41 }
 0x21a   : > { %v2837_v40 = vld [vmem:[%s3802_s4 + $0x2b0] ss:$8 sps:$4 sm:$0xff]   ;;  %v2845_v45 = vld [vmem:[%s3802_s4 + $0x2a4] ss:$8 sps:$4 sm:$0xff]   ;;  %v495_v46 = vrot.slane %v3579_v8, %v494_v36 }
 0x21b   : > { %2176 = vmatprep.mubr.bf16.mxu0 %v1357_v47  ;;  %2219 = vmatprep.mubr.bf16.mxu1 %v1359_v48  ;;  %v2840_v42 = vld [vmem:[%s3802_s4 + $0x3b0] ss:$8 sps:$4 sm:$0xff]   ;;  %v2848_v41 = vld [vmem:[%s3802_s4 + $0x3a4] ss:$8 sps:$4 sm:$0xff]   ;;  %v503_v47 = vrot.slane %v3579_v8, %v502_v37  ;;  %v491_v48 = vrot.slane %v3579_v8, %v490_v38 }
 0x21c   : > { %2177 = vmatmul.mubr.bf16.vlgmr.msra.gmra.mxu0 %v1356_v51  ;;  %2220 = vmatmul.mubr.bf16.vlgmr.msra.gmra.mxu1 %v1358_v52  ;;  %v2843_v52 = vld [vmem:[%s3802_s4 + $0x2a0] ss:$8 sps:$4 sm:$0xff]  }
 0x21d   : > { %2231 = vmatpush1.bf16.msra.mxu0 %v2765_v49  ;;  %2274 = vmatpush1.bf16.msra.mxu1 %v2768_v50  ;;  %v499_v50 = vrot.slane %v3579_v8, %v498_v39  ;;  %v2854_v8 = vld [vmem:[%s3802_s4 + $0x394] ss:$8 sps:$4 sm:$0xff]  }
 0x21e   : > { %2232 = vmatprep.subr.bf16.mxu0 %v2773_v53  ;;  %2275 = vmatprep.subr.bf16.mxu1 %v2776_v54  ;;  %v2846_v53 = vld [vmem:[%s3802_s4 + $0x3a0] ss:$8 sps:$4 sm:$0xff]  }
 0x221   : > { %2233 = vmatpush1.bf16.msra.mxu0 %v2771_v55  ;;  %2276 = vmatpush1.bf16.msra.mxu1 %v2774_v56  ;;  %v2851_v56 = vld [vmem:[%s3802_s4 + $0x294] ss:$8 sps:$4 sm:$0xff]  }
 0x222   : > { %2234 = vmatprep.subr.bf16.mxu0 %v2779_v57  ;;  %2277 = vmatprep.subr.bf16.mxu1 %v2782_v58 }
 0x225   : > { %2235 = vmatpush1.bf16.msra.mxu0 %v2777_v21  ;;  %2278 = vmatpush1.bf16.msra.mxu1 %v2780_v59 }
 0x226   : > { %2236 = vmatprep.subr.bf16.mxu0 %v2785_v60  ;;  %2279 = vmatprep.subr.bf16.mxu1 %v2788_v61 }
 0x229   : > { %2237 = vmatpush1.bf16.msra.mxu0 %v2783_v20  ;;  %2280 = vmatpush1.bf16.msra.mxu1 %v2786_v62  ;;  %v2849_v20 = vld [vmem:[%s3802_s4 + $0x290] ss:$8 sps:$4 sm:$0xff]  }
 0x22a   : > { %2238 = vmatprep.subr.bf16.mxu0 %v2791_v27  ;;  %2281 = vmatprep.subr.bf16.mxu1 %v2794_v26  ;;  %v2852_v62 = vld [vmem:[%s3802_s4 + $0x390] ss:$8 sps:$4 sm:$0xff]  }
 0x22d   : > { %2239 = vmatpush1.bf16.msra.mxu0 %v2789_v63  ;;  %2282 = vmatpush1.bf16.msra.mxu1 %v2792_v5 }
 0x22e   : > { %2240 = vmatprep.subr.bf16.mxu0 %v2797_v6  ;;  %2283 = vmatprep.subr.bf16.mxu1 %v2800_v7  ;;  %v2857_v6 = vld [vmem:[%s3802_s4 + $0x284] ss:$8 sps:$4 sm:$0xff]  }
 0x22f   : > { %v2860_v7 = vld [vmem:[%s3802_s4 + $0x384] ss:$8 sps:$4 sm:$0xff]  }
 0x231   : > { %2241 = vmatpush1.bf16.msra.mxu0 %v2795_v9  ;;  %2284 = vmatpush1.bf16.msra.mxu1 %v2798_v2 }
 0x232   : > { %2242 = vmatprep.subr.bf16.mxu0 %v2803_v10  ;;  %2285 = vmatprep.subr.bf16.mxu1 %v2806_v11 }
 0x235   : > { %2243 = vmatpush1.bf16.msra.mxu0 %v2801_v12  ;;  %2286 = vmatpush1.bf16.msra.mxu1 %v2804_v13 }
 0x236   : > { %2244 = vmatprep.subr.bf16.mxu0 %v2809_v14  ;;  %2287 = vmatprep.subr.bf16.mxu1 %v2812_v15 }
 0x239   : > { %2245 = vmatpush1.bf16.msra.mxu0 %v2807_v16  ;;  %2288 = vmatpush1.bf16.msra.mxu1 %v2810_v17 }
 0x23a   : > { %2246 = vmatprep.subr.bf16.mxu0 %v2815_v18  ;;  %2289 = vmatprep.subr.bf16.mxu1 %v2818_v19  ;;  %v2855_v18 = vld [vmem:[%s3802_s4 + $0x280] ss:$8 sps:$4 sm:$0xff]  }
 0x23b   : > { %v2858_v19 = vld [vmem:[%s3802_s4 + $0x380] ss:$8 sps:$4 sm:$0xff]  }
 0x23d   : > { %2247 = vmatpush2.bf16.msra.mxu0 %v2813_v22  ;;  %2290 = vmatpush2.bf16.msra.mxu1 %v2816_v23 }
 0x23e   : > { %2248 = vmatprep.subr.bf16.mxu0 %v2821_v24  ;;  %2291 = vmatprep.subr.bf16.mxu1 %v2824_v25 }
 0x241   : > { %2249 = vmatpush2.bf16.msra.mxu0 %v2819_v28  ;;  %2292 = vmatpush2.bf16.msra.mxu1 %v2822_v0 }
 0x242   : > { %2250 = vmatprep.subr.bf16.mxu0 %v2827_v1  ;;  %2293 = vmatprep.subr.bf16.mxu1 %v2830_v29 }
 0x245   : > { %2251 = vmatpush2.bf16.msra.mxu0 %v2825_v30  ;;  %2294 = vmatpush2.bf16.msra.mxu1 %v2828_v3 }
 0x246   : > { %2252 = vmatprep.subr.bf16.mxu0 %v2833_v4  ;;  %2295 = vmatprep.subr.bf16.mxu1 %v2836_v31 }
 0x249   : > { %2253 = vmatpush2.bf16.msra.mxu0 %v2831_v32  ;;  %2296 = vmatpush2.bf16.msra.mxu1 %v2834_v33 }
 0x24a   : > { %2254 = vmatprep.subr.bf16.mxu0 %v2839_v34  ;;  %2297 = vmatprep.subr.bf16.mxu1 %v2842_v35  ;;  %v1492_v34 = vld [vmem:[%s3803_s5] sm:$0x3] }
 0x24b   : > { %v1497_v37 = vrot.slane %v1492_v34, %v3180_v44  ;;  %v1501_v38 = vrot.slane %v1492_v34, %v3177_v43 }
 0x24c   : > { %v1272_v49 = vpop.f32.mrf.mxu0  ;;  %v1315_v51 = vpop.f32.mrf.mxu1 }
 0x24d   : > { %2255 = vmatpush2.bf16.msra.mxu0 %v2837_v40  ;;  %2298 = vmatpush2.bf16.msra.mxu1 %v2840_v42  ;;  %v1273_v21 = vadd.f32 %v1272_v49, %v491_v48  ;;  %v1316_v59 = vadd.f32 %v1315_v51, %v499_v50 }
 0x24e   : > { %v1274_v54 = vpop.f32.mrf.mxu0  ;;  %v1317_v55 = vpop.f32.mrf.mxu1  ;;  %2256 = vmatprep.subr.bf16.mxu0 %v2845_v45  ;;  %2299 = vmatprep.subr.bf16.mxu1 %v2848_v41 }
 0x24f   : > { %v1275_v57 = vadd.f32 %v1274_v54, %v495_v46  ;;  %v1318_v58 = vadd.f32 %v1317_v55, %v503_v47  ;;  %v1328_v12 = vmax.f32 %v1273_v21, 0.0  ;;  %v1330_v13 = vmax.f32 %v1316_v59, 0.0  ;;  %v2865_v21 = vld [vmem:[%s2928_s26] sm:$0xff] }
 0x250   : > { %v1276_v60 = vpop.f32.mrf.mxu0  ;;  %v1319_v61 = vpop.f32.mrf.mxu1 }
 0x251   : > { %2257 = vmatpush2.bf16.msra.mxu0 %v2843_v52  ;;  %2300 = vmatpush2.bf16.msra.mxu1 %v2846_v53  ;;  %v1277_v27 = vadd.f32 %v1276_v60, %v491_v48  ;;  %v1320_v26 = vadd.f32 %v1319_v61, %v499_v50  ;;  %v1329_v9 = vmax.f32 %v1275_v57, 0.0  ;;  %v1331_v2 = vmax.f32 %v1318_v58, 0.0 }
 0x252   : > { %v1278_v63 = vpop.f32.mrf.mxu0  ;;  %v1321_v5 = vpop.f32.mrf.mxu1  ;;  %2258 = vmatprep.subr.bf16.mxu0 %v2851_v56  ;;  %2301 = vmatprep.subr.bf16.mxu1 %v2854_v8  ;;  %v1344_v1 = vmul.f32 %v1328_v12, %v1328_v12  ;;  %v1346_v29 = vmul.f32 %v1330_v13, %v1330_v13 }
 0x253   : > { %v1279_v10 = vadd.f32 %v1278_v63, %v495_v46  ;;  %v1322_v11 = vadd.f32 %v1321_v5, %v503_v47  ;;  %v1336_v14 = vmax.f32 %v1277_v27, 0.0  ;;  %v1338_v15 = vmax.f32 %v1320_v26, 0.0 }
 0x254   : > { %v1345_v24 = vmul.f32 %v1329_v9, %v1329_v9  ;;  %v1347_v25 = vmul.f32 %v1331_v2, %v1331_v2  ;;  %v2868_v2 = vld [vmem:[%s2928_s26 + $0x18] sm:$0xff] }
 0x255   : > { %v1337_v16 = vmax.f32 %v1279_v10, 0.0  ;;  %v1339_v17 = vmax.f32 %v1322_v11, 0.0  ;;  %2259 = vmatpush2.bf16.msra.mxu0 %v2849_v20  ;;  %2302 = vmatpush2.bf16.msra.mxu1 %v2852_v62  ;;  %v1352_v22 = vmul.f32 %v1336_v14, %v1336_v14  ;;  %v1354_v23 = vmul.f32 %v1338_v15, %v1338_v15  ;;  %v2866_v62 = vld [vmem:[%s2928_s26 + $0x8] sm:$0xff] }
 0x256   : > { %2260 = vmatprep.subr.bf16.mxu0 %v2857_v6  ;;  %2303 = vmatprep.subr.bf16.mxu1 %v2860_v7  ;;  %v2867_v6 = vld [vmem:[%s2928_s26 + $0x10] sm:$0xff] }
 0x257   : > { %v1353_v28 = vmul.f32 %v1337_v16, %v1337_v16  ;;  %v1355_v0 = vmul.f32 %v1339_v17, %v1339_v17  ;;  %v1360_v4 = vpack.c.bf16 %v1352_v22, %v1344_v1  ;;  %v1362_v31 = vpack.c.bf16 %v1354_v23, %v1346_v29 }
 0x259   : > { %v1361_v30 = vpack.c.bf16 %v1353_v28, %v1345_v24  ;;  %v1363_v3 = vpack.c.bf16 %v1355_v0, %v1347_v25  ;;  %2261 = vmatpush2.bf16.msra.mxu0 %v2855_v18  ;;  %2304 = vmatpush2.bf16.msra.mxu1 %v2858_v19 }
 0x25b   : > { %2262 = vmatprep.mubr.bf16.mxu0 %v1361_v30  ;;  %2305 = vmatprep.mubr.bf16.mxu1 %v1363_v3 }
 0x25c   : > { %2263 = vmatmul.mubr.bf16.vlgmr.msra.gmra.mxu0 %v1360_v4  ;;  %2306 = vmatmul.mubr.bf16.vlgmr.msra.gmra.mxu1 %v1362_v31 }
 0x2dc   : > { %v2178_v32 = vpop.f32.mrf.mxu0  ;;  %v2221_v33 = vpop.f32.mrf.mxu1 }
 0x2dd   : > { %v2179_v42 = vadd.f32 %v2178_v32, %v1497_v37 }
 0x2de   : > { %v2180_v35 = vpop.f32.mrf.mxu0  ;;  %v2223_v36 = vpop.f32.mrf.mxu1 }
 0x2df   : > { %v2181_v45 = vadd.f32 %v2180_v35, %v1501_v38  ;;  %v2222_v47 = vadd.f32 %v2221_v33, %v2179_v42 }
 0x2e0   : > { %v2182_v39 = vpop.f32.mrf.mxu0  ;;  %v2225_v40 = vpop.f32.mrf.mxu1 }
 0x2e1   : > { %v2183_v48 = vadd.f32 %v2182_v39, %v1497_v37  ;;  %v2224_v51 = vadd.f32 %v2223_v36, %v2181_v45 }
 0x2e2   : > { %v2184_v41 = vpop.f32.mrf.mxu0  ;;  %v2227_v46 = vpop.f32.mrf.mxu1 }
 0x2e3   : > { %v2185_v52 = vadd.f32 %v2184_v41, %v1501_v38  ;;  %v2226_v55 = vadd.f32 %v2225_v40, %v2183_v48 }
 0x2e5   : > { %v2228_v58 = vadd.f32 %v2227_v46, %v2185_v52 }
 0x31c   : > { %v2264_v49 = vpop.f32.mrf.mxu0  ;;  %v2307_v50 = vpop.f32.mrf.mxu1 }
 0x31d   : > { %v2265_v53 = vadd.f32 %v2264_v49, %v2222_v47 }
 0x31e   : > { %v2266_v54 = vpop.f32.mrf.mxu0  ;;  %v2309_v44 = vpop.f32.mrf.mxu1 }
 0x31f   : > { %v2308_v43 = vadd.f32 %v2307_v50, %v2265_v53  ;;  %v2267_v56 = vadd.f32 %v2266_v54, %v2224_v51 }
 0x320   : > { %v2268_v8 = vpop.f32.mrf.mxu0  ;;  %v2311_v57 = vpop.f32.mrf.mxu1 }
 0x321   : > { %v2316_v59 = vadd.f32 %v2865_v21, %v2308_v43  ;;  %v2310_v60 = vadd.f32 %v2309_v44, %v2267_v56  ;;  %v2269_v61 = vadd.f32 %v2268_v8, %v2226_v55 }
 0x322   : > { %v2270_v20 = vpop.f32.mrf.mxu0  ;;  %v2313_v5 = vpop.f32.mrf.mxu1 }
 0x323   : > { %2320 = vst [vmem:[%s268_s29] sm:$0xff] %v2316_v59  ;;  %v2317_v27 = vadd.f32 %v2866_v62, %v2310_v60  ;;  %v2312_v26 = vadd.f32 %v2311_v57, %v2269_v61  ;;  %v2271_v63 = vadd.f32 %v2270_v20, %v2228_v58 }
 0x325   : > { %2321 = vst [vmem:[%s268_s29 + $0x8] sm:$0xff] %v2317_v27  ;;  %v2318_v7 = vadd.f32 %v2867_v6, %v2312_v26  ;;  %v2314_v9 = vadd.f32 %v2313_v5, %v2271_v63 }
 0x327   : > { %2322 = vst [vmem:[%s268_s29 + $0x10] sm:$0xff] %v2318_v7  ;;  %v2319_v10 = vadd.f32 %v2868_v2, %v2314_v9 }
 0x329   : > { %2323 = vst [vmem:[%s268_s29 + $0x18] sm:$0xff] %v2319_v10 }
 0x32a PF: > { %s16_s21 = sadd.s32 1, %s2875_s21  }
 0x32b   : > { %p13_p4 = scmp.ge.s32.totalorder %s16_s21, 4  }
 0x32d   :  { %15 = sbr.rel (!%p13_p4) target bundleno = 1 (0x1), region = 77 }

// kernel: ella_forward.9
= control target key start
LH: loop header
LB: loop body
LE: loop exit
PB: predicated region body
PF: predicated region fallthrough
CT: control target
= control target key end

     0   :  { %11 = vsyncpa [#allocation3], 0  ;;  %s3993_s0 = inlined_call_operand.vmem [shape: f32[2,16,256], index: 0, kind: input, shape index: {}]   ;;  %s3994_s1 = inlined_call_operand.vmem [shape: f32[2,1,512], index: 1, kind: input, shape index: {}]   ;;  %s3995_s2 = inlined_call_operand.vmem [shape: bf16[256,1024], index: 2, kind: input, shape index: {}]   ;;  %s3996_s3 = inlined_call_operand.vmem [shape: f32[1,1024], index: 3, kind: input, shape index: {}]   ;;  %s3997_s4 = inlined_call_operand.vmem [shape: bf16[1024,256], index: 4, kind: input, shape index: {}]   ;;  %s3998_s5 = inlined_call_operand.vmem [shape: f32[1,256], index: 5, kind: input, shape index: {}]   ;;  %s3999_s6 = inlined_call_operand.hbm [shape: f32[2,16,256], index: 6, kind: output, shape index: {}]  }
   0x1   :  { %13 = vsyncpa [#allocation3 + $0x1], 0  ;;  %s3022_s21 = smov 0   ;;  %s3024_s22 = smov 0  }
   0x2   :  { %s3026_s23 = smov 0   ;;  %s3028_s24 = smov 0  }
   0x3 LB: > { %s3043_s25 = sadd.s32 4294967295, %s2982_s24   ;;  %s2410_s26 = sadd.s32 4294967294, %s2982_s24   ;;  %s2982_s24 = sphi %s3028_s24, %s4005_s24   ;;  %s2978_s23 = sphi %s3026_s23, %s4004_s23   ;;  %s2974_s22 = sphi %s3024_s22, %s4003_s22   ;;  %s2970_s21 = sphi %s3022_s21, %s4002_s21  }
   0x4   : > { %s3047_s27 = sadd.s32 1, %s2982_s24   ;;  %s162_s28 = sadd.s32 1, %s2978_s23 }
   0x5   : > { %s159_s29 = ssub.s32 %s2982_s24, %s3047_s27  ;;  %p172_p0 = scmp.ne.s32.totalorder %s2978_s23, %s2974_s22 }
   0x6   : > { %p160_p1 = scmp.eq.s32.totalorder %s159_s29, 0  ;;  %p173_p2 = scmp.eq.s32.totalorder %s3043_s25, 1 }
   0x7   : > { %p178_p3 = scmp.ne.s32.totalorder %s2974_s22, %s2970_s21  ;;  %p179_p4 = scmp.eq.s32.totalorder %s2410_s26, 1 }
   0x8   : > { %s3058_s30 = scalar_select %p160_p1, %s2978_s23, %s162_s28  }
   0x9   : > { %p3060_p5 = por %p173_p2, %p172_p0  ;;  %p3064_p6 = por %p179_p4, %p178_p3 }
   0xa   : > { %p2413_p7 = scmp.ge.s32.totalorder %s2982_s24, 1  ;;  %p224_p8 = scmp.lt.s32.totalorder %s2982_s24, 3 }
   0xc   : > { %p225_p9 = pnand %p2413_p7, %p224_p8 }
   0xd   : > { %p258_p10 = scmp.lt.s32.totalorder (!%p225_p9), %s3043_s25, 1  ;;  %s255_s11 = sand.u32 (!%p225_p9), 1, %s2974_s22  }
   0xe   : > { %228 = sbr.rel (%p225_p9) target bundleno = 832 (0x340), region = 44  ;;  %s2414_s12 = sshll.u32 (!%p225_p9), %s255_s11, 5 }
   0xf   : > { %s257_s14 = scalar_lea.vmem (!%p225_p9), [#allocation2], %s2414_s12  ;;  %s2680_s16 = sshll.u32 (!%p225_p9), %s3043_s25, 9 }
  0x10   : > { %s2336_s15 = sshll.u32 (!%p225_p9), %s257_s14, 4  ;;  %s3949_s19 = scalar_lea.hbm (!%p225_p9), %s3999_s6, %s2680_s16  ;;  %s3943_s15 = int_to_ptr.vmem [resolvable:$true] %s2336_s15 }
  0x11   : > { %s2984_s26 = smov (!%p225_p9), [#allocation2]  }
  0x12   : > { %s2926_s28 = sshll.u32 (!%p225_p9), %s2984_s26, 4  ;;  %s2927_s28 = int_to_ptr.vmem [resolvable:$false] %s2926_s28 }
  0x13   : > { %s3072_s9 = scalar_select %p258_p10, %s3043_s25, 1  ;;  %v396_v6 = vld [vmem:[%s3995_s2 + $0x1c0] sm:$0xff]  ;;  %v397_v8 = vld [vmem:[%s3995_s2 + $0x1c8] sm:$0xff] }
  0x14   : > { %v400_v7 = vld [vmem:[%s3995_s2 + $0x1e0] sm:$0xff]  ;;  %v401_v10 = vld [vmem:[%s3995_s2 + $0x1e8] sm:$0xff]  ;;  %s3953_s25 = scalar_lea.sflag [#allocation3], %s255_s11  ;;  %p2929_p0 = scmp.lt.s32.totalorder %s3943_s15, %s2927_s28 }
  0x15   : > { %s2679_s10 = sshll.u32 %s3072_s9, 5  ;;  %v2475_v9 = vcombine.high %v396_v6, %v400_v7  ;;  %v2474_v11 = vcombine.low %v396_v6, %v400_v7  ;;  %v388_v12 = vld [vmem:[%s3995_s2 + $0x180] sm:$0xff]  ;;  %v2477_v14 = vcombine.high %v397_v8, %v401_v10  ;;  %v2476_v15 = vcombine.low %v397_v8, %v401_v10  ;;  %v389_v17 = vld [vmem:[%s3995_s2 + $0x188] sm:$0xff]  ;;  %s2417_s20 = sshll.u32 %s3072_s9, 2 }
  0x16   : > { %s3078_s13 = scalar_lea.vmem %s3993_s0, %s2679_s10  ;;  %v392_v13 = vld [vmem:[%s3995_s2 + $0x1a0] sm:$0xff]  ;;  %v393_v18 = vld [vmem:[%s3995_s2 + $0x1a8] sm:$0xff]  ;;  %s266_s29 = scalar_lea.vmem %s3994_s1, %s2417_s20 }
  0x17   : > { %v3081_v0 = vld [vmem:[%s3078_s13] sm:$0xff]  ;;  %v3084_v1 = vld [vmem:[%s3078_s13 + $0x8] sm:$0xff]  ;;  %v3089_v3 = vld [vmem:[%s3078_s13 + $0x10] sm:$0xff]  ;;  %v2467_v16 = vcombine.high %v388_v12, %v392_v13  ;;  %1150 = vmatprep.subr.bf16.mxu0 %v2475_v9  ;;  %v2469_v20 = vcombine.high %v389_v17, %v393_v18  ;;  %1193 = vmatprep.subr.bf16.mxu1 %v2477_v14  ;;  %v2466_v24 = vcombine.low %v388_v12, %v392_v13  ;;  %s2922_s20 = scalar_lea.vmem %s3943_s15, 512 }
  0x18   : > { %v272_v2 = vadd.f32 %v3084_v1, %v3081_v0  ;;  %v3092_v4 = vld [vmem:[%s3078_s13 + $0x18] sm:$0xff]  ;;  %v380_v19 = vld [vmem:[%s3995_s2 + $0x140] sm:$0xff]  ;;  %v381_v22 = vld [vmem:[%s3995_s2 + $0x148] sm:$0xff]  ;;  %1151 = vmatpush1.bf16.msra.mxu0 %v2474_v11  ;;  %1194 = vmatpush1.bf16.msra.mxu1 %v2476_v15  ;;  %v2468_v25 = vcombine.low %v389_v17, %v393_v18  ;;  %p2923_p11 = scmp.ne.s32.totalorder %s3943_s15, %s2922_s20 }
  0x19   : > { %v275_v5 = vadd.f32 %v3092_v4, %v3089_v3  ;;  %v384_v21 = vld [vmem:[%s3995_s2 + $0x160] sm:$0xff]  ;;  %v385_v23 = vld [vmem:[%s3995_s2 + $0x168] sm:$0xff]  ;;  %1152 = vmatprep.subr.bf16.mxu0 %v2467_v16  ;;  %1195 = vmatprep.subr.bf16.mxu1 %v2469_v20 }
  0x1a   : > { %273 = vadd.xlane.f32.xlu0 %v272_v2  ;;  %v2459_v26 = vcombine.high %v380_v19, %v384_v21  ;;  %v2461_v27 = vcombine.high %v381_v22, %v385_v23  ;;  %v372_v28 = vld [vmem:[%s3995_s2 + $0x100] sm:$0xff]  ;;  %v373_v30 = vld [vmem:[%s3995_s2 + $0x108] sm:$0xff]  ;;  %v2458_v32 = vcombine.low %v380_v19, %v384_v21  ;;  %v2460_v33 = vcombine.low %v381_v22, %v385_v23  ;;  %p2924_p12 = pnand %p2923_p11, %p3060_p5 }
  0x1b   : > { %v376_v29 = vld [vmem:[%s3995_s2 + $0x120] sm:$0xff]  ;;  %v377_v31 = vld [vmem:[%s3995_s2 + $0x128] sm:$0xff] }
  0x1c   : > { %1153 = vmatpush1.bf16.msra.mxu0 %v2466_v24  ;;  %1196 = vmatpush1.bf16.msra.mxu1 %v2468_v25  ;;  %v2451_v34 = vcombine.high %v372_v28, %v376_v29  ;;  %v2453_v35 = vcombine.high %v373_v30, %v377_v31  ;;  %v364_v36 = vld [vmem:[%s3995_s2 + $0xc0] sm:$0xff]  ;;  %v365_v38 = vld [vmem:[%s3995_s2 + $0xc8] sm:$0xff]  ;;  %v2450_v40 = vcombine.low %v372_v28, %v376_v29  ;;  %p2925_p13 = pneg %p2924_p12 }
  0x1d   : > { %1154 = vmatprep.subr.bf16.mxu0 %v2459_v26  ;;  %1197 = vmatprep.subr.bf16.mxu1 %v2461_v27  ;;  %v368_v37 = vld [vmem:[%s3995_s2 + $0xe0] sm:$0xff]  ;;  %v369_v39 = vld [vmem:[%s3995_s2 + $0xe8] sm:$0xff]  ;;  %v2452_v43 = vcombine.low %v373_v30, %v377_v31 }
  0x1e   : > { %276 = vadd.xlane.f32.xlu0 %v275_v5  ;;  %v356_v41 = vld [vmem:[%s3995_s2 + $0x80] sm:$0xff]  ;;  %v2443_v44 = vcombine.high %v364_v36, %v368_v37  ;;  %v357_v45 = vld [vmem:[%s3995_s2 + $0x88] sm:$0xff]  ;;  %v2445_v47 = vcombine.high %v365_v38, %v369_v39  ;;  %v2442_v48 = vcombine.low %v364_v36, %v368_v37  ;;  %v2444_v51 = vcombine.low %v365_v38, %v369_v39 }
  0x1f   : > { %v360_v42 = vld [vmem:[%s3995_s2 + $0xa0] sm:$0xff]  ;;  %v361_v46 = vld [vmem:[%s3995_s2 + $0xa8] sm:$0xff] }
  0x20   : > { %1155 = vmatpush1.bf16.msra.mxu0 %v2458_v32  ;;  %1198 = vmatpush1.bf16.msra.mxu1 %v2460_v33  ;;  %v348_v49 = vld [vmem:[%s3995_s2 + $0x40] sm:$0xff]  ;;  %v2435_v52 = vcombine.high %v356_v41, %v360_v42  ;;  %v349_v53 = vld [vmem:[%s3995_s2 + $0x48] sm:$0xff]  ;;  %v2437_v55 = vcombine.high %v357_v45, %v361_v46  ;;  %v2434_v56 = vcombine.low %v356_v41, %v360_v42 }
  0x21   : > { %1156 = vmatprep.subr.bf16.mxu0 %v2451_v34  ;;  %1199 = vmatprep.subr.bf16.mxu1 %v2453_v35  ;;  %v352_v50 = vld [vmem:[%s3995_s2 + $0x60] sm:$0xff]  ;;  %v353_v54 = vld [vmem:[%s3995_s2 + $0x68] sm:$0xff]  ;;  %v2436_v59 = vcombine.low %v357_v45, %v361_v46 }
  0x22   : > { %v340_v57 = vld [vmem:[%s3995_s2] sm:$0xff]  ;;  %v2427_v60 = vcombine.high %v348_v49, %v352_v50  ;;  %v341_v61 = vld [vmem:[%s3995_s2 + $0x8] sm:$0xff]  ;;  %v2429_v63 = vcombine.high %v349_v53, %v353_v54  ;;  %v2426_v2 = vcombine.low %v348_v49, %v352_v50  ;;  %v2428_v5 = vcombine.low %v349_v53, %v353_v54 }
  0x23   : > { %v344_v58 = vld [vmem:[%s3995_s2 + $0x20] sm:$0xff]  ;;  %v345_v62 = vld [vmem:[%s3995_s2 + $0x28] sm:$0xff] }
  0x24   : > { %1157 = vmatpush1.bf16.msra.mxu0 %v2450_v40  ;;  %1200 = vmatpush1.bf16.msra.mxu1 %v2452_v43  ;;  %v2419_v6 = vcombine.high %v340_v57, %v344_v58  ;;  %v2421_v7 = vcombine.high %v341_v61, %v345_v62  ;;  %v460_v8 = vld [vmem:[%s3995_s2 + $0x3c0] sm:$0xff]  ;;  %v461_v10 = vld [vmem:[%s3995_s2 + $0x3c8] sm:$0xff]  ;;  %v2418_v12 = vcombine.low %v340_v57, %v344_v58 }
  0x25   : > { %1158 = vmatprep.subr.bf16.mxu0 %v2443_v44  ;;  %1201 = vmatprep.subr.bf16.mxu1 %v2445_v47  ;;  %v464_v9 = vld [vmem:[%s3995_s2 + $0x3e0] sm:$0xff]  ;;  %v465_v11 = vld [vmem:[%s3995_s2 + $0x3e8] sm:$0xff]  ;;  %v2420_v13 = vcombine.low %v341_v61, %v345_v62 }
  0x26   : > { %v2539_v14 = vcombine.high %v460_v8, %v464_v9  ;;  %v2541_v15 = vcombine.high %v461_v10, %v465_v11  ;;  %v2538_v16 = vcombine.low %v460_v8, %v464_v9  ;;  %v2540_v17 = vcombine.low %v461_v10, %v465_v11  ;;  %v452_v30 = vld [vmem:[%s3995_s2 + $0x380] sm:$0xff]  ;;  %v457_v32 = vld [vmem:[%s3995_s2 + $0x3a8] sm:$0xff] }
  0x27   : > { %v444_v36 = vld [vmem:[%s3995_s2 + $0x340] sm:$0xff]  ;;  %v445_v38 = vld [vmem:[%s3995_s2 + $0x348] sm:$0xff] }
  0x28   : > { %1159 = vmatpush1.bf16.msra.mxu0 %v2442_v48  ;;  %1202 = vmatpush1.bf16.msra.mxu1 %v2444_v51  ;;  %v448_v37 = vld [vmem:[%s3995_s2 + $0x360] sm:$0xff]  ;;  %v449_v40 = vld [vmem:[%s3995_s2 + $0x368] sm:$0xff] }
  0x29   : > { %1160 = vmatprep.subr.bf16.mxu0 %v2435_v52  ;;  %1203 = vmatprep.subr.bf16.mxu1 %v2437_v55  ;;  %v2523_v39 = vcombine.high %v444_v36, %v448_v37  ;;  %v2525_v41 = vcombine.high %v445_v38, %v449_v40  ;;  %v2522_v42 = vcombine.low %v444_v36, %v448_v37  ;;  %v436_v44 = vld [vmem:[%s3995_s2 + $0x300] sm:$0xff]  ;;  %v437_v46 = vld [vmem:[%s3995_s2 + $0x308] sm:$0xff] }
  0x2a   : > { %v2524_v43 = vcombine.low %v445_v38, %v449_v40  ;;  %v440_v45 = vld [vmem:[%s3995_s2 + $0x320] sm:$0xff]  ;;  %v441_v48 = vld [vmem:[%s3995_s2 + $0x328] sm:$0xff]  ;;  %v310_v38 = vlaneseq }
  0x2b   : > { %v2515_v47 = vcombine.high %v436_v44, %v440_v45  ;;  %v2514_v49 = vcombine.low %v436_v44, %v440_v45  ;;  %v428_v50 = vld [vmem:[%s3995_s2 + $0x2c0] sm:$0xff]  ;;  %v2517_v52 = vcombine.high %v437_v46, %v441_v48  ;;  %v2516_v53 = vcombine.low %v437_v46, %v441_v48  ;;  %v429_v55 = vld [vmem:[%s3995_s2 + $0x2c8] sm:$0xff] }
  0x2c   : > { %1161 = vmatpush1.bf16.msra.mxu0 %v2434_v56  ;;  %1204 = vmatpush1.bf16.msra.mxu1 %v2436_v59  ;;  %v432_v51 = vld [vmem:[%s3995_s2 + $0x2e0] sm:$0xff]  ;;  %v433_v56 = vld [vmem:[%s3995_s2 + $0x2e8] sm:$0xff] }
  0x2d   : > { %1162 = vmatprep.subr.bf16.mxu0 %v2427_v60  ;;  %1205 = vmatprep.subr.bf16.mxu1 %v2429_v63  ;;  %v2507_v54 = vcombine.high %v428_v50, %v432_v51  ;;  %v420_v57 = vld [vmem:[%s3995_s2 + $0x280] sm:$0xff]  ;;  %v2509_v58 = vcombine.high %v429_v55, %v433_v56  ;;  %v421_v60 = vld [vmem:[%s3995_s2 + $0x288] sm:$0xff]  ;;  %v2506_v62 = vcombine.low %v428_v50, %v432_v51 }
  0x2e   : > { %v424_v59 = vld [vmem:[%s3995_s2 + $0x2a0] sm:$0xff]  ;;  %v425_v61 = vld [vmem:[%s3995_s2 + $0x2a8] sm:$0xff]  ;;  %v2508_v63 = vcombine.low %v429_v55, %v433_v56 }
  0x2f   : > { %v413_v8 = vld [vmem:[%s3995_s2 + $0x248] sm:$0xff]  ;;  %v2498_v10 = vcombine.low %v420_v57, %v424_v59  ;;  %v2500_v11 = vcombine.low %v421_v60, %v425_v61 }
  0x30   : > { %1163 = vmatpush1.bf16.msra.mxu0 %v2426_v2  ;;  %1206 = vmatpush1.bf16.msra.mxu1 %v2428_v5  ;;  %v2499_v2 = vcombine.high %v420_v57, %v424_v59  ;;  %v2501_v5 = vcombine.high %v421_v60, %v425_v61  ;;  %v417_v9 = vld [vmem:[%s3995_s2 + $0x268] sm:$0xff] }
  0x31   : > { %1164 = vmatprep.subr.bf16.mxu0 %v2419_v6  ;;  %1207 = vmatprep.subr.bf16.mxu1 %v2421_v7  ;;  %v412_v6 = vld [vmem:[%s3995_s2 + $0x240] sm:$0xff] }
  0x32   : > { %v416_v7 = vld [vmem:[%s3995_s2 + $0x260] sm:$0xff] }
  0x34   : > { %1165 = vmatpush1.bf16.msra.mxu0 %v2418_v12  ;;  %1208 = vmatpush1.bf16.msra.mxu1 %v2420_v13  ;;  %v2491_v12 = vcombine.high %v412_v6, %v416_v7  ;;  %v2493_v13 = vcombine.high %v413_v8, %v417_v9 }
  0x35   : > { %1166 = vmatprep.subr.bf16.mxu0 %v2539_v14  ;;  %1209 = vmatprep.subr.bf16.mxu1 %v2541_v15  ;;  %v404_v14 = vld [vmem:[%s3995_s2 + $0x200] sm:$0xff] }
  0x36   : > { %v408_v15 = vld [vmem:[%s3995_s2 + $0x220] sm:$0xff] }
  0x38   : > { %1167 = vmatpush2.bf16.msra.mxu0 %v2538_v16  ;;  %1210 = vmatpush2.bf16.msra.mxu1 %v2540_v17  ;;  %v405_v16 = vld [vmem:[%s3995_s2 + $0x208] sm:$0xff] }
  0x39   : > { %v409_v17 = vld [vmem:[%s3995_s2 + $0x228] sm:$0xff] }
  0xa3   : > { %v274_v18 = vpop.xlane.xlu0 %273 }
  0xa4   : > { %v279_v19 = vmul.f32 0.00390625, %v274_v18  ;;  %v2490_v18 = vcombine.low %v412_v6, %v416_v7 }
  0xa6   : > { %v3205_v20 = vsub.f32 %v3081_v0, %v279_v19  ;;  %v3208_v21 = vsub.f32 %v3084_v1, %v279_v19  ;;  %v2492_v19 = vcombine.low %v413_v8, %v417_v9  ;;  %v386_v8 = vld [vmem:[%s3995_s2 + $0x170] sm:$0xff]  ;;  %v383_v9 = vld [vmem:[%s3995_s2 + $0x158] sm:$0xff] }
  0xa7   : > { %v277_v22 = vpop.xlane.xlu0 %276 }
  0xa8   : > { %v280_v23 = vmul.f32 0.00390625, %v277_v22  ;;  %v285_v24 = vmul.f32 %v3205_v20, %v3205_v20  ;;  %v286_v25 = vmul.f32 %v3208_v21, %v3208_v21  ;;  %v2483_v22 = vcombine.high %v404_v14, %v408_v15 }
  0xaa   : > { %v3215_v26 = vsub.f32 %v3089_v3, %v280_v23  ;;  %v3218_v27 = vsub.f32 %v3092_v4, %v280_v23  ;;  %v289_v28 = vadd.f32 %v286_v25, %v285_v24  ;;  %v456_v3 = vld [vmem:[%s3995_s2 + $0x3a0] sm:$0xff]  ;;  %v453_v4 = vld [vmem:[%s3995_s2 + $0x388] sm:$0xff]  ;;  %v2485_v23 = vcombine.high %v405_v16, %v409_v17 }
  0xab   : > { %v2531_v31 = vcombine.high %v452_v30, %v456_v3  ;;  %v2533_v33 = vcombine.high %v453_v4, %v457_v32  ;;  %v2530_v34 = vcombine.low %v452_v30, %v456_v3  ;;  %v2532_v35 = vcombine.low %v453_v4, %v457_v32  ;;  %v403_v30 = vld [vmem:[%s3995_s2 + $0x1f8] sm:$0xff] }
  0xac   : > { %290 = vadd.xlane.f32.xlu1 %v289_v28  ;;  %v287_v0 = vmul.f32 %v3215_v26, %v3215_v26  ;;  %v288_v1 = vmul.f32 %v3218_v27, %v3218_v27  ;;  %v2482_v24 = vcombine.low %v404_v14, %v408_v15  ;;  %v2484_v25 = vcombine.low %v405_v16, %v409_v17  ;;  %v398_v28 = vld [vmem:[%s3995_s2 + $0x1d0] sm:$0xff]  ;;  %v375_v17 = vld [vmem:[%s3995_s2 + $0x118] sm:$0xff] }
  0xad   : > { %1168 = vmatprep.subr.bf16.mxu0 %v2531_v31  ;;  %1211 = vmatprep.subr.bf16.mxu1 %v2533_v33  ;;  %v374_v15 = vld [vmem:[%s3995_s2 + $0x110] sm:$0xff] }
  0xae   : > { %v292_v29 = vadd.f32 %v288_v1, %v287_v0  ;;  %1169 = vmatpush2.bf16.msra.mxu0 %v2530_v34  ;;  %1212 = vmatpush2.bf16.msra.mxu1 %v2532_v35  ;;  %v402_v0 = vld [vmem:[%s3995_s2 + $0x1f0] sm:$0xff]  ;;  %v399_v1 = vld [vmem:[%s3995_s2 + $0x1d8] sm:$0xff] }
  0xaf   : > { %1170 = vmatprep.subr.bf16.mxu0 %v2523_v39  ;;  %1213 = vmatprep.subr.bf16.mxu1 %v2525_v41  ;;  %v2478_v3 = vcombine.low %v398_v28, %v402_v0  ;;  %v2480_v4 = vcombine.low %v399_v1, %v403_v30  ;;  %v2481_v31 = vcombine.high %v399_v1, %v403_v30  ;;  %v271_v39 = vld [vmem:[%s266_s29] sm:$0xf]  ;;  %v3324_v41 = vshrl.u32 %v310_v38, 7  ;;  %v378_v16 = vld [vmem:[%s3995_s2 + $0x130] sm:$0xff]  ;;  %v371_v1 = vld [vmem:[%s3995_s2 + $0xf8] sm:$0xff]  ;;  %s2928_s29 = scalar_lea.vmem %s2927_s28, 1024 }
  0xb0   : > { %293 = vadd.xlane.f32.xlu1 %v292_v29  ;;  %v2479_v29 = vcombine.high %v398_v28, %v402_v0  ;;  %v306_v40 = vrot.slane %v271_v39, 2  ;;  %v370_v28 = vld [vmem:[%s3995_s2 + $0xf0] sm:$0xff]  ;;  %v367_v0 = vld [vmem:[%s3995_s2 + $0xd8] sm:$0xff]  ;;  %p2930_p1 = scmp.lt.s32.totalorder %s2928_s29, %s2922_s20 }
  0xb1   : > { %v3330_v44 = vsub.s32 0, %v3324_v41 }
  0xb2   : > { %1171 = vmatpush2.bf16.msra.mxu0 %v2522_v42  ;;  %1214 = vmatpush2.bf16.msra.mxu1 %v2524_v43  ;;  %v308_v42 = vadd.f32 1.0, %v306_v40  ;;  %v3327_v43 = vsub.s32 1, %v3324_v41  ;;  %v354_v40 = vld [vmem:[%s3995_s2 + $0x70] sm:$0xff]  ;;  %p2931_p2 = por %p2930_p1, %p2929_p0 }
  0xb3   : > { %1172 = vmatprep.subr.bf16.mxu0 %v2515_v47  ;;  %1215 = vmatprep.subr.bf16.mxu1 %v2517_v52  ;;  %v327_v52 = vrot.slane %v271_v39, %v3330_v44 }
  0xb4   : > { %v317_v47 = vrot.slane %v308_v42, %v3327_v43  ;;  %v331_v51 = vrot.slane %v271_v39, %v3327_v43  ;;  %v350_v39 = vld [vmem:[%s3995_s2 + $0x50] sm:$0xff]  ;;  %p2932_p3 = pnand %p2931_p2, %p2925_p13 }
  0xb6   : > { %1173 = vmatpush2.bf16.msra.mxu0 %v2514_v49  ;;  %1216 = vmatpush2.bf16.msra.mxu1 %v2516_v53  ;;  %v313_v49 = vrot.slane %v308_v42, %v3330_v44  ;;  %v351_v42 = vld [vmem:[%s3995_s2 + $0x58] sm:$0xff] }
  0xb7   : > { %1174 = vmatprep.subr.bf16.mxu0 %v2507_v54  ;;  %1217 = vmatprep.subr.bf16.mxu1 %v2509_v58 }
  0xba   : > { %1175 = vmatpush2.bf16.msra.mxu0 %v2506_v62  ;;  %1218 = vmatpush2.bf16.msra.mxu1 %v2508_v63  ;;  %v394_v62 = vld [vmem:[%s3995_s2 + $0x1b0] sm:$0xff] }
  0xbb   : > { %1176 = vmatprep.subr.bf16.mxu0 %v2499_v2  ;;  %1219 = vmatprep.subr.bf16.mxu1 %v2501_v5  ;;  %v382_v5 = vld [vmem:[%s3995_s2 + $0x150] sm:$0xff] }
  0xbe   : > { %1177 = vmatpush2.bf16.msra.mxu0 %v2498_v10  ;;  %1220 = vmatpush2.bf16.msra.mxu1 %v2500_v11  ;;  %v387_v10 = vld [vmem:[%s3995_s2 + $0x178] sm:$0xff] }
  0xbf   : > { %1178 = vmatprep.subr.bf16.mxu0 %v2491_v12  ;;  %1221 = vmatprep.subr.bf16.mxu1 %v2493_v13  ;;  %v2463_v13 = vcombine.high %v382_v5, %v386_v8  ;;  %v2465_v14 = vcombine.high %v383_v9, %v387_v10 }
  0xc2   : > { %1179 = vmatpush2.bf16.msra.mxu0 %v2490_v18  ;;  %1222 = vmatpush2.bf16.msra.mxu1 %v2492_v19  ;;  %v379_v18 = vld [vmem:[%s3995_s2 + $0x138] sm:$0xff]  ;;  %v2462_v19 = vcombine.low %v382_v5, %v386_v8 }
  0xc3   : > { %1180 = vmatprep.subr.bf16.mxu0 %v2483_v22  ;;  %1223 = vmatprep.subr.bf16.mxu1 %v2485_v23  ;;  %v2464_v22 = vcombine.low %v383_v9, %v387_v10  ;;  %v2455_v23 = vcombine.high %v374_v15, %v378_v16  ;;  %v2456_v30 = vcombine.low %v375_v17, %v379_v18  ;;  %v455_v5 = vld [vmem:[%s3995_s2 + $0x398] sm:$0xff] }
  0xc6   : > { %1181 = vmatpush2.bf16.msra.mxu0 %v2482_v24  ;;  %1224 = vmatpush2.bf16.msra.mxu1 %v2484_v25  ;;  %v2457_v24 = vcombine.high %v375_v17, %v379_v18  ;;  %v366_v25 = vld [vmem:[%s3995_s2 + $0xd0] sm:$0xff] }
  0xc7   : > { %1236 = vmatprep.subr.bf16.mxu0 %v2479_v29  ;;  %1279 = vmatprep.subr.bf16.mxu1 %v2481_v31  ;;  %v2454_v29 = vcombine.low %v374_v15, %v378_v16  ;;  %v358_v31 = vld [vmem:[%s3995_s2 + $0x90] sm:$0xff] }
 0x135   : > { %v291_v32 = vpop.xlane.xlu1 %290 }
 0x136   : > { %v295_v33 = vmul.f32 0.00390625, %v291_v32  ;;  %v362_v32 = vld [vmem:[%s3995_s2 + $0xb0] sm:$0xff] }
 0x138   : > { %v297_v34 = vadd.f32 1e-06, %v295_v33  ;;  %v359_v33 = vld [vmem:[%s3995_s2 + $0x98] sm:$0xff] }
 0x139   : > { %v294_v35 = vpop.xlane.xlu1 %293 }
 0x13a   : > { %2914 = vrsqrt.f32 %v297_v34  ;;  %v296_v36 = vmul.f32 0.00390625, %v294_v35  ;;  %v363_v34 = vld [vmem:[%s3995_s2 + $0xb8] sm:$0xff]  ;;  %v2446_v35 = vcombine.low %v366_v25, %v370_v28 }
 0x13b   : > { %v2441_v38 = vcombine.high %v359_v33, %v363_v34 }
 0x13c   : > { %v298_v37 = vadd.f32 1e-06, %v296_v36  ;;  %v2448_v36 = vcombine.low %v367_v0, %v371_v1 }
 0x13e   : > { %2916 = vrsqrt.f32 %v298_v37  ;;  %v2439_v37 = vcombine.high %v358_v31, %v362_v32 }
 0x147   : > { %v2915_v45 = vpop.eup %2914 }
 0x148   : > { %v302_v46 = vmul.f32 %v2915_v45, %v3208_v21  ;;  %v301_v48 = vmul.f32 %v2915_v45, %v3205_v20  ;;  %v390_v20 = vld [vmem:[%s3995_s2 + $0x190] sm:$0xff]  ;;  %v355_v45 = vld [vmem:[%s3995_s2 + $0x78] sm:$0xff] }
 0x149   : > { %v2471_v6 = vcombine.high %v390_v20, %v394_v62  ;;  %v2470_v11 = vcombine.low %v390_v20, %v394_v62 }
 0x14a   : > { %v321_v54 = vmul.f32 %v317_v47, %v302_v46  ;;  %v320_v56 = vmul.f32 %v313_v49, %v301_v48  ;;  %v2438_v46 = vcombine.low %v358_v31, %v362_v32  ;;  %v2431_v48 = vcombine.high %v350_v39, %v354_v40 }
 0x14b   : > { %v2917_v50 = vpop.eup %2916 }
 0x14c   : > { %v304_v53 = vmul.f32 %v2917_v50, %v3218_v27  ;;  %v303_v55 = vmul.f32 %v2917_v50, %v3215_v26  ;;  %v335_v21 = vadd.f32 %v331_v51, %v321_v54  ;;  %v334_v60 = vadd.f32 %v327_v52, %v320_v56  ;;  %v391_v27 = vld [vmem:[%s3995_s2 + $0x198] sm:$0xff]  ;;  %v342_v50 = vld [vmem:[%s3995_s2 + $0x10] sm:$0xff] }
 0x14d   : > { %v395_v26 = vld [vmem:[%s3995_s2 + $0x1b8] sm:$0xff]  ;;  %v2430_v54 = vcombine.low %v350_v39, %v354_v40 }
 0x14e   : > { %v323_v57 = vmul.f32 %v317_v47, %v304_v53  ;;  %v322_v58 = vmul.f32 %v313_v49, %v303_v55  ;;  %v2473_v7 = vcombine.high %v391_v27, %v395_v26  ;;  %v2472_v12 = vcombine.low %v391_v27, %v395_v26  ;;  %v347_v53 = vld [vmem:[%s3995_s2 + $0x38] sm:$0xff]  ;;  %v454_v26 = vld [vmem:[%s3995_s2 + $0x390] sm:$0xff] }
 0x14f   : > { %v2440_v47 = vcombine.low %v359_v33, %v363_v34  ;;  %v2433_v49 = vcombine.high %v351_v42, %v355_v45  ;;  %v2432_v55 = vcombine.low %v351_v42, %v355_v45 }
 0x150   : > { %v337_v59 = vadd.f32 %v331_v51, %v323_v57  ;;  %v336_v61 = vadd.f32 %v327_v52, %v322_v58  ;;  %v346_v51 = vld [vmem:[%s3995_s2 + $0x30] sm:$0xff]  ;;  %v343_v52 = vld [vmem:[%s3995_s2 + $0x18] sm:$0xff] }
 0x151   : > { %v2423_v56 = vcombine.high %v342_v50, %v346_v51  ;;  %v2425_v57 = vcombine.high %v343_v52, %v347_v53  ;;  %v462_v58 = vld [vmem:[%s3995_s2 + $0x3d0] sm:$0xff]  ;;  %v2424_v20 = vcombine.low %v343_v52, %v347_v53 }
 0x152   : > { %v339_v63 = vpack.c.bf16 %v337_v59, %v335_v21  ;;  %v3352_v2 = vpack.c.bf16 %v336_v61, %v334_v60  ;;  %v466_v21 = vld [vmem:[%s3995_s2 + $0x3f0] sm:$0xff]  ;;  %v463_v59 = vld [vmem:[%s3995_s2 + $0x3d8] sm:$0xff]  ;;  %v2422_v61 = vcombine.low %v342_v50, %v346_v51 }
 0x153   : > { %v467_v60 = vld [vmem:[%s3995_s2 + $0x3f8] sm:$0xff]  ;;  %v2543_v62 = vcombine.high %v462_v58, %v466_v21 }
 0x154   : > { %1182 = vmatprep.mubr.bf16.mxu0 %v339_v63  ;;  %1225 = vmatprep.mubr.bf16.mxu1 %v339_v63  ;;  %v2545_v27 = vcombine.high %v463_v59, %v467_v60  ;;  %v2544_v8 = vcombine.low %v463_v59, %v467_v60 }
 0x155   : > { %1183 = vmatmul.mubr.bf16.vlgmr.msra.gmra.mxu0 %v3352_v2  ;;  %1226 = vmatmul.mubr.bf16.vlgmr.msra.gmra.mxu1 %v3352_v2 }
 0x156   : > { %1237 = vmatpush1.bf16.msra.mxu0 %v2478_v3  ;;  %1280 = vmatpush1.bf16.msra.mxu1 %v2480_v4  ;;  %v2447_v3 = vcombine.high %v366_v25, %v370_v28  ;;  %v2449_v4 = vcombine.high %v367_v0, %v371_v1 }
 0x157   : > { %1268 = vmatprep.mubr.bf16.mxu0 %v339_v63  ;;  %1311 = vmatprep.mubr.bf16.mxu1 %v339_v63  ;;  %v458_v63 = vld [vmem:[%s3995_s2 + $0x3b0] sm:$0xff] }
 0x158   : > { %1238 = vmatprep.subr.bf16.mxu0 %v2471_v6  ;;  %1281 = vmatprep.subr.bf16.mxu1 %v2473_v7  ;;  %v459_v6 = vld [vmem:[%s3995_s2 + $0x3b8] sm:$0xff]  ;;  %v2542_v7 = vcombine.low %v462_v58, %v466_v21  ;;  %v2535_v9 = vcombine.high %v454_v26, %v458_v63  ;;  %v2534_v15 = vcombine.low %v454_v26, %v458_v63 }
 0x159   : > { %v2537_v10 = vcombine.high %v455_v5, %v459_v6  ;;  %v2536_v16 = vcombine.low %v455_v5, %v459_v6  ;;  %v2722_v26 = vld [vmem:[%s3997_s4 + $0x70] ss:$8 sps:$4 sm:$0xff]   ;;  %v2730_v5 = vld [vmem:[%s3997_s4 + $0x64] ss:$8 sps:$4 sm:$0xff]  }
 0x15a   : > { %1239 = vmatpush1.bf16.msra.mxu0 %v2470_v11  ;;  %1282 = vmatpush1.bf16.msra.mxu1 %v2472_v12  ;;  %v446_v11 = vld [vmem:[%s3995_s2 + $0x350] sm:$0xff]  ;;  %v2733_v6 = vld [vmem:[%s3997_s4 + $0x164] ss:$8 sps:$4 sm:$0xff]  }
 0x15b   : > { %1240 = vmatprep.subr.bf16.mxu0 %v2463_v13  ;;  %1283 = vmatprep.subr.bf16.mxu1 %v2465_v14  ;;  %v450_v12 = vld [vmem:[%s3995_s2 + $0x370] sm:$0xff]  ;;  %v447_v13 = vld [vmem:[%s3995_s2 + $0x358] sm:$0xff] }
 0x15c   : > { %v451_v14 = vld [vmem:[%s3995_s2 + $0x378] sm:$0xff]  ;;  %v2527_v17 = vcombine.high %v446_v11, %v450_v12  ;;  %v2526_v25 = vcombine.low %v446_v11, %v450_v12  ;;  %v2742_v12 = vld [vmem:[%s3997_s4 + $0x44] ss:$8 sps:$4 sm:$0xff]  }
 0x15d   : > { %v2529_v18 = vcombine.high %v447_v13, %v451_v14  ;;  %v2528_v28 = vcombine.low %v447_v13, %v451_v14  ;;  %v2725_v63 = vld [vmem:[%s3997_s4 + $0x170] ss:$8 sps:$4 sm:$0xff]   ;;  %v2745_v13 = vld [vmem:[%s3997_s4 + $0x144] ss:$8 sps:$4 sm:$0xff]   ;;  %v2740_v14 = vld [vmem:[%s3997_s4 + $0x40] ss:$8 sps:$4 sm:$0xff]  }
 0x15e   : > { %1241 = vmatpush1.bf16.msra.mxu0 %v2462_v19  ;;  %1284 = vmatpush1.bf16.msra.mxu1 %v2464_v22  ;;  %v438_v19 = vld [vmem:[%s3995_s2 + $0x310] sm:$0xff] }
 0x15f   : > { %1242 = vmatprep.subr.bf16.mxu0 %v2455_v23  ;;  %1285 = vmatprep.subr.bf16.mxu1 %v2457_v24  ;;  %v442_v22 = vld [vmem:[%s3995_s2 + $0x330] sm:$0xff]  ;;  %v439_v23 = vld [vmem:[%s3995_s2 + $0x318] sm:$0xff] }
 0x160   : > { %v443_v24 = vld [vmem:[%s3995_s2 + $0x338] sm:$0xff]  ;;  %v2519_v0 = vcombine.high %v438_v19, %v442_v22  ;;  %v2518_v31 = vcombine.low %v438_v19, %v442_v22  ;;  %v2754_v22 = vld [vmem:[%s3997_s4 + $0x24] ss:$8 sps:$4 sm:$0xff]  }
 0x161   : > { %v2521_v1 = vcombine.high %v439_v23, %v443_v24  ;;  %v2520_v32 = vcombine.low %v439_v23, %v443_v24  ;;  %v2737_v11 = vld [vmem:[%s3997_s4 + $0x150] ss:$8 sps:$4 sm:$0xff]   ;;  %v2757_v23 = vld [vmem:[%s3997_s4 + $0x124] ss:$8 sps:$4 sm:$0xff]   ;;  %v2752_v24 = vld [vmem:[%s3997_s4 + $0x20] ss:$8 sps:$4 sm:$0xff]  }
 0x162   : > { %1243 = vmatpush1.bf16.msra.mxu0 %v2454_v29  ;;  %1286 = vmatpush1.bf16.msra.mxu1 %v2456_v30  ;;  %v430_v29 = vld [vmem:[%s3995_s2 + $0x2d0] sm:$0xff] }
 0x163   : > { %1244 = vmatprep.subr.bf16.mxu0 %v2447_v3  ;;  %1287 = vmatprep.subr.bf16.mxu1 %v2449_v4  ;;  %v434_v30 = vld [vmem:[%s3995_s2 + $0x2f0] sm:$0xff]  ;;  %v431_v3 = vld [vmem:[%s3995_s2 + $0x2d8] sm:$0xff] }
 0x164   : > { %v435_v4 = vld [vmem:[%s3995_s2 + $0x2f8] sm:$0xff]  ;;  %v2511_v33 = vcombine.high %v430_v29, %v434_v30  ;;  %v2510_v39 = vcombine.low %v430_v29, %v434_v30  ;;  %v2766_v30 = vld [vmem:[%s3997_s4 + $0x4] ss:$8 sps:$4 sm:$0xff]  }
 0x165   : > { %v2513_v34 = vcombine.high %v431_v3, %v435_v4  ;;  %v2512_v40 = vcombine.low %v431_v3, %v435_v4  ;;  %v2749_v19 = vld [vmem:[%s3997_s4 + $0x130] ss:$8 sps:$4 sm:$0xff]   ;;  %v2769_v3 = vld [vmem:[%s3997_s4 + $0x104] ss:$8 sps:$4 sm:$0xff]   ;;  %v2764_v4 = vld [vmem:[%s3997_s4] ss:$8 sps:$4 sm:$0xff]  }
 0x166   : > { %1245 = vmatpush1.bf16.msra.mxu0 %v2446_v35  ;;  %1288 = vmatpush1.bf16.msra.mxu1 %v2448_v36  ;;  %v422_v35 = vld [vmem:[%s3995_s2 + $0x290] sm:$0xff] }
 0x167   : > { %1246 = vmatprep.subr.bf16.mxu0 %v2439_v37  ;;  %1289 = vmatprep.subr.bf16.mxu1 %v2441_v38  ;;  %v426_v36 = vld [vmem:[%s3995_s2 + $0x2b0] sm:$0xff]  ;;  %v423_v37 = vld [vmem:[%s3995_s2 + $0x298] sm:$0xff] }
 0x168   : > { %v427_v38 = vld [vmem:[%s3995_s2 + $0x2b8] sm:$0xff]  ;;  %v2503_v42 = vcombine.high %v422_v35, %v426_v36  ;;  %v2502_v50 = vcombine.low %v422_v35, %v426_v36  ;;  %v2778_v36 = vld [vmem:[%s3997_s4 + $0xe4] ss:$8 sps:$4 sm:$0xff]  }
 0x169   : > { %v2505_v45 = vcombine.high %v423_v37, %v427_v38  ;;  %v2504_v51 = vcombine.low %v423_v37, %v427_v38  ;;  %v2761_v29 = vld [vmem:[%s3997_s4 + $0x110] ss:$8 sps:$4 sm:$0xff]   ;;  %v2781_v37 = vld [vmem:[%s3997_s4 + $0x1e4] ss:$8 sps:$4 sm:$0xff]   ;;  %v2776_v38 = vld [vmem:[%s3997_s4 + $0xe0] ss:$8 sps:$4 sm:$0xff]  }
 0x16a   : > { %1247 = vmatpush1.bf16.msra.mxu0 %v2438_v46  ;;  %1290 = vmatpush1.bf16.msra.mxu1 %v2440_v47  ;;  %v414_v46 = vld [vmem:[%s3995_s2 + $0x250] sm:$0xff] }
 0x16b   : > { %1248 = vmatprep.subr.bf16.mxu0 %v2431_v48  ;;  %1291 = vmatprep.subr.bf16.mxu1 %v2433_v49  ;;  %v418_v47 = vld [vmem:[%s3995_s2 + $0x270] sm:$0xff]  ;;  %v415_v48 = vld [vmem:[%s3995_s2 + $0x258] sm:$0xff] }
 0x16c   : > { %v419_v49 = vld [vmem:[%s3995_s2 + $0x278] sm:$0xff]  ;;  %v2495_v52 = vcombine.high %v414_v46, %v418_v47  ;;  %v2494_v58 = vcombine.low %v414_v46, %v418_v47  ;;  %v2790_v47 = vld [vmem:[%s3997_s4 + $0xc4] ss:$8 sps:$4 sm:$0xff]  }
 0x16d   : > { %v2497_v53 = vcombine.high %v415_v48, %v419_v49  ;;  %v2496_v21 = vcombine.low %v415_v48, %v419_v49  ;;  %v2773_v35 = vld [vmem:[%s3997_s4 + $0x1f0] ss:$8 sps:$4 sm:$0xff]   ;;  %v2793_v48 = vld [vmem:[%s3997_s4 + $0x1c4] ss:$8 sps:$4 sm:$0xff]   ;;  %v2788_v49 = vld [vmem:[%s3997_s4 + $0xc0] ss:$8 sps:$4 sm:$0xff]  }
 0x16e   : > { %1249 = vmatpush1.bf16.msra.mxu0 %v2430_v54  ;;  %1292 = vmatpush1.bf16.msra.mxu1 %v2432_v55  ;;  %v406_v54 = vld [vmem:[%s3995_s2 + $0x210] sm:$0xff] }
 0x16f   : > { %1250 = vmatprep.subr.bf16.mxu0 %v2423_v56  ;;  %1293 = vmatprep.subr.bf16.mxu1 %v2425_v57  ;;  %v410_v55 = vld [vmem:[%s3995_s2 + $0x230] sm:$0xff]  ;;  %v407_v56 = vld [vmem:[%s3995_s2 + $0x218] sm:$0xff] }
 0x170   : > { %v411_v57 = vld [vmem:[%s3995_s2 + $0x238] sm:$0xff]  ;;  %v2487_v59 = vcombine.high %v406_v54, %v410_v55 }
 0x171   : > { %v2489_v60 = vcombine.high %v407_v56, %v411_v57  ;;  %v2785_v46 = vld [vmem:[%s3997_s4 + $0x1d0] ss:$8 sps:$4 sm:$0xff]  }
 0x172   : > { %1251 = vmatpush1.bf16.msra.mxu0 %v2422_v61  ;;  %1294 = vmatpush1.bf16.msra.mxu1 %v2424_v20  ;;  %v2486_v61 = vcombine.low %v406_v54, %v410_v55  ;;  %v2488_v20 = vcombine.low %v407_v56, %v411_v57  ;;  %v2797_v54 = vld [vmem:[%s3997_s4 + $0x1b0] ss:$8 sps:$4 sm:$0xff]   ;;  %v2802_v55 = vld [vmem:[%s3997_s4 + $0xa4] ss:$8 sps:$4 sm:$0xff]   ;;  %v2800_v57 = vld [vmem:[%s3997_s4 + $0xa0] ss:$8 sps:$4 sm:$0xff]  }
 0x173   : > { %1252 = vmatprep.subr.bf16.mxu0 %v2543_v62  ;;  %1295 = vmatprep.subr.bf16.mxu1 %v2545_v27  ;;  %v2724_v62 = vld [vmem:[%s3997_s4 + $0x74] ss:$8 sps:$4 sm:$0xff]   ;;  %v2805_v56 = vld [vmem:[%s3997_s4 + $0x1a4] ss:$8 sps:$4 sm:$0xff]  }
 0x174   : > { %v2727_v27 = vld [vmem:[%s3997_s4 + $0x174] ss:$8 sps:$4 sm:$0xff]  }
 0x176   : > { %1253 = vmatpush2.bf16.msra.mxu0 %v2542_v7  ;;  %1296 = vmatpush2.bf16.msra.mxu1 %v2544_v8  ;;  %v2728_v7 = vld [vmem:[%s3997_s4 + $0x60] ss:$8 sps:$4 sm:$0xff]  }
 0x177   : > { %1254 = vmatprep.subr.bf16.mxu0 %v2535_v9  ;;  %1297 = vmatprep.subr.bf16.mxu1 %v2537_v10  ;;  %v2731_v8 = vld [vmem:[%s3997_s4 + $0x160] ss:$8 sps:$4 sm:$0xff]   ;;  %v2736_v9 = vld [vmem:[%s3997_s4 + $0x54] ss:$8 sps:$4 sm:$0xff]   ;;  %v2734_v10 = vld [vmem:[%s3997_s4 + $0x50] ss:$8 sps:$4 sm:$0xff]  }
 0x17a   : > { %1255 = vmatpush2.bf16.msra.mxu0 %v2534_v15  ;;  %1298 = vmatpush2.bf16.msra.mxu1 %v2536_v16  ;;  %v2743_v15 = vld [vmem:[%s3997_s4 + $0x140] ss:$8 sps:$4 sm:$0xff]   ;;  %v2748_v16 = vld [vmem:[%s3997_s4 + $0x34] ss:$8 sps:$4 sm:$0xff]  }
 0x17b   : > { %1256 = vmatprep.subr.bf16.mxu0 %v2527_v17  ;;  %1299 = vmatprep.subr.bf16.mxu1 %v2529_v18  ;;  %v2751_v17 = vld [vmem:[%s3997_s4 + $0x134] ss:$8 sps:$4 sm:$0xff]   ;;  %v2746_v18 = vld [vmem:[%s3997_s4 + $0x30] ss:$8 sps:$4 sm:$0xff]  }
 0x17e   : > { %1257 = vmatpush2.bf16.msra.mxu0 %v2526_v25  ;;  %1300 = vmatpush2.bf16.msra.mxu1 %v2528_v28  ;;  %v2755_v25 = vld [vmem:[%s3997_s4 + $0x120] ss:$8 sps:$4 sm:$0xff]   ;;  %v2760_v28 = vld [vmem:[%s3997_s4 + $0x14] ss:$8 sps:$4 sm:$0xff]  }
 0x17f   : > { %1258 = vmatprep.subr.bf16.mxu0 %v2519_v0  ;;  %1301 = vmatprep.subr.bf16.mxu1 %v2521_v1  ;;  %v2763_v0 = vld [vmem:[%s3997_s4 + $0x114] ss:$8 sps:$4 sm:$0xff]   ;;  %v2758_v1 = vld [vmem:[%s3997_s4 + $0x10] ss:$8 sps:$4 sm:$0xff]  }
 0x182   : > { %1259 = vmatpush2.bf16.msra.mxu0 %v2518_v31  ;;  %1302 = vmatpush2.bf16.msra.mxu1 %v2520_v32  ;;  %v2767_v31 = vld [vmem:[%s3997_s4 + $0x100] ss:$8 sps:$4 sm:$0xff]   ;;  %v2772_v32 = vld [vmem:[%s3997_s4 + $0xf4] ss:$8 sps:$4 sm:$0xff]  }
 0x183   : > { %1260 = vmatprep.subr.bf16.mxu0 %v2511_v33  ;;  %1303 = vmatprep.subr.bf16.mxu1 %v2513_v34  ;;  %v2775_v33 = vld [vmem:[%s3997_s4 + $0x1f4] ss:$8 sps:$4 sm:$0xff]   ;;  %v2770_v34 = vld [vmem:[%s3997_s4 + $0xf0] ss:$8 sps:$4 sm:$0xff]  }
 0x186   : > { %1261 = vmatpush2.bf16.msra.mxu0 %v2510_v39  ;;  %1304 = vmatpush2.bf16.msra.mxu1 %v2512_v40  ;;  %v2779_v39 = vld [vmem:[%s3997_s4 + $0x1e0] ss:$8 sps:$4 sm:$0xff]   ;;  %v2784_v40 = vld [vmem:[%s3997_s4 + $0xd4] ss:$8 sps:$4 sm:$0xff]  }
 0x187   : > { %1262 = vmatprep.subr.bf16.mxu0 %v2503_v42  ;;  %1305 = vmatprep.subr.bf16.mxu1 %v2505_v45  ;;  %v2787_v42 = vld [vmem:[%s3997_s4 + $0x1d4] ss:$8 sps:$4 sm:$0xff]   ;;  %v2782_v45 = vld [vmem:[%s3997_s4 + $0xd0] ss:$8 sps:$4 sm:$0xff]  }
 0x18a   : > { %1263 = vmatpush2.bf16.msra.mxu0 %v2502_v50  ;;  %1306 = vmatpush2.bf16.msra.mxu1 %v2504_v51  ;;  %v2791_v50 = vld [vmem:[%s3997_s4 + $0x1c0] ss:$8 sps:$4 sm:$0xff]   ;;  %v2796_v51 = vld [vmem:[%s3997_s4 + $0xb4] ss:$8 sps:$4 sm:$0xff]  }
 0x18b   : > { %1264 = vmatprep.subr.bf16.mxu0 %v2495_v52  ;;  %1307 = vmatprep.subr.bf16.mxu1 %v2497_v53  ;;  %v2799_v52 = vld [vmem:[%s3997_s4 + $0x1b4] ss:$8 sps:$4 sm:$0xff]   ;;  %v2794_v53 = vld [vmem:[%s3997_s4 + $0xb0] ss:$8 sps:$4 sm:$0xff]  }
 0x18e   : > { %1265 = vmatpush2.bf16.msra.mxu0 %v2494_v58  ;;  %1308 = vmatpush2.bf16.msra.mxu1 %v2496_v21  ;;  %v2803_v58 = vld [vmem:[%s3997_s4 + $0x1a0] ss:$8 sps:$4 sm:$0xff]   ;;  %v2808_v21 = vld [vmem:[%s3997_s4 + $0x94] ss:$8 sps:$4 sm:$0xff]  }
 0x18f   : > { %1266 = vmatprep.subr.bf16.mxu0 %v2487_v59  ;;  %1309 = vmatprep.subr.bf16.mxu1 %v2489_v60  ;;  %v2811_v59 = vld [vmem:[%s3997_s4 + $0x194] ss:$8 sps:$4 sm:$0xff]   ;;  %v2806_v60 = vld [vmem:[%s3997_s4 + $0x90] ss:$8 sps:$4 sm:$0xff]  }
 0x192   : > { %1267 = vmatpush2.bf16.msra.mxu0 %v2486_v61  ;;  %1310 = vmatpush2.bf16.msra.mxu1 %v2488_v20  ;;  %v2809_v61 = vld [vmem:[%s3997_s4 + $0x190] ss:$8 sps:$4 sm:$0xff]   ;;  %v2814_v20 = vld [vmem:[%s3997_s4 + $0x84] ss:$8 sps:$4 sm:$0xff]  }
 0x193   : > { %2142 = vmatprep.subr.bf16.mxu0 %v2724_v62  ;;  %2185 = vmatprep.subr.bf16.mxu1 %v2727_v27  ;;  %v2817_v62 = vld [vmem:[%s3997_s4 + $0x184] ss:$8 sps:$4 sm:$0xff]   ;;  %v2812_v27 = vld [vmem:[%s3997_s4 + $0x80] ss:$8 sps:$4 sm:$0xff]  }
 0x195   : > { %1269 = vmatmul.mubr.bf16.vlgmr.msra.gmra.mxu0 %v3352_v2  ;;  %1312 = vmatmul.mubr.bf16.vlgmr.msra.gmra.mxu1 %v3352_v2  ;;  %v2739_v2 = vld [vmem:[%s3997_s4 + $0x154] ss:$8 sps:$4 sm:$0xff]  }
 0x196   : > { %2143 = vmatpush1.bf16.msra.mxu0 %v2722_v26  ;;  %2186 = vmatpush1.bf16.msra.mxu1 %v2725_v63  ;;  %v2815_v26 = vld [vmem:[%s3997_s4 + $0x180] ss:$8 sps:$4 sm:$0xff]   ;;  %v2820_v63 = vld [vmem:[%s3997_s4 + $0x274] ss:$8 sps:$4 sm:$0xff]  }
 0x197   : > { %2144 = vmatprep.subr.bf16.mxu0 %v2730_v5  ;;  %2187 = vmatprep.subr.bf16.mxu1 %v2733_v6  ;;  %v2823_v5 = vld [vmem:[%s3997_s4 + $0x374] ss:$8 sps:$4 sm:$0xff]   ;;  %v484_v6 = vsub.s32 3, %v3324_v41 }
 0x19a   : > { %2145 = vmatpush1.bf16.msra.mxu0 %v2728_v7  ;;  %2188 = vmatpush1.bf16.msra.mxu1 %v2731_v8  ;;  %v480_v7 = vsub.s32 2, %v3324_v41  ;;  %v3729_v8 = vld [vmem:[%s3996_s3] sm:$0xff] }
 0x19b   : > { %2146 = vmatprep.subr.bf16.mxu0 %v2736_v9  ;;  %2189 = vmatprep.subr.bf16.mxu1 %v2739_v2  ;;  %v477_v9 = vrot.slane %v3729_v8, %v3327_v43  ;;  %v485_v2 = vrot.slane %v3729_v8, %v484_v6  ;;  %v2850_v6 = vld [vmem:[%s3997_s4 + $0x224] ss:$8 sps:$4 sm:$0xff]  }
 0x19e   : > { %2147 = vmatpush1.bf16.msra.mxu0 %v2734_v10  ;;  %2190 = vmatpush1.bf16.msra.mxu1 %v2737_v11  ;;  %v473_v10 = vrot.slane %v3729_v8, %v3330_v44 }
 0x19f   : > { %2148 = vmatprep.subr.bf16.mxu0 %v2742_v12  ;;  %2191 = vmatprep.subr.bf16.mxu1 %v2745_v13  ;;  %v481_v12 = vrot.slane %v3729_v8, %v480_v7  ;;  %v2853_v7 = vld [vmem:[%s3997_s4 + $0x324] ss:$8 sps:$4 sm:$0xff]  }
 0x1a2   : > { %2149 = vmatpush1.bf16.msra.mxu0 %v2740_v14  ;;  %2192 = vmatpush1.bf16.msra.mxu1 %v2743_v15 }
 0x1a3   : > { %2150 = vmatprep.subr.bf16.mxu0 %v2748_v16  ;;  %2193 = vmatprep.subr.bf16.mxu1 %v2751_v17 }
 0x1a6   : > { %2151 = vmatpush1.bf16.msra.mxu0 %v2746_v18  ;;  %2194 = vmatpush1.bf16.msra.mxu1 %v2749_v19 }
 0x1a7   : > { %2152 = vmatprep.subr.bf16.mxu0 %v2754_v22  ;;  %2195 = vmatprep.subr.bf16.mxu1 %v2757_v23 }
 0x1aa   : > { %2153 = vmatpush1.bf16.msra.mxu0 %v2752_v24  ;;  %2196 = vmatpush1.bf16.msra.mxu1 %v2755_v25 }
 0x1ab   : > { %2154 = vmatprep.subr.bf16.mxu0 %v2760_v28  ;;  %2197 = vmatprep.subr.bf16.mxu1 %v2763_v0 }
 0x1ae   : > { %2155 = vmatpush1.bf16.msra.mxu0 %v2758_v1  ;;  %2198 = vmatpush1.bf16.msra.mxu1 %v2761_v29 }
 0x1af   : > { %2156 = vmatprep.subr.bf16.mxu0 %v2766_v30  ;;  %2199 = vmatprep.subr.bf16.mxu1 %v2769_v3 }
 0x1b2   : > { %2157 = vmatpush1.bf16.msra.mxu0 %v2764_v4  ;;  %2200 = vmatpush1.bf16.msra.mxu1 %v2767_v31 }
 0x1b3   : > { %2158 = vmatprep.subr.bf16.mxu0 %v2772_v32  ;;  %2201 = vmatprep.subr.bf16.mxu1 %v2775_v33 }
 0x1b6   : > { %2159 = vmatpush2.bf16.msra.mxu0 %v2770_v34  ;;  %2202 = vmatpush2.bf16.msra.mxu1 %v2773_v35 }
 0x1b7   : > { %2160 = vmatprep.subr.bf16.mxu0 %v2778_v36  ;;  %2203 = vmatprep.subr.bf16.mxu1 %v2781_v37 }
 0x1ba   : > { %2161 = vmatpush2.bf16.msra.mxu0 %v2776_v38  ;;  %2204 = vmatpush2.bf16.msra.mxu1 %v2779_v39 }
 0x1bb   : > { %2162 = vmatprep.subr.bf16.mxu0 %v2784_v40  ;;  %2205 = vmatprep.subr.bf16.mxu1 %v2787_v42 }
 0x1be   : > { %2163 = vmatpush2.bf16.msra.mxu0 %v2782_v45  ;;  %2206 = vmatpush2.bf16.msra.mxu1 %v2785_v46 }
 0x1bf   : > { %2164 = vmatprep.subr.bf16.mxu0 %v2790_v47  ;;  %2207 = vmatprep.subr.bf16.mxu1 %v2793_v48 }
 0x1c2   : > { %2165 = vmatpush2.bf16.msra.mxu0 %v2788_v49  ;;  %2208 = vmatpush2.bf16.msra.mxu1 %v2791_v50  ;;  %v2818_v49 = vld [vmem:[%s3997_s4 + $0x270] ss:$8 sps:$4 sm:$0xff]  }
 0x1c3   : > { %2166 = vmatprep.subr.bf16.mxu0 %v2796_v51  ;;  %2209 = vmatprep.subr.bf16.mxu1 %v2799_v52  ;;  %v2821_v50 = vld [vmem:[%s3997_s4 + $0x370] ss:$8 sps:$4 sm:$0xff]  }
 0x1c6   : > { %2167 = vmatpush2.bf16.msra.mxu0 %v2794_v53  ;;  %2210 = vmatpush2.bf16.msra.mxu1 %v2797_v54  ;;  %v2826_v53 = vld [vmem:[%s3997_s4 + $0x264] ss:$8 sps:$4 sm:$0xff]  }
 0x1c7   : > { %2168 = vmatprep.subr.bf16.mxu0 %v2802_v55  ;;  %2211 = vmatprep.subr.bf16.mxu1 %v2805_v56  ;;  %v2829_v54 = vld [vmem:[%s3997_s4 + $0x364] ss:$8 sps:$4 sm:$0xff]   ;;  %v2824_v55 = vld [vmem:[%s3997_s4 + $0x260] ss:$8 sps:$4 sm:$0xff]  }
 0x1c8   : > { %v2827_v56 = vld [vmem:[%s3997_s4 + $0x360] ss:$8 sps:$4 sm:$0xff]  }
 0x1ca   : > { %2169 = vmatpush2.bf16.msra.mxu0 %v2800_v57  ;;  %2212 = vmatpush2.bf16.msra.mxu1 %v2803_v58  ;;  %v2832_v57 = vld [vmem:[%s3997_s4 + $0x254] ss:$8 sps:$4 sm:$0xff]  }
 0x1cb   : > { %2170 = vmatprep.subr.bf16.mxu0 %v2808_v21  ;;  %2213 = vmatprep.subr.bf16.mxu1 %v2811_v59  ;;  %v2835_v58 = vld [vmem:[%s3997_s4 + $0x354] ss:$8 sps:$4 sm:$0xff]   ;;  %v2830_v21 = vld [vmem:[%s3997_s4 + $0x250] ss:$8 sps:$4 sm:$0xff]  }
 0x1cc   : > { %v2833_v59 = vld [vmem:[%s3997_s4 + $0x350] ss:$8 sps:$4 sm:$0xff]  }
 0x1ce   : > { %2171 = vmatpush2.bf16.msra.mxu0 %v2806_v60  ;;  %2214 = vmatpush2.bf16.msra.mxu1 %v2809_v61  ;;  %v2838_v60 = vld [vmem:[%s3997_s4 + $0x244] ss:$8 sps:$4 sm:$0xff]  }
 0x1cf   : > { %2172 = vmatprep.subr.bf16.mxu0 %v2814_v20  ;;  %2215 = vmatprep.subr.bf16.mxu1 %v2817_v62  ;;  %v2841_v61 = vld [vmem:[%s3997_s4 + $0x344] ss:$8 sps:$4 sm:$0xff]   ;;  %v2836_v20 = vld [vmem:[%s3997_s4 + $0x240] ss:$8 sps:$4 sm:$0xff]  }
 0x1d0   : > { %v2839_v62 = vld [vmem:[%s3997_s4 + $0x340] ss:$8 sps:$4 sm:$0xff]  }
 0x1d2   : > { %2173 = vmatpush2.bf16.msra.mxu0 %v2812_v27  ;;  %2216 = vmatpush2.bf16.msra.mxu1 %v2815_v26  ;;  %v2844_v27 = vld [vmem:[%s3997_s4 + $0x234] ss:$8 sps:$4 sm:$0xff]  }
 0x1d3   : > { %2228 = vmatprep.subr.bf16.mxu0 %v2820_v63  ;;  %2271 = vmatprep.subr.bf16.mxu1 %v2823_v5  ;;  %v2847_v26 = vld [vmem:[%s3997_s4 + $0x334] ss:$8 sps:$4 sm:$0xff]   ;;  %v2842_v63 = vld [vmem:[%s3997_s4 + $0x230] ss:$8 sps:$4 sm:$0xff]  }
 0x1d4   : > { %v2845_v5 = vld [vmem:[%s3997_s4 + $0x330] ss:$8 sps:$4 sm:$0xff]  }
 0x215   : > { %v1184_v11 = vpop.f32.mrf.mxu0  ;;  %v1227_v13 = vpop.f32.mrf.mxu1 }
 0x216   : > { %v1185_v18 = vadd.f32 %v1184_v11, %v473_v10  ;;  %v1228_v19 = vadd.f32 %v1227_v13, %v481_v12  ;;  %v2859_v11 = vld [vmem:[%s3997_s4 + $0x314] ss:$8 sps:$4 sm:$0xff]   ;;  %v2857_v13 = vld [vmem:[%s3997_s4 + $0x310] ss:$8 sps:$4 sm:$0xff]  }
 0x217   : > { %v1186_v14 = vpop.f32.mrf.mxu0  ;;  %v1229_v15 = vpop.f32.mrf.mxu1 }
 0x218   : > { %v1187_v16 = vadd.f32 %v1186_v14, %v477_v9  ;;  %v1230_v17 = vadd.f32 %v1229_v15, %v485_v2  ;;  %v1322_v4 = vmax.f32 %v1185_v18, 0.0  ;;  %v1324_v31 = vmax.f32 %v1228_v19, 0.0  ;;  %v2862_v14 = vld [vmem:[%s3997_s4 + $0x204] ss:$8 sps:$4 sm:$0xff]   ;;  %v2868_v18 = vld [vmem:[%s3997_s4 + $0x2f4] ss:$8 sps:$4 sm:$0xff]  }
 0x219   : > { %v1188_v22 = vpop.f32.mrf.mxu0  ;;  %v1231_v23 = vpop.f32.mrf.mxu1  ;;  %v2865_v15 = vld [vmem:[%s3997_s4 + $0x304] ss:$8 sps:$4 sm:$0xff]   ;;  %v2871_v19 = vld [vmem:[%s3997_s4 + $0x3f4] ss:$8 sps:$4 sm:$0xff]  }
 0x21a   : > { %v1189_v24 = vadd.f32 %v1188_v22, %v473_v10  ;;  %v1232_v25 = vadd.f32 %v1231_v23, %v481_v12  ;;  %v1323_v1 = vmax.f32 %v1187_v16, 0.0  ;;  %v1325_v29 = vmax.f32 %v1230_v17, 0.0  ;;  %v2856_v10 = vld [vmem:[%s3997_s4 + $0x214] ss:$8 sps:$4 sm:$0xff]   ;;  %v2854_v12 = vld [vmem:[%s3997_s4 + $0x210] ss:$8 sps:$4 sm:$0xff]  }
 0x21b   : > { %v1190_v28 = vpop.f32.mrf.mxu0  ;;  %v1233_v0 = vpop.f32.mrf.mxu1  ;;  %v1338_v45 = vmul.f32 %v1322_v4, %v1322_v4  ;;  %v1340_v46 = vmul.f32 %v1324_v31, %v1324_v31  ;;  %v2860_v16 = vld [vmem:[%s3997_s4 + $0x200] ss:$8 sps:$4 sm:$0xff]   ;;  %v2866_v22 = vld [vmem:[%s3997_s4 + $0x2f0] ss:$8 sps:$4 sm:$0xff]   ;;  %v2886_v4 = vld [vmem:[%s3997_s4 + $0x2c4] ss:$8 sps:$4 sm:$0xff]  }
 0x21c   : > { %v1191_v30 = vadd.f32 %v1190_v28, %v477_v9  ;;  %v1234_v3 = vadd.f32 %v1233_v0, %v485_v2  ;;  %v1330_v32 = vmax.f32 %v1189_v24, 0.0  ;;  %v1332_v33 = vmax.f32 %v1232_v25, 0.0  ;;  %v2848_v9 = vld [vmem:[%s3997_s4 + $0x220] ss:$8 sps:$4 sm:$0xff]   ;;  %v2869_v23 = vld [vmem:[%s3997_s4 + $0x3f0] ss:$8 sps:$4 sm:$0xff]  }
 0x21d   : > { %v1339_v38 = vmul.f32 %v1323_v1, %v1323_v1  ;;  %v1341_v39 = vmul.f32 %v1325_v29, %v1325_v29  ;;  %v2851_v2 = vld [vmem:[%s3997_s4 + $0x320] ss:$8 sps:$4 sm:$0xff]   ;;  %v2874_v24 = vld [vmem:[%s3997_s4 + $0x2e4] ss:$8 sps:$4 sm:$0xff]   ;;  %v2880_v1 = vld [vmem:[%s3997_s4 + $0x2d4] ss:$8 sps:$4 sm:$0xff]  }
 0x21e   : > { %v1331_v34 = vmax.f32 %v1191_v30, 0.0  ;;  %v1333_v35 = vmax.f32 %v1234_v3, 0.0  ;;  %v1346_v36 = vmul.f32 %v1330_v32, %v1330_v32  ;;  %v1348_v37 = vmul.f32 %v1332_v33, %v1332_v33  ;;  %v2863_v17 = vld [vmem:[%s3997_s4 + $0x300] ss:$8 sps:$4 sm:$0xff]   ;;  %v2877_v25 = vld [vmem:[%s3997_s4 + $0x3e4] ss:$8 sps:$4 sm:$0xff]  }
 0x21f   : > { %v2872_v28 = vld [vmem:[%s3997_s4 + $0x2e0] ss:$8 sps:$4 sm:$0xff]   ;;  %v2883_v29 = vld [vmem:[%s3997_s4 + $0x3d4] ss:$8 sps:$4 sm:$0xff]   ;;  %v2878_v30 = vld [vmem:[%s3997_s4 + $0x2d0] ss:$8 sps:$4 sm:$0xff]  }
 0x220   : > { %v1347_v40 = vmul.f32 %v1331_v34, %v1331_v34  ;;  %v1349_v42 = vmul.f32 %v1333_v35, %v1333_v35  ;;  %v1354_v51 = vpack.c.bf16 %v1346_v36, %v1338_v45  ;;  %v1356_v52 = vpack.c.bf16 %v1348_v37, %v1340_v46  ;;  %v2875_v0 = vld [vmem:[%s3997_s4 + $0x3e0] ss:$8 sps:$4 sm:$0xff]   ;;  %v2881_v3 = vld [vmem:[%s3997_s4 + $0x3d0] ss:$8 sps:$4 sm:$0xff]   ;;  %v2889_v31 = vld [vmem:[%s3997_s4 + $0x3c4] ss:$8 sps:$4 sm:$0xff]  }
 0x221   : > { %v2884_v32 = vld [vmem:[%s3997_s4 + $0x2c0] ss:$8 sps:$4 sm:$0xff]   ;;  %v2892_v34 = vld [vmem:[%s3997_s4 + $0x2b4] ss:$8 sps:$4 sm:$0xff]   ;;  %v492_v36 = vsub.s32 5, %v3324_v41  ;;  %v500_v37 = vsub.s32 7, %v3324_v41 }
 0x222   : > { %v1355_v47 = vpack.c.bf16 %v1347_v40, %v1339_v38  ;;  %v1357_v48 = vpack.c.bf16 %v1349_v42, %v1341_v39  ;;  %v2887_v33 = vld [vmem:[%s3997_s4 + $0x3c0] ss:$8 sps:$4 sm:$0xff]   ;;  %v2895_v35 = vld [vmem:[%s3997_s4 + $0x3b4] ss:$8 sps:$4 sm:$0xff]   ;;  %v488_v38 = vsub.s32 4, %v3324_v41  ;;  %v496_v39 = vsub.s32 6, %v3324_v41 }
 0x223   : > { %v2890_v40 = vld [vmem:[%s3997_s4 + $0x2b0] ss:$8 sps:$4 sm:$0xff]   ;;  %v2898_v45 = vld [vmem:[%s3997_s4 + $0x2a4] ss:$8 sps:$4 sm:$0xff]   ;;  %v493_v46 = vrot.slane %v3729_v8, %v492_v36 }
 0x224   : > { %2174 = vmatprep.mubr.bf16.mxu0 %v1355_v47  ;;  %2217 = vmatprep.mubr.bf16.mxu1 %v1357_v48  ;;  %v2893_v42 = vld [vmem:[%s3997_s4 + $0x3b0] ss:$8 sps:$4 sm:$0xff]   ;;  %v2901_v41 = vld [vmem:[%s3997_s4 + $0x3a4] ss:$8 sps:$4 sm:$0xff]   ;;  %v501_v47 = vrot.slane %v3729_v8, %v500_v37  ;;  %v489_v48 = vrot.slane %v3729_v8, %v488_v38 }
 0x225   : > { %2175 = vmatmul.mubr.bf16.vlgmr.msra.gmra.mxu0 %v1354_v51  ;;  %2218 = vmatmul.mubr.bf16.vlgmr.msra.gmra.mxu1 %v1356_v52  ;;  %v2896_v52 = vld [vmem:[%s3997_s4 + $0x2a0] ss:$8 sps:$4 sm:$0xff]  }
 0x226   : > { %2229 = vmatpush1.bf16.msra.mxu0 %v2818_v49  ;;  %2272 = vmatpush1.bf16.msra.mxu1 %v2821_v50  ;;  %v497_v50 = vrot.slane %v3729_v8, %v496_v39  ;;  %v2907_v8 = vld [vmem:[%s3997_s4 + $0x394] ss:$8 sps:$4 sm:$0xff]  }
 0x227   : > { %2230 = vmatprep.subr.bf16.mxu0 %v2826_v53  ;;  %2273 = vmatprep.subr.bf16.mxu1 %v2829_v54  ;;  %v2899_v53 = vld [vmem:[%s3997_s4 + $0x3a0] ss:$8 sps:$4 sm:$0xff]  }
 0x22a   : > { %2231 = vmatpush1.bf16.msra.mxu0 %v2824_v55  ;;  %2274 = vmatpush1.bf16.msra.mxu1 %v2827_v56  ;;  %v2904_v56 = vld [vmem:[%s3997_s4 + $0x294] ss:$8 sps:$4 sm:$0xff]  }
 0x22b   : > { %2232 = vmatprep.subr.bf16.mxu0 %v2832_v57  ;;  %2275 = vmatprep.subr.bf16.mxu1 %v2835_v58 }
 0x22e   : > { %2233 = vmatpush1.bf16.msra.mxu0 %v2830_v21  ;;  %2276 = vmatpush1.bf16.msra.mxu1 %v2833_v59 }
 0x22f   : > { %2234 = vmatprep.subr.bf16.mxu0 %v2838_v60  ;;  %2277 = vmatprep.subr.bf16.mxu1 %v2841_v61 }
 0x232   : > { %2235 = vmatpush1.bf16.msra.mxu0 %v2836_v20  ;;  %2278 = vmatpush1.bf16.msra.mxu1 %v2839_v62  ;;  %v2902_v20 = vld [vmem:[%s3997_s4 + $0x290] ss:$8 sps:$4 sm:$0xff]  }
 0x233   : > { %2236 = vmatprep.subr.bf16.mxu0 %v2844_v27  ;;  %2279 = vmatprep.subr.bf16.mxu1 %v2847_v26  ;;  %v2905_v62 = vld [vmem:[%s3997_s4 + $0x390] ss:$8 sps:$4 sm:$0xff]  }
 0x236   : > { %2237 = vmatpush1.bf16.msra.mxu0 %v2842_v63  ;;  %2280 = vmatpush1.bf16.msra.mxu1 %v2845_v5 }
 0x237   : > { %2238 = vmatprep.subr.bf16.mxu0 %v2850_v6  ;;  %2281 = vmatprep.subr.bf16.mxu1 %v2853_v7  ;;  %v2910_v6 = vld [vmem:[%s3997_s4 + $0x284] ss:$8 sps:$4 sm:$0xff]  }
 0x238   : > { %v2913_v7 = vld [vmem:[%s3997_s4 + $0x384] ss:$8 sps:$4 sm:$0xff]  }
 0x23a   : > { %2239 = vmatpush1.bf16.msra.mxu0 %v2848_v9  ;;  %2282 = vmatpush1.bf16.msra.mxu1 %v2851_v2 }
 0x23b   : > { %2240 = vmatprep.subr.bf16.mxu0 %v2856_v10  ;;  %2283 = vmatprep.subr.bf16.mxu1 %v2859_v11 }
 0x23e   : > { %2241 = vmatpush1.bf16.msra.mxu0 %v2854_v12  ;;  %2284 = vmatpush1.bf16.msra.mxu1 %v2857_v13 }
 0x23f   : > { %2242 = vmatprep.subr.bf16.mxu0 %v2862_v14  ;;  %2285 = vmatprep.subr.bf16.mxu1 %v2865_v15 }
 0x242   : > { %2243 = vmatpush1.bf16.msra.mxu0 %v2860_v16  ;;  %2286 = vmatpush1.bf16.msra.mxu1 %v2863_v17 }
 0x243   : > { %2244 = vmatprep.subr.bf16.mxu0 %v2868_v18  ;;  %2287 = vmatprep.subr.bf16.mxu1 %v2871_v19  ;;  %v2908_v18 = vld [vmem:[%s3997_s4 + $0x280] ss:$8 sps:$4 sm:$0xff]  }
 0x244   : > { %v2911_v19 = vld [vmem:[%s3997_s4 + $0x380] ss:$8 sps:$4 sm:$0xff]  }
 0x246   : > { %2245 = vmatpush2.bf16.msra.mxu0 %v2866_v22  ;;  %2288 = vmatpush2.bf16.msra.mxu1 %v2869_v23 }
 0x247   : > { %2246 = vmatprep.subr.bf16.mxu0 %v2874_v24  ;;  %2289 = vmatprep.subr.bf16.mxu1 %v2877_v25 }
 0x24a   : > { %2247 = vmatpush2.bf16.msra.mxu0 %v2872_v28  ;;  %2290 = vmatpush2.bf16.msra.mxu1 %v2875_v0 }
 0x24b   : > { %2248 = vmatprep.subr.bf16.mxu0 %v2880_v1  ;;  %2291 = vmatprep.subr.bf16.mxu1 %v2883_v29 }
 0x24e   : > { %2249 = vmatpush2.bf16.msra.mxu0 %v2878_v30  ;;  %2292 = vmatpush2.bf16.msra.mxu1 %v2881_v3 }
 0x24f   : > { %2250 = vmatprep.subr.bf16.mxu0 %v2886_v4  ;;  %2293 = vmatprep.subr.bf16.mxu1 %v2889_v31 }
 0x252   : > { %2251 = vmatpush2.bf16.msra.mxu0 %v2884_v32  ;;  %2294 = vmatpush2.bf16.msra.mxu1 %v2887_v33 }
 0x253   : > { %2252 = vmatprep.subr.bf16.mxu0 %v2892_v34  ;;  %2295 = vmatprep.subr.bf16.mxu1 %v2895_v35  ;;  %v1490_v34 = vld [vmem:[%s3998_s5] sm:$0x3] }
 0x254   : > { %v1495_v37 = vrot.slane %v1490_v34, %v3330_v44  ;;  %v1499_v38 = vrot.slane %v1490_v34, %v3327_v43 }
 0x255   : > { %v1270_v49 = vpop.f32.mrf.mxu0  ;;  %v1313_v51 = vpop.f32.mrf.mxu1 }
 0x256   : > { %2253 = vmatpush2.bf16.msra.mxu0 %v2890_v40  ;;  %2296 = vmatpush2.bf16.msra.mxu1 %v2893_v42  ;;  %v1271_v21 = vadd.f32 %v1270_v49, %v489_v48  ;;  %v1314_v59 = vadd.f32 %v1313_v51, %v497_v50 }
 0x257   : > { %v1272_v54 = vpop.f32.mrf.mxu0  ;;  %v1315_v55 = vpop.f32.mrf.mxu1  ;;  %2254 = vmatprep.subr.bf16.mxu0 %v2898_v45  ;;  %2297 = vmatprep.subr.bf16.mxu1 %v2901_v41 }
 0x258   : > { %v1273_v57 = vadd.f32 %v1272_v54, %v493_v46  ;;  %v1316_v58 = vadd.f32 %v1315_v55, %v501_v47  ;;  %v1326_v12 = vmax.f32 %v1271_v21, 0.0  ;;  %v1328_v13 = vmax.f32 %v1314_v59, 0.0  ;;  %v2918_v21 = vld [vmem:[%s3078_s13] sm:$0xff] }
 0x259   : > { %v1274_v60 = vpop.f32.mrf.mxu0  ;;  %v1317_v61 = vpop.f32.mrf.mxu1 }
 0x25a   : > { %2255 = vmatpush2.bf16.msra.mxu0 %v2896_v52  ;;  %2298 = vmatpush2.bf16.msra.mxu1 %v2899_v53  ;;  %v1275_v27 = vadd.f32 %v1274_v60, %v489_v48  ;;  %v1318_v26 = vadd.f32 %v1317_v61, %v497_v50  ;;  %v1327_v9 = vmax.f32 %v1273_v57, 0.0  ;;  %v1329_v2 = vmax.f32 %v1316_v58, 0.0 }
 0x25b   : > { %v1276_v63 = vpop.f32.mrf.mxu0  ;;  %v1319_v5 = vpop.f32.mrf.mxu1  ;;  %2256 = vmatprep.subr.bf16.mxu0 %v2904_v56  ;;  %2299 = vmatprep.subr.bf16.mxu1 %v2907_v8  ;;  %v1342_v1 = vmul.f32 %v1326_v12, %v1326_v12  ;;  %v1344_v29 = vmul.f32 %v1328_v13, %v1328_v13 }
 0x25c   : > { %v1277_v10 = vadd.f32 %v1276_v63, %v493_v46  ;;  %v1320_v11 = vadd.f32 %v1319_v5, %v501_v47  ;;  %v1334_v14 = vmax.f32 %v1275_v27, 0.0  ;;  %v1336_v15 = vmax.f32 %v1318_v26, 0.0 }
 0x25d   : > { %v1343_v24 = vmul.f32 %v1327_v9, %v1327_v9  ;;  %v1345_v25 = vmul.f32 %v1329_v2, %v1329_v2  ;;  %v2921_v2 = vld [vmem:[%s3078_s13 + $0x18] sm:$0xff] }
 0x25e   : > { %v1335_v16 = vmax.f32 %v1277_v10, 0.0  ;;  %v1337_v17 = vmax.f32 %v1320_v11, 0.0  ;;  %2257 = vmatpush2.bf16.msra.mxu0 %v2902_v20  ;;  %2300 = vmatpush2.bf16.msra.mxu1 %v2905_v62  ;;  %v1350_v22 = vmul.f32 %v1334_v14, %v1334_v14  ;;  %v1352_v23 = vmul.f32 %v1336_v15, %v1336_v15  ;;  %v2919_v62 = vld [vmem:[%s3078_s13 + $0x8] sm:$0xff] }
 0x25f   : > { %2258 = vmatprep.subr.bf16.mxu0 %v2910_v6  ;;  %2301 = vmatprep.subr.bf16.mxu1 %v2913_v7  ;;  %v2920_v6 = vld [vmem:[%s3078_s13 + $0x10] sm:$0xff] }
 0x260   : > { %v1351_v28 = vmul.f32 %v1335_v16, %v1335_v16  ;;  %v1353_v0 = vmul.f32 %v1337_v17, %v1337_v17  ;;  %v1358_v4 = vpack.c.bf16 %v1350_v22, %v1342_v1  ;;  %v1360_v31 = vpack.c.bf16 %v1352_v23, %v1344_v29 }
 0x262   : > { %v1359_v30 = vpack.c.bf16 %v1351_v28, %v1343_v24  ;;  %v1361_v3 = vpack.c.bf16 %v1353_v0, %v1345_v25  ;;  %2259 = vmatpush2.bf16.msra.mxu0 %v2908_v18  ;;  %2302 = vmatpush2.bf16.msra.mxu1 %v2911_v19 }
 0x264   : > { %2260 = vmatprep.mubr.bf16.mxu0 %v1359_v30  ;;  %2303 = vmatprep.mubr.bf16.mxu1 %v1361_v3 }
 0x265   : > { %2261 = vmatmul.mubr.bf16.vlgmr.msra.gmra.mxu0 %v1358_v4  ;;  %2304 = vmatmul.mubr.bf16.vlgmr.msra.gmra.mxu1 %v1360_v31 }
 0x2e5   : > { %v2176_v32 = vpop.f32.mrf.mxu0  ;;  %v2219_v33 = vpop.f32.mrf.mxu1 }
 0x2e6   : > { %v2177_v42 = vadd.f32 %v2176_v32, %v1495_v37 }
 0x2e7   : > { %v2178_v35 = vpop.f32.mrf.mxu0  ;;  %v2221_v36 = vpop.f32.mrf.mxu1 }
 0x2e8   : > { %v2179_v45 = vadd.f32 %v2178_v35, %v1499_v38  ;;  %v2220_v47 = vadd.f32 %v2219_v33, %v2177_v42 }
 0x2e9   : > { %v2180_v39 = vpop.f32.mrf.mxu0  ;;  %v2223_v40 = vpop.f32.mrf.mxu1 }
 0x2ea   : > { %v2181_v48 = vadd.f32 %v2180_v39, %v1495_v37  ;;  %v2222_v51 = vadd.f32 %v2221_v36, %v2179_v45 }
 0x2eb   : > { %v2182_v41 = vpop.f32.mrf.mxu0  ;;  %v2225_v46 = vpop.f32.mrf.mxu1 }
 0x2ec   : > { %v2183_v52 = vadd.f32 %v2182_v41, %v1499_v38  ;;  %v2224_v54 = vadd.f32 %v2223_v40, %v2181_v48 }
 0x2ee   : > { %v2226_v58 = vadd.f32 %v2225_v46, %v2183_v52 }
 0x325   : > { %v2262_v49 = vpop.f32.mrf.mxu0  ;;  %v2305_v50 = vpop.f32.mrf.mxu1 }
 0x326   : > { %v2263_v53 = vadd.f32 %v2262_v49, %v2220_v47 }
 0x327   : > { %v2264_v44 = vpop.f32.mrf.mxu0  ;;  %v2307_v43 = vpop.f32.mrf.mxu1 }
 0x328   : > { %v2306_v55 = vadd.f32 %v2305_v50, %v2263_v53  ;;  %v2265_v56 = vadd.f32 %v2264_v44, %v2222_v51 }
 0x329   : > { %v2266_v8 = vpop.f32.mrf.mxu0  ;;  %v2309_v57 = vpop.f32.mrf.mxu1 }
 0x32a   : > { %v2314_v59 = vadd.f32 %v2918_v21, %v2306_v55  ;;  %v2308_v60 = vadd.f32 %v2307_v43, %v2265_v56  ;;  %v2267_v61 = vadd.f32 %v2266_v8, %v2224_v54 }
 0x32b   : > { %v2268_v20 = vpop.f32.mrf.mxu0  ;;  %v2311_v5 = vpop.f32.mrf.mxu1 }
 0x32c   : > { %2318 = vst [vmem:[%s257_s14] sm:$0xff] %v2314_v59  ;;  %v2315_v27 = vadd.f32 %v2919_v62, %v2308_v60  ;;  %v2310_v26 = vadd.f32 %v2309_v57, %v2267_v61  ;;  %v2269_v63 = vadd.f32 %v2268_v20, %v2226_v58 }
 0x32e   : > { %2319 = vst [vmem:[%s257_s14 + $0x8] sm:$0xff] %v2315_v27  ;;  %v2316_v7 = vadd.f32 %v2920_v6, %v2310_v26  ;;  %v2312_v9 = vadd.f32 %v2311_v5, %v2269_v63 }
 0x330   : > { %2320 = vst [vmem:[%s257_s14 + $0x10] sm:$0xff] %v2316_v7  ;;  %v2317_v10 = vadd.f32 %v2921_v2, %v2312_v9 }
 0x332   : > { %2321 = vst [vmem:[%s257_s14 + $0x18] sm:$0xff] %v2317_v10 }
 0x333   : > { %2935 = shalt.err (!%p2932_p3)
}
 0x334   : > { %s2936_s13 = scalar_lea.hbm %s3949_s19, 512  ;;  %s2940_s11 = scalar_lea.hbm %s3999_s6, 1024 }
 0x335   : > { %p2937_p4 = scmp.ne.s32.totalorder %s3949_s19, %s2936_s13  ;;  %p2941_p9 = scmp.lt.s32.totalorder %s3949_s19, %s3999_s6 }
 0x336   : > { %p2942_p10 = scmp.lt.s32.totalorder %s2940_s11, %s2936_s13 }
 0x337   : > { %p2938_p7 = pnand %p2937_p4, %p3060_p5 }
 0x338   : > { %p2943_p11 = por %p2942_p10, %p2941_p9 }
 0x339   : > { %p2939_p8 = pneg %p2938_p7 }
 0x33b   : > { %p2944_p12 = pnand %p2943_p11, %p2939_p8 }
 0x33d   : > { %2947 = shalt.err (!%p2944_p12)
}
 0x33e   : > { %s2985_s16 = smov 256   ;;  %s2986_s17 = smov 16  }
 0x33f   : > { %2681 = dma.vmem_to_hbm [thread:$0]  (%p3060_p5), %s3943_s15, 512, %s3949_s19, %s3953_s25, %s2985_s16, %s2985_s16, %s2986_s17  }
 0x340 PF: > { %p2687_p13 = scmp.ge.s32.totalorder %s2982_s24, 2  ;;  %s2351_s18 = sand.u32 1, %s2970_s21  }
 0x341   : > { %s2352_s20 = scalar_lea.sflag [#allocation3], %s2351_s18 }
 0x342   : > { %p2684_p0 = pnand %p2687_p13, %p3064_p6 }
 0x344   : > { %p2685_p1 = pneg %p2684_p0 }
 0x346   : > { %2965 = dma.done.wait (%p2685_p1), %s2352_s20, 512  }
 0x347   : > { %2967 = vsyncadd (%p2685_p1), %s2352_s20, 4294966784  ;;  %p16_p2 = scmp.ge.s32.totalorder %s3047_s27, 4   ;;  %s4002_s21 = smov %s2974_s22 }
 0x348   : > { %s4003_s22 = smov %s2978_s23  ;;  %s4004_s23 = smov %s3058_s30 }
 0x349   : > { %s4005_s24 = smov %s3047_s27  ;;  %18 = sbr.rel (!%p16_p2) target bundleno = 3 (0x3), region = 82 }
 0x34e   :  { %2357 = vsyncpa [#allocation3], 1 }
 0x34f   :  { %2359 = vsyncpa [#allocation3 + $0x1], 1 }

</bundles_post_ra>
